<compile_context>
chip_gen: v5e
topology: v5e:2x2
jax: 0.10.0
libtpu: 0.0.40
codegen_flags: <defaults>
</compile_context>

<pallas_src>
import numpy as np
import jax
import jax.numpy as jnp
from jax.experimental import pallas as pl
from jax.experimental.pallas import tpu as pltpu


# ----------------------------- Pallas kernel ------------------------------

def _gnn_kernel(ni_ref, x_ref, w_ref, o_ref):
    # ni_ref: (K, tn) int32         neighbour indices for this lane tile
    # x_ref : (2, Dp, Mp) float32   VMEM-resident re/im stacked Xf^T
    # w_ref : (2, K, tn) float32    re/im weights for this lane tile
    # o_ref : (2, Dp, tn) float32   re/im output tile
    K, tn = ni_ref.shape
    _, Dp, Mp = x_ref.shape

    x_re = x_ref[0]                                    # (Dp, Mp)
    x_im = x_ref[1]
    iota_m = jax.lax.broadcasted_iota(jnp.int32, (Mp, tn), 0)

    acc_re = jnp.zeros((Dp, tn), jnp.float32)
    acc_im = jnp.zeros((Dp, tn), jnp.float32)

    # K is tiny (3-4) and static -> fully unrolled accumulate, no K-on-sublane
    # padded temporaries and no cross-sublane reduce.
    for k in range(K):
        idx = ni_ref[k:k + 1, :]                       # (1, tn) int32
        onehot = (iota_m == idx).astype(jnp.float32)   # (Mp, tn)
        # One-hot gather on the MXU; HIGHEST keeps it exact in f32.
        g_re = jnp.dot(x_re, onehot,
                       preferred_element_type=jnp.float32,
                       precision=jax.lax.Precision.HIGHEST)   # (Dp, tn)
        g_im = jnp.dot(x_im, onehot,
                       preferred_element_type=jnp.float32,
                       precision=jax.lax.Precision.HIGHEST)
        wr = w_ref[0, k:k + 1, :]                      # (1, tn)
        wi = w_ref[1, k:k + 1, :]
        acc_re = acc_re + (wr * g_re - wi * g_im)
        acc_im = acc_im + (wr * g_im + wi * g_re)

    o_ref[0] = acc_re
    o_ref[1] = acc_im


def _pick_tn(n_pad, d_pad, m_pad, k, *, budget_bytes=20 << 20, cap=4096):
    """VMEM-budget-driven lane tile: largest multiple of 128 dividing n_pad
    whose working set (resident Xf_T + double-buffered streams + one-hot
    temporaries) fits the budget; prefer >=2 grid steps (v7x megacore) when it
    costs at most a factor of two in tile size."""
    x_bytes = 2 * d_pad * m_pad * 4
    k_pad = ((k + 7) // 8) * 8            # sublane padding of K inside VMEM

    def footprint(tn):
        stream = (k_pad * tn * 4) + (2 * k_pad * tn * 4) + (2 * d_pad * tn * 4)
        onehot = m_pad * tn * 4
        return x_bytes + 2 * stream + 2 * onehot

    nb = n_pad // 128
    divs = [t * 128 for t in range(1, nb + 1) if nb % t == 0]
    fit = [t for t in divs if t <= cap and footprint(t) <= budget_bytes] or [128]
    best = max(fit)
    multi = [t for t in fit if n_pad // t >= 2]
    if multi and 2 * max(multi) >= best:
        best = max(multi)
    return best


def gnn_gather_mac(ni, xf_t, w):
    """Fused neighbour-gather + complex MAC over K.

    ni:   (K, Np)    int32
    xf_t: (2, Dp, Mp) float32  (re/im stacked, D on sublanes, M on lanes)
    w:    (2, K, Np) float32
    returns (2, Dp, Np) float32 with
      out[0/1, d, n] = Re/Im( sum_k (w_re+j w_im)[k,n] * (x_re+j x_im)[d, ni[k,n]] )
    """
    K, Np = ni.shape
    _, Dp, Mp = xf_t.shape
    assert Dp % 8 == 0 and Np % 128 == 0 and Mp % 128 == 0, (Dp, Np, Mp)
    tn = _pick_tn(Np, Dp, Mp, K)
    return pl.pallas_call(
        _gnn_kernel,
        out_shape=jax.ShapeDtypeStruct((2, Dp, Np), jnp.float32),
        grid_spec=pltpu.PrefetchScalarGridSpec(
            num_scalar_prefetch=0,
            grid=(Np // tn,),
            in_specs=[
                pl.BlockSpec((K, tn), lambda i: (0, i)),
                pl.BlockSpec((2, Dp, Mp), lambda i: (0, 0, 0)),   # resident
                pl.BlockSpec((2, K, tn), lambda i: (0, 0, i)),
            ],
            out_specs=pl.BlockSpec((2, Dp, tn), lambda i: (0, 0, i)),
        ),
        compiler_params=pltpu.CompilerParams(
            dimension_semantics=("parallel",),
            vmem_limit_bytes=32 << 20),
    )(ni, xf_t, w)


# --------------------------- module forward pass ---------------------------

def cmplx_xavier_init(key, shape):
    """Matches Cmplx_Xavier_Init: |w| = 1/n_in, uniform phases in (-pi, pi)."""
    n_in, _ = shape
    phases = jax.random.uniform(key, shape, minval=-np.pi, maxval=np.pi)
    mag = jnp.ones(shape, jnp.float32) / n_in
    return (mag * jnp.exp(1j * phases.astype(jnp.complex64))).astype(jnp.complex64)


def gnn_forward(Xf, NI, hier_mask, hier_ind, w, inc):
    """JAX/Pallas port of gnn.forward.

    Xf:  complex64, shape (M, B, C)
    NI:  int32, shape (K+1, N) -- module uses NI[1:]
    w:   complex64, shape (K, N)
    """
    NI_k = NI[1:].astype(jnp.int32)            # (K, N)
    K, N = NI_k.shape
    M, B, C = Xf.shape
    D = B * C

    D_pad = (D + 7) // 8 * 8
    N_pad = (N + 127) // 128 * 128
    M_pad = (M + 127) // 128 * 128

    # re/im split + transpose on the SMALL (M, D) array only.
    Xf_ri = jnp.stack((jnp.real(Xf), jnp.imag(Xf)), axis=0).reshape(2, M, D)
    Xf_T = jnp.transpose(Xf_ri, (0, 2, 1)).astype(jnp.float32)       # (2, D, M)
    Xf_T = jnp.pad(Xf_T, ((0, 0), (0, D_pad - D), (0, M_pad - M)))

    NI_p = jnp.pad(NI_k, ((0, 0), (0, N_pad - N)))                   # pad -> idx 0
    w_ri = jnp.stack((jnp.real(w), jnp.imag(w)), axis=0).astype(jnp.float32)
    w_ri = jnp.pad(w_ri, ((0, 0), (0, 0), (0, N_pad - N)))           # pad -> weight 0

    out = gnn_gather_mac(NI_p, Xf_T, w_ri)                           # (2, D_pad, N_pad)
    out = out[:, :D, :N]
    Xfcx = (out[0] + 1j * out[1]).astype(jnp.complex64)              # (D, N)
    Xfcx = jnp.transpose(Xfcx, (1, 0)).reshape(N, B, C)              # (N, B, C)

    # concat with masked rows, hierarchical reorder, final reshape (XLA glue)
    Xf_tv = jnp.concatenate((Xfcx, Xf[hier_mask]), axis=0)           # (N+H, B, C)
    return Xf_tv[hier_ind].reshape(1, -1, 1, inc)


def gnn_forward_ref(Xf, NI, hier_mask, hier_ind, w, inc):
    """Pure-JAX reference mirroring the torch code."""
    NI_k = NI[1:]
    Xfcx = jnp.sum(jnp.einsum('knbc,kn->knbc', Xf[NI_k], w), 0)
    return jnp.concatenate((Xfcx, Xf[hier_mask]), 0)[hier_ind].reshape(1, -1, 1, inc)


# --------------------------------- main ------------------------------------

def _run_case(key, *, M, K, N, B, inc, H):
    k_ni, k_mask, k_perm, k_w, k_re, k_im = jax.random.split(key, 6)
    NI = jax.random.randint(k_ni, (K + 1, N), 0, M, dtype=jnp.int32)
    hier_mask = jax.random.randint(k_mask, (H,), 0, M, dtype=jnp.int32)
    hier_ind = jax.random.permutation(k_perm, N + H).astype(jnp.int32)
    w = cmplx_xavier_init(k_w, (K, N))
    Xf = (jax.random.normal(k_re, (M, B, inc), dtype=jnp.float32)
          + 1j * jax.random.normal(k_im, (M, B, inc), dtype=jnp.float32)
          ).astype(jnp.complex64)

    out = jax.block_until_ready(gnn_forward(Xf, NI, hier_mask, hier_ind, w, inc))
    ref = jax.block_until_ready(gnn_forward_ref(Xf, NI, hier_mask, hier_ind, w, inc))
    assert out.shape == ref.shape, (out.shape, ref.shape)
    np.testing.assert_allclose(np.asarray(out), np.asarray(ref),
                               rtol=1e-5, atol=1e-5)


if __name__ == "__main__":
    key = jax.random.PRNGKey(0)
    k1, k2 = jax.random.split(key)
    # aligned shapes: D = 8, N = 256 -> tn = 128, 2 parallel grid steps
    _run_case(k1, M=320, K=4, N=256, B=1, inc=8, H=64)
    # unaligned shapes: D = 12 (pad 16), N = 200 (pad 256), M = 100 (pad 128)
    _run_case(k2, M=100, K=3, N=200, B=2, inc=6, H=40)
    print("KERNEL_OK")
</pallas_src>

<mosaic_0001>
module attributes {stable_mosaic.version = 11 : i64} {
  func.func @_gnn_kernel(%arg0: i32, %arg1: memref<4x128xi32, #tpu.memory_space<vmem>>, %arg2: memref<2x8x384xf32, #tpu.memory_space<vmem>>, %arg3: memref<2x4x128xf32, #tpu.memory_space<vmem>>, %arg4: memref<2x8x128xf32, #tpu.memory_space<vmem>>) attributes {dimension_semantics = [#tpu.dimension_semantics<parallel>], iteration_bounds = array<i64: 2>, scalar_prefetch = 0 : i64, scratch_operands = 0 : i64, tpu.core_type = #tpu.core_type<tc>, window_params = [{transform_indices = @transform_0, window_bounds = array<i64: 4, 128>}, {pipeline_mode = #tpu.pipeline_mode<synchronous>, transform_indices = @transform_1, window_bounds = array<i64: 2, 8, 384>}, {transform_indices = @transform_2, window_bounds = array<i64: 2, 4, 128>}, {transform_indices = @transform_3, window_bounds = array<i64: 2, 8, 128>}]} {
    %c0 = arith.constant 0 : index
    %c0_0 = arith.constant 0 : index
    %c0_1 = arith.constant 0 : index
    %0 = vector.load %arg2[%c0, %c0_0, %c0_1] : memref<2x8x384xf32, #tpu.memory_space<vmem>>, vector<1x8x384xf32>
    %1 = vector.shape_cast %0 : vector<1x8x384xf32> to vector<8x384xf32>
    %c1 = arith.constant 1 : index
    %c0_2 = arith.constant 0 : index
    %c0_3 = arith.constant 0 : index
    %2 = vector.load %arg2[%c1, %c0_2, %c0_3] : memref<2x8x384xf32, #tpu.memory_space<vmem>>, vector<1x8x384xf32>
    %3 = vector.shape_cast %2 : vector<1x8x384xf32> to vector<8x384xf32>
    %4 = tpu.iota {dimensions = array<i32: 0>} : vector<384x128xi32>
    %cst = arith.constant 0.000000e+00 : f32
    %5 = vector.broadcast %cst : f32 to vector<8x128xf32>
    %cst_4 = arith.constant 0.000000e+00 : f32
    %6 = vector.broadcast %cst_4 : f32 to vector<8x128xf32>
    %c0_5 = arith.constant 0 : index
    %c0_6 = arith.constant 0 : index
    %7 = vector.load %arg1[%c0_5, %c0_6] : memref<4x128xi32, #tpu.memory_space<vmem>>, vector<1x128xi32>
    %8 = vector.broadcast %7 : vector<1x128xi32> to vector<384x128xi32>
    %9 = arith.cmpi eq, %4, %8 : vector<384x128xi32>
    %10 = arith.extui %9 : vector<384x128xi1> to vector<384x128xi32>
    %11 = arith.sitofp %10 : vector<384x128xi32> to vector<384x128xf32>
    %cst_7 = arith.constant dense<0.000000e+00> : vector<8x128xf32>
    %12 = tpu.matmul %1, %11, %cst_7 {dimension_numbers = #tpu.dot_dimension_numbers<[1], [0], [0], [1], [0, 0, 1, 1], [], []>, precision = #tpu.contract_precision<fp32>} : vector<8x384xf32>, vector<384x128xf32>, vector<8x128xf32> -> vector<8x128xf32>
    %cst_8 = arith.constant dense<0.000000e+00> : vector<8x128xf32>
    %13 = tpu.matmul %3, %11, %cst_8 {dimension_numbers = #tpu.dot_dimension_numbers<[1], [0], [0], [1], [0, 0, 1, 1], [], []>, precision = #tpu.contract_precision<fp32>} : vector<8x384xf32>, vector<384x128xf32>, vector<8x128xf32> -> vector<8x128xf32>
    %c0_9 = arith.constant 0 : index
    %c0_10 = arith.constant 0 : index
    %c0_11 = arith.constant 0 : index
    %14 = vector.load %arg3[%c0_9, %c0_10, %c0_11] : memref<2x4x128xf32, #tpu.memory_space<vmem>>, vector<1x1x128xf32>
    %15 = vector.shape_cast %14 : vector<1x1x128xf32> to vector<1x128xf32>
    %c1_12 = arith.constant 1 : index
    %c0_13 = arith.constant 0 : index
    %c0_14 = arith.constant 0 : index
    %16 = vector.load %arg3[%c1_12, %c0_13, %c0_14] : memref<2x4x128xf32, #tpu.memory_space<vmem>>, vector<1x1x128xf32>
    %17 = vector.shape_cast %16 : vector<1x1x128xf32> to vector<1x128xf32>
    %18 = vector.broadcast %15 : vector<1x128xf32> to vector<8x128xf32>
    %19 = arith.mulf %18, %12 : vector<8x128xf32>
    %20 = vector.broadcast %17 : vector<1x128xf32> to vector<8x128xf32>
    %21 = arith.mulf %20, %13 : vector<8x128xf32>
    %22 = arith.subf %19, %21 : vector<8x128xf32>
    %23 = arith.addf %5, %22 : vector<8x128xf32>
    %24 = vector.broadcast %15 : vector<1x128xf32> to vector<8x128xf32>
    %25 = arith.mulf %24, %13 : vector<8x128xf32>
    %26 = vector.broadcast %17 : vector<1x128xf32> to vector<8x128xf32>
    %27 = arith.mulf %26, %12 : vector<8x128xf32>
    %28 = arith.addf %25, %27 : vector<8x128xf32>
    %29 = arith.addf %6, %28 : vector<8x128xf32>
    %c1_15 = arith.constant 1 : index
    %c0_16 = arith.constant 0 : index
    %30 = vector.load %arg1[%c1_15, %c0_16] : memref<4x128xi32, #tpu.memory_space<vmem>>, vector<1x128xi32>
    %31 = vector.broadcast %30 : vector<1x128xi32> to vector<384x128xi32>
    %32 = arith.cmpi eq, %4, %31 : vector<384x128xi32>
    %33 = arith.extui %32 : vector<384x128xi1> to vector<384x128xi32>
    %34 = arith.sitofp %33 : vector<384x128xi32> to vector<384x128xf32>
    %cst_17 = arith.constant dense<0.000000e+00> : vector<8x128xf32>
    %35 = tpu.matmul %1, %34, %cst_17 {dimension_numbers = #tpu.dot_dimension_numbers<[1], [0], [0], [1], [0, 0, 1, 1], [], []>, precision = #tpu.contract_precision<fp32>} : vector<8x384xf32>, vector<384x128xf32>, vector<8x128xf32> -> vector<8x128xf32>
    %cst_18 = arith.constant dense<0.000000e+00> : vector<8x128xf32>
    %36 = tpu.matmul %3, %34, %cst_18 {dimension_numbers = #tpu.dot_dimension_numbers<[1], [0], [0], [1], [0, 0, 1, 1], [], []>, precision = #tpu.contract_precision<fp32>} : vector<8x384xf32>, vector<384x128xf32>, vector<8x128xf32> -> vector<8x128xf32>
    %c0_19 = arith.constant 0 : index
    %c1_20 = arith.constant 1 : index
    %c0_21 = arith.constant 0 : index
    %37 = vector.load %arg3[%c0_19, %c1_20, %c0_21] : memref<2x4x128xf32, #tpu.memory_space<vmem>>, vector<1x1x128xf32>
    %38 = vector.shape_cast %37 : vector<1x1x128xf32> to vector<1x128xf32>
    %c1_22 = arith.constant 1 : index
    %c1_23 = arith.constant 1 : index
    %c0_24 = arith.constant 0 : index
    %39 = vector.load %arg3[%c1_22, %c1_23, %c0_24] : memref<2x4x128xf32, #tpu.memory_space<vmem>>, vector<1x1x128xf32>
    %40 = vector.shape_cast %39 : vector<1x1x128xf32> to vector<1x128xf32>
    %41 = vector.broadcast %38 : vector<1x128xf32> to vector<8x128xf32>
    %42 = arith.mulf %41, %35 : vector<8x128xf32>
    %43 = vector.broadcast %40 : vector<1x128xf32> to vector<8x128xf32>
    %44 = arith.mulf %43, %36 : vector<8x128xf32>
    %45 = arith.subf %42, %44 : vector<8x128xf32>
    %46 = arith.addf %23, %45 : vector<8x128xf32>
    %47 = vector.broadcast %38 : vector<1x128xf32> to vector<8x128xf32>
    %48 = arith.mulf %47, %36 : vector<8x128xf32>
    %49 = vector.broadcast %40 : vector<1x128xf32> to vector<8x128xf32>
    %50 = arith.mulf %49, %35 : vector<8x128xf32>
    %51 = arith.addf %48, %50 : vector<8x128xf32>
    %52 = arith.addf %29, %51 : vector<8x128xf32>
    %c2 = arith.constant 2 : index
    %c0_25 = arith.constant 0 : index
    %53 = vector.load %arg1[%c2, %c0_25] : memref<4x128xi32, #tpu.memory_space<vmem>>, vector<1x128xi32>
    %54 = vector.broadcast %53 : vector<1x128xi32> to vector<384x128xi32>
    %55 = arith.cmpi eq, %4, %54 : vector<384x128xi32>
    %56 = arith.extui %55 : vector<384x128xi1> to vector<384x128xi32>
    %57 = arith.sitofp %56 : vector<384x128xi32> to vector<384x128xf32>
    %cst_26 = arith.constant dense<0.000000e+00> : vector<8x128xf32>
    %58 = tpu.matmul %1, %57, %cst_26 {dimension_numbers = #tpu.dot_dimension_numbers<[1], [0], [0], [1], [0, 0, 1, 1], [], []>, precision = #tpu.contract_precision<fp32>} : vector<8x384xf32>, vector<384x128xf32>, vector<8x128xf32> -> vector<8x128xf32>
    %cst_27 = arith.constant dense<0.000000e+00> : vector<8x128xf32>
    %59 = tpu.matmul %3, %57, %cst_27 {dimension_numbers = #tpu.dot_dimension_numbers<[1], [0], [0], [1], [0, 0, 1, 1], [], []>, precision = #tpu.contract_precision<fp32>} : vector<8x384xf32>, vector<384x128xf32>, vector<8x128xf32> -> vector<8x128xf32>
    %c0_28 = arith.constant 0 : index
    %c2_29 = arith.constant 2 : index
    %c0_30 = arith.constant 0 : index
    %60 = vector.load %arg3[%c0_28, %c2_29, %c0_30] : memref<2x4x128xf32, #tpu.memory_space<vmem>>, vector<1x1x128xf32>
    %61 = vector.shape_cast %60 : vector<1x1x128xf32> to vector<1x128xf32>
    %c1_31 = arith.constant 1 : index
    %c2_32 = arith.constant 2 : index
    %c0_33 = arith.constant 0 : index
    %62 = vector.load %arg3[%c1_31, %c2_32, %c0_33] : memref<2x4x128xf32, #tpu.memory_space<vmem>>, vector<1x1x128xf32>
    %63 = vector.shape_cast %62 : vector<1x1x128xf32> to vector<1x128xf32>
    %64 = vector.broadcast %61 : vector<1x128xf32> to vector<8x128xf32>
    %65 = arith.mulf %64, %58 : vector<8x128xf32>
    %66 = vector.broadcast %63 : vector<1x128xf32> to vector<8x128xf32>
    %67 = arith.mulf %66, %59 : vector<8x128xf32>
    %68 = arith.subf %65, %67 : vector<8x128xf32>
    %69 = arith.addf %46, %68 : vector<8x128xf32>
    %70 = vector.broadcast %61 : vector<1x128xf32> to vector<8x128xf32>
    %71 = arith.mulf %70, %59 : vector<8x128xf32>
    %72 = vector.broadcast %63 : vector<1x128xf32> to vector<8x128xf32>
    %73 = arith.mulf %72, %58 : vector<8x128xf32>
    %74 = arith.addf %71, %73 : vector<8x128xf32>
    %75 = arith.addf %52, %74 : vector<8x128xf32>
    %c3 = arith.constant 3 : index
    %c0_34 = arith.constant 0 : index
    %76 = vector.load %arg1[%c3, %c0_34] : memref<4x128xi32, #tpu.memory_space<vmem>>, vector<1x128xi32>
    %77 = vector.broadcast %76 : vector<1x128xi32> to vector<384x128xi32>
    %78 = arith.cmpi eq, %4, %77 : vector<384x128xi32>
    %79 = arith.extui %78 : vector<384x128xi1> to vector<384x128xi32>
    %80 = arith.sitofp %79 : vector<384x128xi32> to vector<384x128xf32>
    %cst_35 = arith.constant dense<0.000000e+00> : vector<8x128xf32>
    %81 = tpu.matmul %1, %80, %cst_35 {dimension_numbers = #tpu.dot_dimension_numbers<[1], [0], [0], [1], [0, 0, 1, 1], [], []>, precision = #tpu.contract_precision<fp32>} : vector<8x384xf32>, vector<384x128xf32>, vector<8x128xf32> -> vector<8x128xf32>
    %cst_36 = arith.constant dense<0.000000e+00> : vector<8x128xf32>
    %82 = tpu.matmul %3, %80, %cst_36 {dimension_numbers = #tpu.dot_dimension_numbers<[1], [0], [0], [1], [0, 0, 1, 1], [], []>, precision = #tpu.contract_precision<fp32>} : vector<8x384xf32>, vector<384x128xf32>, vector<8x128xf32> -> vector<8x128xf32>
    %c0_37 = arith.constant 0 : index
    %c3_38 = arith.constant 3 : index
    %c0_39 = arith.constant 0 : index
    %83 = vector.load %arg3[%c0_37, %c3_38, %c0_39] : memref<2x4x128xf32, #tpu.memory_space<vmem>>, vector<1x1x128xf32>
    %84 = vector.shape_cast %83 : vector<1x1x128xf32> to vector<1x128xf32>
    %c1_40 = arith.constant 1 : index
    %c3_41 = arith.constant 3 : index
    %c0_42 = arith.constant 0 : index
    %85 = vector.load %arg3[%c1_40, %c3_41, %c0_42] : memref<2x4x128xf32, #tpu.memory_space<vmem>>, vector<1x1x128xf32>
    %86 = vector.shape_cast %85 : vector<1x1x128xf32> to vector<1x128xf32>
    %87 = vector.broadcast %84 : vector<1x128xf32> to vector<8x128xf32>
    %88 = arith.mulf %87, %81 : vector<8x128xf32>
    %89 = vector.broadcast %86 : vector<1x128xf32> to vector<8x128xf32>
    %90 = arith.mulf %89, %82 : vector<8x128xf32>
    %91 = arith.subf %88, %90 : vector<8x128xf32>
    %92 = arith.addf %69, %91 : vector<8x128xf32>
    %93 = vector.broadcast %84 : vector<1x128xf32> to vector<8x128xf32>
    %94 = arith.mulf %93, %82 : vector<8x128xf32>
    %95 = vector.broadcast %86 : vector<1x128xf32> to vector<8x128xf32>
    %96 = arith.mulf %95, %81 : vector<8x128xf32>
    %97 = arith.addf %94, %96 : vector<8x128xf32>
    %98 = arith.addf %75, %97 : vector<8x128xf32>
    %c0_43 = arith.constant 0 : index
    %c0_44 = arith.constant 0 : index
    %c0_45 = arith.constant 0 : index
    %99 = vector.load %arg4[%c0_43, %c0_44, %c0_45] : memref<2x8x128xf32, #tpu.memory_space<vmem>>, vector<1x8x128xf32>
    %100 = vector.shape_cast %99 : vector<1x8x128xf32> to vector<8x128xf32>
    %101 = vector.shape_cast %92 : vector<8x128xf32> to vector<1x8x128xf32>
    tpu.vector_store %arg4[%c0_43, %c0_44, %c0_45], %101 {strides = array<i32>} : memref<2x8x128xf32, #tpu.memory_space<vmem>>, vector<1x8x128xf32>,
    %c1_46 = arith.constant 1 : index
    %c0_47 = arith.constant 0 : index
    %c0_48 = arith.constant 0 : index
    %102 = vector.load %arg4[%c1_46, %c0_47, %c0_48] : memref<2x8x128xf32, #tpu.memory_space<vmem>>, vector<1x8x128xf32>
    %103 = vector.shape_cast %102 : vector<1x8x128xf32> to vector<8x128xf32>
    %104 = vector.shape_cast %98 : vector<8x128xf32> to vector<1x8x128xf32>
    tpu.vector_store %arg4[%c1_46, %c0_47, %c0_48], %104 {strides = array<i32>} : memref<2x8x128xf32, #tpu.memory_space<vmem>>, vector<1x8x128xf32>,
    return
  }
  func.func @transform_0(%arg0: i32) -> (i32, i32) {
    %c0_i32 = arith.constant 0 : i32
    %c0_i32_0 = arith.constant 0 : i32
    return %c0_i32, %arg0 : i32, i32
  }
  func.func @transform_1(%arg0: i32) -> (i32, i32, i32) {
    %c0_i32 = arith.constant 0 : i32
    %c0_i32_0 = arith.constant 0 : i32
    %c0_i32_1 = arith.constant 0 : i32
    %c0_i32_2 = arith.constant 0 : i32
    return %c0_i32, %c0_i32_0, %c0_i32_1 : i32, i32, i32
  }
  func.func @transform_2(%arg0: i32) -> (i32, i32, i32) {
    %c0_i32 = arith.constant 0 : i32
    %c0_i32_0 = arith.constant 0 : i32
    %c0_i32_1 = arith.constant 0 : i32
    return %c0_i32, %c0_i32_0, %arg0 : i32, i32, i32
  }
  func.func @transform_3(%arg0: i32) -> (i32, i32, i32) {
    %c0_i32 = arith.constant 0 : i32
    %c0_i32_0 = arith.constant 0 : i32
    %c0_i32_1 = arith.constant 0 : i32
    return %c0_i32, %c0_i32_0, %arg0 : i32, i32, i32
  }
}

</mosaic_0001>

<bundles_post_ra>
// kernel: tpu_custom_call.1
= control target key start
LH: loop header
LB: loop body
LE: loop exit
PB: predicated region body
PF: predicated region fallthrough
CT: control target
= control target key end

     0   :  { %8 = vsyncpa [#allocation3], 0  ;;  %s19652_s0 = inlined_call_operand.hbm [shape: s32[4,256], index: 0, kind: input, shape index: {}]   ;;  %s19653_s1 = inlined_call_operand.hbm [shape: f32[2,8,384], index: 1, kind: input, shape index: {}]   ;;  %s19654_s2 = inlined_call_operand.hbm [shape: f32[2,4,256], index: 2, kind: input, shape index: {}]   ;;  %s19655_s3 = inlined_call_operand.hbm [shape: f32[2,8,256], index: 3, kind: output, shape index: {}]  }
   0x1   :  { %10 = vsyncpa [#allocation3 + $0x1], 0 }
   0x2   :  { %11 = vsyncpa [#allocation6], 0 }
   0x3   :  { %12 = vsyncpa [#allocation4], 0 }
   0x4   :  { %14 = vsyncpa [#allocation4 + $0x1], 0  ;;  %s10888_s12 = smov 0   ;;  %s10890_s13 = smov 0  }
   0x5   :  { %s10892_s14 = smov 0   ;;  %s10894_s15 = smov 0  }
   0x6 LB: > { %s10909_s16 = sadd.s32 4294967295, %s10855_s15   ;;  %s9237_s17 = sadd.s32 4294967294, %s10855_s15   ;;  %s10855_s15 = sphi %s10894_s15, %s23201_s15   ;;  %s10851_s14 = sphi %s10892_s14, %s23200_s14   ;;  %s10847_s13 = sphi %s10890_s13, %s23199_s13   ;;  %s10843_s12 = sphi %s10888_s12, %s23198_s12  }
   0x7   : > { %s10913_s18 = sadd.s32 1, %s10855_s15   ;;  %s27_s19 = sadd.s32 1, %s10851_s14 }
   0x8   : > { %s24_s20 = ssub.s32 %s10855_s15, %s10913_s18  ;;  %p34_p0 = scmp.ne.s32.totalorder %s10851_s14, %s10847_s13 }
   0x9   : > { %p25_p1 = scmp.eq.s32.totalorder %s24_s20, 0  ;;  %p35_p2 = scmp.eq.s32.totalorder %s10855_s15, 0 }
   0xa   : > { %p40_p3 = scmp.ne.s32.totalorder %s10847_s13, %s10843_s12  ;;  %p111_p4 = scmp.eq.s32.totalorder %s10909_s16, 1 }
   0xb   : > { %s10925_s21 = scalar_select %p25_p1, %s10851_s14, %s27_s19  }
   0xc   : > { %p10927_p5 = por %p35_p2, %p34_p0  ;;  %p10931_p6 = por %p111_p4, %p34_p0 }
   0xd   : > { %p117_p7 = scmp.eq.s32.totalorder %s9237_s17, 1  ;;  %p10629_p9 = scmp.lt.s32.totalorder %s10855_s15, 2 }
   0xe   : > { %s151_s25 = sand.u32 1, %s10855_s15   ;;  %s153_s26 = sand.u32 1, %s10851_s14  }
   0xf   : > { %p10940_p10 = por %p117_p7, %p40_p3  ;;  %s9241_s27 = sshll.u32 %s153_s26, 2 }
  0x10   : > { %s9242_s28 = sshll.u32 %s10855_s15, 2  ;;  %s155_s6 = scalar_lea.vmem [#allocation2], %s9241_s27 }
  0x11   : > { %s159_s4 = scalar_lea.hbm %s19652_s0, %s9242_s28  ;;  %s163_s7 = sshll.u32 %s155_s6, 4  ;;  %s164_s7 = int_to_ptr.vmem [resolvable:$true] %s163_s7 }
  0x12   : > { %s161_s5 = sshll.u32 %s159_s4, 4  ;;  %p10952_p11 = pnand %p10629_p9, %p10927_p5  ;;  %s162_s5 = int_to_ptr.hbm [resolvable:$true] %s161_s5 }
  0x13   : > { %s9243_s9 = sshll.u32 %s153_s26, 3  ;;  %s178_s17 = scalar_lea.hbm %s19654_s2, %s9242_s28 }
  0x14   : > { %s179_s19 = sshll.u32 %s178_s17, 4  ;;  %s10959_s20 = scalar_lea.sflag [#allocation3], %s151_s25  ;;  %s10975_s19 = int_to_ptr.hbm [resolvable:$true] %s179_s19 }
  0x15   : > { %s10691_s29 = sshra.s32 %s162_s5, 4  ;;  %p10695_p13 = pneg %p10952_p11  ;;  %s10692_s29 = int_to_ptr.hbm [resolvable:$true] %s10691_s29 }
  0x16   : > { %s10693_s27 = scalar_lea.hbm %s10692_s29, 4  ;;  %s10698_s26 = scalar_lea.hbm %s19652_s0, 8 }
  0x17   : > { %p10694_p12 = scmp.ne.s32.totalorder %s10692_s29, %s10693_s27  ;;  %p10699_p2 = scmp.lt.s32.totalorder %s10692_s29, %s19652_s0 }
  0x18   : > { %p10700_p4 = scmp.lt.s32.totalorder %s10698_s26, %s10693_s27 }
  0x19   : > { %p10696_p0 = pnand %p10695_p13, %p10694_p12 }
  0x1a   : > { %p10701_p5 = por %p10700_p4, %p10699_p2 }
  0x1b   : > { %p10697_p1 = pneg %p10696_p0 }
  0x1d   : > { %p10702_p7 = pnand %p10701_p5, %p10697_p1 }
  0x1f   : > { %10705 = shalt.err (!%p10702_p7)
}
  0x20   : > { %10620 = dma.hbm_to_vmem [thread:$0]  (!%p10952_p11), %s162_s5, 64, %s164_s7, %s10959_s20  }
  0x21   : > { %s174_s25 = scalar_lea.vmem [#allocation7], %s9243_s9  ;;  %p19656_p9 = scmp.eq.s32.totalorder %s10909_s16, 0 }
  0x22   : > { %s10977_s28 = sshll.u32 %s174_s25, 4  ;;  %p9238_p12 = scmp.ge.s32.totalorder %s10855_s15, 1  ;;  %s182_s28 = int_to_ptr.vmem [resolvable:$true] %s10977_s28 }
  0x23   : > { %p124_p0 = scmp.lt.s32.totalorder %s10855_s15, 3  ;;  %p10988_p1 = por %p19656_p9, %p40_p3 }
  0x24   : > { %s135_s7 = sshll.u32 %s19653_s1, 4  ;;  %s10857_s17 = smov [#allocation5]   ;;  %s136_s7 = int_to_ptr.hbm [resolvable:$true] %s135_s7 }
  0x25   : > { %p10995_p2 = pnand %p9238_p12, %p124_p0  ;;  %s137_s29 = sshll.u32 %s10857_s17, 4  ;;  %s138_s29 = int_to_ptr.vmem [resolvable:$true] %s137_s29 }
  0x26   : > { %s10858_s27 = smov 384   ;;  %s10859_s22 = smov 24  }
  0x27   : > { %p10613_p4 = pneg %p10995_p2  ;;  %s10751_s30 = sshra.s32 %s10975_s19, 4  ;;  %s10752_s30 = int_to_ptr.hbm [resolvable:$true] %s10751_s30 }
  0x28   : > { %s10753_s26 = scalar_lea.hbm %s10752_s30, 8  ;;  %s10758_s25 = scalar_lea.hbm %s19654_s2, 16 }
  0x29   : > { %p10614_p3 = pnand %p10613_p4, %p19656_p9  ;;  %p10754_p5 = scmp.ne.s32.totalorder %s10752_s30, %s10753_s26 }
  0x2a   : > { %p10759_p0 = scmp.lt.s32.totalorder %s10752_s30, %s19654_s2  ;;  %p10760_p4 = scmp.lt.s32.totalorder %s10758_s25, %s10753_s26 }
  0x2b   : > { %10616 = dma.hbm_to_vmem [thread:$0]  (!%p10614_p3), %s136_s7, 768, %s138_s29, [#allocation6], %s10858_s27, %s10858_s27, %s10859_s22  }
  0x2c   : > { %p10756_p7 = pnand %p10754_p5, %p10695_p13  ;;  %p10761_p8 = por %p10760_p4, %p10759_p0 }
  0x2e   : > { %p10757_p12 = pneg %p10756_p7 }
  0x30   : > { %p10762_p9 = pnand %p10761_p8, %p10757_p12 }
  0x32   : > { %10765 = shalt.err (!%p10762_p9)
}
  0x33   : > { %s10860_s7 = smov 128   ;;  %s10861_s17 = smov 64  }
  0x34   : > { %s10862_s29 = smov 4   ;;  %193 = sbr.rel (%p10995_p2) target bundleno = 1603 (0x643), region = 32 }
  0x35   : > { %10623 = dma.hbm_to_vmem [thread:$0]  (!%p10952_p11), %s10975_s19, 128, %s182_s28, %s10959_s20, %s10860_s7, %s10861_s17, %s10862_s29  }
  0x39   : > { %s195_s27 = sand.u32 1, %s10909_s16   ;;  %s11023_s22 = sand.u32 1, %s10847_s13  }
  0x3a   : > { %s9246_s30 = sshll.u32 %s11023_s22, 2  ;;  %s196_s26 = scalar_lea.sflag [#allocation3], %s195_s27 }
  0x3b   : > { %s11026_s4 = scalar_lea.vmem [#allocation2], %s9246_s30 }
  0x3c   : > { %10826 = dma.done.wait (%p10988_p1), %s196_s26, 64  }
  0x3d   : > { %10828 = vsyncadd (%p10988_p1), %s196_s26, 4294967232  ;;  %p20944_p8 = scmp.eq.s32.totalorder %s10909_s16, 0 }
  0x3f   : > { %10830 = dma.done.wait (%p20944_p8), [#allocation6], 768   ;;  %p20945_p11 = pmov %p20944_p8 }
  0x40   : > { %s9248_s8 = sshll.u32 %s11023_s22, 3 }
  0x41   : > { %10832 = vsyncadd (%p20945_p11), [#allocation6], 4294966528  ;;  %s11037_s19 = scalar_lea.vmem [#allocation7], %s9248_s8 }
  0x42   : > { %10834 = dma.done.wait (%p10988_p1), %s196_s26, 128  }
  0x43   : > { %10836 = vsyncadd (%p10988_p1), %s196_s26, 4294967168  ;;  %v250_v0 = vlaneseq  ;;  %v11070_v10 = vld [vmem:[%s11026_s4] ss:$0 sm:$0xff]  ;;  %v20959_v15 = vmov 0  ;;  %v20962_v16 = vmov 0  ;;  %v20965_v17 = vmov 0 }
  0x44   : > { %v20968_v18 = vmov 0  ;;  %v19657_v19 = vmov 1.0   ;;  %v19663_v20 = vmov 0.0   ;;  %v20971_v23 = vmov 0  ;;  %s9249_s20 = sshll.u32 %s11023_s22, 4  ;;  %s10600_s28 = sshll.u32 %s10909_s16, 3 }
  0x45   : > { %v11043_v1 = vshrl.u32 %v250_v0, 7  ;;  %v20977_v28 = vmov 0  ;;  %v20980_v30 = vmov 0  ;;  %v20983_v32 = vmov 0  ;;  %s9130_s6 = scalar_lea.hbm %s19655_s3, %s10600_s28  ;;  %s242_s25 = scalar_lea.vmem [#allocation8], %s9249_s20 }
  0x46   : > { %v20990_v39 = vmov 0  ;;  %v20996_v48 = vmov 0  ;;  %v21002_v56 = vmov 0  ;;  %v21009_v0 = vmov 0  ;;  %s9131_s11 = sshll.u32 %s242_s25, 4  ;;  %s9133_s5 = sshll.u32 %s9130_s6, 4  ;;  %s9132_s11 = int_to_ptr.vmem [resolvable:$true] %s9131_s11  ;;  %s9134_s5 = int_to_ptr.hbm [resolvable:$true] %s9133_s5 }
  0x47   : > { %20946 = vst [vmem:[#allocation13_spill] sm:$0xff] %v11043_v1  ;;  %v11046_v2 = vadd.s32 120, %v11043_v1  ;;  %v11049_v3 = vadd.s32 112, %v11043_v1  ;;  %v11052_v4 = vadd.s32 104, %v11043_v1  ;;  %v11055_v5 = vadd.s32 96, %v11043_v1  ;;  %s9120_s16 = scalar_lea.sflag [#allocation4], %s11023_s22 }
  0x48   : > { %v11058_v6 = vadd.s32 88, %v11043_v1  ;;  %v11061_v7 = vadd.s32 80, %v11043_v1  ;;  %v11064_v8 = vadd.s32 72, %v11043_v1  ;;  %v11067_v9 = vadd.s32 64, %v11043_v1  ;;  %s10795_s7 = sshra.s32 %s9134_s5, 4  ;;  %s10801_s30 = scalar_lea.hbm %s19655_s3, 32  ;;  %s10796_s7 = int_to_ptr.hbm [resolvable:$true] %s10795_s7 }
  0x49   : > { %20947 = vst [vmem:[#allocation14_spill] sm:$0xff] %v11046_v2  ;;  %v11073_v11 = vadd.s32 56, %v11043_v1  ;;  %v11076_v12 = vadd.s32 48, %v11043_v1  ;;  %v11079_v13 = vadd.s32 40, %v11043_v1  ;;  %v11082_v14 = vadd.s32 32, %v11043_v1  ;;  %s10797_s17 = scalar_lea.hbm %s10796_s7, 16  ;;  %p10802_p2 = scmp.lt.s32.totalorder %s10796_s7, %s19655_s3 }
  0x4a   : > { %20948 = vst [vmem:[#allocation15_spill] sm:$0xff] %v11049_v3  ;;  %vm11086_vm0 = vcmp.eq.s32.totalorder %v11046_v2, %v11070_v10  ;;  %vm11092_vm1 = vcmp.eq.s32.totalorder %v11049_v3, %v11070_v10  ;;  %vm11098_vm2 = vcmp.eq.s32.totalorder %v11052_v4, %v11070_v10  ;;  %vm11104_vm3 = vcmp.eq.s32.totalorder %v11055_v5, %v11070_v10  ;;  %p10798_p13 = scmp.ne.s32.totalorder %s10796_s7, %s10797_s17  ;;  %p10803_p3 = scmp.lt.s32.totalorder %s10801_s30, %s10797_s17 }
  0x4b   : > { %20949 = vst [vmem:[#allocation16_spill] sm:$0xff] %v11052_v4  ;;  %v20960_v15 = vsel %vm11086_vm0, 4294967295, %v20959_v15  ;;  %v20963_v16 = vsel %vm11092_vm1, 4294967295, %v20962_v16  ;;  %v20966_v17 = vsel %vm11098_vm2, 4294967295, %v20965_v17  ;;  %v20969_v18 = vsel %vm11104_vm3, 4294967295, %v20968_v18  ;;  %9298 = vmatpush.msk.msra.mxu0 %vm11086_vm0, %v19657_v19  ;;  %9314 = vmatpush.msk.msra.mxu3 %vm11086_vm0, %v19657_v19 }
  0x4c   : > { %20950 = vst [vmem:[#allocation17_spill] sm:$0xff] %v11055_v5  ;;  %v9265_v21 = vsel %vm11086_vm0, 1.0, %v19663_v20  ;;  %v9264_v22 = vsel %vm11092_vm1, 1.0, %v19663_v20  ;;  %vm11122_vm4 = vcmp.eq.s32.totalorder %v11058_v6, %v11070_v10  ;;  %v9263_v24 = vsel %vm11098_vm2, 1.0, %v19663_v20  ;;  %p10799_p9 = pnand %p10798_p13, %p10931_p6  ;;  %p10804_p5 = por %p10803_p3, %p10802_p2 }
  0x4d   : > { %20951 = vst [vmem:[#allocation18_spill] sm:$0xff] %v11058_v6  ;;  %v20972_v23 = vsel %vm11122_vm4, 4294967295, %v20971_v23  ;;  %v11129_v25 = vsub.f32 %v9265_v21, %v9265_v21  ;;  %v11131_v26 = vsub.f32 %v9264_v22, %v9264_v22  ;;  %v11133_v27 = vsub.f32 %v9263_v24, %v9263_v24  ;;  %9299 = vmatpush.msk.msra.mxu0 %vm11092_vm1, %v19657_v19 }
  0x4e   : > { %20952 = vst [vmem:[#allocation19_spill] sm:$0xff] %v11061_v7  ;;  %vm11137_vm5 = vcmp.eq.s32.totalorder %v11061_v7, %v11070_v10  ;;  %9315 = vmatpush.msk.msra.mxu3 %vm11092_vm1, %v19657_v19  ;;  %v9262_v29 = vsel %vm11104_vm3, 1.0, %v19663_v20  ;;  %vm11152_vm6 = vcmp.eq.s32.totalorder %v11064_v8, %v11070_v10  ;;  %v9261_v31 = vsel %vm11122_vm4, 1.0, %v19663_v20  ;;  %p10800_p1 = pneg %p10799_p9 }
  0x4f   : > { %20953 = vst [vmem:[#allocation20_spill] sm:$0xff] %v11064_v8  ;;  %v20978_v28 = vsel %vm11137_vm5, 4294967295, %v20977_v28  ;;  %v20981_v30 = vsel %vm11152_vm6, 4294967295, %v20980_v30  ;;  %vm11161_vm7 = vcmp.eq.s32.totalorder %v11067_v9, %v11070_v10  ;;  %589 = vmatpush.msra.mxu2 %v11129_v25  ;;  %v11167_v33 = vand.u32 4294901760, %v11129_v25  ;;  %9300 = vmatpush.msk.msra.mxu0 %vm11098_vm2, %v19657_v19 }
  0x50   : > { %20954 = vst [vmem:[#allocation21_spill] sm:$0xff] %v11067_v9  ;;  %v20984_v32 = vsel %vm11161_vm7, 4294967295, %v20983_v32  ;;  %v11170_v34 = vand.u32 4294901760, %v11131_v26  ;;  %v11172_v35 = vsub.f32 %v9262_v29, %v9262_v29  ;;  %v11175_v36 = vand.u32 4294901760, %v11133_v27  ;;  %9316 = vmatpush.msk.msra.mxu3 %vm11098_vm2, %v19657_v19  ;;  %p10805_p7 = pnand %p10804_p5, %p10800_p1 }
  0x51   : > { %20955 = vst [vmem:[#allocation22_spill] sm:$0xff] %v11073_v11  ;;  %v11183_v37 = vsub.f32 %v9261_v31, %v9261_v31  ;;  %v9260_v38 = vsel %vm11137_vm5, 1.0, %v19663_v20  ;;  %vm11190_vm8 = vcmp.eq.s32.totalorder %v11073_v11, %v11070_v10  ;;  %v9259_v40 = vsel %vm11152_vm6, 1.0, %v19663_v20  ;;  %592 = vmatpush.msra.mxu2 %v11131_v26  ;;  %9301 = vmatpush.msk.msra.mxu0 %vm11104_vm3, %v19657_v19 }
  0x52   : > { %20956 = vst [vmem:[#allocation23_spill] sm:$0xff] %v11076_v12  ;;  %v20991_v39 = vsel %vm11190_vm8, 4294967295, %v20990_v39  ;;  %v489_v41 = vsub.f32 %v11129_v25, %v11167_v33  ;;  %v495_v42 = vsub.f32 %v11131_v26, %v11170_v34  ;;  %v501_v43 = vsub.f32 %v11133_v27, %v11175_v36  ;;  %9317 = vmatpush.msk.msra.mxu3 %vm11104_vm3, %v19657_v19 }
  0x53   : > { %20957 = vst [vmem:[#allocation24_spill] sm:$0xff] %v11079_v13  ;;  %v11205_v44 = vand.u32 4294901760, %v11172_v35  ;;  %v11213_v45 = vsub.f32 %v9260_v38, %v9260_v38  ;;  %v11216_v46 = vand.u32 4294901760, %v11183_v37  ;;  %v11218_v47 = vsub.f32 %v9259_v40, %v9259_v40  ;;  %595 = vmatpush.msra.mxu2 %v11133_v27  ;;  %9302 = vmatpush.msk.msra.mxu0 %vm11122_vm4, %v19657_v19 }
  0x54   : > { %20958 = vst [vmem:[#allocation25_spill] sm:$0xff] %v11082_v14  ;;  %vm11222_vm9 = vcmp.eq.s32.totalorder %v11076_v12, %v11070_v10  ;;  %v11226_v49 = vand.u32 4294901760, %v489_v41  ;;  %v11229_v50 = vand.u32 4294901760, %v495_v42  ;;  %v11231_v51 = vand.u32 4294901760, %v501_v43  ;;  %9318 = vmatpush.msk.msra.mxu3 %vm11122_vm4, %v19657_v19 }
  0x55   : > { %20961 = vst [vmem:[#allocation26_spill] sm:$0xff] %v20960_v15  ;;  %v20997_v48 = vsel %vm11222_vm9, 4294967295, %v20996_v48  ;;  %v507_v52 = vsub.f32 %v11172_v35, %v11205_v44  ;;  %v513_v53 = vsub.f32 %v11183_v37, %v11216_v46  ;;  %v11244_v54 = vand.u32 4294901760, %v11213_v45  ;;  %598 = vmatpush.msra.mxu2 %v11172_v35  ;;  %9303 = vmatpush.msk.msra.mxu0 %vm11137_vm5, %v19657_v19 }
  0x56   : > { %20964 = vst [vmem:[#allocation27_spill] sm:$0xff] %v20963_v16  ;;  %v9258_v55 = vsel %vm11161_vm7, 1.0, %v19663_v20  ;;  %vm11251_vm10 = vcmp.eq.s32.totalorder %v11079_v13, %v11070_v10  ;;  %491 = vmatpush.msra.mxu1 %v11226_v49  ;;  %v11262_v59 = vand.u32 4294901760, %v11218_v47  ;;  %v9257_v60 = vsel %vm11190_vm8, 1.0, %v19663_v20  ;;  %9319 = vmatpush.msk.msra.mxu3 %vm11137_vm5, %v19657_v19 }
  0x57   : > { %20967 = vst [vmem:[#allocation28_spill] sm:$0xff] %v20966_v17  ;;  %v21003_v56 = vsel %vm11251_vm10, 4294967295, %v21002_v56  ;;  %v11257_v57 = vand.u32 4294901760, %v507_v52  ;;  %v11259_v58 = vsub.f32 %v9258_v55, %v9258_v55  ;;  %v11270_v61 = vand.u32 4294901760, %v513_v53  ;;  %601 = vmatpush.msra.mxu2 %v11183_v37  ;;  %9304 = vmatpush.msk.msra.mxu0 %vm11152_vm6, %v19657_v19 }
  0x58   : > { %20970 = vst [vmem:[#allocation29_spill] sm:$0xff] %v20969_v18  ;;  %v519_v62 = vsub.f32 %v11213_v45, %v11244_v54  ;;  %v11277_v63 = vsub.f32 %v9257_v60, %v9257_v60  ;;  %vm11281_vm11 = vcmp.eq.s32.totalorder %v11082_v14, %v11070_v10  ;;  %497 = vmatpush.msra.mxu1 %v11229_v50  ;;  %v9256_v24 = vsel %vm11222_vm9, 1.0, %v19663_v20 }
  0x59   : > { %20973 = vst [vmem:[#allocation30_spill] sm:$0xff] %v20972_v23  ;;  %v21010_v0 = vsel %vm11281_vm11, 4294967295, %v21009_v0  ;;  %v525_v21 = vsub.f32 %v11218_v47, %v11262_v59  ;;  %v11290_v22 = vand.u32 4294901760, %v11259_v58  ;;  %v11296_v29 = vadd.s32 24, %v11043_v1  ;;  %9320 = vmatpush.msk.msra.mxu3 %vm11152_vm6, %v19657_v19  ;;  %604 = vmatpush.msra.mxu2 %v11213_v45 }
  0x5a   : > { %20974 = vst [vmem:[#allocation31_spill] sm:$0xff] %v11129_v25  ;;  %v11301_v31 = vand.u32 4294901760, %v519_v62  ;;  %v11306_v38 = vsub.f32 %v9256_v24, %v9256_v24  ;;  %v11309_v40 = vand.u32 4294901760, %v11277_v63  ;;  %v9255_v41 = vsel %vm11251_vm10, 1.0, %v19663_v20  ;;  %503 = vmatpush.msra.mxu1 %v11231_v51  ;;  %9305 = vmatpush.msk.msra.mxu0 %vm11161_vm7, %v19657_v19 }
  0x5b   : > { %20975 = vst [vmem:[#allocation32_spill] sm:$0xff] %v11131_v26  ;;  %v11316_v42 = vand.u32 4294901760, %v525_v21  ;;  %v531_v43 = vsub.f32 %v11259_v58, %v11290_v22  ;;  %vm11322_vm12 = vcmp.eq.s32.totalorder %v11296_v29, %v11070_v10  ;;  %v21017_v52 = vmov 0  ;;  %9321 = vmatpush.msk.msra.mxu3 %vm11161_vm7, %v19657_v19  ;;  %607 = vmatpush.msra.mxu2 %v11218_v47 }
  0x5c   : > { %20976 = vst [vmem:[#allocation33_spill] sm:$0xff] %v11133_v27  ;;  %v21018_v52 = vsel %vm11322_vm12, 4294967295, %v21017_v52  ;;  %v11326_v53 = vsub.f32 %v9255_v41, %v9255_v41  ;;  %v537_v55 = vsub.f32 %v11277_v63, %v11309_v40  ;;  %v11337_v60 = vadd.s32 16, %v11043_v1  ;;  %509 = vmatpush.msra.mxu1 %v11257_v57 }
  0x5d   : > { %20979 = vst [vmem:[#allocation34_spill] sm:$0xff] %v20978_v28  ;;  %v11340_v62 = vand.u32 4294901760, %v11306_v38  ;;  %v9254_v21 = vsel %vm11281_vm11, 1.0, %v19663_v20  ;;  %v11347_v24 = vand.u32 4294901760, %v531_v43  ;;  %v11352_v19 = vadd.s32 8, %v11043_v1  ;;  %610 = vmatpush.msra.mxu2 %v11259_v58 }
  0x5e   : > { %20982 = vst [vmem:[#allocation35_spill] sm:$0xff] %v20981_v30  ;;  %v11349_v41 = vsub.f32 %v9254_v21, %v9254_v21  ;;  %v21026_v14 = vmov 1.0   ;;  %v11363_v20 = vand.u32 4294901760, %v537_v55  ;;  %vm11367_vm13 = vcmp.eq.s32.totalorder %v11337_v60, %v11070_v10  ;;  %515 = vmatpush.msra.mxu1 %v11270_v61 }
  0x5f   : > { %20985 = vst [vmem:[#allocation36_spill] sm:$0xff] %v11167_v33  ;;  %9306 = vmatpush.msk.msra.mxu0 %vm11190_vm8, %v21026_v14  ;;  %9322 = vmatpush.msk.msra.mxu3 %vm11190_vm8, %v21026_v14  ;;  %v21028_v43 = vmov 0  ;;  %v543_v21 = vsub.f32 %v11306_v38, %v11340_v62  ;;  %v21030_v13 = vmov 0.0   ;;  %vm11380_vm14 = vcmp.eq.s32.totalorder %v11352_v19, %v11070_v10 }
  0x60   : > { %20986 = vst [vmem:[#allocation37_spill] sm:$0xff] %v11170_v34  ;;  %v21029_v43 = vsel %vm11367_vm13, 4294967295, %v21028_v43  ;;  %v9253_v12 = vsel %vm11322_vm12, 1.0, %v21030_v13  ;;  %v21031_v55 = vmov 0  ;;  %v11389_v9 = vand.u32 4294901760, %v11349_v41  ;;  %521 = vmatpush.msra.mxu1 %v11301_v31  ;;  %613 = vmatpush.msra.mxu2 %v11277_v63 }
  0x61   : > { %20987 = vst [vmem:[#allocation38_spill] sm:$0xff] %v11172_v35  ;;  %v21032_v55 = vsel %vm11380_vm14, 4294967295, %v21031_v55  ;;  %v11386_v11 = vsub.f32 %v9253_v12, %v9253_v12  ;;  %9307 = vmatpush.msk.msra.mxu0 %vm11222_vm9, %v21026_v14  ;;  %9323 = vmatpush.msk.msra.mxu3 %vm11222_vm9, %v21026_v14  ;;  %vm11401_vm15 = vcmp.eq.s32.totalorder %v11043_v1, %v11070_v10  ;;  %v21035_v8 = vmov 0 }
  0x62   : > { %20988 = vst [vmem:[#allocation39_spill] sm:$0xff] %v11175_v36  ;;  %v21036_v8 = vsel %vm11401_vm15, 4294967295, %v21035_v8  ;;  %v9252_v12 = vsel %vm11367_vm13, 1.0, %v21030_v13  ;;  %v9251_v7 = vsel %vm11380_vm14, 1.0, %v21030_v13  ;;  %v555_v6 = vsub.f32 %v11349_v41, %v11389_v9  ;;  %527 = vmatpush.msra.mxu1 %v11316_v42  ;;  %616 = vmatpush.msra.mxu2 %v11306_v38 }
  0x63   : > { %20989 = vst [vmem:[#allocation40_spill] sm:$0xff] %v11183_v37  ;;  %v11417_v5 = vsub.f32 %v9252_v12, %v9252_v12  ;;  %v11420_v4 = vand.u32 4294901760, %v11386_v11  ;;  %9308 = vmatpush.msk.msra.mxu0 %vm11251_vm10, %v21026_v14  ;;  %9324 = vmatpush.msk.msra.mxu3 %vm11251_vm10, %v21026_v14  ;;  %v11428_v3 = vsub.f32 %v9251_v7, %v9251_v7  ;;  %v11434_v12 = vadd.s32 248, %v11043_v1 }
  0x64   : > { %20992 = vst [vmem:[#allocation41_spill] sm:$0xff] %v11205_v44  ;;  %v11437_v2 = vadd.s32 240, %v11043_v1  ;;  %533 = vmatpush.msra.mxu1 %v11347_v24  ;;  %619 = vmatpush.msra.mxu2 %v11326_v53  ;;  %v21053_v27 = vmov 0  ;;  %v21134_v17 = vmov 0  ;;  %v21147_v23 = vmov 0 }
  0x65   : > { %20993 = vst [vmem:[#allocation42_spill] sm:$0xff] %v11213_v45  ;;  %v561_v7 = vsub.f32 %v11386_v11, %v11420_v4  ;;  %9309 = vmatpush.msk.msra.mxu0 %vm11281_vm11, %v21026_v14  ;;  %9325 = vmatpush.msk.msra.mxu3 %vm11281_vm11, %v21026_v14  ;;  %vm11458_vm10 = vcmp.eq.s32.totalorder %v11434_v12, %v11070_v10  ;;  %v11472_v45 = vadd.s32 232, %v11043_v1 }
  0x66   : > { %20994 = vst [vmem:[#allocation43_spill] sm:$0xff] %v11216_v46  ;;  %vm11467_vm9 = vcmp.eq.s32.totalorder %v11437_v2, %v11070_v10  ;;  %v9281_v35 = vsel %vm11458_vm10, 1.0, %v21030_v13  ;;  %539 = vmatpush.msra.mxu1 %v11363_v20  ;;  %622 = vmatpush.msra.mxu2 %v11349_v41 }
  0x67   : > { %20995 = vst [vmem:[#allocation44_spill] sm:$0xff] %v11218_v47  ;;  %9310 = vmatpush.msk.msra.mxu0 %vm11322_vm12, %v21026_v14  ;;  %9326 = vmatpush.msk.msra.mxu3 %vm11322_vm12, %v21026_v14  ;;  %vm11498_vm11 = vcmp.eq.s32.totalorder %v11472_v45, %v11070_v10  ;;  %v9280_v26 = vsel %vm11467_vm9, 1.0, %v21030_v13 }
  0x68   : > { %20998 = vst [vmem:[#allocation45_spill] sm:$0xff] %v11226_v49  ;;  %v21054_v27 = vsel %vm11498_vm11, 4294967295, %v21053_v27  ;;  %625 = vmatpush.msra.mxu2 %v11386_v11 }
  0x69   : > { %20999 = vst [vmem:[#allocation46_spill] sm:$0xff] %v11229_v50  ;;  %9311 = vmatpush.msk.msra.mxu0 %vm11367_vm13, %v21026_v14  ;;  %9327 = vmatpush.msk.msra.mxu3 %vm11367_vm13, %v21026_v14  ;;  %v11597_v50 = vadd.s32 200, %v11043_v1 }
  0x6a   : > { %21000 = vst [vmem:[#allocation47_spill] sm:$0xff] %v11231_v51  ;;  %628 = vmatpush.msra.mxu2 %v11417_v5 }
  0x6b   : > { %21001 = vst [vmem:[#allocation48_spill] sm:$0xff] %v11244_v54  ;;  %9312 = vmatpush.msk.msra.mxu0 %vm11380_vm14, %v21026_v14  ;;  %9328 = vmatpush.msk.msra.mxu3 %vm11380_vm14, %v21026_v14 }
  0x6c   : > { %21004 = vst [vmem:[#allocation49_spill] sm:$0xff] %v11257_v57  ;;  %631 = vmatpush.msra.mxu2 %v11428_v3 }
  0x6d   : > { %21005 = vst [vmem:[#allocation50_spill] sm:$0xff] %v11259_v58  ;;  %v11446_v58 = vand.u32 4294901760, %v11417_v5  ;;  %9313 = vmatpush.msk.msra.mxu0 %vm11401_vm15, %v21026_v14  ;;  %9329 = vmatpush.msk.msra.mxu3 %vm11401_vm15, %v21026_v14 }
  0x6e   : > { %21006 = vst [vmem:[#allocation51_spill] sm:$0xff] %v11262_v59 }
  0x6f   : > { %21007 = vst [vmem:[#allocation52_spill] sm:$0xff] %v11270_v61  ;;  %v567_v37 = vsub.f32 %v11417_v5, %v11446_v58  ;;  %683 = vmatpush.msrb.mxu0 %v11167_v33 }
  0x70   : > { %21008 = vst [vmem:[#allocation53_spill] sm:$0xff] %v11277_v63  ;;  %v11441_v63 = vand.u32 4294901760, %v555_v6  ;;  %v21045_v6 = vmov 0 }
  0x71   : > { %21011 = vst [vmem:[#allocation54_spill] sm:$0xff] %v11290_v22  ;;  %v21046_v6 = vsel %vm11458_vm10, 4294967295, %v21045_v6  ;;  %v11507_v25 = vand.u32 4294901760, %v567_v37  ;;  %687 = vmatpush.msrb.mxu0 %v11170_v34  ;;  %v21091_v34 = vmov 0 }
  0x72   : > { %21012 = vst [vmem:[#allocation55_spill] sm:$0xff] %v11296_v29  ;;  %v11355_v29 = vand.u32 4294901760, %v11326_v53 }
  0x73   : > { %21013 = vst [vmem:[#allocation56_spill] sm:$0xff] %v11301_v31  ;;  %691 = vmatpush.msrb.mxu0 %v11175_v36 }
  0x74   : > { %21014 = vst [vmem:[#allocation57_spill] sm:$0xff] %v11306_v38  ;;  %v11463_v38 = vand.u32 4294901760, %v11428_v3 }
  0x75   : > { %21015 = vst [vmem:[#allocation58_spill] sm:$0xff] %v11309_v40  ;;  %695 = vmatpush.msrb.mxu0 %v11205_v44 }
  0x76   : > { %21016 = vst [vmem:[#allocation59_spill] sm:$0xff] %v11316_v42 }
  0x77   : > { %21019 = vst [vmem:[#allocation60_spill] sm:$0xff] %v11326_v53  ;;  %699 = vmatpush.msrb.mxu0 %v11216_v46  ;;  %v243_v46 = vld [vmem:[#allocation5] sm:$0xff] }
  0x78   : > { %21020 = vst [vmem:[#allocation61_spill] sm:$0xff] %v11337_v60  ;;  %v549_v60 = vsub.f32 %v11326_v53, %v11355_v29  ;;  %v11494_v53 = vsub.f32 %v9281_v35, %v9281_v35 }
  0x79   : > { %21021 = vst [vmem:[#allocation62_spill] sm:$0xff] %v11340_v62  ;;  %703 = vmatpush.msrb.mxu0 %v11244_v54  ;;  %v11775_v54 = vand.u32 4294901760, %v243_v46 }
  0x7a   : > { %21022 = vst [vmem:[#allocation63_spill] sm:$0xff] %v11347_v24  ;;  %v11511_v24 = vsub.f32 %v9280_v26, %v9280_v26  ;;  %v11525_v37 = vand.u32 4294901760, %v11494_v53  ;;  %v9279_v26 = vsel %vm11498_vm11, 1.0, %v21030_v13 }
  0x7b   : > { %21023 = vst [vmem:[#allocation64_spill] sm:$0xff] %v11349_v41  ;;  %v11531_v41 = vadd.s32 216, %v11043_v1  ;;  %v11546_v61 = vsub.f32 %v9279_v26, %v9279_v26  ;;  %707 = vmatpush.msrb.mxu0 %v11262_v59 }
  0x7c   : > { %21024 = vst [vmem:[#allocation65_spill] sm:$0xff] %v11352_v19  ;;  %v11397_v19 = vand.u32 4294901760, %v543_v21  ;;  %v11413_v21 = vand.u32 4294901760, %v549_v60  ;;  %v9250_v60 = vsel %vm11401_vm15, 1.0, %v21030_v13  ;;  %v11538_v31 = vand.u32 4294901760, %v11511_v24 }
  0x7d   : > { %21025 = vst [vmem:[#allocation66_spill] sm:$0xff] %v11355_v29  ;;  %v11448_v47 = vsub.f32 %v9250_v60, %v9250_v60  ;;  %v21047_v60 = vmov 0  ;;  %vm11558_vm12 = vcmp.eq.s32.totalorder %v11531_v41, %v11070_v10  ;;  %v11573_v57 = vand.u32 4294901760, %v11546_v61  ;;  %711 = vmatpush.msrb.mxu0 %v11290_v22 }
  0x7e   : > { %21027 = vst [vmem:[#allocation67_spill] sm:$0xff] %v11363_v20  ;;  %v21048_v60 = vsel %vm11467_vm9, 4294967295, %v21047_v60  ;;  %545 = vmatpush.msra.mxu1 %v11397_v19  ;;  %v9277_v51 = vsel %vm11558_vm12, 1.0, %v21030_v13  ;;  %vm11618_vm15 = vcmp.eq.s32.totalorder %v11597_v50, %v11070_v10 }
  0x7f   : > { %21033 = vst [vmem:[#allocation68_spill] sm:$0xff] %v11386_v11  ;;  %v11566_v11 = vadd.s32 208, %v11043_v1  ;;  %634 = vmatpush.msra.mxu2 %v11448_v47  ;;  %715 = vmatpush.msrb.mxu0 %v11309_v40 }
  0x80   : > { %21034 = vst [vmem:[#allocation69_spill] sm:$0xff] %v11397_v19  ;;  %551 = vmatpush.msra.mxu1 %v11413_v21  ;;  %v836_v19 = vsub.f32 %v11511_v24, %v11538_v31 }
  0x81   : > { %21037 = vst [vmem:[#allocation70_spill] sm:$0xff] %v21036_v8  ;;  %vm11590_vm14 = vcmp.eq.s32.totalorder %v11566_v11, %v11070_v10  ;;  %9346 = vmatpush.msk.msrb.mxu2 %vm11458_vm10, %v21026_v14  ;;  %719 = vmatpush.msrb.mxu0 %v11340_v62  ;;  %v244_v62 = vld [vmem:[#allocation5 + $0x8] sm:$0xff] }
  0x82   : > { %21038 = vst [vmem:[#allocation71_spill] sm:$0xff] %v11413_v21  ;;  %v21075_v21 = vmov 0  ;;  %557 = vmatpush.msra.mxu1 %v11441_v63  ;;  %v11601_v49 = vand.u32 4294901760, %v836_v19  ;;  %v21083_v19 = vmov 0 }
  0x83   : > { %21039 = vst [vmem:[#allocation72_spill] sm:$0xff] %v11417_v5  ;;  %v21076_v21 = vsel %vm11590_vm14, 4294967295, %v21075_v21  ;;  %v21084_v19 = vsel %vm11618_vm15, 4294967295, %v21083_v19  ;;  %9347 = vmatpush.msk.msrb.mxu2 %vm11467_vm9, %v21026_v14  ;;  %723 = vmatpush.msrb.mxu0 %v11355_v29 }
  0x84   : > { %21040 = vst [vmem:[#allocation73_spill] sm:$0xff] %v11428_v3 }
  0x85   : > { %21041 = vst [vmem:[#allocation74_spill] sm:$0xff] %v11434_v12  ;;  %v11476_v12 = vand.u32 4294901760, %v561_v7  ;;  %v573_v7 = vsub.f32 %v11428_v3, %v11463_v38  ;;  %9348 = vmatpush.msk.msrb.mxu2 %vm11498_vm11, %v21026_v14  ;;  %727 = vmatpush.msrb.mxu0 %v11389_v9 }
  0x86   : > { %21042 = vst [vmem:[#allocation75_spill] sm:$0xff] %v11437_v2  ;;  %v11484_v2 = vand.u32 4294901760, %v11448_v47 }
  0x87   : > { %21043 = vst [vmem:[#allocation76_spill] sm:$0xff] %v11441_v63  ;;  %v11522_v20 = vand.u32 4294901760, %v573_v7  ;;  %v21064_v7 = vmov 0  ;;  %v11625_v63 = vadd.s32 192, %v11043_v1  ;;  %563 = vmatpush.msra.mxu1 %v11476_v12  ;;  %731 = vmatpush.msrb.mxu0 %v11420_v4 }
  0x88   : > { %21044 = vst [vmem:[#allocation77_spill] sm:$0xff] %v11448_v47  ;;  %v579_v35 = vsub.f32 %v11448_v47, %v11484_v2 }
  0x89   : > { %21049 = vst [vmem:[#allocation78_spill] sm:$0xff] %v11472_v45  ;;  %v11514_v45 = vadd.s32 224, %v11043_v1  ;;  %vm11648_vm8 = vcmp.eq.s32.totalorder %v11625_v63, %v11070_v10  ;;  %569 = vmatpush.msra.mxu1 %v11507_v25  ;;  %735 = vmatpush.msrb.mxu0 %v11446_v58 }
  0x8a   : > { %21050 = vst [vmem:[#allocation79_spill] sm:$0xff] %v11476_v12  ;;  %v11535_v42 = vand.u32 4294901760, %v579_v35  ;;  %v830_v35 = vsub.f32 %v11494_v53, %v11525_v37  ;;  %v21092_v34 = vsel %vm11648_vm8, 4294967295, %v21091_v34 }
  0x8b   : > { %21051 = vst [vmem:[#allocation80_spill] sm:$0xff] %v11484_v2  ;;  %vm11542_vm13 = vcmp.eq.s32.totalorder %v11514_v45, %v11070_v10  ;;  %575 = vmatpush.msra.mxu1 %v11522_v20  ;;  %739 = vmatpush.msrb.mxu0 %v11463_v38 }
  0x8c   : > { %21052 = vst [vmem:[#allocation81_spill] sm:$0xff] %v11494_v53  ;;  %v21065_v7 = vsel %vm11542_vm13, 4294967295, %v21064_v7  ;;  %v9278_v26 = vsel %vm11542_vm13, 1.0, %v21030_v13  ;;  %v11586_v5 = vand.u32 4294901760, %v830_v35  ;;  %v842_v35 = vsub.f32 %v11546_v61, %v11573_v57  ;;  %9349 = vmatpush.msk.msrb.mxu2 %vm11542_vm13, %v21026_v14 }
  0x8d   : > { %21055 = vst [vmem:[#allocation82_spill] sm:$0xff] %v21054_v27  ;;  %581 = vmatpush.msra.mxu1 %v11535_v42  ;;  %743 = vmatpush.msrb.mxu0 %v11484_v2 }
  0x8e   : > { %21056 = vst [vmem:[#allocation83_spill] sm:$0xff] %v11507_v25  ;;  %832 = vmatpush.msrb.mxu3 %v11586_v5  ;;  %v11629_v3 = vand.u32 4294901760, %v842_v35  ;;  %v21103_v25 = vmov 0  ;;  %9350 = vmatpush.msk.msrb.mxu2 %vm11558_vm12, %v21026_v14 }
  0x8f   : > { %21057 = vst [vmem:[#allocation84_spill] sm:$0xff] %v11511_v24  ;;  %9330 = vmatpush.msk.msrb.mxu1 %vm11086_vm0, %v21026_v14 }
  0x90   : > { %21058 = vst [vmem:[#allocation85_spill] sm:$0xff] %v11514_v45  ;;  %v21068_v45 = vmov 0  ;;  %838 = vmatpush.msrb.mxu3 %v11601_v49  ;;  %9351 = vmatpush.msk.msrb.mxu2 %vm11590_vm14, %v21026_v14 }
  0x91   : > { %21059 = vst [vmem:[#allocation86_spill] sm:$0xff] %v11522_v20  ;;  %v21069_v45 = vsel %vm11558_vm12, 4294967295, %v21068_v45  ;;  %9331 = vmatpush.msk.msrb.mxu1 %vm11092_vm1, %v21026_v14  ;;  %vm21161_vm1 = vnez %v20991_v39 }
  0x92   : > { %21060 = vst [vmem:[#allocation87_spill] sm:$0xff] %v11525_v37  ;;  %844 = vmatpush.msrb.mxu3 %v11629_v3  ;;  %9352 = vmatpush.msk.msrb.mxu2 %vm11618_vm15, %v21026_v14 }
  0x93   : > { %21061 = vst [vmem:[#allocation88_spill] sm:$0xff] %v11531_v41  ;;  %v11575_v41 = vsub.f32 %v9278_v26, %v9278_v26  ;;  %v11594_v26 = vsub.f32 %v9277_v51, %v9277_v51  ;;  %v9276_v51 = vsel %vm11590_vm14, 1.0, %v21030_v13  ;;  %9332 = vmatpush.msk.msrb.mxu1 %vm11098_vm2, %v21026_v14 }
  0x94   : > { %21062 = vst [vmem:[#allocation89_spill] sm:$0xff] %v11535_v42  ;;  %v11622_v33 = vsub.f32 %v9276_v51, %v9276_v51  ;;  %9353 = vmatpush.msk.msrb.mxu2 %vm11648_vm8, %v21026_v14  ;;  %583 = vmatmul.f32.vlgmr.msra.gmra.mxu1 %v11775_v54 }
  0x95   : > { %21063 = vst [vmem:[#allocation90_spill] sm:$0xff] %v11538_v31  ;;  %v11606_v8 = vand.u32 4294901760, %v11575_v41  ;;  %9333 = vmatpush.msk.msrb.mxu1 %vm11104_vm3, %v21026_v14 }
  0x96   : > { %21066 = vst [vmem:[#allocation91_spill] sm:$0xff] %v21065_v7  ;;  %v11644_v35 = vand.u32 4294901760, %v11622_v33 }
  0x97   : > { %21067 = vst [vmem:[#allocation92_spill] sm:$0xff] %v11546_v61  ;;  %9334 = vmatpush.msk.msrb.mxu1 %vm11122_vm4, %v21026_v14 }
  0x98   : > { %21070 = vst [vmem:[#allocation93_spill] sm:$0xff] %v21069_v45 }
  0x99   : > { %21071 = vst [vmem:[#allocation94_spill] sm:$0xff] %v11566_v11  ;;  %v11614_v11 = vand.u32 4294901760, %v11594_v26  ;;  %9335 = vmatpush.msk.msrb.mxu1 %vm11137_vm5, %v21026_v14  ;;  %vm21154_vm5 = vnez %v20981_v30  ;;  %v11919_v30 = vand.u32 4294901760, %v244_v62 }
  0x9a   : > { %21072 = vst [vmem:[#allocation95_spill] sm:$0xff] %v11573_v57  ;;  %v11637_v57 = vadd.s32 184, %v11043_v1 }
  0x9b   : > { %21073 = vst [vmem:[#allocation96_spill] sm:$0xff] %v11575_v41  ;;  %v854_v51 = vsub.f32 %v11594_v26, %v11614_v11  ;;  %9336 = vmatpush.msk.msrb.mxu1 %vm21154_vm5, %v21026_v14  ;;  %vm21158_vm5 = vnez %v20984_v32 }
  0x9c   : > { %21074 = vst [vmem:[#allocation97_spill] sm:$0xff] %v11586_v5  ;;  %v848_v5 = vsub.f32 %v11575_v41, %v11606_v8  ;;  %vm11660_vm7 = vcmp.eq.s32.totalorder %v11637_v57, %v11070_v10 }
  0x9d   : > { %21077 = vst [vmem:[#allocation98_spill] sm:$0xff] %v21076_v21  ;;  %9354 = vmatpush.msk.msrb.mxu2 %vm11660_vm7, %v21026_v14  ;;  %9337 = vmatpush.msk.msrb.mxu1 %vm21158_vm5, %v21026_v14  ;;  %vm21163_vm5 = vnez %v20997_v48 }
  0x9e   : > { %21078 = vst [vmem:[#allocation99_spill] sm:$0xff] %v11594_v26  ;;  %v11656_v47 = vand.u32 4294901760, %v848_v5  ;;  %v11674_v5 = vand.u32 4294901760, %v854_v51  ;;  %v9273_v51 = vsel %vm11660_vm7, 1.0, %v21030_v13 }
  0x9f   : > { %21079 = vst [vmem:[#allocation100_spill] sm:$0xff] %v11597_v50  ;;  %v9275_v50 = vsel %vm11618_vm15, 1.0, %v21030_v13  ;;  %9338 = vmatpush.msk.msrb.mxu1 %vm21161_vm1, %v21026_v14  ;;  %vm21166_vm1 = vnez %v21003_v56 }
  0xa0   : > { %21080 = vst [vmem:[#allocation101_spill] sm:$0xff] %v11601_v49  ;;  %v11652_v12 = vsub.f32 %v9275_v50, %v9275_v50  ;;  %v21096_v49 = vmov 0  ;;  %v860_v50 = vsub.f32 %v11622_v33, %v11644_v35  ;;  %850 = vmatpush.msrb.mxu3 %v11656_v47 }
  0xa1   : > { %21081 = vst [vmem:[#allocation102_spill] sm:$0xff] %v11606_v8  ;;  %v21097_v49 = vsel %vm11660_vm7, 4294967295, %v21096_v49  ;;  %v21111_v8 = vmov 0  ;;  %9339 = vmatpush.msk.msrb.mxu1 %vm21163_vm5, %v21026_v14  ;;  %vm21168_vm5 = vnez %v21010_v0 }
  0xa2   : > { %21082 = vst [vmem:[#allocation103_spill] sm:$0xff] %v11614_v11  ;;  %v11668_v11 = vadd.s32 176, %v11043_v1  ;;  %856 = vmatpush.msrb.mxu3 %v11674_v5 }
  0xa3   : > { %21085 = vst [vmem:[#allocation104_spill] sm:$0xff] %v21084_v19  ;;  %9340 = vmatpush.msk.msrb.mxu1 %vm21166_vm1, %v21026_v14  ;;  %vm21170_vm1 = vnez %v21018_v52 }
  0xa4   : > { %21086 = vst [vmem:[#allocation105_spill] sm:$0xff] %v11622_v33  ;;  %vm11687_vm6 = vcmp.eq.s32.totalorder %v11668_v11, %v11070_v10 }
  0xa5   : > { %21087 = vst [vmem:[#allocation106_spill] sm:$0xff] %v11625_v63  ;;  %v9274_v63 = vsel %vm11648_vm8, 1.0, %v21030_v13  ;;  %v21104_v25 = vsel %vm11687_vm6, 4294967295, %v21103_v25  ;;  %9355 = vmatpush.msk.msrb.mxu2 %vm11687_vm6, %v21026_v14  ;;  %9341 = vmatpush.msk.msrb.mxu1 %vm21168_vm5, %v21026_v14  ;;  %vm21172_vm5 = vnez %v21029_v43 }
  0xa6   : > { %21088 = vst [vmem:[#allocation107_spill] sm:$0xff] %v11629_v3  ;;  %v11681_v36 = vsub.f32 %v9274_v63, %v9274_v63  ;;  %v11695_v3 = vadd.s32 168, %v11043_v1  ;;  %v11698_v63 = vadd.s32 160, %v11043_v1 }
  0xa7   : > { %21089 = vst [vmem:[#allocation108_spill] sm:$0xff] %v11637_v57  ;;  %v11679_v57 = vand.u32 4294901760, %v11652_v12  ;;  %9342 = vmatpush.msk.msrb.mxu1 %vm21170_vm1, %v21026_v14  ;;  %vm21173_vm1 = vnez %v21032_v55 }
  0xa8   : > { %21090 = vst [vmem:[#allocation109_spill] sm:$0xff] %v11644_v35  ;;  %v11709_v20 = vand.u32 4294901760, %v11681_v36  ;;  %v11711_v35 = vsub.f32 %v9273_v51, %v9273_v51  ;;  %vm11717_vm10 = vcmp.eq.s32.totalorder %v11695_v3, %v11070_v10  ;;  %vm11726_vm9 = vcmp.eq.s32.totalorder %v11698_v63, %v11070_v10 }
  0xa9   : > { %21093 = vst [vmem:[#allocation110_spill] sm:$0xff] %v21092_v34  ;;  %v866_v44 = vsub.f32 %v11652_v12, %v11679_v57  ;;  %v21112_v8 = vsel %vm11717_vm10, 4294967295, %v21111_v8  ;;  %v11731_v51 = vadd.s32 152, %v11043_v1  ;;  %v9271_v15 = vsel %vm11717_vm10, 1.0, %v21030_v13  ;;  %9356 = vmatpush.msk.msrb.mxu2 %vm11717_vm10, %v21026_v14  ;;  %9343 = vmatpush.msk.msrb.mxu1 %vm21172_vm5, %v21026_v14 }
  0xaa   : > { %21094 = vst [vmem:[#allocation111_spill] sm:$0xff] %v11652_v12  ;;  %v21121_v12 = vmov 0  ;;  %vm21175_vm5 = vnez %v21046_v6 }
  0xab   : > { %21095 = vst [vmem:[#allocation112_spill] sm:$0xff] %v11656_v47  ;;  %v21114_v47 = vmov 0  ;;  %vm11755_vm0 = vcmp.eq.s32.totalorder %v11731_v51, %v11070_v10  ;;  %9357 = vmatpush.msk.msrb.mxu2 %vm11726_vm9, %v21026_v14  ;;  %9344 = vmatpush.msk.msrb.mxu1 %vm21173_vm1, %v21026_v14  ;;  %vm21179_vm1 = vnez %v21048_v60 }
  0xac   : > { %21098 = vst [vmem:[#allocation113_spill] sm:$0xff] %v21097_v49  ;;  %v21115_v47 = vsel %vm11726_vm9, 4294967295, %v21114_v47  ;;  %v21122_v12 = vsel %vm11755_vm0, 4294967295, %v21121_v12 }
  0xad   : > { %21099 = vst [vmem:[#allocation114_spill] sm:$0xff] %v11668_v11  ;;  %v11704_v11 = vand.u32 4294901760, %v860_v50  ;;  %v9272_v50 = vsel %vm11687_vm6, 1.0, %v21030_v13  ;;  %9358 = vmatpush.msk.msrb.mxu2 %vm11755_vm0, %v21026_v14 }
  0xae   : > { %21100 = vst [vmem:[#allocation115_spill] sm:$0xff] %v11674_v5  ;;  %v11744_v42 = vsub.f32 %v9272_v50, %v9272_v50  ;;  %v9270_v50 = vsel %vm11726_vm9, 1.0, %v21030_v13  ;;  %v11773_v5 = vsub.f32 %v9271_v15, %v9271_v15 }
  0xaf   : > { %21101 = vst [vmem:[#allocation116_spill] sm:$0xff] %v11679_v57  ;;  %v11748_v57 = vand.u32 4294901760, %v866_v44  ;;  %862 = vmatpush.msrb.mxu3 %v11704_v11 }
  0xb0   : > { %21102 = vst [vmem:[#allocation117_spill] sm:$0xff] %v11681_v36  ;;  %v11798_v15 = vand.u32 4294901760, %v11773_v5 }
  0xb1   : > { %21105 = vst [vmem:[#allocation118_spill] sm:$0xff] %v21104_v25  ;;  %868 = vmatpush.msrb.mxu3 %v11748_v57  ;;  %v12275_v25 = vadd.s32 296, %v11043_v1 }
  0xb2   : > { %21106 = vst [vmem:[#allocation119_spill] sm:$0xff] %v11695_v3  ;;  %v872_v3 = vsub.f32 %v11681_v36, %v11709_v20  ;;  %v11784_v36 = vadd.s32 144, %v11043_v1 }
  0xb3   : > { %21107 = vst [vmem:[#allocation120_spill] sm:$0xff] %v11698_v63  ;;  %v11742_v63 = vand.u32 4294901760, %v11711_v35 }
  0xb4   : > { %21108 = vst [vmem:[#allocation121_spill] sm:$0xff] %v11704_v11  ;;  %v11779_v16 = vand.u32 4294901760, %v872_v3  ;;  %vm11811_vm2 = vcmp.eq.s32.totalorder %v11784_v36, %v11070_v10 }
  0xb5   : > { %21109 = vst [vmem:[#allocation122_spill] sm:$0xff] %v11709_v20  ;;  %v878_v44 = vsub.f32 %v11711_v35, %v11742_v63  ;;  %v11781_v20 = vsub.f32 %v9270_v50, %v9270_v50  ;;  %v21135_v17 = vsel %vm11811_vm2, 4294967295, %v21134_v17  ;;  %9359 = vmatpush.msk.msrb.mxu2 %vm11811_vm2, %v21026_v14 }
  0xb6   : > { %21110 = vst [vmem:[#allocation123_spill] sm:$0xff] %v11711_v35  ;;  %874 = vmatpush.msrb.mxu3 %v11779_v16 }
  0xb7   : > { %21113 = vst [vmem:[#allocation124_spill] sm:$0xff] %v21112_v8  ;;  %v11804_v11 = vand.u32 4294901760, %v878_v44  ;;  %v11807_v59 = vand.u32 4294901760, %v11781_v20  ;;  %v11827_v44 = vsub.f32 %v243_v46, %v11775_v54  ;;  %v21141_v46 = vmov 0 }
  0xb8   : > { %21116 = vst [vmem:[#allocation125_spill] sm:$0xff] %v21115_v47 }
  0xb9   : > { %21117 = vst [vmem:[#allocation126_spill] sm:$0xff] %v11731_v51  ;;  %v11771_v51 = vand.u32 4294901760, %v11744_v42  ;;  %v896_v18 = vsub.f32 %v11781_v20, %v11807_v59  ;;  %880 = vmatpush.msrb.mxu3 %v11804_v11  ;;  %637 = vmatmul.f32.vlgmr.msra.gmra.mxu2 %v11827_v44 }
  0xba   : > { %21118 = vst [vmem:[#allocation127_spill] sm:$0xff] %v11742_v63  ;;  %v9269_v63 = vsel %vm11755_vm0, 1.0, %v21030_v13 }
  0xbb   : > { %21119 = vst [vmem:[#allocation128_spill] sm:$0xff] %v11744_v42  ;;  %v884_v3 = vsub.f32 %v11744_v42, %v11771_v51  ;;  %v11800_v50 = vsub.f32 %v9269_v63, %v9269_v63  ;;  %v890_v63 = vsub.f32 %v11773_v5, %v11798_v15 }
  0xbc   : > { %21120 = vst [vmem:[#allocation129_spill] sm:$0xff] %v11748_v57  ;;  %v9268_v57 = vsel %vm11811_vm2, 1.0, %v21030_v13 }
  0xbd   : > { %21123 = vst [vmem:[#allocation130_spill] sm:$0xff] %v21122_v12  ;;  %v11837_v22 = vand.u32 4294901760, %v884_v3  ;;  %v11856_v3 = vsub.f32 %v9268_v57, %v9268_v57  ;;  %v12237_v12 = vadd.s32 304, %v11043_v1 }
  0xbe   : > { %21124 = vst [vmem:[#allocation131_spill] sm:$0xff] %v11771_v51  ;;  %v11816_v51 = vadd.s32 136, %v11043_v1 }
  0xbf   : > { %21125 = vst [vmem:[#allocation132_spill] sm:$0xff] %v11773_v5  ;;  %886 = vmatpush.msrb.mxu3 %v11837_v22 }
  0xc0   : > { %21126 = vst [vmem:[#allocation133_spill] sm:$0xff] %v11775_v54  ;;  %vm11843_vm3 = vcmp.eq.s32.totalorder %v11816_v51, %v11070_v10 }
  0xc1   : > { %21127 = vst [vmem:[#allocation134_spill] sm:$0xff] %v11779_v16  ;;  %v21142_v46 = vsel %vm11843_vm3, 4294967295, %v21141_v46  ;;  %v11863_v16 = vand.u32 4294901760, %v890_v63  ;;  %v11882_v63 = vand.u32 4294901760, %v11827_v44  ;;  %9360 = vmatpush.msk.msrb.mxu2 %vm11843_vm3, %v21026_v14 }
  0xc2   : > { %21128 = vst [vmem:[#allocation135_spill] sm:$0xff] %v11781_v20 }
  0xc3   : > { %21129 = vst [vmem:[#allocation136_spill] sm:$0xff] %v11784_v36  ;;  %v11830_v36 = vand.u32 4294901760, %v11800_v50  ;;  %892 = vmatpush.msrb.mxu3 %v11863_v16  ;;  %v480_v29 = vsub.f32 %v11827_v44, %v11882_v63 }
  0xc4   : > { %21130 = vst [vmem:[#allocation137_spill] sm:$0xff] %v11798_v15  ;;  %v11848_v15 = vadd.s32 128, %v11043_v1  ;;  %676 = vmatmul.f32.vlgmr.msra.gmra.mxu3 %v11882_v63 }
  0xc5   : > { %21131 = vst [vmem:[#allocation138_spill] sm:$0xff] %v11800_v50  ;;  %v902_v40 = vsub.f32 %v11800_v50, %v11830_v36 }
  0xc6   : > { %21132 = vst [vmem:[#allocation139_spill] sm:$0xff] %v11804_v11  ;;  %vm11869_vm4 = vcmp.eq.s32.totalorder %v11848_v15, %v11070_v10  ;;  %v11885_v11 = vand.u32 4294901760, %v11856_v3 }
  0xc7   : > { %21133 = vst [vmem:[#allocation140_spill] sm:$0xff] %v11807_v59  ;;  %v21148_v23 = vsel %vm11869_vm4, 4294967295, %v21147_v23  ;;  %9361 = vmatpush.msk.msrb.mxu2 %vm11869_vm4, %v21026_v14 }
  0xc8   : > { %21136 = vst [vmem:[#allocation141_spill] sm:$0xff] %v21135_v17  ;;  %v908_v28 = vsub.f32 %v11856_v3, %v11885_v11 }
  0xc9   : > { %21137 = vst [vmem:[#allocation142_spill] sm:$0xff] %v11816_v51  ;;  %v9267_v51 = vsel %vm11843_vm3, 1.0, %v21030_v13  ;;  %1024 = vmatpush.msra.mxu2 %v11525_v37 }
  0xca   : > { %21138 = vst [vmem:[#allocation143_spill] sm:$0xff] %v11827_v44  ;;  %v11873_v57 = vsub.f32 %v9267_v51, %v9267_v51  ;;  %v11892_v51 = vand.u32 4294901760, %v896_v18  ;;  %v11907_v18 = vand.u32 4294901760, %v902_v40  ;;  %v11923_v40 = vand.u32 4294901760, %v908_v28 }
  0xcb   : > { %21139 = vst [vmem:[#allocation144_spill] sm:$0xff] %v11830_v36  ;;  %v11944_v28 = vand.u32 4294901760, %v480_v29  ;;  %1028 = vmatpush.msra.mxu2 %v11538_v31  ;;  %v21194_v31 = vmov 0 }
  0xcc   : > { %21140 = vst [vmem:[#allocation145_spill] sm:$0xff] %v11837_v22  ;;  %v11903_v36 = vand.u32 4294901760, %v11873_v57  ;;  %898 = vmatpush.msrb.mxu3 %v11892_v51 }
  0xcd   : > { %21143 = vst [vmem:[#allocation146_spill] sm:$0xff] %v21142_v46  ;;  %482 = vmatmul.f32.vlgmr.msra.gmra.mxu0 %v11944_v28 }
  0xce   : > { %21144 = vst [vmem:[#allocation147_spill] sm:$0xff] %v11848_v15  ;;  %v9266_v15 = vsel %vm11869_vm4, 1.0, %v21030_v13  ;;  %904 = vmatpush.msrb.mxu3 %v11907_v18  ;;  %930 = vmatpush.msra.mxu0 %v11494_v53 }
  0xcf   : > { %21145 = vst [vmem:[#allocation148_spill] sm:$0xff] %v11856_v3  ;;  %v11909_v22 = vsub.f32 %v9266_v15, %v9266_v15  ;;  %v914_v15 = vsub.f32 %v11873_v57, %v11903_v36 }
  0xd0   : > { %21146 = vst [vmem:[#allocation149_spill] sm:$0xff] %v11863_v16  ;;  %910 = vmatpush.msrb.mxu3 %v11923_v40  ;;  %933 = vmatpush.msra.mxu0 %v11511_v24 }
  0xd1   : > { %21149 = vst [vmem:[#allocation150_spill] sm:$0xff] %v21148_v23  ;;  %v11936_v16 = vand.u32 4294901760, %v11909_v22 }
  0xd2   : > { %21150 = vst [vmem:[#allocation151_spill] sm:$0xff] %v11873_v57  ;;  %936 = vmatpush.msra.mxu0 %v11546_v61 }
  0xd3   : > { %21151 = vst [vmem:[#allocation152_spill] sm:$0xff] %v11882_v63  ;;  %v920_v29 = vsub.f32 %v11909_v22, %v11936_v16  ;;  %v21176_v63 = vld [vmem:[#allocation70_spill] sm:$0xff] }
  0xd4   : > { %21152 = vst [vmem:[#allocation153_spill] sm:$0xff] %v11885_v11  ;;  %939 = vmatpush.msra.mxu0 %v11575_v41  ;;  %vm21177_vm4 = vnez %v21176_v63 }
  0xd5   : > { %21153 = vst [vmem:[#allocation154_spill] sm:$0xff] %v11892_v51  ;;  %v11947_v51 = vsub.f32 %v244_v62, %v11919_v30  ;;  %9345 = vmatpush.msk.msrb.mxu1 %vm21177_vm4, %v21026_v14  ;;  %745 = vmatmul.f32.vlgmr.msrb.gmra.mxu0 %v11775_v54 }
  0xd6   : > { %21155 = vst [vmem:[#allocation155_spill] sm:$0xff] %v11903_v36  ;;  %942 = vmatpush.msra.mxu0 %v11594_v26  ;;  %782 = vmatmul.f32.vlgmr.msrb.gmra.mxu1 %v11775_v54  ;;  %v12055_v54 = vadd.s32 376, %v11043_v1 }
  0xd7   : > { %21156 = vst [vmem:[#allocation156_spill] sm:$0xff] %v11907_v18  ;;  %v11957_v18 = vand.u32 4294901760, %v914_v15  ;;  %v11968_v62 = vand.u32 4294901760, %v11947_v51  ;;  %v11982_v15 = vand.u32 4294901760, %v920_v29  ;;  %9362 = vmatpush.msk.msra.mxu1 %vm21175_vm5, %v21026_v14 }
  0xd8   : > { %21157 = vst [vmem:[#allocation157_spill] sm:$0xff] %v11909_v22  ;;  %945 = vmatpush.msra.mxu0 %v11622_v33  ;;  %v12301_v33 = vadd.s32 288, %v11043_v1 }
  0xd9   : > { %21159 = vst [vmem:[#allocation158_spill] sm:$0xff] %v11919_v30  ;;  %916 = vmatpush.msrb.mxu3 %v11957_v18  ;;  %v821_v44 = vsub.f32 %v11947_v51, %v11968_v62  ;;  %9363 = vmatpush.msk.msra.mxu1 %vm21179_vm1, %v21026_v14 }
  0xda   : > { %21160 = vst [vmem:[#allocation159_spill] sm:$0xff] %v11923_v40  ;;  %v12071_v40 = vadd.s32 360, %v11043_v1 }
  0xdb   : > { %21162 = vst [vmem:[#allocation160_spill] sm:$0xff] %v11936_v16  ;;  %922 = vmatpush.msrb.mxu3 %v11982_v15  ;;  %v12002_v29 = vand.u32 4294901760, %v821_v44  ;;  %v21180_v44 = vld [vmem:[#allocation102_spill] sm:$0xff]  ;;  %9364 = vmatpush.msk.msra.mxu1 %vm11498_vm11, %v21026_v14 }
  0xdc   : > { %21164 = vst [vmem:[#allocation161_spill] sm:$0xff] %v11944_v28  ;;  %v21178_v28 = vld [vmem:[#allocation95_spill] sm:$0xff]  ;;  %924 = vmatmul.f32.vlgmr.msrb.gmra.mxu3 %v11919_v30 }
  0xdd   : > { %21165 = vst [vmem:[#allocation162_spill] sm:$0xff] %v11947_v51  ;;  %9378 = vmatpush.msk.msra.mxu3 %vm21175_vm5, %v21026_v14  ;;  %1032 = vmatpush.msra.mxu2 %v21178_v28  ;;  %v12060_v28 = vadd.s32 368, %v11043_v1 }
  0xde   : > { %21167 = vst [vmem:[#allocation163_spill] sm:$0xff] %v11957_v18  ;;  %823 = vmatmul.f32.vlgmr.msrb.gmra.mxu2 %v12002_v29  ;;  %v21184_v18 = vld [vmem:[#allocation109_spill] sm:$0xff]  ;;  %9365 = vmatpush.msk.msra.mxu1 %vm11542_vm13, %v21026_v14 }
  0xdf   : > { %21169 = vst [vmem:[#allocation164_spill] sm:$0xff] %v11968_v62  ;;  %9379 = vmatpush.msk.msra.mxu3 %vm21179_vm1, %v21026_v14  ;;  %1036 = vmatpush.msra.mxu2 %v21180_v44  ;;  %v21183_v44 = vld [vmem:[#allocation117_spill] sm:$0xff] }
  0xe0   : > { %21171 = vst [vmem:[#allocation165_spill] sm:$0xff] %v11982_v15  ;;  %v21181_v15 = vld [vmem:[#allocation111_spill] sm:$0xff]  ;;  %9366 = vmatpush.msk.msra.mxu1 %vm11558_vm12, %v21026_v14 }
  0xe1   : > { %21174 = vst [vmem:[#allocation166_spill] sm:$0xff] %v12002_v29  ;;  %9380 = vmatpush.msk.msra.mxu3 %vm11498_vm11, %v21026_v14  ;;  %948 = vmatpush.msra.mxu0 %v21181_v15  ;;  %v21182_v29 = vld [vmem:[#allocation103_spill] sm:$0xff]  ;;  %v21227_v15 = vmov 0 }
  0xe2   : > { %1040 = vmatpush.msra.mxu2 %v21182_v29  ;;  %v21185_v29 = vld [vmem:[#allocation116_spill] sm:$0xff]  ;;  %21186 = vst [vmem:[#allocation70_spill] sm:$0xff] %v12055_v54  ;;  %9367 = vmatpush.msk.msra.mxu1 %vm11590_vm14, %v21026_v14 }
  0xe3   : > { %9381 = vmatpush.msk.msra.mxu3 %vm11542_vm13, %v21026_v14  ;;  %951 = vmatpush.msra.mxu0 %v21183_v44  ;;  %21188 = vst [vmem:[#allocation167_spill] sm:$0xff] %v12060_v28  ;;  %v21223_v44 = vmov 0  ;;  %vm12327_vm13 = vcmp.eq.s32.totalorder %v12275_v25, %v11070_v10 }
  0xe4   : > { %1044 = vmatpush.msra.mxu2 %v21184_v18  ;;  %v21187_v18 = vld [vmem:[#allocation122_spill] sm:$0xff]  ;;  %21190 = vst [vmem:[#allocation168_spill] sm:$0xff] %v12071_v40  ;;  %9368 = vmatpush.msk.msra.mxu1 %vm11618_vm15, %v21026_v14 }
  0xe5   : > { %9382 = vmatpush.msk.msra.mxu3 %vm11558_vm12, %v21026_v14  ;;  %954 = vmatpush.msra.mxu0 %v11711_v35  ;;  %vm12089_vm12 = vcmp.eq.s32.totalorder %v12060_v28, %v11070_v10  ;;  %v21198_v28 = vmov 0  ;;  %v12217_v35 = vadd.s32 312, %v11043_v1  ;;  %21221 = vst [vmem:[#allocation180_spill] sm:$0xff] %v12237_v12 }
  0xe6   : > { %1048 = vmatpush.msra.mxu2 %v21185_v29  ;;  %v21189_v29 = vld [vmem:[#allocation127_spill] sm:$0xff]  ;;  %v21195_v31 = vsel %vm12089_vm12, 4294967295, %v21194_v31  ;;  %9369 = vmatpush.msk.msra.mxu1 %vm11648_vm8, %v21026_v14  ;;  %21225 = vst [vmem:[#allocation182_spill] sm:$0xff] %v12275_v25 }
  0xe7   : > { %9383 = vmatpush.msk.msra.mxu3 %vm11590_vm14, %v21026_v14  ;;  %957 = vmatpush.msra.mxu0 %v11744_v42  ;;  %vm12081_vm14 = vcmp.eq.s32.totalorder %v12055_v54, %v11070_v10  ;;  %v12100_v54 = vadd.s32 352, %v11043_v1  ;;  %21217 = vst [vmem:[#allocation178_spill] sm:$0xff] %v12217_v35 }
  0xe8   : > { %1052 = vmatpush.msra.mxu2 %v21187_v18  ;;  %v21191_v18 = vmov 0  ;;  %v9297_v37 = vsel %vm12081_vm14, 1.0, %v21030_v13  ;;  %9370 = vmatpush.msk.msra.mxu1 %vm11660_vm7, %v21026_v14  ;;  %21231 = vst [vmem:[#allocation185_spill] sm:$0xff] %v12301_v33 }
  0xe9   : > { %9384 = vmatpush.msk.msra.mxu3 %vm11618_vm15, %v21026_v14  ;;  %960 = vmatpush.msra.mxu0 %v11773_v5  ;;  %v21192_v18 = vsel %vm12081_vm14, 4294967295, %v21191_v18  ;;  %21196 = vst [vmem:[#allocation169_spill] sm:$0xff] %v12100_v54  ;;  %vm12106_vm15 = vcmp.eq.s32.totalorder %v12071_v40, %v11070_v10  ;;  %v9296_v40 = vsel %vm12089_vm12, 1.0, %v21030_v13  ;;  %v21203_v5 = vmov 0 }
  0xea   : > { %1056 = vmatpush.msra.mxu2 %v21189_v29  ;;  %v21193_v29 = vld [vmem:[#allocation131_spill] sm:$0xff]  ;;  %v21199_v28 = vsel %vm12106_vm15, 4294967295, %v21198_v28  ;;  %9371 = vmatpush.msk.msra.mxu1 %vm11687_vm6, %v21026_v14  ;;  %v12149_v42 = vsub.f32 %v9296_v40, %v9296_v40 }
  0xeb   : > { %9385 = vmatpush.msk.msra.mxu3 %vm11648_vm8, %v21026_v14  ;;  %963 = vmatpush.msra.mxu0 %v11781_v20  ;;  %v12114_v20 = vadd.s32 344, %v11043_v1 }
  0xec   : > { %1060 = vmatpush.msra.mxu2 %v21193_v29  ;;  %v21197_v29 = vld [vmem:[#allocation137_spill] sm:$0xff]  ;;  %21206 = vst [vmem:[#allocation173_spill] sm:$0xff] %v12149_v42  ;;  %9372 = vmatpush.msk.msra.mxu1 %vm11717_vm10, %v21026_v14 }
  0xed   : > { %9386 = vmatpush.msk.msra.mxu3 %vm11660_vm7, %v21026_v14  ;;  %966 = vmatpush.msra.mxu0 %v11800_v50  ;;  %21200 = vst [vmem:[#allocation170_spill] sm:$0xff] %v12114_v20  ;;  %v12136_v50 = vsub.f32 %v9297_v37, %v9297_v37  ;;  %vm12140_vm7 = vcmp.eq.s32.totalorder %v12100_v54, %v11070_v10  ;;  %v21207_v37 = vmov 0  ;;  %v12164_v54 = vadd.s32 328, %v11043_v1 }
  0xee   : > { %1064 = vmatpush.msra.mxu2 %v21197_v29  ;;  %v12128_v29 = vadd.s32 336, %v11043_v1  ;;  %v21204_v5 = vsel %vm12140_vm7, 4294967295, %v21203_v5  ;;  %9373 = vmatpush.msk.msra.mxu1 %vm11726_vm9, %v21026_v14 }
  0xef   : > { %9387 = vmatpush.msk.msra.mxu3 %vm11687_vm6, %v21026_v14  ;;  %969 = vmatpush.msra.mxu0 %v11856_v3  ;;  %21202 = vst [vmem:[#allocation172_spill] sm:$0xff] %v12136_v50  ;;  %v21205_v3 = vld [vmem:[#allocation144_spill] sm:$0xff]  ;;  %vm12153_vm6 = vcmp.eq.s32.totalorder %v12114_v20, %v11070_v10  ;;  %v21211_v20 = vmov 0 }
  0xf0   : > { %1068 = vmatpush.msra.mxu2 %v11807_v59  ;;  %21201 = vst [vmem:[#allocation171_spill] sm:$0xff] %v12128_v29  ;;  %v9295_v59 = vsel %vm12106_vm15, 1.0, %v21030_v13  ;;  %v21208_v37 = vsel %vm12153_vm6, 4294967295, %v21207_v37  ;;  %vm12172_vm8 = vcmp.eq.s32.totalorder %v12128_v29, %v11070_v10  ;;  %v9293_v29 = vsel %vm12153_vm6, 1.0, %v21030_v13  ;;  %9374 = vmatpush.msk.msra.mxu1 %vm11755_vm0, %v21026_v14 }
  0xf1   : > { %9388 = vmatpush.msk.msra.mxu3 %vm11717_vm10, %v21026_v14  ;;  %972 = vmatpush.msra.mxu0 %v11873_v57  ;;  %21209 = vst [vmem:[#allocation174_spill] sm:$0xff] %v12164_v54  ;;  %v12168_v40 = vsub.f32 %v9295_v59, %v9295_v59  ;;  %v21212_v20 = vsel %vm12172_vm8, 4294967295, %v21211_v20  ;;  %v12180_v57 = vadd.s32 320, %v11043_v1  ;;  %v12187_v59 = vand.u32 4294901760, %v12136_v50 }
  0xf2   : > { %1072 = vmatpush.msra.mxu2 %v21205_v3  ;;  %v9294_v3 = vsel %vm12140_vm7, 1.0, %v21030_v13  ;;  %v9292_v47 = vsel %vm12172_vm8, 1.0, %v21030_v13  ;;  %9375 = vmatpush.msk.msra.mxu1 %vm11811_vm2, %v21026_v14  ;;  %vm12288_vm10 = vcmp.eq.s32.totalorder %v12237_v12, %v11070_v10 }
  0xf3   : > { %9389 = vmatpush.msk.msra.mxu3 %vm11726_vm9, %v21026_v14  ;;  %975 = vmatpush.msra.mxu0 %v11909_v22  ;;  %21210 = vst [vmem:[#allocation175_spill] sm:$0xff] %v12168_v40  ;;  %vm12209_vm9 = vcmp.eq.s32.totalorder %v12164_v54, %v11070_v10  ;;  %v21215_v22 = vmov 0  ;;  %v12228_v54 = vsub.f32 %v9293_v29, %v9293_v29  ;;  %v21228_v15 = vsel %vm12288_vm10, 4294967295, %v21227_v15 }
  0xf4   : > { %1076 = vmatpush.msra.mxu2 %v11885_v11  ;;  %21213 = vst [vmem:[#allocation176_spill] sm:$0xff] %v12180_v57  ;;  %978 = vmatmul.f32.vlgmr.msra.gmra.mxu0 %v11947_v51  ;;  %v12199_v51 = vand.u32 4294901760, %v12149_v42  ;;  %v12205_v11 = vsub.f32 %v9294_v3, %v9294_v3  ;;  %v21216_v22 = vsel %vm12209_vm9, 4294967295, %v21215_v22  ;;  %v12226_v3 = vand.u32 4294901760, %v12168_v40 }
  0xf5   : > { %9390 = vmatpush.msk.msra.mxu3 %vm11755_vm0, %v21026_v14  ;;  %9394 = vmatpush.msk.msrb.mxu0 %vm12081_vm14, %v21026_v14  ;;  %21218 = vst [vmem:[#allocation179_spill] sm:$0xff] %v12228_v54  ;;  %vm12232_vm0 = vcmp.eq.s32.totalorder %v12180_v57, %v11070_v10  ;;  %v1171_v8 = vsub.f32 %v12136_v50, %v12187_v59 }
  0xf6   : > { %1080 = vmatpush.msra.mxu2 %v11903_v36  ;;  %21214 = vst [vmem:[#allocation177_spill] sm:$0xff] %v12205_v11  ;;  %v21219_v36 = vmov 0  ;;  %v1177_v29 = vsub.f32 %v12149_v42, %v12199_v51  ;;  %v12253_v57 = vsub.f32 %v9292_v47, %v9292_v47  ;;  %9376 = vmatpush.msk.msra.mxu1 %vm11843_vm3, %v21026_v14  ;;  %v12263_v17 = vand.u32 4294901760, %v12205_v11 }
  0xf7   : > { %9391 = vmatpush.msk.msra.mxu3 %vm11811_vm2, %v21026_v14  ;;  %9395 = vmatpush.msk.msrb.mxu0 %vm12089_vm12, %v21026_v14  ;;  %v21220_v36 = vsel %vm12232_vm0, 4294967295, %v21219_v36  ;;  %vm12267_vm2 = vcmp.eq.s32.totalorder %v12217_v35, %v11070_v10  ;;  %v9290_v47 = vsel %vm12232_vm0, 1.0, %v21030_v13  ;;  %v1183_v46 = vsub.f32 %v12168_v40, %v12226_v3  ;;  %v245_v10 = vld [vmem:[#allocation5 + $0x10] sm:$0xff] }
  0xf8   : > { %1084 = vmatpush.msra.mxu2 %v11936_v16  ;;  %21222 = vst [vmem:[#allocation181_spill] sm:$0xff] %v12253_v57  ;;  %v9291_v16 = vsel %vm12209_vm9, 1.0, %v21030_v13  ;;  %v21224_v44 = vsel %vm12267_vm2, 4294967295, %v21223_v44  ;;  %v12284_v35 = vand.u32 4294901760, %v12228_v54  ;;  %v12307_v12 = vand.u32 4294901760, %v1177_v29 }
  0xf9   : > { %9392 = vmatpush.msk.msra.mxu3 %vm11843_vm3, %v21026_v14  ;;  %9396 = vmatpush.msk.msrb.mxu0 %vm12106_vm15, %v21026_v14  ;;  %vm21226_vm3 = vnez %v21148_v23  ;;  %v12298_v49 = vsub.f32 %v9291_v16, %v9291_v16  ;;  %v12310_v34 = vand.u32 4294901760, %v12253_v57  ;;  %v12312_v26 = vsub.f32 %v9290_v47, %v9290_v47 }
  0xfa   : > { %1086 = vmatmul.f32.vlgmr.msra.gmra.mxu2 %v11919_v30  ;;  %21232 = vst [vmem:[#allocation186_spill] sm:$0xff] %v12307_v12  ;;  %9377 = vmatpush.msk.msra.mxu1 %vm21226_vm3, %v21026_v14  ;;  %v1189_v16 = vsub.f32 %v12205_v11, %v12263_v17  ;;  %v21235_v29 = vmov 0  ;;  %v9288_v47 = vsel %vm12288_vm10, 1.0, %v21030_v13  ;;  %v1195_v23 = vsub.f32 %v12228_v54, %v12284_v35 }
  0xfb   : > { %1271 = vmatpush.msrb.mxu2 %v12136_v50  ;;  %9393 = vmatpush.msk.msra.mxu3 %vm21226_vm3, %v21026_v14  ;;  %v12296_v50 = vand.u32 4294901760, %v1171_v8  ;;  %21230 = vst [vmem:[#allocation184_spill] sm:$0xff] %v12298_v49  ;;  %v9289_v8 = vsel %vm12267_vm2, 1.0, %v21030_v13  ;;  %v21236_v29 = vsel %vm12327_vm13, 4294967295, %v21235_v29  ;;  %v12348_v25 = vand.u32 4294901760, %v12298_v49 }
  0xfc   : > { %9397 = vmatpush.msk.msrb.mxu0 %vm12140_vm7, %v21026_v14  ;;  %1123 = vmatmul.f32.vlgmr.msra.gmra.mxu3 %v11919_v30  ;;  %21233 = vst [vmem:[#allocation187_spill] sm:$0xff] %v12310_v34  ;;  %v12335_v30 = vadd.s32 280, %v11043_v1  ;;  %v12350_v19 = vsub.f32 %v9289_v8, %v9289_v8  ;;  %v12368_v8 = vand.u32 4294901760, %v12312_v26  ;;  %v12370_v41 = vsub.f32 %v9288_v47, %v9288_v47 }
  0xfd   : > { %21229 = vst [vmem:[#allocation183_spill] sm:$0xff] %v12296_v50  ;;  %1274 = vmatpush.msrb.mxu2 %v12149_v42  ;;  %9410 = vmatpush.msk.msrb.mxu3 %vm12081_vm14, %v21026_v14  ;;  %v12339_v42 = vand.u32 4294901760, %v1183_v46  ;;  %v21241_v46 = vmov 0  ;;  %v12379_v21 = vand.u32 4294901760, %v1189_v16  ;;  %v12387_v47 = vadd.s32 264, %v11043_v1 }
  0xfe   : > { %21234 = vst [vmem:[#allocation188_spill] sm:$0xff] %v12312_v26  ;;  %9398 = vmatpush.msk.msrb.mxu0 %vm12153_vm6, %v21026_v14  ;;  %1017 = vmatmul.f32.vlgmr.msra.gmra.mxu1 %v11968_v62  ;;  %v10687_v62 = vld [vmem:[%s11026_s4] ss:$0 sm:$0xff]  ;;  %v12389_v61 = vand.u32 4294901760, %v245_v10  ;;  %v12407_v45 = vand.u32 4294901760, %v12350_v19  ;;  %v12425_v7 = vand.u32 4294901760, %v12370_v41 }
  0xff   : > { %21237 = vst [vmem:[#allocation189_spill] sm:$0xff] %v12335_v30  ;;  %1277 = vmatpush.msrb.mxu2 %v12168_v40  ;;  %1173 = vmatpush.msrb.mxu1 %v12296_v50  ;;  %vm12354_vm3 = vcmp.eq.s32.totalorder %v12301_v33, %v10687_v62  ;;  %v12359_v40 = vadd.s32 272, %v11043_v1  ;;  %v1201_v50 = vsub.f32 %v12253_v57, %v12310_v34  ;;  %v9287_v33 = vsel %vm12327_vm13, 1.0, %v21030_v13 }
 0x100   : > { %21238 = vst [vmem:[#allocation190_spill] sm:$0xff] %v12339_v42  ;;  %9411 = vmatpush.msk.msrb.mxu3 %vm12089_vm12, %v21026_v14  ;;  %v21242_v46 = vsel %vm12354_vm3, 4294967295, %v21241_v46  ;;  %9399 = vmatpush.msk.msrb.mxu0 %vm12172_vm8, %v21026_v14  ;;  %vm12382_vm11 = vcmp.eq.s32.totalorder %v12335_v30, %v10687_v62  ;;  %v9286_v16 = vsel %vm12354_vm3, 1.0, %v21030_v13  ;;  %v1207_v30 = vsub.f32 %v12298_v49, %v12348_v25 }
 0x101   : > { %21239 = vst [vmem:[#allocation191_spill] sm:$0xff] %v12348_v25  ;;  %1280 = vmatpush.msrb.mxu2 %v12205_v11  ;;  %1179 = vmatpush.msrb.mxu1 %v12307_v12  ;;  %v21246_v11 = vmov 0  ;;  %v12395_v12 = vand.u32 4294901760, %v1195_v23  ;;  %v12409_v24 = vsub.f32 %v9287_v33, %v9287_v33  ;;  %vm12412_vm1 = vcmp.eq.s32.totalorder %v12359_v40, %v10687_v62 }
 0x102   : > { %21240 = vst [vmem:[#allocation192_spill] sm:$0xff] %v12350_v19  ;;  %9412 = vmatpush.msk.msrb.mxu3 %vm12106_vm15, %v21026_v14  ;;  %v21247_v11 = vsel %vm12382_vm11, 4294967295, %v21246_v11  ;;  %9400 = vmatpush.msk.msrb.mxu0 %vm12209_vm9, %v21026_v14  ;;  %v21252_v23 = vmov 0  ;;  %v9285_v33 = vsel %vm12382_vm11, 1.0, %v21030_v13  ;;  %vm12437_vm5 = vcmp.eq.s32.totalorder %v12387_v47, %v10687_v62 }
 0x103   : > { %21243 = vst [vmem:[#allocation193_spill] sm:$0xff] %v12359_v40  ;;  %1283 = vmatpush.msrb.mxu2 %v12228_v54  ;;  %1185 = vmatpush.msrb.mxu1 %v12339_v42  ;;  %v21253_v23 = vsel %vm12412_vm1, 4294967295, %v21252_v23  ;;  %v12420_v54 = vand.u32 4294901760, %v1201_v50  ;;  %v1213_v42 = vsub.f32 %v12312_v26, %v12368_v8  ;;  %v12434_v40 = vsub.f32 %v9286_v16, %v9286_v16 }
 0x104   : > { %21244 = vst [vmem:[#allocation194_spill] sm:$0xff] %v12370_v41  ;;  %9413 = vmatpush.msk.msrb.mxu3 %vm12140_vm7, %v21026_v14  ;;  %9401 = vmatpush.msk.msrb.mxu0 %vm12232_vm0, %v21026_v14  ;;  %v21256_v50 = vmov 0  ;;  %v12445_v53 = vsub.f32 %v245_v10, %v12389_v61  ;;  %v9284_v16 = vsel %vm12412_vm1, 1.0, %v21030_v13  ;;  %v1219_v10 = vsub.f32 %v12350_v19, %v12407_v45 }
 0x105   : > { %21245 = vst [vmem:[#allocation195_spill] sm:$0xff] %v12379_v21  ;;  %1286 = vmatpush.msrb.mxu2 %v12253_v57  ;;  %1191 = vmatpush.msrb.mxu1 %v12379_v21  ;;  %v21257_v50 = vsel %vm12437_vm5, 4294967295, %v21256_v50  ;;  %v12442_v57 = vadd.s32 256, %v11043_v1  ;;  %v12463_v1 = vand.u32 4294901760, %v12409_v24  ;;  %v12465_v21 = vsub.f32 %v9285_v33, %v9285_v33 }
 0x106   : > { %21248 = vst [vmem:[#allocation196_spill] sm:$0xff] %v12387_v47  ;;  %9414 = vmatpush.msk.msrb.mxu3 %vm12153_vm6, %v21026_v14  ;;  %9402 = vmatpush.msk.msrb.mxu0 %vm12267_vm2, %v21026_v14  ;;  %v12458_v47 = vand.u32 4294901760, %v1207_v30  ;;  %v1225_v30 = vsub.f32 %v12370_v41, %v12425_v7  ;;  %v21263_v33 = vmov 0  ;;  %v12493_v27 = vsub.f32 %v9284_v16, %v9284_v16 }
 0x107   : > { %21249 = vst [vmem:[#allocation197_spill] sm:$0xff] %v12389_v61  ;;  %1289 = vmatpush.msrb.mxu2 %v12298_v49  ;;  %1197 = vmatpush.msrb.mxu1 %v12395_v12  ;;  %v12471_v49 = vand.u32 4294901760, %v1213_v42  ;;  %vm12483_vm4 = vcmp.eq.s32.totalorder %v12442_v57, %v10687_v62  ;;  %v12488_v42 = vand.u32 4294901760, %v12445_v53  ;;  %v12503_v62 = vand.u32 4294901760, %v1219_v10 }
 0x108   : > { %21250 = vst [vmem:[#allocation198_spill] sm:$0xff] %v12395_v12  ;;  %9415 = vmatpush.msk.msrb.mxu3 %vm12172_vm8, %v21026_v14  ;;  %9403 = vmatpush.msk.msrb.mxu0 %vm12288_vm10, %v21026_v14  ;;  %v9283_v12 = vsel %vm12437_vm5, 1.0, %v21030_v13  ;;  %v21264_v33 = vsel %vm12483_vm4, 4294967295, %v21263_v33  ;;  %v12508_v16 = vand.u32 4294901760, %v12465_v21  ;;  %v12523_v10 = vand.u32 4294901760, %v1225_v30 }
 0x109   : > { %21251 = vst [vmem:[#allocation199_spill] sm:$0xff] %v12409_v24  ;;  %1292 = vmatpush.msrb.mxu2 %v12312_v26  ;;  %1203 = vmatpush.msrb.mxu1 %v12420_v54  ;;  %v12491_v26 = vand.u32 4294901760, %v12434_v40 }
 0x10a   : > { %21254 = vst [vmem:[#allocation200_spill] sm:$0xff] %v12420_v54  ;;  %9416 = vmatpush.msk.msrb.mxu3 %vm12209_vm9, %v21026_v14  ;;  %9404 = vmatpush.msk.msrb.mxu0 %vm12327_vm13, %v21026_v14  ;;  %v12510_v54 = vsub.f32 %v9283_v12, %v9283_v12  ;;  %v1162_v12 = vsub.f32 %v12445_v53, %v12488_v42 }
 0x10b   : > { %21255 = vst [vmem:[#allocation201_spill] sm:$0xff] %v12434_v40  ;;  %1295 = vmatpush.msrb.mxu2 %v12350_v19  ;;  %1209 = vmatpush.msrb.mxu1 %v12458_v47  ;;  %v9282_v19 = vsel %vm12483_vm4, 1.0, %v21030_v13  ;;  %v1243_v13 = vsub.f32 %v12465_v21, %v12508_v16 }
 0x10c   : > { %21258 = vst [vmem:[#allocation202_spill] sm:$0xff] %v12442_v57  ;;  %9417 = vmatpush.msk.msrb.mxu3 %vm12232_vm0, %v21026_v14  ;;  %v1231_v57 = vsub.f32 %v12409_v24, %v12463_v1  ;;  %9405 = vmatpush.msk.msrb.mxu0 %vm12354_vm3, %v21026_v14  ;;  %v12547_v2 = vand.u32 4294901760, %v12510_v54 }
 0x10d   : > { %21259 = vst [vmem:[#allocation203_spill] sm:$0xff] %v12445_v53  ;;  %1298 = vmatpush.msrb.mxu2 %v12370_v41  ;;  %1215 = vmatpush.msrb.mxu1 %v12471_v49  ;;  %v12530_v41 = vand.u32 4294901760, %v12493_v27 }
 0x10e   : > { %21260 = vst [vmem:[#allocation204_spill] sm:$0xff] %v12458_v47  ;;  %9418 = vmatpush.msk.msrb.mxu3 %vm12267_vm2, %v21026_v14  ;;  %v1237_v47 = vsub.f32 %v12434_v40, %v12491_v26  ;;  %9406 = vmatpush.msk.msrb.mxu0 %vm12382_vm11, %v21026_v14  ;;  %v12540_v30 = vand.u32 4294901760, %v1231_v57  ;;  %v12557_v57 = vand.u32 4294901760, %v1162_v12 }
 0x10f   : > { %21261 = vst [vmem:[#allocation205_spill] sm:$0xff] %v12465_v21  ;;  %1301 = vmatpush.msrb.mxu2 %v12409_v24  ;;  %1221 = vmatpush.msrb.mxu1 %v12503_v62 }
 0x110   : > { %21262 = vst [vmem:[#allocation206_spill] sm:$0xff] %v12471_v49  ;;  %9419 = vmatpush.msk.msrb.mxu3 %vm12288_vm10, %v21026_v14  ;;  %v12544_v49 = vsub.f32 %v9282_v19, %v9282_v19  ;;  %9407 = vmatpush.msk.msrb.mxu0 %vm12412_vm1, %v21026_v14  ;;  %v12559_v24 = vand.u32 4294901760, %v1237_v47  ;;  %v1249_v19 = vsub.f32 %v12493_v27, %v12530_v41 }
 0x111   : > { %21265 = vst [vmem:[#allocation207_spill] sm:$0xff] %v12488_v42  ;;  %1304 = vmatpush.msrb.mxu2 %v12434_v40  ;;  %1227 = vmatpush.msrb.mxu1 %v12523_v10  ;;  %v12571_v40 = vand.u32 4294901760, %v1243_v13  ;;  %v1255_v47 = vsub.f32 %v12510_v54, %v12547_v2 }
 0x112   : > { %21266 = vst [vmem:[#allocation208_spill] sm:$0xff] %v12493_v27  ;;  %9420 = vmatpush.msk.msrb.mxu3 %vm12327_vm13, %v21026_v14  ;;  %9408 = vmatpush.msk.msrb.mxu0 %vm12437_vm5, %v21026_v14  ;;  %v12576_v12 = vand.u32 4294901760, %v12544_v49 }
 0x113   : > { %21267 = vst [vmem:[#allocation209_spill] sm:$0xff] %v12508_v16  ;;  %1307 = vmatpush.msrb.mxu2 %v12465_v21  ;;  %1233 = vmatpush.msrb.mxu1 %v12540_v30  ;;  %v12584_v21 = vand.u32 4294901760, %v1249_v19  ;;  %v12592_v13 = vand.u32 4294901760, %v1255_v47  ;;  %v21274_v47 = vld [vmem:[#allocation26_spill] sm:$0xff] }
 0x114   : > { %21268 = vst [vmem:[#allocation210_spill] sm:$0xff] %v12510_v54  ;;  %9421 = vmatpush.msk.msrb.mxu3 %vm12354_vm3, %v21026_v14  ;;  %9409 = vmatpush.msk.msrb.mxu0 %vm12483_vm4, %v21026_v14 }
 0x115   : > { %21269 = vst [vmem:[#allocation211_spill] sm:$0xff] %v12530_v41  ;;  %1310 = vmatpush.msrb.mxu2 %v12493_v27  ;;  %1164 = vmatmul.f32.vlgmr.msrb.gmra.mxu0 %v12557_v57  ;;  %v1261_v27 = vsub.f32 %v12544_v49, %v12576_v12 }
 0x116   : > { %21270 = vst [vmem:[#allocation212_spill] sm:$0xff] %v12544_v49  ;;  %1239 = vmatpush.msrb.mxu1 %v12559_v24  ;;  %9422 = vmatpush.msk.msrb.mxu3 %vm12382_vm11, %v21026_v14 }
 0x117   : > { %21271 = vst [vmem:[#allocation213_spill] sm:$0xff] %v12547_v2  ;;  %1365 = vmatpush.msra.mxu0 %v12187_v59  ;;  %1313 = vmatpush.msrb.mxu2 %v12510_v54  ;;  %v12608_v19 = vand.u32 4294901760, %v1261_v27  ;;  %v21279_v27 = vld [vmem:[#allocation28_spill] sm:$0xff]  ;;  %v21285_v54 = vld [vmem:[#allocation30_spill] sm:$0xff] }
 0x118   : > { %21272 = vst [vmem:[#allocation214_spill] sm:$0xff] %v12557_v57  ;;  %1245 = vmatpush.msrb.mxu1 %v12571_v40  ;;  %9423 = vmatpush.msk.msrb.mxu3 %vm12412_vm1, %v21026_v14  ;;  %vm21275_vm1 = vnez %v21274_v47  ;;  %v21276_v57 = vld [vmem:[#allocation27_spill] sm:$0xff] }
 0x119   : > { %21273 = vst [vmem:[#allocation215_spill] sm:$0xff] %v12576_v12  ;;  %1369 = vmatpush.msra.mxu0 %v12199_v51  ;;  %1316 = vmatpush.msrb.mxu2 %v12544_v49  ;;  %v21284_v49 = vld [vmem:[#allocation47_spill] sm:$0xff] }
 0x11a   : > { %1251 = vmatpush.msrb.mxu1 %v12584_v21  ;;  %9424 = vmatpush.msk.msrb.mxu3 %vm12437_vm5, %v21026_v14  ;;  %vm21277_vm5 = vnez %v21276_v57 }
 0x11b   : > { %1373 = vmatpush.msra.mxu0 %v12226_v3  ;;  %1319 = vmatmul.f32.vlgmr.msrb.gmra.mxu2 %v12445_v53  ;;  %v21278_v53 = vld [vmem:[#allocation45_spill] sm:$0xff] }
 0x11c   : > { %1257 = vmatpush.msrb.mxu1 %v12592_v13  ;;  %9442 = vmatpush.msk.msra.mxu2 %vm21275_vm1, %v21026_v14  ;;  %vm21280_vm1 = vnez %v21279_v27 }
 0x11d   : > { %9425 = vmatpush.msk.msrb.mxu3 %vm12483_vm4, %v21026_v14  ;;  %1377 = vmatpush.msra.mxu0 %v12263_v17 }
 0x11e   : > { %1358 = vmatmul.f32.vlgmr.msrb.gmra.mxu3 %v12488_v42  ;;  %9443 = vmatpush.msk.msra.mxu2 %vm21277_vm5, %v21026_v14  ;;  %v21281_v42 = vld [vmem:[#allocation46_spill] sm:$0xff] }
 0x11f   : > { %1514 = vmatpush.msra.mxu3 %v21278_v53  ;;  %1263 = vmatpush.msrb.mxu1 %v12608_v19  ;;  %v21282_v53 = vld [vmem:[#allocation29_spill] sm:$0xff] }
 0x120   : > { %1381 = vmatpush.msra.mxu0 %v12284_v35  ;;  %1265 = vmatmul.f32.vlgmr.msrb.gmra.mxu1 %v12389_v61  ;;  %vm21283_vm5 = vnez %v21282_v53  ;;  %v21336_v53 = vld [vmem:[#allocation54_spill] sm:$0xff] }
 0x121   : > { %9444 = vmatpush.msk.msra.mxu2 %vm21280_vm1, %v21026_v14  ;;  %9426 = vmatpush.msk.msra.mxu1 %vm12081_vm14, %v21026_v14  ;;  %vm21286_vm1 = vnez %v21285_v54  ;;  %v21338_v54 = vld [vmem:[#allocation60_spill] sm:$0xff] }
 0x122   : > { %1520 = vmatpush.msra.mxu3 %v21281_v42  ;;  %1385 = vmatpush.msra.mxu0 %v12310_v34  ;;  %v21287_v42 = vld [vmem:[#allocation49_spill] sm:$0xff]  ;;  %v21288_v34 = vld [vmem:[#allocation34_spill] sm:$0xff] }
 0x123   : > { %9445 = vmatpush.msk.msra.mxu2 %vm21283_vm5, %v21026_v14  ;;  %9427 = vmatpush.msk.msra.mxu1 %vm12089_vm12, %v21026_v14  ;;  %vm21289_vm14 = vnez %v21288_v34  ;;  %v21341_v34 = vld [vmem:[#allocation62_spill] sm:$0xff] }
 0x124   : > { %1526 = vmatpush.msra.mxu3 %v21284_v49  ;;  %1389 = vmatpush.msra.mxu0 %v12348_v25  ;;  %v21290_v49 = vld [vmem:[#allocation52_spill] sm:$0xff]  ;;  %v21291_v25 = vld [vmem:[#allocation35_spill] sm:$0xff] }
 0x125   : > { %9446 = vmatpush.msk.msra.mxu2 %vm21286_vm1, %v21026_v14  ;;  %9428 = vmatpush.msk.msra.mxu1 %vm12106_vm15, %v21026_v14  ;;  %vm21292_vm12 = vnez %v21291_v25  ;;  %vm21294_vm15 = vnez %v20984_v32  ;;  %v21343_v25 = vld [vmem:[#allocation68_spill] sm:$0xff] }
 0x126   : > { %1532 = vmatpush.msra.mxu3 %v21287_v42  ;;  %1393 = vmatpush.msra.mxu0 %v12368_v8  ;;  %v21293_v42 = vld [vmem:[#allocation56_spill] sm:$0xff] }
 0x127   : > { %9447 = vmatpush.msk.msra.mxu2 %vm21289_vm14, %v21026_v14  ;;  %9429 = vmatpush.msk.msra.mxu1 %vm12140_vm7, %v21026_v14  ;;  %vm21296_vm7 = vnez %v20991_v39  ;;  %v21346_v39 = vld [vmem:[#allocation73_spill] sm:$0xff] }
 0x128   : > { %1538 = vmatpush.msra.mxu3 %v21290_v49  ;;  %1397 = vmatpush.msra.mxu0 %v12407_v45  ;;  %v21295_v49 = vld [vmem:[#allocation59_spill] sm:$0xff] }
 0x129   : > { %9448 = vmatpush.msk.msra.mxu2 %vm21292_vm12, %v21026_v14  ;;  %9430 = vmatpush.msk.msra.mxu1 %vm12153_vm6, %v21026_v14  ;;  %vm21298_vm6 = vnez %v20997_v48 }
 0x12a   : > { %1544 = vmatpush.msra.mxu3 %v21293_v42  ;;  %1401 = vmatpush.msra.mxu0 %v12425_v7  ;;  %v21297_v42 = vld [vmem:[#allocation63_spill] sm:$0xff] }
 0x12b   : > { %9449 = vmatpush.msk.msra.mxu2 %vm21294_vm15, %v21026_v14  ;;  %9431 = vmatpush.msk.msra.mxu1 %vm12172_vm8, %v21026_v14  ;;  %vm21300_vm8 = vnez %v21003_v56  ;;  %v21352_v56 = vld [vmem:[#allocation82_spill] sm:$0xff] }
 0x12c   : > { %1550 = vmatpush.msra.mxu3 %v21295_v49  ;;  %1405 = vmatpush.msra.mxu0 %v12463_v1  ;;  %v21299_v49 = vld [vmem:[#allocation67_spill] sm:$0xff] }
 0x12d   : > { %9450 = vmatpush.msk.msra.mxu2 %vm21296_vm7, %v21026_v14  ;;  %9432 = vmatpush.msk.msra.mxu1 %vm12209_vm9, %v21026_v14  ;;  %vm21302_vm9 = vnez %v21010_v0  ;;  %v21355_v0 = vld [vmem:[#allocation91_spill] sm:$0xff] }
 0x12e   : > { %1556 = vmatpush.msra.mxu3 %v21297_v42  ;;  %1409 = vmatpush.msra.mxu0 %v12491_v26  ;;  %v21301_v42 = vld [vmem:[#allocation69_spill] sm:$0xff] }
 0x12f   : > { %9451 = vmatpush.msk.msra.mxu2 %vm21298_vm6, %v21026_v14  ;;  %9433 = vmatpush.msk.msra.mxu1 %vm12232_vm0, %v21026_v14  ;;  %vm21304_vm0 = vnez %v21018_v52  ;;  %v21358_v52 = vld [vmem:[#allocation93_spill] sm:$0xff] }
 0x130   : > { %1562 = vmatpush.msra.mxu3 %v21299_v49  ;;  %1413 = vmatpush.msra.mxu0 %v12508_v16  ;;  %v21303_v49 = vld [vmem:[#allocation71_spill] sm:$0xff]  ;;  %v21320_v16 = vld [vmem:[#allocation37_spill] sm:$0xff] }
 0x131   : > { %9452 = vmatpush.msk.msra.mxu2 %vm21300_vm8, %v21026_v14  ;;  %9434 = vmatpush.msk.msra.mxu1 %vm12267_vm2, %v21026_v14  ;;  %vm21306_vm2 = vnez %v21029_v43  ;;  %v21360_v43 = vld [vmem:[#allocation97_spill] sm:$0xff] }
 0x132   : > { %1568 = vmatpush.msra.mxu3 %v21301_v42  ;;  %1417 = vmatpush.msra.mxu0 %v12530_v41  ;;  %v21305_v42 = vld [vmem:[#allocation76_spill] sm:$0xff] }
 0x133   : > { %9453 = vmatpush.msk.msra.mxu2 %vm21302_vm9, %v21026_v14  ;;  %9435 = vmatpush.msk.msra.mxu1 %vm12288_vm10, %v21026_v14  ;;  %vm21312_vm10 = vnez %v21253_v23  ;;  %v21316_v41 = vld [vmem:[#allocation36_spill] sm:$0xff] }
 0x134   : > { %1574 = vmatpush.msra.mxu3 %v21303_v49  ;;  %1421 = vmatpush.msra.mxu0 %v12547_v2  ;;  %v21307_v49 = vld [vmem:[#allocation79_spill] sm:$0xff] }
 0x135   : > { %9454 = vmatpush.msk.msra.mxu2 %vm21304_vm0, %v21026_v14  ;;  %9436 = vmatpush.msk.msra.mxu1 %vm12327_vm13, %v21026_v14  ;;  %v21308_v2 = vld [vmem:[#allocation31_spill] sm:$0xff]  ;;  %vm21309_vm13 = vnez %v21032_v55  ;;  %v21361_v55 = vld [vmem:[#allocation92_spill] sm:$0xff] }
 0x136   : > { %1580 = vmatpush.msra.mxu3 %v21305_v42  ;;  %1425 = vmatpush.msra.mxu0 %v12576_v12  ;;  %v21310_v42 = vld [vmem:[#allocation83_spill] sm:$0xff]  ;;  %v21311_v12 = vld [vmem:[#allocation32_spill] sm:$0xff] }
 0x137   : > { %9455 = vmatpush.msk.msra.mxu2 %vm21306_vm2, %v21026_v14  ;;  %1427 = vmatmul.f32.vlgmr.msra.gmra.mxu0 %v12389_v61 }
 0x138   : > { %9437 = vmatpush.msk.msra.mxu1 %vm12354_vm3, %v21026_v14  ;;  %1586 = vmatpush.msra.mxu3 %v21307_v49  ;;  %vm21313_vm3 = vnez %v21176_v63  ;;  %v21315_v49 = vld [vmem:[#allocation33_spill] sm:$0xff] }
 0x139   : > { %1612 = vmatpush.msrb.mxu0 %v21308_v2  ;;  %9456 = vmatpush.msk.msra.mxu2 %vm21309_vm13, %v21026_v14  ;;  %v21314_v2 = vld [vmem:[#allocation86_spill] sm:$0xff]  ;;  %v248_v63 = vld [vmem:[#allocation5 + $0x20] sm:$0xff] }
 0x13a   : > { %9438 = vmatpush.msk.msra.mxu1 %vm12382_vm11, %v21026_v14  ;;  %1592 = vmatpush.msra.mxu3 %v21310_v42  ;;  %vm21317_vm11 = vnez %v21257_v50  ;;  %v21318_v42 = vld [vmem:[#allocation89_spill] sm:$0xff] }
 0x13b   : > { %1615 = vmatpush.msrb.mxu0 %v21311_v12  ;;  %9457 = vmatpush.msk.msra.mxu2 %vm21313_vm3, %v21026_v14  ;;  %v21319_v12 = vld [vmem:[#allocation38_spill] sm:$0xff] }
 0x13c   : > { %9439 = vmatpush.msk.msra.mxu1 %vm21312_vm10, %v21026_v14  ;;  %1598 = vmatpush.msra.mxu3 %v21314_v2  ;;  %vm21321_vm10 = vnez %v21274_v47  ;;  %v21322_v2 = vld [vmem:[#allocation40_spill] sm:$0xff]  ;;  %v21329_v47 = vld [vmem:[#allocation43_spill] sm:$0xff] }
 0x13d   : > { %1618 = vmatpush.msrb.mxu0 %v21315_v49  ;;  %1706 = vmatpush.msrb.mxu2 %v21316_v41  ;;  %v21323_v41 = vld [vmem:[#allocation39_spill] sm:$0xff]  ;;  %v21326_v49 = vld [vmem:[#allocation41_spill] sm:$0xff] }
 0x13e   : > { %9440 = vmatpush.msk.msra.mxu1 %vm21317_vm11, %v21026_v14  ;;  %1604 = vmatpush.msra.mxu3 %v21318_v42  ;;  %vm21324_vm11 = vnez %v21276_v57  ;;  %v247_v42 = vld [vmem:[#allocation5 + $0x18] sm:$0xff] }
 0x13f   : > { %1621 = vmatpush.msrb.mxu0 %v21319_v12  ;;  %1710 = vmatpush.msrb.mxu2 %v21320_v16  ;;  %v21325_v16 = vld [vmem:[#allocation42_spill] sm:$0xff]  ;;  %v21328_v12 = vld [vmem:[#allocation44_spill] sm:$0xff] }
 0x140   : > { %9474 = vmatpush.msk.msrb.mxu3 %vm21321_vm10, %v21026_v14  ;;  %9441 = vmatpush.msk.msra.mxu1 %vm12483_vm4, %v21026_v14  ;;  %vm21327_vm4 = vnez %v21279_v27  ;;  %v21331_v57 = vld [vmem:[#allocation48_spill] sm:$0xff]  ;;  %v21333_v27 = vld [vmem:[#allocation53_spill] sm:$0xff] }
 0x141   : > { %1624 = vmatpush.msrb.mxu0 %v21322_v2  ;;  %1464 = vmatmul.f32.vlgmr.msra.gmra.mxu1 %v12389_v61  ;;  %v21330_v2 = vld [vmem:[#allocation50_spill] sm:$0xff] }
 0x142   : > { %1714 = vmatpush.msrb.mxu2 %v21323_v41  ;;  %9458 = vmatpush.msk.msrb.mxu1 %vm21321_vm10, %v21026_v14  ;;  %v12778_v41 = vand.u32 4294901760, %v247_v42 }
 0x143   : > { %9475 = vmatpush.msk.msrb.mxu3 %vm21324_vm11, %v21026_v14  ;;  %1627 = vmatpush.msrb.mxu0 %v21325_v16  ;;  %v21334_v16 = vld [vmem:[#allocation51_spill] sm:$0xff] }
 0x144   : > { %1718 = vmatpush.msrb.mxu2 %v21326_v49  ;;  %9459 = vmatpush.msk.msrb.mxu1 %vm21324_vm11, %v21026_v14  ;;  %21332 = vst [vmem:[#allocation26_spill] sm:$0xff] %v12778_v41  ;;  %v21335_v49 = vld [vmem:[#allocation57_spill] sm:$0xff] }
 0x145   : > { %9476 = vmatpush.msk.msrb.mxu3 %vm21327_vm4, %v21026_v14  ;;  %1630 = vmatpush.msrb.mxu0 %v21328_v12  ;;  %v12797_v12 = vsub.f32 %v247_v42, %v12778_v41  ;;  %v21340_v42 = vld [vmem:[#allocation64_spill] sm:$0xff] }
 0x146   : > { %1722 = vmatpush.msrb.mxu2 %v21329_v47  ;;  %9460 = vmatpush.msk.msrb.mxu1 %vm21327_vm4, %v21026_v14  ;;  %v21339_v47 = vld [vmem:[#allocation58_spill] sm:$0xff]  ;;  %vm21350_vm4 = vnez %v21048_v60 }
 0x147   : > { %9477 = vmatpush.msk.msrb.mxu3 %vm21283_vm5, %v21026_v14  ;;  %1633 = vmatpush.msrb.mxu0 %v21330_v2  ;;  %21337 = vst [vmem:[#allocation27_spill] sm:$0xff] %v12797_v12  ;;  %v12816_v2 = vand.u32 4294901760, %v12797_v12  ;;  %v249_v60 = vld [vmem:[#allocation5 + $0x28] sm:$0xff] }
 0x148   : > { %1726 = vmatpush.msrb.mxu2 %v21331_v57  ;;  %9461 = vmatpush.msk.msrb.mxu1 %vm21283_vm5, %v21026_v14  ;;  %v21344_v57 = vld [vmem:[#allocation66_spill] sm:$0xff]  ;;  %vm21359_vm5 = vnez %v21358_v52 }
 0x149   : > { %9478 = vmatpush.msk.msrb.mxu3 %vm21286_vm1, %v21026_v14  ;;  %1636 = vmatpush.msrb.mxu0 %v21333_v27  ;;  %21342 = vst [vmem:[#allocation45_spill] sm:$0xff] %v12816_v2  ;;  %v21345_v27 = vld [vmem:[#allocation72_spill] sm:$0xff]  ;;  %v1503_v32 = vsub.f32 %v12797_v12, %v12816_v2  ;;  %v21444_v52 = vld [vmem:[#allocation206_spill] sm:$0xff] }
 0x14a   : > { %1730 = vmatpush.msrb.mxu2 %v21334_v16  ;;  %9462 = vmatpush.msk.msrb.mxu1 %vm21286_vm1, %v21026_v14  ;;  %vm21349_vm1 = vnez %v21046_v6  ;;  %v21362_v16 = vld [vmem:[#allocation98_spill] sm:$0xff]  ;;  %v21431_v6 = vld [vmem:[#allocation195_spill] sm:$0xff] }
 0x14b   : > { %9479 = vmatpush.msk.msrb.mxu3 %vm21289_vm14, %v21026_v14  ;;  %1639 = vmatpush.msrb.mxu0 %v21335_v49  ;;  %v12852_v48 = vand.u32 4294901760, %v1503_v32  ;;  %v21364_v49 = vld [vmem:[#allocation101_spill] sm:$0xff] }
 0x14c   : > { %1734 = vmatpush.msrb.mxu2 %v21336_v53  ;;  %9463 = vmatpush.msk.msrb.mxu1 %vm21289_vm14, %v21026_v14  ;;  %v21365_v53 = vld [vmem:[#allocation96_spill] sm:$0xff] }
 0x14d   : > { %9480 = vmatpush.msk.msrb.mxu3 %vm21292_vm12, %v21026_v14  ;;  %1642 = vmatpush.msrb.mxu0 %v21338_v54  ;;  %21348 = vst [vmem:[#allocation28_spill] sm:$0xff] %v12852_v48  ;;  %v21366_v54 = vld [vmem:[#allocation104_spill] sm:$0xff] }
 0x14e   : > { %1738 = vmatpush.msrb.mxu2 %v21339_v47  ;;  %9464 = vmatpush.msk.msrb.mxu1 %vm21292_vm12, %v21026_v14  ;;  %v12924_v47 = vand.u32 4294901760, %v248_v63 }
 0x14f   : > { %9481 = vmatpush.msk.msrb.mxu3 %vm21294_vm15, %v21026_v14  ;;  %1645 = vmatpush.msrb.mxu0 %v21340_v42  ;;  %v21369_v42 = vld [vmem:[#allocation107_spill] sm:$0xff] }
 0x150   : > { %1742 = vmatpush.msrb.mxu2 %v21341_v34  ;;  %9465 = vmatpush.msk.msrb.mxu1 %vm21294_vm15, %v21026_v14  ;;  %21368 = vst [vmem:[#allocation46_spill] sm:$0xff] %v12924_v47  ;;  %v21370_v34 = vld [vmem:[#allocation99_spill] sm:$0xff]  ;;  %v12941_v32 = vsub.f32 %v248_v63, %v12924_v47  ;;  %v21385_v63 = vld [vmem:[#allocation124_spill] sm:$0xff] }
 0x151   : > { %9482 = vmatpush.msk.msrb.mxu3 %vm21296_vm7, %v21026_v14  ;;  %1648 = vmatpush.msrb.mxu0 %v21343_v25  ;;  %v21371_v25 = vld [vmem:[#allocation110_spill] sm:$0xff]  ;;  %vm21386_vm10 = vnez %v21385_v63  ;;  %v21488_v63 = vld [vmem:[#allocation205_spill] sm:$0xff] }
 0x152   : > { %1746 = vmatpush.msrb.mxu2 %v21344_v57  ;;  %9466 = vmatpush.msk.msrb.mxu1 %vm21296_vm7, %v21026_v14  ;;  %vm21372_vm7 = vnez %v21371_v25  ;;  %v21373_v57 = vld [vmem:[#allocation105_spill] sm:$0xff]  ;;  %21375 = vst [vmem:[#allocation29_spill] sm:$0xff] %v12941_v32  ;;  %v21455_v25 = vld [vmem:[#allocation160_spill] sm:$0xff] }
 0x153   : > { %9483 = vmatpush.msk.msrb.mxu3 %vm21298_vm6, %v21026_v14  ;;  %1651 = vmatpush.msrb.mxu0 %v21345_v27  ;;  %v21374_v27 = vld [vmem:[#allocation112_spill] sm:$0xff] }
 0x154   : > { %1750 = vmatpush.msrb.mxu2 %v11389_v9  ;;  %9467 = vmatpush.msk.msrb.mxu1 %vm21298_vm6, %v21026_v14  ;;  %v21347_v9 = vld [vmem:[#allocation77_spill] sm:$0xff]  ;;  %vm21363_vm6 = vnez %v21362_v16  ;;  %v21448_v16 = vld [vmem:[#allocation144_spill] sm:$0xff] }
 0x155   : > { %9484 = vmatpush.msk.msrb.mxu3 %vm21300_vm8, %v21026_v14  ;;  %1654 = vmatpush.msrb.mxu0 %v21346_v39  ;;  %v21376_v39 = vld [vmem:[#allocation113_spill] sm:$0xff] }
 0x156   : > { %1754 = vmatpush.msrb.mxu2 %v11420_v4  ;;  %9468 = vmatpush.msk.msrb.mxu1 %vm21300_vm8, %v21026_v14  ;;  %v21351_v4 = vld [vmem:[#allocation80_spill] sm:$0xff]  ;;  %vm21377_vm8 = vnez %v21376_v39  ;;  %v21461_v39 = vld [vmem:[#allocation173_spill] sm:$0xff] }
 0x157   : > { %9485 = vmatpush.msk.msrb.mxu3 %vm21302_vm9, %v21026_v14  ;;  %1657 = vmatpush.msrb.mxu0 %v21347_v9  ;;  %v21378_v9 = vld [vmem:[#allocation111_spill] sm:$0xff] }
 0x158   : > { %1758 = vmatpush.msrb.mxu2 %v11446_v58  ;;  %9469 = vmatpush.msk.msrb.mxu1 %vm21302_vm9, %v21026_v14  ;;  %v21354_v58 = vld [vmem:[#allocation81_spill] sm:$0xff] }
 0x159   : > { %9486 = vmatpush.msk.msrb.mxu3 %vm21304_vm0, %v21026_v14  ;;  %9490 = vmatpush.msk.msra.mxu0 %vm21349_vm1, %v21026_v14 }
 0x15a   : > { %1762 = vmatpush.msrb.mxu2 %v11463_v38  ;;  %9470 = vmatpush.msk.msrb.mxu1 %vm21304_vm0, %v21026_v14  ;;  %vm21353_vm0 = vnez %v21352_v56  ;;  %v21357_v38 = vld [vmem:[#allocation84_spill] sm:$0xff] }
 0x15b   : > { %9487 = vmatpush.msk.msrb.mxu3 %vm21306_vm2, %v21026_v14  ;;  %9491 = vmatpush.msk.msra.mxu0 %vm21350_vm4, %v21026_v14  ;;  %v21437_v56 = vld [vmem:[#allocation200_spill] sm:$0xff] }
 0x15c   : > { %1505 = vmatmul.f32.vlgmr.msra.gmra.mxu2 %v12852_v48  ;;  %9471 = vmatpush.msk.msrb.mxu1 %vm21306_vm2, %v21026_v14  ;;  %vm21356_vm2 = vnez %v21355_v0  ;;  %v21441_v0 = vld [vmem:[#allocation204_spill] sm:$0xff] }
 0x15d   : > { %1766 = vmatpush.msrb.mxu2 %v21351_v4  ;;  %9488 = vmatpush.msk.msrb.mxu3 %vm21309_vm13, %v21026_v14  ;;  %v21379_v4 = vld [vmem:[#allocation115_spill] sm:$0xff] }
 0x15e   : > { %9492 = vmatpush.msk.msra.mxu0 %vm21353_vm0, %v21026_v14  ;;  %1606 = vmatmul.f32.vlgmr.msra.gmra.mxu3 %v12778_v41 }
 0x15f   : > { %1953 = vmatpush.msra.mxu2 %v21354_v58  ;;  %9472 = vmatpush.msk.msrb.mxu1 %vm21309_vm13, %v21026_v14  ;;  %v21380_v58 = vld [vmem:[#allocation118_spill] sm:$0xff] }
 0x160   : > { %9489 = vmatpush.msk.msrb.mxu3 %vm21313_vm3, %v21026_v14  ;;  %9493 = vmatpush.msk.msra.mxu0 %vm21356_vm2, %v21026_v14  ;;  %vm21381_vm9 = vnez %v21380_v58 }
 0x161   : > { %1956 = vmatpush.msra.mxu2 %v21357_v38  ;;  %9473 = vmatpush.msk.msrb.mxu1 %vm21313_vm3, %v21026_v14  ;;  %vm21367_vm3 = vnez %v21366_v54  ;;  %v21382_v38 = vld [vmem:[#allocation117_spill] sm:$0xff] }
 0x162   : > { %9506 = vmatpush.msk.msra.mxu3 %vm21349_vm1, %v21026_v14  ;;  %9494 = vmatpush.msk.msra.mxu0 %vm21359_vm5, %v21026_v14 }
 0x163   : > { %1855 = vmatpush.msra.mxu1 %v21360_v43  ;;  %1959 = vmatpush.msra.mxu2 %v21361_v55  ;;  %v21383_v43 = vld [vmem:[#allocation121_spill] sm:$0xff]  ;;  %v12960_v55 = vand.u32 4294901760, %v12941_v32 }
 0x164   : > { %9507 = vmatpush.msk.msra.mxu3 %vm21350_vm4, %v21026_v14  ;;  %9495 = vmatpush.msk.msra.mxu0 %vm21363_vm6, %v21026_v14 }
 0x165   : > { %1768 = vmatmul.f32.vlgmr.msrb.gmra.mxu2 %v12778_v41  ;;  %1861 = vmatpush.msra.mxu1 %v21364_v49  ;;  %21384 = vst [vmem:[#allocation47_spill] sm:$0xff] %v12960_v55  ;;  %v21387_v49 = vld [vmem:[#allocation123_spill] sm:$0xff] }
 0x166   : > { %1962 = vmatpush.msra.mxu2 %v21365_v53  ;;  %9508 = vmatpush.msk.msra.mxu3 %vm21353_vm0, %v21026_v14  ;;  %v21388_v53 = vld [vmem:[#allocation129_spill] sm:$0xff] }
 0x167   : > { %9496 = vmatpush.msk.msra.mxu0 %vm21367_vm3, %v21026_v14  ;;  %1805 = vmatmul.f32.vlgmr.msrb.gmra.mxu3 %v12778_v41 }
 0x168   : > { %1660 = vmatmul.f32.vlgmr.msrb.gmra.mxu0 %v12797_v12  ;;  %1867 = vmatpush.msra.mxu1 %v21369_v42  ;;  %v21389_v42 = vld [vmem:[#allocation125_spill] sm:$0xff]  ;;  %v21413_v12 = vld [vmem:[#allocation90_spill] sm:$0xff] }
 0x169   : > { %1965 = vmatpush.msra.mxu2 %v21370_v34  ;;  %9509 = vmatpush.msk.msra.mxu3 %vm21356_vm2, %v21026_v14  ;;  %vm21390_vm11 = vnez %v21389_v42  ;;  %v21391_v34 = vld [vmem:[#allocation128_spill] sm:$0xff] }
 0x16a   : > { %9497 = vmatpush.msk.msra.mxu0 %vm21372_vm7, %v21026_v14  ;;  %1699 = vmatmul.f32.vlgmr.msrb.gmra.mxu1 %v12816_v2  ;;  %v21412_v2 = vld [vmem:[#allocation151_spill] sm:$0xff] }
 0x16b   : > { %1968 = vmatpush.msra.mxu2 %v21373_v57  ;;  %1873 = vmatpush.msra.mxu1 %v21374_v27  ;;  %v21392_v57 = vld [vmem:[#allocation134_spill] sm:$0xff]  ;;  %v1844_v27 = vsub.f32 %v12941_v32, %v12960_v55 }
 0x16c   : > { %9510 = vmatpush.msk.msra.mxu3 %vm21359_vm5, %v21026_v14  ;;  %9498 = vmatpush.msk.msra.mxu0 %vm21377_vm8, %v21026_v14 }
 0x16d   : > { %1971 = vmatpush.msra.mxu2 %v21378_v9  ;;  %1879 = vmatpush.msra.mxu1 %v21379_v4  ;;  %v21393_v9 = vld [vmem:[#allocation130_spill] sm:$0xff]  ;;  %v21395_v4 = vld [vmem:[#allocation132_spill] sm:$0xff] }
 0x16e   : > { %9511 = vmatpush.msk.msra.mxu3 %vm21363_vm6, %v21026_v14  ;;  %9499 = vmatpush.msk.msra.mxu0 %vm21381_vm9, %v21026_v14  ;;  %vm21394_vm12 = vnez %v21393_v9 }
 0x16f   : > { %1974 = vmatpush.msra.mxu2 %v21382_v38  ;;  %1885 = vmatpush.msra.mxu1 %v21383_v43  ;;  %v21396_v38 = vld [vmem:[#allocation139_spill] sm:$0xff]  ;;  %v21397_v43 = vld [vmem:[#allocation141_spill] sm:$0xff] }
 0x170   : > { %9512 = vmatpush.msk.msra.mxu3 %vm21367_vm3, %v21026_v14  ;;  %9500 = vmatpush.msk.msra.mxu0 %vm21386_vm10, %v21026_v14  ;;  %vm21398_vm13 = vnez %v21397_v43  ;;  %v21496_v43 = vmov 0 }
 0x171   : > { %1977 = vmatpush.msra.mxu2 %v21387_v49  ;;  %1891 = vmatpush.msra.mxu1 %v21388_v53  ;;  %v21399_v49 = vld [vmem:[#allocation135_spill] sm:$0xff]  ;;  %v21400_v53 = vld [vmem:[#allocation145_spill] sm:$0xff] }
 0x172   : > { %9513 = vmatpush.msk.msra.mxu3 %vm21372_vm7, %v21026_v14  ;;  %9501 = vmatpush.msk.msra.mxu0 %vm21390_vm11, %v21026_v14 }
 0x173   : > { %1980 = vmatpush.msra.mxu2 %v21391_v34  ;;  %1897 = vmatpush.msra.mxu1 %v21392_v57  ;;  %v12996_v34 = vand.u32 4294901760, %v1844_v27  ;;  %v21402_v57 = vld [vmem:[#allocation146_spill] sm:$0xff] }
 0x174   : > { %9514 = vmatpush.msk.msra.mxu3 %vm21377_vm8, %v21026_v14  ;;  %9502 = vmatpush.msk.msra.mxu0 %vm21394_vm12, %v21026_v14  ;;  %vm21403_vm14 = vnez %v21402_v57  ;;  %v21409_v27 = vld [vmem:[#allocation154_spill] sm:$0xff] }
 0x175   : > { %1983 = vmatpush.msra.mxu2 %v21395_v4  ;;  %1903 = vmatpush.msra.mxu1 %v21396_v38  ;;  %21401 = vst [vmem:[#allocation30_spill] sm:$0xff] %v12996_v34  ;;  %v21404_v4 = vld [vmem:[#allocation138_spill] sm:$0xff]  ;;  %v21405_v38 = vld [vmem:[#allocation149_spill] sm:$0xff] }
 0x176   : > { %9515 = vmatpush.msk.msra.mxu3 %vm21381_vm9, %v21026_v14  ;;  %9503 = vmatpush.msk.msra.mxu0 %vm21398_vm13, %v21026_v14 }
 0x177   : > { %1986 = vmatpush.msra.mxu2 %v21399_v49  ;;  %1909 = vmatpush.msra.mxu1 %v21400_v53  ;;  %v21406_v49 = vld [vmem:[#allocation150_spill] sm:$0xff]  ;;  %v21408_v53 = vld [vmem:[#allocation148_spill] sm:$0xff] }
 0x178   : > { %9516 = vmatpush.msk.msra.mxu3 %vm21386_vm10, %v21026_v14  ;;  %9504 = vmatpush.msk.msra.mxu0 %vm21403_vm14, %v21026_v14  ;;  %vm21407_vm15 = vnez %v21406_v49  ;;  %v21500_v49 = vld [vmem:[#allocation209_spill] sm:$0xff] }
 0x179   : > { %1989 = vmatpush.msra.mxu2 %v21404_v4  ;;  %1915 = vmatpush.msra.mxu1 %v21405_v38  ;;  %v21410_v4 = vld [vmem:[#allocation87_spill] sm:$0xff]  ;;  %v21411_v38 = vld [vmem:[#allocation156_spill] sm:$0xff] }
 0x17a   : > { %9517 = vmatpush.msk.msra.mxu3 %vm21390_vm11, %v21026_v14  ;;  %9505 = vmatpush.msk.msra.mxu0 %vm21407_vm15, %v21026_v14 }
 0x17b   : > { %1992 = vmatpush.msra.mxu2 %v21408_v53  ;;  %1846 = vmatmul.f32.vlgmr.msra.gmra.mxu0 %v12996_v34  ;;  %v21414_v53 = vld [vmem:[#allocation159_spill] sm:$0xff]  ;;  %v21415_v34 = vld [vmem:[#allocation157_spill] sm:$0xff] }
 0x17c   : > { %1921 = vmatpush.msra.mxu1 %v21409_v27  ;;  %9518 = vmatpush.msk.msra.mxu3 %vm21394_vm12, %v21026_v14  ;;  %v21416_v27 = vld [vmem:[#allocation95_spill] sm:$0xff]  ;;  %vm21418_vm12 = vnez %v21192_v18 }
 0x17d   : > { %2047 = vmatpush.msrb.mxu0 %v21410_v4  ;;  %1995 = vmatpush.msra.mxu2 %v21412_v2  ;;  %v21417_v4 = vld [vmem:[#allocation163_spill] sm:$0xff] }
 0x17e   : > { %1927 = vmatpush.msra.mxu1 %v21411_v38  ;;  %9519 = vmatpush.msk.msra.mxu3 %vm21398_vm13, %v21026_v14  ;;  %v21421_v2 = vld [vmem:[#allocation183_spill] sm:$0xff] }
 0x17f   : > { %2051 = vmatpush.msrb.mxu0 %v21413_v12  ;;  %1998 = vmatpush.msra.mxu2 %v21415_v34  ;;  %v21419_v12 = vld [vmem:[#allocation102_spill] sm:$0xff]  ;;  %v21422_v34 = vld [vmem:[#allocation165_spill] sm:$0xff]  ;;  %v21423_v38 = vld [vmem:[#allocation103_spill] sm:$0xff] }
 0x180   : > { %1933 = vmatpush.msra.mxu1 %v21414_v53  ;;  %9520 = vmatpush.msk.msra.mxu3 %vm21403_vm14, %v21026_v14  ;;  %vm21420_vm14 = vnez %v21195_v31  ;;  %v21425_v53 = vld [vmem:[#allocation186_spill] sm:$0xff] }
 0x181   : > { %2055 = vmatpush.msrb.mxu0 %v21416_v27  ;;  %2001 = vmatmul.f32.vlgmr.msra.gmra.mxu2 %v12941_v32  ;;  %v21426_v27 = vld [vmem:[#allocation109_spill] sm:$0xff] }
 0x182   : > { %1939 = vmatpush.msra.mxu1 %v21417_v4  ;;  %9538 = vmatpush.msk.msrb.mxu2 %vm21418_vm12, %v21026_v14  ;;  %vm21424_vm12 = vnez %v21199_v28  ;;  %v21428_v4 = vld [vmem:[#allocation190_spill] sm:$0xff] }
 0x183   : > { %9521 = vmatpush.msk.msra.mxu3 %vm21407_vm15, %v21026_v14  ;;  %2059 = vmatpush.msrb.mxu0 %v21419_v12  ;;  %v21429_v12 = vld [vmem:[#allocation116_spill] sm:$0xff] }
 0x184   : > { %2040 = vmatmul.f32.vlgmr.msra.gmra.mxu3 %v12960_v55  ;;  %9539 = vmatpush.msk.msrb.mxu2 %vm21420_vm14, %v21026_v14  ;;  %vm21427_vm14 = vnez %v21204_v5  ;;  %v21476_v5 = vld [vmem:[#allocation194_spill] sm:$0xff]  ;;  %v21578_v55 = vmov 0 }
 0x185   : > { %2196 = vmatpush.msrb.mxu3 %v21421_v2  ;;  %1945 = vmatpush.msra.mxu1 %v21422_v34  ;;  %v21432_v2 = vld [vmem:[#allocation122_spill] sm:$0xff] }
 0x186   : > { %2063 = vmatpush.msrb.mxu0 %v21423_v38  ;;  %1947 = vmatmul.f32.vlgmr.msra.gmra.mxu1 %v12924_v47  ;;  %v21434_v34 = vld [vmem:[#allocation198_spill] sm:$0xff]  ;;  %v21435_v38 = vld [vmem:[#allocation127_spill] sm:$0xff] }
 0x187   : > { %9540 = vmatpush.msk.msrb.mxu2 %vm21424_vm12, %v21026_v14  ;;  %9522 = vmatpush.msk.msrb.mxu1 %vm21349_vm1, %v21026_v14  ;;  %vm21430_vm12 = vnez %v21208_v37  ;;  %vm21433_vm1 = vnez %v21212_v20  ;;  %v21478_v37 = vld [vmem:[#allocation14_spill] sm:$0xff]  ;;  %v21482_v20 = vld [vmem:[#allocation201_spill] sm:$0xff] }
 0x188   : > { %2202 = vmatpush.msrb.mxu3 %v21425_v53  ;;  %2067 = vmatpush.msrb.mxu0 %v21426_v27  ;;  %v13084_v53 = vand.u32 4294901760, %v249_v60  ;;  %v21439_v27 = vld [vmem:[#allocation131_spill] sm:$0xff] }
 0x189   : > { %9541 = vmatpush.msk.msrb.mxu2 %vm21427_vm14, %v21026_v14  ;;  %9523 = vmatpush.msk.msrb.mxu1 %vm21350_vm4, %v21026_v14  ;;  %vm21436_vm4 = vnez %v21216_v22  ;;  %v21487_v22 = vmov 0.0  }
 0x18a   : > { %2208 = vmatpush.msrb.mxu3 %v21428_v4  ;;  %2071 = vmatpush.msrb.mxu0 %v21429_v12  ;;  %21438 = vst [vmem:[#allocation49_spill] sm:$0xff] %v13084_v53  ;;  %v21442_v4 = vld [vmem:[#allocation137_spill] sm:$0xff]  ;;  %v13103_v12 = vsub.f32 %v249_v60, %v13084_v53 }
 0x18b   : > { %9542 = vmatpush.msk.msrb.mxu2 %vm21430_vm12, %v21026_v14  ;;  %9524 = vmatpush.msk.msrb.mxu1 %vm21353_vm0, %v21026_v14  ;;  %vm21440_vm0 = vnez %v21220_v36  ;;  %v21489_v36 = vld [vmem:[#allocation16_spill] sm:$0xff] }
 0x18c   : > { %2214 = vmatpush.msrb.mxu3 %v21431_v6  ;;  %2075 = vmatpush.msrb.mxu0 %v21432_v2  ;;  %21445 = vst [vmem:[#allocation34_spill] sm:$0xff] %v13103_v12  ;;  %v21446_v6 = vld [vmem:[#allocation140_spill] sm:$0xff]  ;;  %v13122_v54 = vand.u32 4294901760, %v13103_v12  ;;  %v21451_v2 = vld [vmem:[#allocation153_spill] sm:$0xff] }
 0x18d   : > { %9543 = vmatpush.msk.msrb.mxu2 %vm21433_vm1, %v21026_v14  ;;  %9525 = vmatpush.msk.msrb.mxu1 %vm21356_vm2, %v21026_v14  ;;  %vm21443_vm2 = vnez %v21224_v44  ;;  %v21495_v44 = vld [vmem:[#allocation17_spill] sm:$0xff] }
 0x18e   : > { %2220 = vmatpush.msrb.mxu3 %v21434_v34  ;;  %2079 = vmatpush.msrb.mxu0 %v21435_v38  ;;  %21450 = vst [vmem:[#allocation52_spill] sm:$0xff] %v13122_v54  ;;  %v21503_v34 = vmov 0 }
 0x18f   : > { %9544 = vmatpush.msk.msrb.mxu2 %vm21436_vm4, %v21026_v14  ;;  %9526 = vmatpush.msk.msrb.mxu1 %vm21359_vm5, %v21026_v14  ;;  %vm21447_vm5 = vnez %v21228_v15  ;;  %v21502_v15 = vld [vmem:[#allocation18_spill] sm:$0xff] }
 0x190   : > { %2226 = vmatpush.msrb.mxu3 %v21437_v56  ;;  %2083 = vmatpush.msrb.mxu0 %v21439_v27  ;;  %v21506_v56 = vld [vmem:[#allocation212_spill] sm:$0xff]  ;;  %v21507_v27 = vld [vmem:[#allocation211_spill] sm:$0xff] }
 0x191   : > { %9545 = vmatpush.msk.msrb.mxu2 %vm21440_vm0, %v21026_v14  ;;  %9527 = vmatpush.msk.msrb.mxu1 %vm21363_vm6, %v21026_v14  ;;  %vm21449_vm6 = vnez %v21236_v29 }
 0x192   : > { %2232 = vmatpush.msrb.mxu3 %v21441_v0  ;;  %2087 = vmatpush.msrb.mxu0 %v21442_v4  ;;  %v21510_v4 = vld [vmem:[#allocation19_spill] sm:$0xff] }
 0x193   : > { %9546 = vmatpush.msk.msrb.mxu2 %vm21443_vm2, %v21026_v14  ;;  %9528 = vmatpush.msk.msrb.mxu1 %vm21367_vm3, %v21026_v14  ;;  %vm21452_vm3 = vnez %v21242_v46 }
 0x194   : > { %2238 = vmatpush.msrb.mxu3 %v21444_v52  ;;  %2091 = vmatpush.msrb.mxu0 %v21446_v6  ;;  %v21511_v52 = vmov 0 }
 0x195   : > { %9547 = vmatpush.msk.msrb.mxu2 %vm21447_vm5, %v21026_v14  ;;  %9529 = vmatpush.msk.msrb.mxu1 %vm21372_vm7, %v21026_v14  ;;  %vm21454_vm7 = vnez %v21247_v11  ;;  %v21519_v11 = vld [vmem:[#allocation215_spill] sm:$0xff] }
 0x196   : > { %2244 = vmatpush.msrb.mxu3 %v12503_v62  ;;  %2095 = vmatpush.msrb.mxu0 %v21448_v16  ;;  %v21453_v62 = vld [vmem:[#allocation155_spill] sm:$0xff]  ;;  %v21515_v16 = vld [vmem:[#allocation20_spill] sm:$0xff] }
 0x197   : > { %9548 = vmatpush.msk.msrb.mxu2 %vm21449_vm6, %v21026_v14  ;;  %9530 = vmatpush.msk.msrb.mxu1 %vm21377_vm8, %v21026_v14  ;;  %vm21456_vm8 = vnez %v21253_v23 }
 0x198   : > { %2250 = vmatpush.msrb.mxu3 %v12523_v10  ;;  %2099 = vmatpush.msrb.mxu0 %v21451_v2  ;;  %v2185_v10 = vsub.f32 %v13103_v12, %v13122_v54  ;;  %v21516_v2 = vmov 0 }
 0x199   : > { %9549 = vmatpush.msk.msrb.mxu2 %vm21452_vm3, %v21026_v14  ;;  %9531 = vmatpush.msk.msrb.mxu1 %vm21381_vm9, %v21026_v14  ;;  %vm21458_vm9 = vnez %v21393_v9  ;;  %v21493_v9 = vld [vmem:[#allocation208_spill] sm:$0xff] }
 0x19a   : > { %2256 = vmatpush.msrb.mxu3 %v12540_v30  ;;  %2103 = vmatpush.msrb.mxu0 %v21453_v62  ;;  %v21457_v30 = vld [vmem:[#allocation172_spill] sm:$0xff] }
 0x19b   : > { %9550 = vmatpush.msk.msrb.mxu2 %vm21454_vm7, %v21026_v14  ;;  %9532 = vmatpush.msk.msrb.mxu1 %vm21386_vm10, %v21026_v14  ;;  %vm21459_vm10 = vnez %v21257_v50 }
 0x19c   : > { %2262 = vmatpush.msrb.mxu3 %v12559_v24  ;;  %2107 = vmatpush.msrb.mxu0 %v21455_v25  ;;  %v13158_v24 = vand.u32 4294901760, %v2185_v10  ;;  %v21518_v10 = vld [vmem:[#allocation213_spill] sm:$0xff] }
 0x19d   : > { %9551 = vmatpush.msk.msrb.mxu2 %vm21456_vm8, %v21026_v14  ;;  %2109 = vmatmul.f32.vlgmr.msrb.gmra.mxu0 %v12924_v47 }
 0x19e   : > { %9533 = vmatpush.msk.msrb.mxu1 %vm21390_vm11, %v21026_v14  ;;  %2268 = vmatpush.msrb.mxu3 %v12571_v40  ;;  %21460 = vst [vmem:[#allocation35_spill] sm:$0xff] %v13158_v24  ;;  %vm21462_vm11 = vnez %v21264_v33  ;;  %v21463_v40 = vld [vmem:[#allocation175_spill] sm:$0xff] }
 0x19f   : > { %2294 = vmatpush.msra.mxu0 %v21457_v30  ;;  %9552 = vmatpush.msk.msrb.mxu2 %vm21459_vm10, %v21026_v14 }
 0x1a0   : > { %9534 = vmatpush.msk.msrb.mxu1 %vm21458_vm9, %v21026_v14  ;;  %2274 = vmatpush.msrb.mxu3 %v12584_v21  ;;  %vm21464_vm9 = vnez %v21402_v57  ;;  %v21465_v21 = vld [vmem:[#allocation177_spill] sm:$0xff]  ;;  %v21499_v57 = vld [vmem:[#allocation210_spill] sm:$0xff] }
 0x1a1   : > { %2297 = vmatpush.msra.mxu0 %v21461_v39  ;;  %9553 = vmatpush.msk.msrb.mxu2 %vm21462_vm11, %v21026_v14 }
 0x1a2   : > { %9535 = vmatpush.msk.msrb.mxu1 %vm21398_vm13, %v21026_v14  ;;  %2280 = vmatpush.msrb.mxu3 %v12592_v13  ;;  %vm21466_vm13 = vnez %v21192_v18  ;;  %v21467_v13 = vld [vmem:[#allocation179_spill] sm:$0xff]  ;;  %v21474_v18 = vld [vmem:[#allocation192_spill] sm:$0xff] }
 0x1a3   : > { %2300 = vmatpush.msra.mxu0 %v21463_v40  ;;  %2187 = vmatmul.f32.vlgmr.msrb.gmra.mxu2 %v13158_v24 }
 0x1a4   : > { %9536 = vmatpush.msk.msrb.mxu1 %vm21464_vm9, %v21026_v14  ;;  %2388 = vmatpush.msra.mxu2 %v12187_v59  ;;  %vm21468_vm9 = vnez %v21195_v31  ;;  %v21471_v59 = vld [vmem:[#allocation184_spill] sm:$0xff]  ;;  %v21473_v31 = vld [vmem:[#allocation187_spill] sm:$0xff] }
 0x1a5   : > { %2286 = vmatpush.msrb.mxu3 %v12608_v19  ;;  %2303 = vmatpush.msra.mxu0 %v21465_v21  ;;  %v21479_v19 = vmov 0  ;;  %v21522_v21 = vld [vmem:[#allocation21_spill] sm:$0xff] }
 0x1a6   : > { %2288 = vmatmul.f32.vlgmr.msrb.gmra.mxu3 %v13084_v53  ;;  %2392 = vmatpush.msra.mxu2 %v12199_v51  ;;  %v21469_v51 = vld [vmem:[#allocation181_spill] sm:$0xff] }
 0x1a7   : > { %9570 = vmatpush.msk.msra.mxu3 %vm21466_vm13, %v21026_v14  ;;  %9537 = vmatpush.msk.msrb.mxu1 %vm21407_vm15, %v21026_v14  ;;  %vm21470_vm15 = vnez %v21199_v28  ;;  %v21475_v28 = vld [vmem:[#allocation191_spill] sm:$0xff] }
 0x1a8   : > { %2306 = vmatpush.msra.mxu0 %v21467_v13  ;;  %2146 = vmatmul.f32.vlgmr.msrb.gmra.mxu1 %v12924_v47  ;;  %v21523_v13 = vmov 0  ;;  %v21577_v47 = vld [vmem:[#allocation75_spill] sm:$0xff] }
 0x1a9   : > { %2396 = vmatpush.msra.mxu2 %v12226_v3  ;;  %9554 = vmatpush.msk.msra.mxu1 %vm21466_vm13, %v21026_v14  ;;  %v21477_v3 = vld [vmem:[#allocation199_spill] sm:$0xff] }
 0x1aa   : > { %9571 = vmatpush.msk.msra.mxu3 %vm21468_vm9, %v21026_v14  ;;  %2309 = vmatpush.msra.mxu0 %v21469_v51 }
 0x1ab   : > { %2400 = vmatpush.msra.mxu2 %v12263_v17  ;;  %9555 = vmatpush.msk.msra.mxu1 %vm21468_vm9, %v21026_v14  ;;  %v21472_v17 = vld [vmem:[#allocation188_spill] sm:$0xff] }
 0x1ac   : > { %9572 = vmatpush.msk.msra.mxu3 %vm21470_vm15, %v21026_v14  ;;  %2312 = vmatpush.msra.mxu0 %v21471_v59 }
 0x1ad   : > { %2404 = vmatpush.msra.mxu2 %v12284_v35  ;;  %9556 = vmatpush.msk.msra.mxu1 %vm21470_vm15, %v21026_v14  ;;  %v13219_v35 = vld [vmem:[%s11026_s4 + $0x1] ss:$0 sm:$0xff] }
 0x1ae   : > { %9573 = vmatpush.msk.msra.mxu3 %vm21427_vm14, %v21026_v14  ;;  %2315 = vmatpush.msra.mxu0 %v21472_v17  ;;  %v21527_v17 = vld [vmem:[#allocation22_spill] sm:$0xff] }
 0x1af   : > { %2408 = vmatpush.msra.mxu2 %v21473_v31  ;;  %9557 = vmatpush.msk.msra.mxu1 %vm21427_vm14, %v21026_v14  ;;  %v21528_v31 = vmov 0 }
 0x1b0   : > { %9574 = vmatpush.msk.msra.mxu3 %vm21430_vm12, %v21026_v14  ;;  %2318 = vmatpush.msra.mxu0 %v21474_v18 }
 0x1b1   : > { %2412 = vmatpush.msra.mxu2 %v21475_v28  ;;  %9558 = vmatpush.msk.msra.mxu1 %vm21430_vm12, %v21026_v14  ;;  %vm13241_vm12 = vcmp.eq.s32.totalorder %v21478_v37, %v13219_v35  ;;  %v21573_v37 = vld [vmem:[#allocation74_spill] sm:$0xff] }
 0x1b2   : > { %9575 = vmatpush.msk.msra.mxu3 %vm21433_vm1, %v21026_v14  ;;  %2321 = vmatpush.msra.mxu0 %v21476_v5  ;;  %v21480_v19 = vsel %vm13241_vm12, 4294967295, %v21479_v19  ;;  %v9602_v58 = vsel %vm13241_vm12, 1.0, %v21487_v22  ;;  %v21532_v5 = vld [vmem:[#allocation23_spill] sm:$0xff] }
 0x1b3   : > { %2416 = vmatpush.msra.mxu2 %v12368_v8  ;;  %9559 = vmatpush.msk.msra.mxu1 %vm21433_vm1, %v21026_v14  ;;  %21481 = vst [vmem:[#allocation56_spill] sm:$0xff] %v21480_v19  ;;  %v21484_v8 = vmov 0  ;;  %vm13278_vm1 = vcmp.eq.s32.totalorder %v21489_v36, %v13219_v35  ;;  %v21569_v36 = vmov 0  ;;  %v21652_v19 = vld [vmem:[#allocation126_spill] sm:$0xff] }
 0x1b4   : > { %9576 = vmatpush.msk.msra.mxu3 %vm21436_vm4, %v21026_v14  ;;  %2324 = vmatpush.msra.mxu0 %v21477_v3  ;;  %v9600_v60 = vsel %vm13278_vm1, 1.0, %v21487_v22  ;;  %v21533_v3 = vmov 0 }
 0x1b5   : > { %2420 = vmatpush.msra.mxu2 %v12407_v45  ;;  %9560 = vmatpush.msk.msra.mxu1 %vm21436_vm4, %v21026_v14  ;;  %v21483_v45 = vld [vmem:[#allocation15_spill] sm:$0xff]  ;;  %vm13291_vm4 = vcmp.eq.s32.totalorder %v21495_v44, %v13219_v35  ;;  %v13332_v0 = vsub.f32 %v9600_v60, %v9600_v60  ;;  %v21568_v44 = vld [vmem:[#allocation13_spill] sm:$0xff] }
 0x1b6   : > { %9577 = vmatpush.msk.msra.mxu3 %vm21440_vm0, %v21026_v14  ;;  %2327 = vmatpush.msra.mxu0 %v21482_v20  ;;  %vm13255_vm14 = vcmp.eq.s32.totalorder %v21483_v45, %v13219_v35  ;;  %v21497_v43 = vsel %vm13291_vm4, 4294967295, %v21496_v43  ;;  %v9599_v38 = vsel %vm13291_vm4, 1.0, %v21487_v22  ;;  %vm13582_vm15 = vcmp.eq.s32.totalorder %v21568_v44, %v13219_v35 }
 0x1b7   : > { %2424 = vmatpush.msra.mxu2 %v12425_v7  ;;  %v21485_v8 = vsel %vm13255_vm14, 4294967295, %v21484_v8  ;;  %9561 = vmatpush.msk.msra.mxu1 %vm21440_vm0, %v21026_v14  ;;  %v21490_v7 = vmov 0  ;;  %v9601_v42 = vsel %vm13255_vm14, 1.0, %v21487_v22  ;;  %21498 = vst [vmem:[#allocation69_spill] sm:$0xff] %v21497_v43  ;;  %vm13316_vm0 = vcmp.eq.s32.totalorder %v21502_v15, %v13219_v35 }
 0x1b8   : > { %21486 = vst [vmem:[#allocation59_spill] sm:$0xff] %v21485_v8  ;;  %9578 = vmatpush.msk.msra.mxu3 %vm21443_vm2, %v21026_v14  ;;  %2330 = vmatpush.msra.mxu0 %v21488_v63  ;;  %v21491_v7 = vsel %vm13278_vm1, 4294967295, %v21490_v7  ;;  %v21504_v34 = vsel %vm13316_vm0, 4294967295, %v21503_v34  ;;  %v13349_v46 = vsub.f32 %v9599_v38, %v9599_v38  ;;  %v9598_v62 = vsel %vm13316_vm0, 1.0, %v21487_v22  ;;  %v21540_v38 = vld [vmem:[#allocation24_spill] sm:$0xff] }
 0x1b9   : > { %2428 = vmatpush.msra.mxu2 %v12463_v1  ;;  %9562 = vmatpush.msk.msra.mxu1 %vm21443_vm2, %v21026_v14  ;;  %21492 = vst [vmem:[#allocation63_spill] sm:$0xff] %v21491_v7  ;;  %v13287_v1 = vsub.f32 %v9602_v58, %v9602_v58  ;;  %vm13336_vm2 = vcmp.eq.s32.totalorder %v21510_v4, %v13219_v35  ;;  %v13380_v39 = vand.u32 4294901760, %v13332_v0  ;;  %v21570_v36 = vsel %vm13582_vm15, 4294967295, %v21569_v36 }
 0x1ba   : > { %9579 = vmatpush.msk.msra.mxu3 %vm21447_vm5, %v21026_v14  ;;  %2333 = vmatpush.msra.mxu0 %v21493_v9  ;;  %21505 = vst [vmem:[#allocation76_spill] sm:$0xff] %v21504_v34  ;;  %v21512_v52 = vsel %vm13336_vm2, 4294967295, %v21511_v52  ;;  %v9597_v30 = vsel %vm13336_vm2, 1.0, %v21487_v22  ;;  %v13382_v40 = vsub.f32 %v9598_v62, %v9598_v62  ;;  %v13402_v59 = vand.u32 4294901760, %v13349_v46 }
 0x1bb   : > { %2432 = vmatpush.msra.mxu2 %v12491_v26  ;;  %21494 = vst [vmem:[#allocation67_spill] sm:$0xff] %v13287_v1  ;;  %9563 = vmatpush.msk.msra.mxu1 %vm21447_vm5, %v21026_v14  ;;  %v13303_v26 = vsub.f32 %v9601_v42, %v9601_v42  ;;  %v13326_v29 = vand.u32 4294901760, %v13287_v1  ;;  %vm13353_vm5 = vcmp.eq.s32.totalorder %v21515_v16, %v13219_v35  ;;  %v9587_v41 = vsel %vm13582_vm15, 1.0, %v21487_v22 }
 0x1bc   : > { %9580 = vmatpush.msk.msra.mxu3 %vm21449_vm6, %v21026_v14  ;;  %2336 = vmatpush.msra.mxu0 %v21499_v57  ;;  %21509 = vst [vmem:[#allocation31_spill] sm:$0xff] %v13332_v0  ;;  %v21517_v2 = vsel %vm13353_vm5, 4294967295, %v21516_v2  ;;  %v9596_v51 = vsel %vm13353_vm5, 1.0, %v21487_v22  ;;  %v13414_v18 = vsub.f32 %v9597_v30, %v9597_v30  ;;  %v2706_v58 = vsub.f32 %v13332_v0, %v13380_v39 }
 0x1bd   : > { %2436 = vmatpush.msra.mxu2 %v21500_v49  ;;  %21501 = vst [vmem:[#allocation71_spill] sm:$0xff] %v13303_v26  ;;  %9564 = vmatpush.msk.msra.mxu1 %vm21449_vm6, %v21026_v14  ;;  %v13347_v6 = vand.u32 4294901760, %v13303_v26  ;;  %v2694_v25 = vsub.f32 %v13287_v1, %v13326_v29  ;;  %vm13386_vm6 = vcmp.eq.s32.totalorder %v21522_v21, %v13219_v35  ;;  %v13440_v63 = vand.u32 4294901760, %v13382_v40 }
 0x1be   : > { %9581 = vmatpush.msk.msra.mxu3 %vm21452_vm3, %v21026_v14  ;;  %2339 = vmatpush.msra.mxu0 %v21506_v56  ;;  %21508 = vst [vmem:[#allocation79_spill] sm:$0xff] %v13326_v29  ;;  %v21524_v13 = vsel %vm13386_vm6, 4294967295, %v21523_v13  ;;  %v13420_v28 = vsub.f32 %v9596_v51, %v9596_v51  ;;  %v9595_v50 = vsel %vm13386_vm6, 1.0, %v21487_v22  ;;  %v2712_v57 = vsub.f32 %v13349_v46, %v13402_v59 }
 0x1bf   : > { %2440 = vmatpush.msra.mxu2 %v21507_v27  ;;  %2342 = vmatmul.f32.vlgmr.msra.gmra.mxu0 %v13103_v12  ;;  %21513 = vst [vmem:[#allocation83_spill] sm:$0xff] %v13347_v6  ;;  %v2700_v23 = vsub.f32 %v13303_v26, %v13347_v6  ;;  %v13435_v20 = vand.u32 4294901760, %v2694_v25  ;;  %v13460_v49 = vand.u32 4294901760, %v13414_v18  ;;  %v13462_v60 = vsub.f32 %v9595_v50, %v9595_v50 }
 0x1c0   : > { %9565 = vmatpush.msk.msra.mxu1 %vm21452_vm3, %v21026_v14  ;;  %9582 = vmatpush.msk.msra.mxu3 %vm21454_vm7, %v21026_v14  ;;  %21514 = vst [vmem:[#allocation32_spill] sm:$0xff] %v13349_v46  ;;  %vm13406_vm3 = vcmp.eq.s32.totalorder %v21527_v17, %v13219_v35  ;;  %v21541_v56 = vmov 0  ;;  %v13476_v27 = vand.u32 4294901760, %v13420_v28  ;;  %v21546_v25 = vmov 0  ;;  %v21558_v17 = vld [vmem:[#allocation61_spill] sm:$0xff] }
 0x1c1   : > { %9635 = vmatpush.msk.msrb.mxu0 %vm13241_vm12, %v21026_v14  ;;  %2444 = vmatpush.msra.mxu2 %v21518_v10  ;;  %21520 = vst [vmem:[#allocation86_spill] sm:$0xff] %v13380_v39  ;;  %v21529_v31 = vsel %vm13406_vm3, 4294967295, %v21528_v31  ;;  %v9594_v42 = vsel %vm13406_vm3, 1.0, %v21487_v22  ;;  %v13449_v9 = vand.u32 4294901760, %v2700_v23  ;;  %v21545_v10 = vld [vmem:[#allocation25_spill] sm:$0xff]  ;;  %v13490_v30 = vand.u32 4294901760, %v2706_v58 }
 0x1c2   : > { %9566 = vmatpush.msk.msra.mxu1 %vm21454_vm7, %v21026_v14  ;;  %9583 = vmatpush.msk.msra.mxu3 %vm21456_vm8, %v21026_v14  ;;  %21521 = vst [vmem:[#allocation33_spill] sm:$0xff] %v13382_v40  ;;  %vm13424_vm7 = vcmp.eq.s32.totalorder %v21532_v5, %v13219_v35  ;;  %v13478_v62 = vsub.f32 %v9594_v42, %v9594_v42  ;;  %v13498_v51 = vand.u32 4294901760, %v2712_v57  ;;  %v13512_v42 = vand.u32 4294901760, %v13462_v60  ;;  %v21552_v57 = vld [vmem:[#allocation55_spill] sm:$0xff] }
 0x1c3   : > { %9636 = vmatpush.msk.msrb.mxu0 %vm13255_vm14, %v21026_v14  ;;  %2448 = vmatpush.msra.mxu2 %v21519_v11  ;;  %21525 = vst [vmem:[#allocation36_spill] sm:$0xff] %v21524_v13  ;;  %v21534_v3 = vsel %vm13424_vm7, 4294967295, %v21533_v3  ;;  %v9593_v33 = vsel %vm13424_vm7, 1.0, %v21487_v22  ;;  %v2718_v11 = vsub.f32 %v13382_v40, %v13440_v63  ;;  %v2724_v58 = vsub.f32 %v13414_v18, %v13460_v49 }
 0x1c4   : > { %9567 = vmatpush.msk.msra.mxu1 %vm21456_vm8, %v21026_v14  ;;  %9584 = vmatpush.msk.msra.mxu3 %vm21459_vm10, %v21026_v14  ;;  %21526 = vst [vmem:[#allocation89_spill] sm:$0xff] %v13402_v59  ;;  %vm13466_vm8 = vcmp.eq.s32.totalorder %v21540_v38, %v13219_v35  ;;  %v13500_v23 = vsub.f32 %v9593_v33, %v9593_v33  ;;  %v21553_v33 = vmov 0  ;;  %v13530_v38 = vand.u32 4294901760, %v13478_v62 }
 0x1c5   : > { %9637 = vmatpush.msk.msrb.mxu0 %vm13278_vm1, %v21026_v14  ;;  %2450 = vmatmul.f32.vlgmr.msra.gmra.mxu2 %v13084_v53  ;;  %21530 = vst [vmem:[#allocation38_spill] sm:$0xff] %v13414_v18  ;;  %v21542_v56 = vsel %vm13466_vm8, 4294967295, %v21541_v56  ;;  %v9592_v50 = vsel %vm13466_vm8, 1.0, %v21487_v22  ;;  %vm13542_vm13 = vcmp.eq.s32.totalorder %v21558_v17, %v13219_v35  ;;  %v21559_v21 = vmov 0 }
 0x1c6   : > { %9568 = vmatpush.msk.msra.mxu1 %vm21459_vm10, %v21026_v14  ;;  %2794 = vmatpush.msrb.mxu2 %v13287_v1  ;;  %21531 = vst [vmem:[#allocation37_spill] sm:$0xff] %v13420_v28  ;;  %vm13482_vm10 = vcmp.eq.s32.totalorder %v21545_v10, %v13219_v35  ;;  %v13538_v5 = vsub.f32 %v9592_v50, %v9592_v50  ;;  %v21560_v21 = vsel %vm13542_vm13, 4294967295, %v21559_v21  ;;  %v13551_v16 = vand.u32 4294901760, %v13500_v23  ;;  %v21595_v1 = vld [vmem:[#allocation88_spill] sm:$0xff] }
 0x1c7   : > { %9585 = vmatpush.msk.msra.mxu3 %vm21462_vm11, %v21026_v14  ;;  %9638 = vmatpush.msk.msrb.mxu0 %vm13291_vm4, %v21026_v14  ;;  %21535 = vst [vmem:[#allocation40_spill] sm:$0xff] %v13435_v20  ;;  %v21547_v25 = vsel %vm13482_vm10, 4294967295, %v21546_v25  ;;  %v9591_v10 = vsel %vm13482_vm10, 1.0, %v21487_v22  ;;  %v21564_v50 = vmov 0  ;;  %v13568_v12 = vand.u32 4294901760, %v2724_v58 }
 0x1c8   : > { %2487 = vmatmul.f32.vlgmr.msra.gmra.mxu3 %v13084_v53  ;;  %21536 = vst [vmem:[#allocation39_spill] sm:$0xff] %v13440_v63  ;;  %2797 = vmatpush.msrb.mxu2 %v13303_v26  ;;  %v13553_v4 = vsub.f32 %v9591_v10, %v9591_v10  ;;  %v2736_v10 = vsub.f32 %v13462_v60, %v13512_v42  ;;  %v9589_v58 = vsel %vm13542_vm13, 1.0, %v21487_v22  ;;  %v21574_v53 = vmov 0 }
 0x1c9   : > { %9651 = vmatpush.msk.msrb.mxu3 %vm13241_vm12, %v21026_v14  ;;  %21537 = vst [vmem:[#allocation42_spill] sm:$0xff] %v13449_v9  ;;  %9569 = vmatpush.msk.msra.mxu1 %vm21462_vm11, %v21026_v14  ;;  %vm13516_vm11 = vcmp.eq.s32.totalorder %v21552_v57, %v13219_v35  ;;  %v13536_v57 = vand.u32 4294901760, %v2718_v11  ;;  %v21563_v11 = vld [vmem:[#allocation65_spill] sm:$0xff]  ;;  %v2742_v15 = vsub.f32 %v13478_v62, %v13530_v38 }
 0x1ca   : > { %9639 = vmatpush.msk.msrb.mxu0 %vm13316_vm0, %v21026_v14  ;;  %21538 = vst [vmem:[#allocation41_spill] sm:$0xff] %v13460_v49  ;;  %2381 = vmatmul.f32.vlgmr.msra.gmra.mxu1 %v13122_v54  ;;  %v21554_v33 = vsel %vm13516_vm11, 4294967295, %v21553_v33  ;;  %v2730_v54 = vsub.f32 %v13420_v28, %v13476_v27  ;;  %vm13557_vm9 = vcmp.eq.s32.totalorder %v21563_v11, %v13219_v35  ;;  %v9590_v17 = vsel %vm13516_vm11, 1.0, %v21487_v22 }
 0x1cb   : > { %21539 = vst [vmem:[#allocation44_spill] sm:$0xff] %v13462_v60  ;;  %2800 = vmatpush.msrb.mxu2 %v13332_v0  ;;  %2696 = vmatpush.msrb.mxu1 %v13435_v20  ;;  %v21565_v50 = vsel %vm13557_vm9, 4294967295, %v21564_v50  ;;  %v13596_v45 = vsub.f32 %v9590_v17, %v9590_v17  ;;  %v9588_v44 = vsel %vm13557_vm9, 1.0, %v21487_v22  ;;  %v2748_v17 = vsub.f32 %v13500_v23, %v13551_v16 }
 0x1cc   : > { %21543 = vst [vmem:[#allocation43_spill] sm:$0xff] %v13476_v27  ;;  %9652 = vmatpush.msk.msrb.mxu3 %vm13255_vm14, %v21026_v14  ;;  %9640 = vmatpush.msk.msrb.mxu0 %vm13336_vm2, %v21026_v14  ;;  %v13576_v11 = vand.u32 4294901760, %v2730_v54  ;;  %v13594_v54 = vand.u32 4294901760, %v13538_v5  ;;  %v13614_v24 = vand.u32 4294901760, %v13553_v4  ;;  %v13628_v32 = vsub.f32 %v9589_v58, %v9589_v58 }
 0x1cd   : > { %21544 = vst [vmem:[#allocation50_spill] sm:$0xff] %v13478_v62  ;;  %2803 = vmatpush.msrb.mxu2 %v13349_v46  ;;  %2702 = vmatpush.msrb.mxu1 %v13449_v9  ;;  %v21585_v58 = vmov 0 }
 0x1ce   : > { %21548 = vst [vmem:[#allocation48_spill] sm:$0xff] %v13490_v30  ;;  %9653 = vmatpush.msk.msrb.mxu3 %vm13278_vm1, %v21026_v14  ;;  %9641 = vmatpush.msk.msrb.mxu0 %vm13353_vm5, %v21026_v14 }
 0x1cf   : > { %21549 = vst [vmem:[#allocation53_spill] sm:$0xff] %v13498_v51  ;;  %2806 = vmatpush.msrb.mxu2 %v13382_v40  ;;  %2708 = vmatpush.msrb.mxu1 %v13490_v30  ;;  %v13677_v40 = vand.u32 4294901760, %v13628_v32  ;;  %v21615_v30 = vmov 0 }
 0x1d0   : > { %21550 = vst [vmem:[#allocation51_spill] sm:$0xff] %v13500_v23  ;;  %9654 = vmatpush.msk.msrb.mxu3 %vm13291_vm4, %v21026_v14  ;;  %9642 = vmatpush.msk.msrb.mxu0 %vm13386_vm6, %v21026_v14 }
 0x1d1   : > { %21551 = vst [vmem:[#allocation57_spill] sm:$0xff] %v13512_v42  ;;  %2809 = vmatpush.msrb.mxu2 %v13414_v18  ;;  %2714 = vmatpush.msrb.mxu1 %v13498_v51  ;;  %v13670_v18 = vsub.f32 %v9587_v41, %v9587_v41  ;;  %v21610_v51 = vmov 0 }
 0x1d2   : > { %21555 = vst [vmem:[#allocation54_spill] sm:$0xff] %v13530_v38  ;;  %9655 = vmatpush.msk.msrb.mxu3 %vm13316_vm0, %v21026_v14  ;;  %9643 = vmatpush.msk.msrb.mxu0 %vm13406_vm3, %v21026_v14  ;;  %vm13603_vm0 = vcmp.eq.s32.totalorder %v21573_v37, %v13219_v35  ;;  %v13626_v37 = vand.u32 4294901760, %v2736_v10  ;;  %v21584_v10 = vld [vmem:[#allocation78_spill] sm:$0xff] }
 0x1d3   : > { %21556 = vst [vmem:[#allocation60_spill] sm:$0xff] %v13536_v57  ;;  %2812 = vmatpush.msrb.mxu2 %v13420_v28  ;;  %2720 = vmatpush.msrb.mxu1 %v13536_v57  ;;  %v21575_v53 = vsel %vm13603_vm0, 4294967295, %v21574_v53  ;;  %v9618_v48 = vsel %vm13603_vm0, 1.0, %v21487_v22  ;;  %v13666_v28 = vand.u32 4294901760, %v2748_v17  ;;  %v21591_v17 = vmov 0 }
 0x1d4   : > { %21557 = vst [vmem:[#allocation58_spill] sm:$0xff] %v13538_v5  ;;  %9656 = vmatpush.msk.msrb.mxu3 %vm13336_vm2, %v21026_v14  ;;  %9644 = vmatpush.msk.msrb.mxu0 %vm13424_vm7, %v21026_v14  ;;  %vm13618_vm2 = vcmp.eq.s32.totalorder %v21577_v47, %v13219_v35  ;;  %v13637_v47 = vsub.f32 %v9588_v44, %v9588_v44 }
 0x1d5   : > { %21561 = vst [vmem:[#allocation64_spill] sm:$0xff] %v13551_v16  ;;  %2815 = vmatpush.msrb.mxu2 %v13462_v60  ;;  %v21579_v55 = vsel %vm13618_vm2, 4294967295, %v21578_v55  ;;  %2726 = vmatpush.msrb.mxu1 %v13568_v12  ;;  %v13652_v60 = vand.u32 4294901760, %v2742_v15  ;;  %v2754_v44 = vsub.f32 %v13538_v5, %v13594_v54  ;;  %v2760_v15 = vsub.f32 %v13553_v4, %v13614_v24 }
 0x1d6   : > { %21562 = vst [vmem:[#allocation62_spill] sm:$0xff] %v13553_v4  ;;  %9657 = vmatpush.msk.msrb.mxu3 %vm13353_vm5, %v21026_v14  ;;  %9645 = vmatpush.msk.msrb.mxu0 %vm13466_vm8, %v21026_v14  ;;  %vm13644_vm5 = vcmp.eq.s32.totalorder %v21584_v10, %v13219_v35  ;;  %v9617_v10 = vsel %vm13618_vm2, 1.0, %v21487_v22  ;;  %v13679_v46 = vsub.f32 %v9618_v48, %v9618_v48  ;;  %v13695_v0 = vand.u32 4294901760, %v13637_v47 }
 0x1d7   : > { %21566 = vst [vmem:[#allocation68_spill] sm:$0xff] %v13568_v12  ;;  %2818 = vmatpush.msrb.mxu2 %v13478_v62  ;;  %v21586_v58 = vsel %vm13644_vm5, 4294967295, %v21585_v58  ;;  %2732 = vmatpush.msrb.mxu1 %v13576_v11  ;;  %v13657_v62 = vand.u32 4294901760, %v13596_v45  ;;  %v9616_v41 = vsel %vm13644_vm5, 1.0, %v21487_v22  ;;  %v13697_v48 = vsub.f32 %v9617_v10, %v9617_v10 }
 0x1d8   : > { %21567 = vst [vmem:[#allocation66_spill] sm:$0xff] %v13576_v11  ;;  %9658 = vmatpush.msk.msrb.mxu3 %vm13386_vm6, %v21026_v14  ;;  %9646 = vmatpush.msk.msrb.mxu0 %vm13482_vm10, %v21026_v14  ;;  %v13718_v10 = vand.u32 4294901760, %v13670_v18  ;;  %v21603_v11 = vmov 0 }
 0x1d9   : > { %21571 = vst [vmem:[#allocation72_spill] sm:$0xff] %v13594_v54  ;;  %2821 = vmatpush.msrb.mxu2 %v13500_v23  ;;  %2738 = vmatpush.msrb.mxu1 %v13626_v37  ;;  %v21590_v23 = vld [vmem:[#allocation85_spill] sm:$0xff]  ;;  %v2766_v26 = vsub.f32 %v13596_v45, %v13657_v62 }
 0x1da   : > { %21572 = vst [vmem:[#allocation73_spill] sm:$0xff] %v13596_v45  ;;  %9659 = vmatpush.msk.msrb.mxu3 %vm13406_vm3, %v21026_v14  ;;  %vm13683_vm6 = vcmp.eq.s32.totalorder %v21590_v23, %v13219_v35  ;;  %9647 = vmatpush.msk.msrb.mxu0 %vm13516_vm11, %v21026_v14  ;;  %v13703_v23 = vand.u32 4294901760, %v2754_v44  ;;  %vm13709_vm3 = vcmp.eq.s32.totalorder %v21595_v1, %v13219_v35  ;;  %v13729_v1 = vand.u32 4294901760, %v2760_v15 }
 0x1db   : > { %21576 = vst [vmem:[#allocation77_spill] sm:$0xff] %v13614_v24  ;;  %v21592_v17 = vsel %vm13683_vm6, 4294967295, %v21591_v17  ;;  %2824 = vmatpush.msrb.mxu2 %v13538_v5  ;;  %2744 = vmatpush.msrb.mxu1 %v13652_v60  ;;  %v21596_v5 = vmov 0  ;;  %v13720_v44 = vsub.f32 %v9616_v41, %v9616_v41  ;;  %v21602_v41 = vld [vmem:[#allocation94_spill] sm:$0xff]  ;;  %v2778_v15 = vsub.f32 %v13637_v47, %v13695_v0 }
 0x1dc   : > { %21580 = vst [vmem:[#allocation80_spill] sm:$0xff] %v21579_v55  ;;  %9660 = vmatpush.msk.msrb.mxu3 %vm13424_vm7, %v21026_v14  ;;  %v21597_v5 = vsel %vm13709_vm3, 4294967295, %v21596_v5  ;;  %9648 = vmatpush.msk.msrb.mxu0 %vm13542_vm13, %v21026_v14  ;;  %vm13738_vm7 = vcmp.eq.s32.totalorder %v21602_v41, %v13219_v35  ;;  %v9614_v12 = vsel %vm13709_vm3, 1.0, %v21487_v22  ;;  %v13758_v41 = vand.u32 4294901760, %v2766_v26  ;;  %v21645_v55 = vld [vmem:[#allocation120_spill] sm:$0xff] }
 0x1dd   : > { %21581 = vst [vmem:[#allocation82_spill] sm:$0xff] %v13626_v37  ;;  %2827 = vmatpush.msrb.mxu2 %v13553_v4  ;;  %2750 = vmatpush.msrb.mxu1 %v13666_v28  ;;  %v2772_v4 = vsub.f32 %v13628_v32, %v13677_v40  ;;  %v13734_v37 = vand.u32 4294901760, %v13679_v46  ;;  %v21604_v11 = vsel %vm13738_vm7, 4294967295, %v21603_v11  ;;  %v13775_v26 = vand.u32 4294901760, %v13720_v44 }
 0x1de   : > { %21582 = vst [vmem:[#allocation81_spill] sm:$0xff] %v13628_v32  ;;  %9661 = vmatpush.msk.msrb.mxu3 %vm13466_vm8, %v21026_v14  ;;  %9649 = vmatpush.msk.msrb.mxu0 %vm13557_vm9, %v21026_v14  ;;  %v13794_v61 = vsub.f32 %v9614_v12, %v9614_v12 }
 0x1df   : > { %21583 = vst [vmem:[#allocation91_spill] sm:$0xff] %v13637_v47  ;;  %2830 = vmatpush.msrb.mxu2 %v13596_v45  ;;  %2756 = vmatpush.msrb.mxu1 %v13703_v23  ;;  %v21609_v45 = vld [vmem:[#allocation100_spill] sm:$0xff]  ;;  %v3035_v9 = vsub.f32 %v13679_v46, %v13734_v37 }
 0x1e0   : > { %21587 = vst [vmem:[#allocation84_spill] sm:$0xff] %v13652_v60  ;;  %v9615_v60 = vsel %vm13683_vm6, 1.0, %v21487_v22  ;;  %9662 = vmatpush.msk.msrb.mxu3 %vm13482_vm10, %v21026_v14  ;;  %vm13764_vm8 = vcmp.eq.s32.totalorder %v21609_v45, %v13219_v35  ;;  %9650 = vmatpush.msk.msrb.mxu0 %vm13582_vm15, %v21026_v14  ;;  %v21614_v45 = vld [vmem:[#allocation106_spill] sm:$0xff] }
 0x1e1   : > { %21588 = vst [vmem:[#allocation93_spill] sm:$0xff] %v13666_v28  ;;  %v13749_v28 = vand.u32 4294901760, %v13697_v48  ;;  %v13760_v57 = vsub.f32 %v9615_v60, %v9615_v60  ;;  %v21611_v51 = vsel %vm13764_vm8, 4294967295, %v21610_v51  ;;  %2833 = vmatpush.msrb.mxu2 %v13628_v32  ;;  %v9613_v60 = vsel %vm13738_vm7, 1.0, %v21487_v22  ;;  %2762 = vmatpush.msrb.mxu1 %v13729_v1 }
 0x1e2   : > { %21589 = vst [vmem:[#allocation97_spill] sm:$0xff] %v13670_v18  ;;  %vm13782_vm10 = vcmp.eq.s32.totalorder %v21614_v45, %v13219_v35  ;;  %9663 = vmatpush.msk.msrb.mxu3 %vm13516_vm11, %v21026_v14  ;;  %v13790_v32 = vand.u32 4294901760, %v2772_v4  ;;  %2888 = vmatpush.msra.mxu0 %v13326_v29  ;;  %v13798_v45 = vand.u32 4294901760, %v2778_v15  ;;  %v9612_v20 = vsel %vm13764_vm8, 1.0, %v21487_v22  ;;  %v21623_v15 = vld [vmem:[#allocation108_spill] sm:$0xff] }
 0x1e3   : > { %21593 = vst [vmem:[#allocation92_spill] sm:$0xff] %v13695_v0  ;;  %v21616_v30 = vsel %vm13782_vm10, 4294967295, %v21615_v30  ;;  %2836 = vmatpush.msrb.mxu2 %v13637_v47  ;;  %2768 = vmatpush.msrb.mxu1 %v13758_v41  ;;  %v13810_v12 = vand.u32 4294901760, %v13760_v57  ;;  %v13812_v4 = vsub.f32 %v9613_v60, %v9613_v60  ;;  %vm13816_vm11 = vcmp.eq.s32.totalorder %v21623_v15, %v13219_v35 }
 0x1e4   : > { %21594 = vst [vmem:[#allocation98_spill] sm:$0xff] %v13703_v23  ;;  %v2784_v23 = vsub.f32 %v13670_v18, %v13718_v10  ;;  %9664 = vmatpush.msk.msrb.mxu3 %vm13542_vm13, %v21026_v14  ;;  %v21624_v47 = vmov 0  ;;  %v9611_v29 = vsel %vm13782_vm10, 1.0, %v21487_v22  ;;  %2892 = vmatpush.msra.mxu0 %v13347_v6  ;;  %v3047_v60 = vsub.f32 %v13720_v44, %v13775_v26 }
 0x1e5   : > { %21598 = vst [vmem:[#allocation101_spill] sm:$0xff] %v21597_v5  ;;  %v21625_v47 = vsel %vm13816_vm11, 4294967295, %v21624_v47  ;;  %2839 = vmatpush.msrb.mxu2 %v13670_v18  ;;  %2774 = vmatpush.msrb.mxu1 %v13790_v32  ;;  %v13833_v15 = vand.u32 4294901760, %v3035_v9  ;;  %v21631_v18 = vld [vmem:[#allocation114_spill] sm:$0xff]  ;;  %v13850_v6 = vsub.f32 %v9611_v29, %v9611_v29  ;;  %v9610_v9 = vsel %vm13816_vm11, 1.0, %v21487_v22  ;;  %v21638_v29 = vld [vmem:[#allocation119_spill] sm:$0xff] }
 0x1e6   : > { %21599 = vst [vmem:[#allocation96_spill] sm:$0xff] %v13720_v44  ;;  %9665 = vmatpush.msk.msrb.mxu3 %vm13557_vm9, %v21026_v14  ;;  %vm13842_vm13 = vcmp.eq.s32.totalorder %v21631_v18, %v13219_v35  ;;  %2896 = vmatpush.msra.mxu0 %v13380_v39  ;;  %v3053_v18 = vsub.f32 %v13760_v57, %v13810_v12  ;;  %v13864_v39 = vand.u32 4294901760, %v13812_v4  ;;  %v21796_v5 = vmov 0 }
 0x1e7   : > { %21600 = vst [vmem:[#allocation104_spill] sm:$0xff] %v13729_v1  ;;  %v3041_v1 = vsub.f32 %v13697_v48, %v13749_v28  ;;  %9683 = vmatpush.msk.msra.mxu2 %vm13603_vm0, %v21026_v14  ;;  %2780 = vmatpush.msrb.mxu1 %v13798_v45  ;;  %vm13868_vm0 = vcmp.eq.s32.totalorder %v21638_v29, %v13219_v35 }
 0x1e8   : > { %21601 = vst [vmem:[#allocation107_spill] sm:$0xff] %v13734_v37  ;;  %v13838_v37 = vsub.f32 %v9612_v20, %v9612_v20  ;;  %9666 = vmatpush.msk.msrb.mxu3 %vm13582_vm15, %v21026_v14  ;;  %2900 = vmatpush.msra.mxu0 %v13402_v59  ;;  %v13888_v59 = vsub.f32 %v9610_v9, %v9610_v9  ;;  %v9608_v9 = vsel %vm13868_vm0, 1.0, %v21487_v22 }
 0x1e9   : > { %21605 = vst [vmem:[#allocation99_spill] sm:$0xff] %v21604_v11  ;;  %v13859_v20 = vand.u32 4294901760, %v3041_v1  ;;  %9684 = vmatpush.msk.msra.mxu2 %vm13618_vm2, %v21026_v14  ;;  %v13876_v1 = vand.u32 4294901760, %v3047_v60  ;;  %vm13892_vm2 = vcmp.eq.s32.totalorder %v21645_v55, %v13219_v35  ;;  %v21646_v60 = vmov 0 }
 0x1ea   : > { %21606 = vst [vmem:[#allocation110_spill] sm:$0xff] %v13749_v28  ;;  %v13836_v28 = vand.u32 4294901760, %v13794_v61  ;;  %3037 = vmatpush.msra.mxu3 %v13833_v15  ;;  %v21647_v60 = vsel %vm13892_vm2, 4294967295, %v21646_v60  ;;  %2904 = vmatpush.msra.mxu0 %v13440_v63  ;;  %v13910_v55 = vand.u32 4294901760, %v3053_v18  ;;  %v3065_v63 = vsub.f32 %v13812_v4, %v13864_v39 }
 0x1eb   : > { %21607 = vst [vmem:[#allocation105_spill] sm:$0xff] %v13758_v41  ;;  %v13825_v41 = vand.u32 4294901760, %v2784_v23  ;;  %v21632_v23 = vmov 0  ;;  %9685 = vmatpush.msk.msra.mxu2 %vm13644_vm5, %v21026_v14  ;;  %v9607_v18 = vsel %vm13892_vm2, 1.0, %v21487_v22 }
 0x1ec   : > { %21608 = vst [vmem:[#allocation112_spill] sm:$0xff] %v13760_v57  ;;  %v21633_v23 = vsel %vm13842_vm13, 4294967295, %v21632_v23  ;;  %v3059_v29 = vsub.f32 %v13794_v61, %v13836_v28  ;;  %3043 = vmatpush.msra.mxu3 %v13859_v20  ;;  %2908 = vmatpush.msra.mxu0 %v13460_v49  ;;  %v13940_v49 = vsub.f32 %v9608_v9, %v9608_v9  ;;  %v13958_v9 = vand.u32 4294901760, %v3065_v63 }
 0x1ed   : > { %21612 = vst [vmem:[#allocation113_spill] sm:$0xff] %v21611_v51  ;;  %2786 = vmatpush.msrb.mxu1 %v13825_v41  ;;  %9686 = vmatpush.msk.msra.mxu2 %vm13683_vm6, %v21026_v14  ;;  %v13963_v7 = vsub.f32 %v9607_v18, %v9607_v18  ;;  %v21667_v63 = vmov 0 }
 0x1ee   : > { %21613 = vst [vmem:[#allocation111_spill] sm:$0xff] %v13775_v26  ;;  %3049 = vmatpush.msra.mxu3 %v13876_v1  ;;  %2912 = vmatpush.msra.mxu0 %v13476_v27 }
 0x1ef   : > { %21617 = vst [vmem:[#allocation115_spill] sm:$0xff] %v21616_v30  ;;  %9667 = vmatpush.msk.msra.mxu1 %vm13241_vm12, %v21026_v14  ;;  %vm13922_vm12 = vcmp.eq.s32.totalorder %v21652_v19, %v13219_v35  ;;  %v13938_v19 = vand.u32 4294901760, %v13888_v59  ;;  %9687 = vmatpush.msk.msra.mxu2 %vm13709_vm3, %v21026_v14  ;;  %v21779_v30 = vmov 0 }
 0x1f0   : > { %21618 = vst [vmem:[#allocation118_spill] sm:$0xff] %v13790_v32  ;;  %v21639_v32 = vmov 0  ;;  %3055 = vmatpush.msra.mxu3 %v13910_v55  ;;  %2916 = vmatpush.msra.mxu0 %v13512_v42  ;;  %v13987_v42 = vand.u32 4294901760, %v13940_v49 }
 0x1f1   : > { %21619 = vst [vmem:[#allocation117_spill] sm:$0xff] %v13794_v61  ;;  %v21640_v32 = vsel %vm13868_vm0, 4294967295, %v21639_v32  ;;  %9668 = vmatpush.msk.msra.mxu1 %vm13255_vm14, %v21026_v14  ;;  %9688 = vmatpush.msk.msra.mxu2 %vm13738_vm7, %v21026_v14 }
 0x1f2   : > { %21620 = vst [vmem:[#allocation121_spill] sm:$0xff] %v13798_v45  ;;  %v9609_v45 = vsel %vm13842_vm13, 1.0, %v21487_v22  ;;  %2920 = vmatpush.msra.mxu0 %v13530_v38  ;;  %v21676_v38 = vld [vmem:[#allocation147_spill] sm:$0xff] }
 0x1f3   : > { %21621 = vst [vmem:[#allocation124_spill] sm:$0xff] %v13810_v12  ;;  %v13886_v12 = vand.u32 4294901760, %v13838_v37  ;;  %9669 = vmatpush.msk.msra.mxu1 %vm13278_vm1, %v21026_v14  ;;  %9689 = vmatpush.msk.msra.mxu2 %vm13764_vm8, %v21026_v14  ;;  %vm14011_vm7 = vcmp.eq.s32.totalorder %v21676_v38, %v13219_v35  ;;  %vm21683_vm8 = vnez %v21517_v2 }
 0x1f4   : > { %21622 = vst [vmem:[#allocation123_spill] sm:$0xff] %v13812_v4  ;;  %2924 = vmatpush.msra.mxu0 %v13551_v16 }
 0x1f5   : > { %21626 = vst [vmem:[#allocation129_spill] sm:$0xff] %v21625_v47  ;;  %9670 = vmatpush.msk.msra.mxu1 %vm13291_vm4, %v21026_v14  ;;  %vm21672_vm4 = vnez %v21504_v34  ;;  %v21677_v34 = vmov 0  ;;  %9690 = vmatpush.msk.msra.mxu2 %vm13782_vm10, %v21026_v14  ;;  %v21773_v47 = vmov 0 }
 0x1f6   : > { %21627 = vst [vmem:[#allocation125_spill] sm:$0xff] %v13825_v41  ;;  %v13914_v41 = vsub.f32 %v9609_v45, %v9609_v45  ;;  %v13933_v45 = vand.u32 4294901760, %v3059_v29  ;;  %v21659_v29 = vld [vmem:[#allocation136_spill] sm:$0xff]  ;;  %v21678_v34 = vsel %vm14011_vm7, 4294967295, %v21677_v34  ;;  %2928 = vmatpush.msra.mxu0 %v13594_v54 }
 0x1f7   : > { %21628 = vst [vmem:[#allocation128_spill] sm:$0xff] %v13833_v15  ;;  %v13901_v15 = vand.u32 4294901760, %v13850_v6  ;;  %vm13950_vm14 = vcmp.eq.s32.totalorder %v21659_v29, %v13219_v35  ;;  %v9606_v29 = vsel %vm13922_vm12, 1.0, %v21487_v22  ;;  %9671 = vmatpush.msk.msra.mxu1 %vm21672_vm4, %v21026_v14  ;;  %vm21680_vm4 = vnez %v21512_v52  ;;  %9691 = vmatpush.msk.msra.mxu2 %vm13816_vm11, %v21026_v14 }
 0x1f8   : > { %21629 = vst [vmem:[#allocation134_spill] sm:$0xff] %v13836_v28  ;;  %v21653_v28 = vmov 0  ;;  %v13961_v27 = vand.u32 4294901760, %v13914_v41  ;;  %3061 = vmatpush.msra.mxu3 %v13933_v45  ;;  %2932 = vmatpush.msra.mxu0 %v13614_v24 }
 0x1f9   : > { %21630 = vst [vmem:[#allocation130_spill] sm:$0xff] %v13838_v37  ;;  %v21654_v28 = vsel %vm13922_vm12, 4294967295, %v21653_v28  ;;  %v3077_v8 = vsub.f32 %v13850_v6, %v13901_v15  ;;  %9672 = vmatpush.msk.msra.mxu1 %vm21680_vm4, %v21026_v14  ;;  %9692 = vmatpush.msk.msra.mxu2 %vm13842_vm13, %v21026_v14  ;;  %vm21691_vm4 = vnez %v21529_v31 }
 0x1fa   : > { %21634 = vst [vmem:[#allocation132_spill] sm:$0xff] %v21633_v23  ;;  %3067 = vmatpush.msra.mxu3 %v13958_v9  ;;  %2936 = vmatpush.msra.mxu0 %v13657_v62 }
 0x1fb   : > { %21635 = vst [vmem:[#allocation139_spill] sm:$0xff] %v13850_v6  ;;  %v13996_v43 = vand.u32 4294901760, %v3077_v8  ;;  %9673 = vmatpush.msk.msra.mxu1 %vm21683_vm8, %v21026_v14  ;;  %vm21687_vm8 = vnez %v21524_v13  ;;  %9693 = vmatpush.msk.msra.mxu2 %vm13868_vm0, %v21026_v14 }
 0x1fc   : > { %21636 = vst [vmem:[#allocation141_spill] sm:$0xff] %v13859_v20  ;;  %v3071_v20 = vsub.f32 %v13838_v37, %v13886_v12  ;;  %2940 = vmatpush.msra.mxu0 %v13677_v40 }
 0x1fd   : > { %21637 = vst [vmem:[#allocation135_spill] sm:$0xff] %v13864_v39  ;;  %9674 = vmatpush.msk.msra.mxu1 %vm21687_vm8, %v21026_v14  ;;  %vm21694_vm8 = vnez %v21534_v3  ;;  %9694 = vmatpush.msk.msra.mxu2 %vm13892_vm2, %v21026_v14 }
 0x1fe   : > { %21641 = vst [vmem:[#allocation145_spill] sm:$0xff] %v21640_v32  ;;  %v13982_v18 = vand.u32 4294901760, %v3071_v20  ;;  %v13998_v20 = vsub.f32 %v9606_v29, %v9606_v29  ;;  %2944 = vmatpush.msra.mxu0 %v13695_v0  ;;  %v21700_v0 = vld [vmem:[#allocation161_spill] sm:$0xff]  ;;  %v21761_v32 = vmov 0 }
 0x1ff   : > { %21642 = vst [vmem:[#allocation146_spill] sm:$0xff] %v13876_v1  ;;  %v21660_v1 = vmov 0  ;;  %9675 = vmatpush.msk.msra.mxu1 %vm21691_vm4, %v21026_v14  ;;  %vm21696_vm4 = vnez %v21542_v56  ;;  %9695 = vmatpush.msk.msra.mxu2 %vm13922_vm12, %v21026_v14 }
 0x200   : > { %21643 = vst [vmem:[#allocation138_spill] sm:$0xff] %v13886_v12  ;;  %v21661_v1 = vsel %vm13950_vm14, 4294967295, %v21660_v1  ;;  %3073 = vmatpush.msra.mxu3 %v13982_v18  ;;  %2948 = vmatpush.msra.mxu0 %v13718_v10 }
 0x201   : > { %21644 = vst [vmem:[#allocation149_spill] sm:$0xff] %v13888_v59  ;;  %9676 = vmatpush.msk.msra.mxu1 %vm21694_vm8, %v21026_v14  ;;  %vm21698_vm8 = vnez %v21547_v25  ;;  %2687 = vmatmul.f32.vlgmr.msrb.gmra.mxu0 %v21700_v0  ;;  %v21706_v0 = vld [vmem:[#allocation152_spill] sm:$0xff] }
 0x202   : > { %21648 = vst [vmem:[#allocation150_spill] sm:$0xff] %v21647_v60  ;;  %3079 = vmatpush.msra.mxu3 %v13996_v43  ;;  %9696 = vmatpush.msk.msra.mxu2 %vm13950_vm14, %v21026_v14 }
 0x203   : > { %21649 = vst [vmem:[#allocation148_spill] sm:$0xff] %v13901_v15  ;;  %v21666_v15 = vld [vmem:[#allocation142_spill] sm:$0xff]  ;;  %9677 = vmatpush.msk.msra.mxu1 %vm21696_vm4, %v21026_v14  ;;  %3135 = vmatpush.msrb.mxu0 %v13679_v46  ;;  %vm21704_vm4 = vnez %v21560_v21 }
 0x204   : > { %21650 = vst [vmem:[#allocation154_spill] sm:$0xff] %v13910_v55  ;;  %vm13974_vm1 = vcmp.eq.s32.totalorder %v21666_v15, %v13219_v35  ;;  %v3083_v55 = vsub.f32 %v13888_v59, %v13938_v19  ;;  %v9605_v15 = vsel %vm13950_vm14, 1.0, %v21487_v22  ;;  %2881 = vmatmul.f32.vlgmr.msrb.gmra.mxu3 %v21706_v0  ;;  %v21711_v0 = vld [vmem:[#allocation80_spill] sm:$0xff] }
 0x205   : > { %21651 = vst [vmem:[#allocation87_spill] sm:$0xff] %v13914_v41  ;;  %v21668_v63 = vsel %vm13974_vm1, 4294967295, %v21667_v63  ;;  %v9604_v8 = vsel %vm13974_vm1, 1.0, %v21487_v22  ;;  %v14022_v29 = vsub.f32 %v9605_v15, %v9605_v15  ;;  %v14037_v15 = vand.u32 4294901760, %v13998_v20  ;;  %9678 = vmatpush.msk.msra.mxu1 %vm21698_vm8, %v21026_v14  ;;  %9697 = vmatpush.msk.msra.mxu2 %vm13974_vm1, %v21026_v14 }
 0x206   : > { %21655 = vst [vmem:[#allocation156_spill] sm:$0xff] %v21654_v28  ;;  %v14028_v38 = vand.u32 4294901760, %v3083_v55  ;;  %v14039_v16 = vsub.f32 %v9604_v8, %v9604_v8  ;;  %vm21702_vm8 = vnez %v21554_v33  ;;  %3138 = vmatpush.msrb.mxu0 %v13697_v48  ;;  %v21754_v28 = vld [vmem:[#allocation178_spill] sm:$0xff] }
 0x207   : > { %21656 = vst [vmem:[#allocation151_spill] sm:$0xff] %v13933_v45  ;;  %v3089_v45 = vsub.f32 %v13914_v41, %v13961_v27  ;;  %v14057_v8 = vand.u32 4294901760, %v14022_v29  ;;  %v3107_v24 = vsub.f32 %v13998_v20, %v14037_v15  ;;  %9679 = vmatpush.msk.msra.mxu1 %vm21702_vm8, %v21026_v14  ;;  %9698 = vmatpush.msk.msra.mxu2 %vm14011_vm7, %v21026_v14 }
 0x208   : > { %21657 = vst [vmem:[#allocation90_spill] sm:$0xff] %v13938_v19  ;;  %v14007_v19 = vand.u32 4294901760, %v13963_v7  ;;  %3085 = vmatpush.msra.mxu3 %v14028_v38  ;;  %v14074_v13 = vand.u32 4294901760, %v14039_v16  ;;  %3141 = vmatpush.msrb.mxu0 %v13720_v44 }
 0x209   : > { %21658 = vst [vmem:[#allocation159_spill] sm:$0xff] %v13940_v49  ;;  %v14048_v55 = vand.u32 4294901760, %v3089_v45  ;;  %9680 = vmatpush.msk.msra.mxu1 %vm21704_vm4, %v21026_v14  ;;  %vm21710_vm4 = vnez %v21575_v53 }
 0x20a   : > { %21662 = vst [vmem:[#allocation157_spill] sm:$0xff] %v21661_v1  ;;  %v3101_v54 = vsub.f32 %v13963_v7, %v14007_v19  ;;  %3144 = vmatpush.msrb.mxu0 %v13760_v57 }
 0x20b   : > { %21663 = vst [vmem:[#allocation95_spill] sm:$0xff] %v13958_v9  ;;  %v3095_v9 = vsub.f32 %v13940_v49, %v13987_v42  ;;  %3091 = vmatpush.msra.mxu3 %v14048_v55  ;;  %9681 = vmatpush.msk.msra.mxu1 %vm13557_vm9, %v21026_v14  ;;  %vm21712_vm9 = vnez %v21711_v0 }
 0x20c   : > { %21664 = vst [vmem:[#allocation163_spill] sm:$0xff] %v13961_v27  ;;  %3147 = vmatpush.msrb.mxu0 %v13794_v61  ;;  %v21785_v61 = vmov 0 }
 0x20d   : > { %21665 = vst [vmem:[#allocation102_spill] sm:$0xff] %v13963_v7  ;;  %v14063_v45 = vand.u32 4294901760, %v3095_v9  ;;  %v14080_v9 = vand.u32 4294901760, %v3101_v54  ;;  %v14099_v54 = vand.u32 4294901760, %v3107_v24  ;;  %9682 = vmatpush.msk.msra.mxu1 %vm13582_vm15, %v21026_v14 }
 0x20e   : > { %21669 = vst [vmem:[#allocation183_spill] sm:$0xff] %v21668_v63  ;;  %3150 = vmatpush.msrb.mxu0 %v13812_v4  ;;  %v21778_v4 = vld [vmem:[#allocation189_spill] sm:$0xff] }
 0x20f   : > { %21670 = vst [vmem:[#allocation165_spill] sm:$0xff] %v13982_v18  ;;  %v9603_v18 = vsel %vm14011_vm7, 1.0, %v21487_v22  ;;  %3097 = vmatpush.msra.mxu3 %v14063_v45 }
 0x210   : > { %21671 = vst [vmem:[#allocation103_spill] sm:$0xff] %v13987_v42  ;;  %3153 = vmatpush.msrb.mxu0 %v13838_v37 }
 0x211   : > { %21673 = vst [vmem:[#allocation186_spill] sm:$0xff] %v13996_v43  ;;  %v14065_v43 = vsub.f32 %v9603_v18, %v9603_v18  ;;  %v3113_v18 = vsub.f32 %v14022_v29, %v14057_v8  ;;  %3103 = vmatpush.msra.mxu3 %v14080_v9 }
 0x212   : > { %21674 = vst [vmem:[#allocation109_spill] sm:$0xff] %v13998_v20  ;;  %3156 = vmatpush.msrb.mxu0 %v13850_v6  ;;  %v21766_v6 = vmov 0 }
 0x213   : > { %21675 = vst [vmem:[#allocation190_spill] sm:$0xff] %v14007_v19  ;;  %3109 = vmatpush.msra.mxu3 %v14099_v54 }
 0x214   : > { %21679 = vst [vmem:[#allocation116_spill] sm:$0xff] %v21678_v34  ;;  %3159 = vmatpush.msrb.mxu0 %v13888_v59  ;;  %v21768_v34 = vld [vmem:[#allocation164_spill] sm:$0xff] }
 0x215   : > { %21681 = vst [vmem:[#allocation195_spill] sm:$0xff] %v14022_v29 }
 0x216   : > { %21682 = vst [vmem:[#allocation122_spill] sm:$0xff] %v14028_v38  ;;  %v14093_v38 = vand.u32 4294901760, %v14065_v43  ;;  %3162 = vmatpush.msrb.mxu0 %v13914_v41  ;;  %v21755_v41 = vmov 0 }
 0x217   : > { %21684 = vst [vmem:[#allocation198_spill] sm:$0xff] %v14037_v15 }
 0x218   : > { %21685 = vst [vmem:[#allocation127_spill] sm:$0xff] %v14039_v16  ;;  %v3125_v24 = vsub.f32 %v14065_v43, %v14093_v38  ;;  %3165 = vmatpush.msrb.mxu0 %v13940_v49 }
 0x219   : > { %21686 = vst [vmem:[#allocation200_spill] sm:$0xff] %v14048_v55  ;;  %v3119_v55 = vsub.f32 %v14039_v16, %v14074_v13 }
 0x21a   : > { %21688 = vst [vmem:[#allocation131_spill] sm:$0xff] %v14057_v8  ;;  %3168 = vmatpush.msrb.mxu0 %v13963_v7 }
 0x21b   : > { %21689 = vst [vmem:[#allocation204_spill] sm:$0xff] %v14063_v45  ;;  %v14111_v45 = vand.u32 4294901760, %v3113_v18  ;;  %v21703_v18 = vld [vmem:[#allocation143_spill] sm:$0xff] }
 0x21c   : > { %21690 = vst [vmem:[#allocation137_spill] sm:$0xff] %v14065_v43  ;;  %2842 = vmatmul.f32.vlgmr.msrb.gmra.mxu2 %v21703_v18  ;;  %v21709_v18 = vld [vmem:[#allocation110_spill] sm:$0xff]  ;;  %3171 = vmatpush.msrb.mxu0 %v13998_v20 }
 0x21d   : > { %21692 = vst [vmem:[#allocation206_spill] sm:$0xff] %v14074_v13  ;;  %3115 = vmatpush.msra.mxu3 %v14111_v45 }
 0x21e   : > { %21693 = vst [vmem:[#allocation140_spill] sm:$0xff] %v14080_v9  ;;  %v14121_v9 = vand.u32 4294901760, %v3119_v55  ;;  %v14135_v55 = vand.u32 4294901760, %v3125_v24  ;;  %v21708_v24 = vld [vmem:[#allocation133_spill] sm:$0xff]  ;;  %3174 = vmatpush.msrb.mxu0 %v14022_v29  ;;  %v21745_v29 = vmov 0 }
 0x21f   : > { %21695 = vst [vmem:[#allocation144_spill] sm:$0xff] %v14093_v38  ;;  %2788 = vmatmul.f32.vlgmr.msrb.gmra.mxu1 %v21708_v24  ;;  %2950 = vmatmul.f32.vlgmr.msra.gmra.mxu0 %v21708_v24 }
 0x220   : > { %21697 = vst [vmem:[#allocation153_spill] sm:$0xff] %v14099_v54  ;;  %3121 = vmatpush.msra.mxu3 %v14121_v9  ;;  %9699 = vmatpush.msk.msrb.mxu1 %vm21710_vm4, %v21026_v14  ;;  %v21735_v54 = vld [vmem:[#allocation170_spill] sm:$0xff] }
 0x221   : > { %21699 = vst [vmem:[#allocation155_spill] sm:$0xff] %v14111_v45  ;;  %v21707_v45 = vld [vmem:[#allocation107_spill] sm:$0xff]  ;;  %3177 = vmatpush.msrb.mxu0 %v14039_v16 }
 0x222   : > { %21701 = vst [vmem:[#allocation160_spill] sm:$0xff] %v14121_v9  ;;  %3229 = vmatpush.msrb.mxu2 %v21707_v45  ;;  %3127 = vmatpush.msra.mxu3 %v14135_v55  ;;  %v21714_v9 = vld [vmem:[#allocation124_spill] sm:$0xff]  ;;  %v21736_v45 = vmov 0  ;;  %v21740_v16 = vld [vmem:[#allocation171_spill] sm:$0xff] }
 0x223   : > { %21705 = vst [vmem:[#allocation172_spill] sm:$0xff] %v14135_v55  ;;  %v21713_v55 = vld [vmem:[#allocation166_spill] sm:$0xff]  ;;  %9700 = vmatpush.msk.msrb.mxu1 %vm21712_vm9, %v21026_v14  ;;  %3180 = vmatpush.msrb.mxu0 %v14065_v43  ;;  %v21741_v43 = vmov 0 }
 0x224   : > { %3233 = vmatpush.msrb.mxu2 %v21709_v18  ;;  %9715 = vmatpush.msk.msrb.mxu3 %vm21710_vm4, %v21026_v14  ;;  %v21732_v18 = vmov 0 }
 0x225   : > { %3028 = vmatmul.f32.vlgmr.msra.gmra.mxu2 %v21713_v55  ;;  %9701 = vmatpush.msk.msrb.mxu1 %vm13644_vm5, %v21026_v14  ;;  %v21716_v55 = vld [vmem:[#allocation134_spill] sm:$0xff] }
 0x226   : > { %3237 = vmatpush.msrb.mxu2 %v13775_v26  ;;  %9716 = vmatpush.msk.msrb.mxu3 %vm21712_vm9, %v21026_v14  ;;  %v21715_v26 = vld [vmem:[#allocation158_spill] sm:$0xff]  ;;  %vm14488_vm9 = vcmp.eq.s32.totalorder %v21778_v4, %v13219_v35 }
 0x227   : > { %3129 = vmatmul.f32.vlgmr.msra.gmra.mxu3 %v21715_v26  ;;  %2987 = vmatmul.f32.vlgmr.msra.gmra.mxu1 %v21708_v24  ;;  %v21718_v24 = vld [vmem:[#allocation148_spill] sm:$0xff]  ;;  %v21780_v30 = vsel %vm14488_vm9, 4294967295, %v21779_v30 }
 0x228   : > { %3241 = vmatpush.msrb.mxu2 %v21714_v9  ;;  %9717 = vmatpush.msk.msrb.mxu3 %vm13644_vm5, %v21026_v14  ;;  %vm21717_vm5 = vnez %v21604_v11  ;;  %v21731_v9 = vld [vmem:[#allocation169_spill] sm:$0xff]  ;;  %v21790_v11 = vmov 0 }
 0x229   : > { %9702 = vmatpush.msk.msrb.mxu1 %vm13683_vm6, %v21026_v14 }
 0x22a   : > { %3245 = vmatpush.msrb.mxu2 %v21716_v55  ;;  %9718 = vmatpush.msk.msrb.mxu3 %vm13683_vm6, %v21026_v14  ;;  %vm21719_vm6 = vnez %v21611_v51  ;;  %v21725_v55 = vmov 0 }
 0x22b   : > { %9703 = vmatpush.msk.msrb.mxu1 %vm13709_vm3, %v21026_v14 }
 0x22c   : > { %3249 = vmatpush.msrb.mxu2 %v13864_v39  ;;  %9719 = vmatpush.msk.msrb.mxu3 %vm13709_vm3, %v21026_v14  ;;  %v21722_v39 = vmov 0 }
 0x22d   : > { %9704 = vmatpush.msk.msrb.mxu1 %vm21717_vm5, %v21026_v14 }
 0x22e   : > { %3253 = vmatpush.msrb.mxu2 %v13886_v12  ;;  %9720 = vmatpush.msk.msrb.mxu3 %vm21717_vm5, %v21026_v14  ;;  %v21720_v12 = vld [vmem:[#allocation90_spill] sm:$0xff] }
 0x22f   : > { %9705 = vmatpush.msk.msrb.mxu1 %vm21719_vm6, %v21026_v14 }
 0x230   : > { %3257 = vmatpush.msrb.mxu2 %v21718_v24  ;;  %9721 = vmatpush.msk.msrb.mxu3 %vm21719_vm6, %v21026_v14  ;;  %v21721_v24 = vld [vmem:[#allocation70_spill] sm:$0xff] }
 0x231   : > { %vm14219_vm3 = vcmp.eq.s32.totalorder %v21721_v24, %v13219_v35  ;;  %9706 = vmatpush.msk.msrb.mxu1 %vm13782_vm10, %v21026_v14 }
 0x232   : > { %3261 = vmatpush.msrb.mxu2 %v21720_v12  ;;  %9722 = vmatpush.msk.msrb.mxu3 %vm13782_vm10, %v21026_v14  ;;  %v21723_v39 = vsel %vm14219_vm3, 4294967295, %v21722_v39  ;;  %v21724_v12 = vld [vmem:[#allocation167_spill] sm:$0xff]  ;;  %v9634_v24 = vsel %vm14219_vm3, 1.0, %v21487_v22 }
 0x233   : > { %vm14227_vm5 = vcmp.eq.s32.totalorder %v21724_v12, %v13219_v35  ;;  %9707 = vmatpush.msk.msrb.mxu1 %vm13816_vm11, %v21026_v14  ;;  %v21727_v12 = vld [vmem:[#allocation168_spill] sm:$0xff]  ;;  %9731 = vmatpush.msk.msra.mxu0 %vm14219_vm3, %v21026_v14 }
 0x234   : > { %3265 = vmatpush.msrb.mxu2 %v13961_v27  ;;  %v21726_v55 = vsel %vm14227_vm5, 4294967295, %v21725_v55  ;;  %9723 = vmatpush.msk.msrb.mxu3 %vm13816_vm11, %v21026_v14  ;;  %vm14250_vm10 = vcmp.eq.s32.totalorder %v21727_v12, %v13219_v35  ;;  %v21728_v27 = vmov 0  ;;  %v14265_v12 = vsub.f32 %v9634_v24, %v9634_v24 }
 0x235   : > { %v21729_v27 = vsel %vm14250_vm10, 4294967295, %v21728_v27  ;;  %9708 = vmatpush.msk.msrb.mxu1 %vm13842_vm13, %v21026_v14  ;;  %vm14269_vm11 = vcmp.eq.s32.totalorder %v21731_v9, %v13219_v35  ;;  %v9632_v24 = vsel %vm14250_vm10, 1.0, %v21487_v22  ;;  %9732 = vmatpush.msk.msra.mxu0 %vm14227_vm5, %v21026_v14 }
 0x236   : > { %3269 = vmatpush.msrb.mxu2 %v13987_v42  ;;  %9724 = vmatpush.msk.msrb.mxu3 %vm13842_vm13, %v21026_v14  ;;  %v9633_v42 = vsel %vm14227_vm5, 1.0, %v21487_v22  ;;  %21730 = vst [vmem:[#allocation173_spill] sm:$0xff] %v14265_v12  ;;  %v21733_v18 = vsel %vm14269_vm11, 4294967295, %v21732_v18  ;;  %vm14279_vm13 = vcmp.eq.s32.totalorder %v21735_v54, %v13219_v35  ;;  %v21738_v54 = vld [vmem:[#allocation162_spill] sm:$0xff]  ;;  %v14302_v9 = vand.u32 4294901760, %v14265_v12 }
 0x237   : > { %v21737_v45 = vsel %vm14279_vm13, 4294967295, %v21736_v45  ;;  %9709 = vmatpush.msk.msrb.mxu1 %vm13868_vm0, %v21026_v14  ;;  %3183 = vmatmul.f32.vlgmr.msrb.gmra.mxu0 %v21738_v54  ;;  %v21744_v54 = vld [vmem:[#allocation174_spill] sm:$0xff] }
 0x238   : > { %3273 = vmatpush.msrb.mxu2 %v14007_v19  ;;  %9725 = vmatpush.msk.msrb.mxu3 %vm13868_vm0, %v21026_v14  ;;  %v14275_v19 = vsub.f32 %v9633_v42, %v9633_v42  ;;  %v9631_v42 = vsel %vm14269_vm11, 1.0, %v21487_v22  ;;  %vm14308_vm0 = vcmp.eq.s32.totalorder %v21740_v16, %v13219_v35 }
 0x239   : > { %9710 = vmatpush.msk.msrb.mxu1 %vm13892_vm2, %v21026_v14  ;;  %v21742_v43 = vsel %vm14308_vm0, 4294967295, %v21741_v43  ;;  %v14328_v16 = vsub.f32 %v9631_v42, %v9631_v42  ;;  %v21749_v42 = vmov 0  ;;  %9733 = vmatpush.msk.msra.mxu0 %vm14250_vm10, %v21026_v14 }
 0x23a   : > { %3277 = vmatpush.msrb.mxu2 %v14037_v15  ;;  %21734 = vst [vmem:[#allocation175_spill] sm:$0xff] %v14275_v19  ;;  %9726 = vmatpush.msk.msrb.mxu3 %vm13892_vm2, %v21026_v14  ;;  %v14304_v15 = vsub.f32 %v9632_v24, %v9632_v24  ;;  %v14322_v24 = vand.u32 4294901760, %v14275_v19  ;;  %vm14332_vm2 = vcmp.eq.s32.totalorder %v21744_v54, %v13219_v35  ;;  %v9629_v54 = vsel %vm14308_vm0, 1.0, %v21487_v22 }
 0x23b   : > { %9711 = vmatpush.msk.msrb.mxu1 %vm13922_vm12, %v21026_v14  ;;  %21743 = vst [vmem:[#allocation179_spill] sm:$0xff] %v14328_v16  ;;  %v21746_v29 = vsel %vm14332_vm2, 4294967295, %v21745_v29  ;;  %v14378_v1 = vand.u32 4294901760, %v14328_v16  ;;  %v14380_v49 = vsub.f32 %v9629_v54, %v9629_v54  ;;  %9734 = vmatpush.msk.msra.mxu0 %vm14269_vm11, %v21026_v14 }
 0x23c   : > { %3281 = vmatpush.msrb.mxu2 %v14057_v8  ;;  %21739 = vst [vmem:[#allocation177_spill] sm:$0xff] %v14304_v15  ;;  %v9630_v8 = vsel %vm14279_vm13, 1.0, %v21487_v22  ;;  %9727 = vmatpush.msk.msrb.mxu3 %vm13922_vm12, %v21026_v14  ;;  %v14360_v7 = vand.u32 4294901760, %v14304_v15 }
 0x23d   : > { %v14342_v20 = vsub.f32 %v9630_v8, %v9630_v8  ;;  %9712 = vmatpush.msk.msrb.mxu1 %vm13950_vm14, %v21026_v14  ;;  %v3376_v8 = vsub.f32 %v14265_v12, %v14302_v9  ;;  %21752 = vst [vmem:[#allocation188_spill] sm:$0xff] %v14378_v1  ;;  %9735 = vmatpush.msk.msra.mxu0 %vm14279_vm13, %v21026_v14 }
 0x23e   : > { %3285 = vmatpush.msrb.mxu2 %v14074_v13  ;;  %9728 = vmatpush.msk.msrb.mxu3 %vm13950_vm14, %v21026_v14  ;;  %v21748_v13 = vld [vmem:[#allocation176_spill] sm:$0xff]  ;;  %21751 = vst [vmem:[#allocation184_spill] sm:$0xff] %v14360_v7  ;;  %vm14384_vm14 = vcmp.eq.s32.totalorder %v21754_v28, %v13219_v35  ;;  %v3388_v28 = vsub.f32 %v14304_v15, %v14360_v7 }
 0x23f   : > { %21747 = vst [vmem:[#allocation181_spill] sm:$0xff] %v14342_v20  ;;  %vm14346_vm12 = vcmp.eq.s32.totalorder %v21748_v13, %v13219_v35  ;;  %v3382_v13 = vsub.f32 %v14275_v19, %v14322_v24  ;;  %9713 = vmatpush.msk.msrb.mxu1 %vm13974_vm1, %v21026_v14  ;;  %v21756_v41 = vsel %vm14384_vm14, 4294967295, %v21755_v41  ;;  %v14396_v63 = vand.u32 4294901760, %v14342_v20  ;;  %9736 = vmatpush.msk.msra.mxu0 %vm14308_vm0, %v21026_v14 }
 0x240   : > { %v21750_v42 = vsel %vm14346_vm12, 4294967295, %v21749_v42  ;;  %3289 = vmatpush.msrb.mxu2 %v14093_v38  ;;  %9729 = vmatpush.msk.msrb.mxu3 %vm13974_vm1, %v21026_v14  ;;  %v9628_v38 = vsel %vm14332_vm2, 1.0, %v21487_v22  ;;  %21753 = vst [vmem:[#allocation187_spill] sm:$0xff] %v14380_v49  ;;  %v9627_v60 = vsel %vm14346_vm12, 1.0, %v21487_v22  ;;  %v14402_v54 = vand.u32 4294901760, %v3376_v8 }
 0x241   : > { %3291 = vmatmul.f32.vlgmr.msrb.gmra.mxu2 %v21715_v26  ;;  %21757 = vst [vmem:[#allocation192_spill] sm:$0xff] %v14396_v63  ;;  %v14406_v59 = vsub.f32 %v9628_v38, %v9628_v38  ;;  %v9626_v8 = vsel %vm14384_vm14, 1.0, %v21487_v22  ;;  %9714 = vmatpush.msk.msrb.mxu1 %vm14011_vm7, %v21026_v14  ;;  %v14429_v38 = vand.u32 4294901760, %v3382_v13  ;;  %v3400_v13 = vsub.f32 %v14342_v20, %v14396_v63 }
 0x242   : > { %3476 = vmatpush.msra.mxu2 %v14265_v12  ;;  %9730 = vmatpush.msk.msrb.mxu3 %vm14011_vm7, %v21026_v14  ;;  %21758 = vst [vmem:[#allocation191_spill] sm:$0xff] %v14402_v54  ;;  %v21760_v12 = vld [vmem:[#allocation180_spill] sm:$0xff] }
 0x243   : > { %3328 = vmatmul.f32.vlgmr.msrb.gmra.mxu3 %v21715_v26  ;;  %21759 = vst [vmem:[#allocation194_spill] sm:$0xff] %v14406_v59  ;;  %vm14410_vm1 = vcmp.eq.s32.totalorder %v21760_v12, %v13219_v35  ;;  %v14418_v26 = vsub.f32 %v9627_v60, %v9627_v60  ;;  %v3394_v12 = vsub.f32 %v14328_v16, %v14378_v1  ;;  %v14434_v60 = vand.u32 4294901760, %v14380_v49 }
 0x244   : > { %v21762_v32 = vsel %vm14410_vm1, 4294967295, %v21761_v32  ;;  %3479 = vmatpush.msra.mxu2 %v14275_v19  ;;  %9747 = vmatpush.msk.msra.mxu3 %vm14219_vm3, %v21026_v14  ;;  %21764 = vst [vmem:[#allocation201_spill] sm:$0xff] %v14429_v38  ;;  %v21765_v19 = vld [vmem:[#allocation182_spill] sm:$0xff]  ;;  %v9625_v23 = vsel %vm14410_vm1, 1.0, %v21487_v22  ;;  %v14456_v37 = vand.u32 4294901760, %v14406_v59 }
 0x245   : > { %21763 = vst [vmem:[#allocation199_spill] sm:$0xff] %v14418_v26  ;;  %vm14438_vm6 = vcmp.eq.s32.totalorder %v21765_v19, %v13219_v35  ;;  %3222 = vmatmul.f32.vlgmr.msrb.gmra.mxu1 %v21768_v34  ;;  %v14453_v19 = vand.u32 4294901760, %v3388_v28  ;;  %v14458_v34 = vsub.f32 %v9626_v8, %v9626_v8  ;;  %v14471_v28 = vand.u32 4294901760, %v14418_v26  ;;  %9737 = vmatpush.msk.msra.mxu0 %vm14332_vm2, %v21026_v14 }
 0x246   : > { %v21767_v6 = vsel %vm14438_vm6, 4294967295, %v21766_v6  ;;  %3482 = vmatpush.msra.mxu2 %v14304_v15  ;;  %3378 = vmatpush.msra.mxu1 %v14402_v54  ;;  %21770 = vst [vmem:[#allocation208_spill] sm:$0xff] %v14456_v37  ;;  %v21772_v15 = vld [vmem:[#allocation185_spill] sm:$0xff]  ;;  %v9624_v8 = vsel %vm14438_vm6, 1.0, %v21487_v22  ;;  %v3406_v54 = vsub.f32 %v14380_v49, %v14434_v60 }
 0x247   : > { %9748 = vmatpush.msk.msra.mxu3 %vm14227_vm5, %v21026_v14  ;;  %21769 = vst [vmem:[#allocation205_spill] sm:$0xff] %v14453_v19  ;;  %vm14462_vm7 = vcmp.eq.s32.totalorder %v21772_v15, %v13219_v35  ;;  %v14480_v15 = vand.u32 4294901760, %v3394_v12  ;;  %v3412_v35 = vsub.f32 %v14406_v59, %v14456_v37  ;;  %v14510_v4 = vsub.f32 %v9624_v8, %v9624_v8 }
 0x248   : > { %21771 = vst [vmem:[#allocation210_spill] sm:$0xff] %v14458_v34  ;;  %v21774_v47 = vsel %vm14462_vm7, 4294967295, %v21773_v47  ;;  %3485 = vmatpush.msra.mxu2 %v14328_v16  ;;  %3384 = vmatpush.msra.mxu1 %v14429_v38  ;;  %v14484_v16 = vsub.f32 %v9625_v23, %v9625_v23  ;;  %v14496_v38 = vand.u32 4294901760, %v3400_v13  ;;  %v9623_v12 = vsel %vm14462_vm7, 1.0, %v21487_v22  ;;  %v10688_v13 = vld [vmem:[%s11026_s4 + $0x1] ss:$0 sm:$0xff] }
 0x249   : > { %21775 = vst [vmem:[#allocation209_spill] sm:$0xff] %v14471_v28  ;;  %9749 = vmatpush.msk.msra.mxu3 %vm14250_vm10, %v21026_v14  ;;  %v14508_v23 = vand.u32 4294901760, %v14458_v34  ;;  %9738 = vmatpush.msk.msra.mxu0 %vm14346_vm12, %v21026_v14  ;;  %v9622_v8 = vsel %vm14488_vm9, 1.0, %v21487_v22  ;;  %v14536_v57 = vsub.f32 %v9623_v12, %v9623_v12  ;;  %v14554_v12 = vand.u32 4294901760, %v3412_v35 }
 0x24a   : > { %21776 = vst [vmem:[#allocation212_spill] sm:$0xff] %v14480_v15  ;;  %3488 = vmatpush.msra.mxu2 %v14342_v20  ;;  %3390 = vmatpush.msra.mxu1 %v14453_v19  ;;  %v21784_v20 = vld [vmem:[#allocation193_spill] sm:$0xff]  ;;  %v3418_v19 = vsub.f32 %v14418_v26, %v14471_v28  ;;  %v14534_v51 = vand.u32 4294901760, %v14484_v16  ;;  %v14561_v44 = vsub.f32 %v9622_v8, %v9622_v8 }
 0x24b   : > { %21777 = vst [vmem:[#allocation211_spill] sm:$0xff] %v14484_v16  ;;  %9750 = vmatpush.msk.msra.mxu3 %vm14269_vm11, %v21026_v14  ;;  %vm14514_vm4 = vcmp.eq.s32.totalorder %v21784_v20, %v10688_v13  ;;  %v14531_v20 = vand.u32 4294901760, %v3406_v54  ;;  %9739 = vmatpush.msk.msra.mxu0 %vm14384_vm14, %v21026_v14 }
 0x24c   : > { %21781 = vst [vmem:[#allocation213_spill] sm:$0xff] %v14496_v38  ;;  %v21786_v61 = vsel %vm14514_vm4, 4294967295, %v21785_v61  ;;  %3491 = vmatpush.msra.mxu2 %v14380_v49  ;;  %3396 = vmatpush.msra.mxu1 %v14480_v15  ;;  %v21789_v49 = vld [vmem:[#allocation196_spill] sm:$0xff]  ;;  %v9621_v54 = vsel %vm14514_vm4, 1.0, %v21487_v22  ;;  %v14559_v15 = vand.u32 4294901760, %v14510_v4  ;;  %v3430_v8 = vsub.f32 %v14484_v16, %v14534_v51 }
 0x24d   : > { %21782 = vst [vmem:[#allocation215_spill] sm:$0xff] %v14508_v23  ;;  %9751 = vmatpush.msk.msra.mxu3 %vm14279_vm13, %v21026_v14  ;;  %vm14539_vm15 = vcmp.eq.s32.totalorder %v21789_v49, %v10688_v13  ;;  %v3424_v49 = vsub.f32 %v14458_v34, %v14508_v23  ;;  %9740 = vmatpush.msk.msra.mxu0 %vm14410_vm1, %v21026_v14 }
 0x24e   : > { %21783 = vst [vmem:[#allocation80_spill] sm:$0xff] %v14510_v4  ;;  %v21791_v11 = vsel %vm14539_vm15, 4294967295, %v21790_v11  ;;  %3494 = vmatpush.msra.mxu2 %v14406_v59  ;;  %3402 = vmatpush.msra.mxu1 %v14496_v38  ;;  %v14567_v59 = vand.u32 4294901760, %v3418_v19  ;;  %v9620_v35 = vsel %vm14539_vm15, 1.0, %v21487_v22  ;;  %v21795_v38 = vld [vmem:[#allocation202_spill] sm:$0xff]  ;;  %v14584_v19 = vand.u32 4294901760, %v14536_v57 }
 0x24f   : > { %21787 = vst [vmem:[#allocation216_spill] sm:$0xff] %v14531_v20  ;;  %9752 = vmatpush.msk.msra.mxu3 %vm14308_vm0, %v21026_v14  ;;  %vm14579_vm8 = vcmp.eq.s32.totalorder %v21795_v38, %v10688_v13  ;;  %9741 = vmatpush.msk.msra.mxu0 %vm14438_vm6, %v21026_v14  ;;  %v14596_v13 = vand.u32 4294901760, %v3424_v49  ;;  %v3436_v38 = vsub.f32 %v14510_v4, %v14559_v15  ;;  %v14616_v49 = vand.u32 4294901760, %v3430_v8 }
 0x250   : > { %21788 = vst [vmem:[#allocation217_spill] sm:$0xff] %v14536_v57  ;;  %3497 = vmatpush.msra.mxu2 %v14418_v26  ;;  %3408 = vmatpush.msra.mxu1 %v14531_v20  ;;  %v21797_v5 = vsel %vm14579_vm8, 4294967295, %v21796_v5  ;;  %v14586_v26 = vsub.f32 %v9621_v54, %v9621_v54  ;;  %v14601_v54 = vand.u32 4294901760, %v14561_v44  ;;  %v14603_v20 = vsub.f32 %v9620_v35, %v9620_v35 }
 0x251   : > { %21792 = vst [vmem:[#allocation218_spill] sm:$0xff] %v14554_v12  ;;  %9753 = vmatpush.msk.msra.mxu3 %vm14332_vm2, %v21026_v14  ;;  %9742 = vmatpush.msk.msra.mxu0 %vm14462_vm7, %v21026_v14  ;;  %v3442_v35 = vsub.f32 %v14536_v57, %v14584_v19  ;;  %v14631_v8 = vand.u32 4294901760, %v3436_v38 }
 0x252   : > { %21793 = vst [vmem:[#allocation219_spill] sm:$0xff] %v14561_v44  ;;  %3500 = vmatpush.msra.mxu2 %v14458_v34  ;;  %3414 = vmatpush.msra.mxu1 %v14554_v12  ;;  %v9619_v34 = vsel %vm14579_vm8, 1.0, %v21487_v22  ;;  %v14621_v12 = vand.u32 4294901760, %v14586_v26  ;;  %v3448_v22 = vsub.f32 %v14561_v44, %v14601_v54 }
 0x253   : > { %21794 = vst [vmem:[#allocation220_spill] sm:$0xff] %v14567_v59  ;;  %9754 = vmatpush.msk.msra.mxu3 %vm14346_vm12, %v21026_v14  ;;  %9743 = vmatpush.msk.msra.mxu0 %vm14488_vm9, %v21026_v14  ;;  %v14648_v38 = vand.u32 4294901760, %v3442_v35 }
 0x254   : > { %21798 = vst [vmem:[#allocation221_spill] sm:$0xff] %v14586_v26  ;;  %3503 = vmatpush.msra.mxu2 %v14484_v16  ;;  %3420 = vmatpush.msra.mxu1 %v14567_v59  ;;  %v14635_v16 = vsub.f32 %v9619_v34, %v9619_v34  ;;  %v14638_v59 = vand.u32 4294901760, %v14603_v20  ;;  %v3454_v34 = vsub.f32 %v14586_v26, %v14621_v12 }
 0x255   : > { %21799 = vst [vmem:[#allocation222_spill] sm:$0xff] %v14601_v54  ;;  %9755 = vmatpush.msk.msra.mxu3 %vm14384_vm14, %v21026_v14  ;;  %9744 = vmatpush.msk.msra.mxu0 %vm14514_vm4, %v21026_v14 }
 0x256   : > { %21800 = vst [vmem:[#allocation223_spill] sm:$0xff] %v14603_v20  ;;  %3506 = vmatpush.msra.mxu2 %v14510_v4  ;;  %3426 = vmatpush.msra.mxu1 %v14596_v13  ;;  %v3460_v35 = vsub.f32 %v14603_v20, %v14638_v59  ;;  %v14665_v4 = vand.u32 4294901760, %v14635_v16 }
 0x257   : > { %21801 = vst [vmem:[#allocation224_spill] sm:$0xff] %v14621_v12  ;;  %9756 = vmatpush.msk.msra.mxu3 %vm14410_vm1, %v21026_v14  ;;  %9745 = vmatpush.msk.msra.mxu0 %vm14539_vm15, %v21026_v14 }
 0x258   : > { %21802 = vst [vmem:[#allocation225_spill] sm:$0xff] %v14631_v8  ;;  %3509 = vmatpush.msra.mxu2 %v14536_v57  ;;  %3432 = vmatpush.msra.mxu1 %v14616_v49  ;;  %v14660_v57 = vand.u32 4294901760, %v3448_v22  ;;  %v14681_v22 = vand.u32 4294901760, %v3460_v35 }
 0x259   : > { %21803 = vst [vmem:[#allocation226_spill] sm:$0xff] %v14635_v16  ;;  %9757 = vmatpush.msk.msra.mxu3 %vm14438_vm6, %v21026_v14  ;;  %9746 = vmatpush.msk.msra.mxu0 %vm14579_vm8, %v21026_v14 }
 0x25a   : > { %21804 = vst [vmem:[#allocation227_spill] sm:$0xff] %v14638_v59  ;;  %3512 = vmatpush.msra.mxu2 %v14561_v44  ;;  %3438 = vmatpush.msra.mxu1 %v14631_v8  ;;  %v21806_v44 = vld [vmem:[#allocation214_spill] sm:$0xff]  ;;  %v14673_v8 = vand.u32 4294901760, %v3454_v34  ;;  %v21807_v34 = vld [vmem:[#allocation203_spill] sm:$0xff] }
 0x25b   : > { %9758 = vmatpush.msk.msra.mxu3 %vm14462_vm7, %v21026_v14  ;;  %21805 = vst [vmem:[#allocation228_spill] sm:$0xff] %v14665_v4  ;;  %3369 = vmatmul.f32.vlgmr.msra.gmra.mxu0 %v21806_v44  ;;  %v21808_v44 = vld [vmem:[#allocation56_spill] sm:$0xff] }
 0x25c   : > { %3515 = vmatpush.msra.mxu2 %v14586_v26  ;;  %3444 = vmatpush.msra.mxu1 %v14648_v38  ;;  %v3466_v26 = vsub.f32 %v14635_v16, %v14665_v4 }
 0x25d   : > { %9759 = vmatpush.msk.msra.mxu3 %vm14488_vm9, %v21026_v14  ;;  %3570 = vmatpush.msrb.mxu0 %v14302_v9 }
 0x25e   : > { %3450 = vmatpush.msra.mxu1 %v14660_v57  ;;  %3518 = vmatpush.msra.mxu2 %v14603_v20  ;;  %v14697_v35 = vand.u32 4294901760, %v3466_v26  ;;  %v21811_v20 = vld [vmem:[#allocation59_spill] sm:$0xff]  ;;  %v21814_v26 = vld [vmem:[#allocation197_spill] sm:$0xff] }
 0x25f   : > { %9760 = vmatpush.msk.msra.mxu3 %vm14514_vm4, %v21026_v14  ;;  %3574 = vmatpush.msrb.mxu0 %v14322_v24  ;;  %vm21809_vm4 = vnez %v21808_v44 }
 0x260   : > { %3456 = vmatpush.msra.mxu1 %v14673_v8  ;;  %3521 = vmatpush.msra.mxu2 %v14635_v16  ;;  %v21810_v16 = vld [vmem:[#allocation207_spill] sm:$0xff] }
 0x261   : > { %9761 = vmatpush.msk.msra.mxu3 %vm14539_vm15, %v21026_v14  ;;  %3578 = vmatpush.msrb.mxu0 %v14360_v7  ;;  %vm21812_vm15 = vnez %v21811_v20  ;;  %v21815_v7 = vld [vmem:[#allocation63_spill] sm:$0xff] }
 0x262   : > { %3524 = vmatmul.f32.vlgmr.msra.gmra.mxu2 %v21807_v34  ;;  %3462 = vmatpush.msra.mxu1 %v14681_v22  ;;  %v21813_v34 = vld [vmem:[#allocation40_spill] sm:$0xff] }
 0x263   : > { %9779 = vmatpush.msk.msrb.mxu2 %vm21809_vm4, %v21026_v14  ;;  %9762 = vmatpush.msk.msra.mxu3 %vm14579_vm8, %v21026_v14  ;;  %vm21816_vm4 = vnez %v21815_v7 }
 0x264   : > { %3582 = vmatpush.msrb.mxu0 %v14378_v1  ;;  %3563 = vmatmul.f32.vlgmr.msra.gmra.mxu3 %v21810_v16  ;;  %v21817_v16 = vld [vmem:[#allocation42_spill] sm:$0xff]  ;;  %v21821_v1 = vld [vmem:[#allocation76_spill] sm:$0xff] }
 0x265   : > { %9780 = vmatpush.msk.msrb.mxu2 %vm21812_vm15, %v21026_v14  ;;  %3719 = vmatpush.msrb.mxu3 %v21813_v34  ;;  %v21818_v34 = vld [vmem:[#allocation69_spill] sm:$0xff] }
 0x266   : > { %3468 = vmatpush.msra.mxu1 %v14697_v35  ;;  %3586 = vmatpush.msrb.mxu0 %v14396_v63  ;;  %vm21819_vm15 = vnez %v21818_v34  ;;  %v21820_v63 = vld [vmem:[#allocation48_spill] sm:$0xff] }
 0x267   : > { %3470 = vmatmul.f32.vlgmr.msra.gmra.mxu1 %v21814_v26  ;;  %9781 = vmatpush.msk.msrb.mxu2 %vm21816_vm4, %v21026_v14  ;;  %vm21822_vm4 = vnez %v21821_v1 }
 0x268   : > { %9763 = vmatpush.msk.msrb.mxu1 %vm14219_vm3, %v21026_v14  ;;  %3725 = vmatpush.msrb.mxu3 %v21817_v16  ;;  %v21823_v16 = vld [vmem:[#allocation53_spill] sm:$0xff]  ;;  %vm21824_vm3 = vnez %v21512_v52  ;;  %v21892_v52 = vld [vmem:[#allocation62_spill] sm:$0xff] }
 0x269   : > { %3590 = vmatpush.msrb.mxu0 %v14434_v60  ;;  %9782 = vmatpush.msk.msrb.mxu2 %vm21819_vm15, %v21026_v14 }
 0x26a   : > { %9764 = vmatpush.msk.msrb.mxu1 %vm14227_vm5, %v21026_v14  ;;  %3731 = vmatpush.msrb.mxu3 %v21820_v63  ;;  %v21825_v63 = vld [vmem:[#allocation60_spill] sm:$0xff]  ;;  %vm21826_vm5 = vnez %v21517_v2  ;;  %v21895_v2 = vld [vmem:[#allocation73_spill] sm:$0xff] }
 0x26b   : > { %3594 = vmatpush.msrb.mxu0 %v14456_v37  ;;  %9783 = vmatpush.msk.msrb.mxu2 %vm21822_vm4, %v21026_v14  ;;  %v14749_v37 = vpop.f32.mrf.mxu1 }
 0x26c   : > { %9765 = vmatpush.msk.msrb.mxu1 %vm14250_vm10, %v21026_v14  ;;  %3737 = vmatpush.msrb.mxu3 %v21823_v16  ;;  %21827 = vst [vmem:[#allocation56_spill] sm:$0xff] %v14749_v37  ;;  %v21828_v16 = vld [vmem:[#allocation68_spill] sm:$0xff]  ;;  %v21833_v37 = vld [vmem:[#allocation66_spill] sm:$0xff]  ;;  %vm21836_vm10 = vnez %v21534_v3 }
 0x26d   : > { %3598 = vmatpush.msrb.mxu0 %v14471_v28  ;;  %9784 = vmatpush.msk.msrb.mxu2 %vm21824_vm3, %v21026_v14  ;;  %v21829_v28 = vld [vmem:[#allocation36_spill] sm:$0xff] }
 0x26e   : > { %9766 = vmatpush.msk.msrb.mxu1 %vm14269_vm11, %v21026_v14  ;;  %3743 = vmatpush.msrb.mxu3 %v21825_v63  ;;  %vm21830_vm11 = vnez %v21829_v28  ;;  %v14759_v63 = vpop.f32.mrf.mxu0 }
 0x26f   : > { %3602 = vmatpush.msrb.mxu0 %v14508_v23  ;;  %9785 = vmatpush.msk.msrb.mxu2 %vm21826_vm5, %v21026_v14  ;;  %21831 = vst [vmem:[#allocation59_spill] sm:$0xff] %v14759_v63  ;;  %v14761_v23 = vpop.f32.mrf.mxu2 }
 0x270   : > { %9767 = vmatpush.msk.msrb.mxu1 %vm14279_vm13, %v21026_v14  ;;  %3749 = vmatpush.msrb.mxu3 %v21828_v16  ;;  %21832 = vst [vmem:[#allocation40_spill] sm:$0xff] %v14761_v23  ;;  %vm21834_vm13 = vnez %v21529_v31  ;;  %v21835_v16 = vld [vmem:[#allocation82_spill] sm:$0xff]  ;;  %v14779_v23 = vpop.f32.mrf.mxu3 }
 0x271   : > { %3606 = vmatpush.msrb.mxu0 %v14534_v51  ;;  %9786 = vmatpush.msk.msrb.mxu2 %vm21830_vm11, %v21026_v14  ;;  %21837 = vst [vmem:[#allocation63_spill] sm:$0xff] %v14779_v23 }
 0x272   : > { %9768 = vmatpush.msk.msrb.mxu1 %vm14308_vm0, %v21026_v14  ;;  %3755 = vmatpush.msrb.mxu3 %v21833_v37  ;;  %v21838_v37 = vld [vmem:[#allocation84_spill] sm:$0xff]  ;;  %vm21841_vm0 = vnez %v21547_v25 }
 0x273   : > { %3610 = vmatpush.msrb.mxu0 %v14559_v15  ;;  %9787 = vmatpush.msk.msrb.mxu2 %vm21834_vm13, %v21026_v14  ;;  %v14797_v23 = vpop.f32.mrf.mxu1  ;;  %v21909_v25 = vld [vmem:[#allocation28_spill] sm:$0xff] }
 0x274   : > { %9769 = vmatpush.msk.msrb.mxu1 %vm14332_vm2, %v21026_v14  ;;  %3761 = vmatpush.msrb.mxu3 %v21835_v16  ;;  %vm21839_vm2 = vnez %v21542_v56  ;;  %v21840_v16 = vld [vmem:[#allocation93_spill] sm:$0xff]  ;;  %21842 = vst [vmem:[#allocation42_spill] sm:$0xff] %v14797_v23  ;;  %v21847_v23 = vld [vmem:[#allocation104_spill] sm:$0xff] }
 0x275   : > { %3614 = vmatpush.msrb.mxu0 %v14584_v19  ;;  %9788 = vmatpush.msk.msrb.mxu2 %vm21836_vm10, %v21026_v14  ;;  %v21905_v56 = vld [vmem:[#allocation92_spill] sm:$0xff] }
 0x276   : > { %9770 = vmatpush.msk.msrb.mxu1 %vm14346_vm12, %v21026_v14  ;;  %3767 = vmatpush.msrb.mxu3 %v21838_v37  ;;  %v21843_v37 = vld [vmem:[#allocation98_spill] sm:$0xff]  ;;  %vm21857_vm12 = vnez %v21570_v36 }
 0x277   : > { %3618 = vmatpush.msrb.mxu0 %v14601_v54  ;;  %9789 = vmatpush.msk.msrb.mxu2 %vm21839_vm2, %v21026_v14  ;;  %v14809_v63 = vpop.f32.mrf.mxu2  ;;  %v21866_v54 = vld [vmem:[#allocation83_spill] sm:$0xff] }
 0x278   : > { %9771 = vmatpush.msk.msrb.mxu1 %vm14384_vm14, %v21026_v14  ;;  %3773 = vmatpush.msrb.mxu3 %v21840_v16  ;;  %vm21844_vm14 = vnez %v21554_v33  ;;  %v14807_v16 = vpop.f32.mrf.mxu0  ;;  %21846 = vst [vmem:[#allocation48_spill] sm:$0xff] %v14809_v63  ;;  %v21850_v63 = vld [vmem:[#allocation67_spill] sm:$0xff] }
 0x279   : > { %3622 = vmatpush.msrb.mxu0 %v14621_v12  ;;  %9790 = vmatpush.msk.msrb.mxu2 %vm21841_vm0, %v21026_v14  ;;  %21845 = vst [vmem:[#allocation69_spill] sm:$0xff] %v14807_v16  ;;  %v14825_v16 = vpop.f32.mrf.mxu3 }
 0x27a   : > { %9772 = vmatpush.msk.msrb.mxu1 %vm14410_vm1, %v21026_v14  ;;  %3779 = vmatpush.msrb.mxu3 %v21843_v37  ;;  %vm21848_vm1 = vnez %v21560_v21  ;;  %v21849_v37 = vld [vmem:[#allocation105_spill] sm:$0xff]  ;;  %21851 = vst [vmem:[#allocation76_spill] sm:$0xff] %v14825_v16  ;;  %v21917_v21 = vld [vmem:[#allocation128_spill] sm:$0xff] }
 0x27b   : > { %3626 = vmatpush.msrb.mxu0 %v14638_v59  ;;  %9791 = vmatpush.msk.msrb.mxu2 %vm21844_vm14, %v21026_v14  ;;  %v14835_v59 = vpop.f32.mrf.mxu1 }
 0x27c   : > { %9773 = vmatpush.msk.msrb.mxu1 %vm14438_vm6, %v21026_v14  ;;  %3785 = vmatpush.msrb.mxu3 %v21847_v23  ;;  %vm21852_vm6 = vnez %v21565_v50  ;;  %v21853_v23 = vld [vmem:[#allocation118_spill] sm:$0xff]  ;;  %21855 = vst [vmem:[#allocation53_spill] sm:$0xff] %v14835_v59  ;;  %v21865_v59 = vld [vmem:[#allocation32_spill] sm:$0xff] }
 0x27d   : > { %3630 = vmatpush.msrb.mxu0 %v14665_v4  ;;  %9792 = vmatpush.msk.msrb.mxu2 %vm21848_vm1, %v21026_v14  ;;  %v21854_v4 = vld [vmem:[#allocation71_spill] sm:$0xff] }
 0x27e   : > { %3632 = vmatmul.f32.vlgmr.msrb.gmra.mxu0 %v21814_v26  ;;  %9774 = vmatpush.msk.msrb.mxu1 %vm14462_vm7, %v21026_v14  ;;  %vm21856_vm7 = vnez %v21786_v61 }
 0x27f   : > { %3791 = vmatpush.msrb.mxu3 %v21849_v37  ;;  %3817 = vmatpush.msra.mxu0 %v21850_v63  ;;  %v21858_v63 = vld [vmem:[#allocation121_spill] sm:$0xff]  ;;  %v21859_v37 = vld [vmem:[#allocation31_spill] sm:$0xff]  ;;  %v14847_v12 = vpop.f32.mrf.mxu2 }
 0x280   : > { %9775 = vmatpush.msk.msrb.mxu1 %vm14488_vm9, %v21026_v14  ;;  %9793 = vmatpush.msk.msrb.mxu2 %vm21852_vm6, %v21026_v14  ;;  %v14845_v16 = vpop.f32.mrf.mxu0  ;;  %21861 = vst [vmem:[#allocation68_spill] sm:$0xff] %v14847_v12  ;;  %vm21863_vm9 = vnez %v21791_v11  ;;  %v21943_v12 = vld [vmem:[#allocation151_spill] sm:$0xff] }
 0x281   : > { %3797 = vmatpush.msrb.mxu3 %v21853_v23  ;;  %3820 = vmatpush.msra.mxu0 %v21854_v4  ;;  %21860 = vst [vmem:[#allocation60_spill] sm:$0xff] %v14845_v16  ;;  %v21862_v23 = vld [vmem:[#allocation79_spill] sm:$0xff]  ;;  %v21864_v4 = vld [vmem:[#allocation125_spill] sm:$0xff]  ;;  %v21961_v16 = vld [vmem:[#allocation122_spill] sm:$0xff] }
 0x282   : > { %9776 = vmatpush.msk.msrb.mxu1 %vm21856_vm7, %v21026_v14  ;;  %9794 = vmatpush.msk.msrb.mxu2 %vm21857_vm12, %v21026_v14  ;;  %vm21867_vm7 = vnez %v21808_v44 }
 0x283   : > { %3803 = vmatpush.msrb.mxu3 %v21858_v63  ;;  %3823 = vmatpush.msra.mxu0 %v21859_v37  ;;  %v21868_v63 = vld [vmem:[#allocation33_spill] sm:$0xff]  ;;  %v14863_v37 = vpop.f32.mrf.mxu3 }
 0x284   : > { %3911 = vmatpush.msra.mxu2 %v21862_v23  ;;  %9777 = vmatpush.msk.msrb.mxu1 %vm21863_vm9, %v21026_v14  ;;  %21869 = vst [vmem:[#allocation36_spill] sm:$0xff] %v14863_v37  ;;  %v21870_v23 = vld [vmem:[#allocation86_spill] sm:$0xff]  ;;  %vm21871_vm9 = vnez %v21811_v20  ;;  %v21879_v37 = vld [vmem:[#allocation39_spill] sm:$0xff]  ;;  %v21880_v20 = vld [vmem:[#allocation44_spill] sm:$0xff] }
 0x285   : > { %3809 = vmatpush.msrb.mxu3 %v21864_v4  ;;  %3826 = vmatpush.msra.mxu0 %v21865_v59  ;;  %v14873_v59 = vpop.f32.mrf.mxu1  ;;  %v21874_v4 = vld [vmem:[#allocation89_spill] sm:$0xff] }
 0x286   : > { %3915 = vmatpush.msra.mxu2 %v21866_v54  ;;  %9778 = vmatpush.msk.msrb.mxu1 %vm14579_vm8, %v21026_v14  ;;  %21872 = vst [vmem:[#allocation66_spill] sm:$0xff] %v14873_v59  ;;  %v21873_v54 = vld [vmem:[#allocation38_spill] sm:$0xff]  ;;  %vm21875_vm8 = vnez %v21815_v7 }
 0x287   : > { %9811 = vmatpush.msk.msra.mxu3 %vm21867_vm7, %v21026_v14  ;;  %3829 = vmatpush.msra.mxu0 %v21868_v63  ;;  %v14885_v63 = vpop.f32.mrf.mxu2  ;;  %v21883_v7 = vld [vmem:[#allocation50_spill] sm:$0xff] }
 0x288   : > { %3669 = vmatmul.f32.vlgmr.msrb.gmra.mxu1 %v21814_v26  ;;  %3919 = vmatpush.msra.mxu2 %v21870_v23  ;;  %v14883_v44 = vpop.f32.mrf.mxu0  ;;  %21877 = vst [vmem:[#allocation84_spill] sm:$0xff] %v14885_v63  ;;  %v21878_v23 = vld [vmem:[#allocation37_spill] sm:$0xff]  ;;  %v22189_v26 = vmov 0 }
 0x289   : > { %9795 = vmatpush.msk.msra.mxu1 %vm21867_vm7, %v21026_v14  ;;  %9812 = vmatpush.msk.msra.mxu3 %vm21871_vm9, %v21026_v14  ;;  %21876 = vst [vmem:[#allocation82_spill] sm:$0xff] %v14883_v44  ;;  %v21938_v44 = vld [vmem:[#allocation154_spill] sm:$0xff] }
 0x28a   : > { %3832 = vmatpush.msra.mxu0 %v21873_v54  ;;  %3923 = vmatpush.msra.mxu2 %v21874_v4  ;;  %v21881_v54 = vld [vmem:[#allocation41_spill] sm:$0xff]  ;;  %v21884_v4 = vld [vmem:[#allocation43_spill] sm:$0xff] }
 0x28b   : > { %9796 = vmatpush.msk.msra.mxu1 %vm21871_vm9, %v21026_v14  ;;  %9813 = vmatpush.msk.msra.mxu3 %vm21875_vm8, %v21026_v14 }
 0x28c   : > { %3835 = vmatpush.msra.mxu0 %v21878_v23  ;;  %3927 = vmatpush.msra.mxu2 %v21879_v37  ;;  %v14903_v37 = vpop.f32.mrf.mxu3  ;;  %v21886_v23 = vld [vmem:[#allocation51_spill] sm:$0xff] }
 0x28d   : > { %9797 = vmatpush.msk.msra.mxu1 %vm21875_vm8, %v21026_v14  ;;  %9814 = vmatpush.msk.msra.mxu3 %vm21819_vm15, %v21026_v14  ;;  %21882 = vst [vmem:[#allocation93_spill] sm:$0xff] %v14903_v37  ;;  %v14913_v34 = vpop.f32.mrf.mxu1  ;;  %v21935_v37 = vld [vmem:[#allocation123_spill] sm:$0xff] }
 0x28e   : > { %3838 = vmatpush.msra.mxu0 %v21880_v20  ;;  %3931 = vmatpush.msra.mxu2 %v21881_v54  ;;  %21885 = vst [vmem:[#allocation98_spill] sm:$0xff] %v14913_v34  ;;  %v21887_v20 = vld [vmem:[#allocation57_spill] sm:$0xff]  ;;  %v21930_v34 = vld [vmem:[#allocation146_spill] sm:$0xff] }
 0x28f   : > { %9798 = vmatpush.msk.msra.mxu1 %vm21819_vm15, %v21026_v14  ;;  %9815 = vmatpush.msk.msra.mxu3 %vm21822_vm4, %v21026_v14  ;;  %v14925_v54 = vpop.f32.mrf.mxu2 }
 0x290   : > { %3841 = vmatpush.msra.mxu0 %v21883_v7  ;;  %3935 = vmatpush.msra.mxu2 %v21884_v4  ;;  %v14923_v1 = vpop.f32.mrf.mxu0  ;;  %21889 = vst [vmem:[#allocation105_spill] sm:$0xff] %v14925_v54  ;;  %v21890_v7 = vld [vmem:[#allocation58_spill] sm:$0xff]  ;;  %v21994_v54 = vld [vmem:[#allocation135_spill] sm:$0xff] }
 0x291   : > { %9799 = vmatpush.msk.msra.mxu1 %vm21822_vm4, %v21026_v14  ;;  %9816 = vmatpush.msk.msra.mxu3 %vm21824_vm3, %v21026_v14  ;;  %21888 = vst [vmem:[#allocation104_spill] sm:$0xff] %v14923_v1  ;;  %v21891_v4 = vld [vmem:[#allocation54_spill] sm:$0xff]  ;;  %vm21904_vm4 = vnez %v21575_v53  ;;  %v21931_v1 = vld [vmem:[#allocation117_spill] sm:$0xff] }
 0x292   : > { %3844 = vmatpush.msra.mxu0 %v21886_v23  ;;  %3939 = vmatpush.msra.mxu2 %v21887_v20  ;;  %v21893_v23 = vld [vmem:[#allocation64_spill] sm:$0xff] }
 0x293   : > { %9800 = vmatpush.msk.msra.mxu1 %vm21824_vm3, %v21026_v14  ;;  %9817 = vmatpush.msk.msra.mxu3 %vm21826_vm5, %v21026_v14 }
 0x294   : > { %3847 = vmatpush.msra.mxu0 %v21890_v7  ;;  %3943 = vmatpush.msra.mxu2 %v21891_v4  ;;  %v14943_v20 = vpop.f32.mrf.mxu3  ;;  %v21896_v7 = vld [vmem:[#allocation72_spill] sm:$0xff]  ;;  %v21898_v4 = vld [vmem:[#allocation81_spill] sm:$0xff] }
 0x295   : > { %9801 = vmatpush.msk.msra.mxu1 %vm21826_vm5, %v21026_v14  ;;  %9818 = vmatpush.msk.msra.mxu3 %vm21830_vm11, %v21026_v14  ;;  %21894 = vst [vmem:[#allocation67_spill] sm:$0xff] %v14943_v20  ;;  %v14953_v28 = vpop.f32.mrf.mxu1  ;;  %v21993_v20 = vld [vmem:[#allocation201_spill] sm:$0xff] }
 0x296   : > { %3850 = vmatpush.msra.mxu0 %v21892_v52  ;;  %3947 = vmatpush.msra.mxu2 %v21893_v23  ;;  %21897 = vst [vmem:[#allocation118_spill] sm:$0xff] %v14953_v28  ;;  %v21899_v52 = vld [vmem:[#allocation77_spill] sm:$0xff]  ;;  %v21901_v23 = vld [vmem:[#allocation91_spill] sm:$0xff] }
 0x297   : > { %9802 = vmatpush.msk.msra.mxu1 %vm21830_vm11, %v21026_v14  ;;  %9819 = vmatpush.msk.msra.mxu3 %vm21834_vm13, %v21026_v14  ;;  %v14973_v3 = vpop.f32.mrf.mxu2 }
 0x298   : > { %3853 = vmatpush.msra.mxu0 %v21895_v2  ;;  %3951 = vmatpush.msra.mxu2 %v21896_v7  ;;  %v14963_v31 = vpop.f32.mrf.mxu0  ;;  %21902 = vst [vmem:[#allocation121_spill] sm:$0xff] %v14973_v3  ;;  %v21903_v2 = vld [vmem:[#allocation97_spill] sm:$0xff]  ;;  %v21912_v7 = vld [vmem:[#allocation26_spill] sm:$0xff]  ;;  %v21974_v3 = vld [vmem:[#allocation140_spill] sm:$0xff] }
 0x299   : > { %9803 = vmatpush.msk.msra.mxu1 %vm21834_vm13, %v21026_v14  ;;  %9820 = vmatpush.msk.msra.mxu3 %vm21836_vm10, %v21026_v14  ;;  %21900 = vst [vmem:[#allocation71_spill] sm:$0xff] %v14963_v31  ;;  %v21979_v31 = vld [vmem:[#allocation155_spill] sm:$0xff] }
 0x29a   : > { %3856 = vmatpush.msra.mxu0 %v21898_v4  ;;  %3955 = vmatpush.msra.mxu2 %v21899_v52  ;;  %v21920_v52 = vld [vmem:[#allocation96_spill] sm:$0xff] }
 0x29b   : > { %9804 = vmatpush.msk.msra.mxu1 %vm21836_vm10, %v21026_v14  ;;  %9821 = vmatpush.msk.msra.mxu3 %vm21839_vm2, %v21026_v14 }
 0x29c   : > { %3859 = vmatpush.msra.mxu0 %v21901_v23  ;;  %3959 = vmatpush.msra.mxu2 %v13657_v62  ;;  %v21924_v23 = vld [vmem:[#allocation141_spill] sm:$0xff] }
 0x29d   : > { %9805 = vmatpush.msk.msra.mxu1 %vm21839_vm2, %v21026_v14  ;;  %9822 = vmatpush.msk.msra.mxu3 %vm21841_vm0, %v21026_v14  ;;  %v14995_v62 = vpop.f32.mrf.mxu1 }
 0x29e   : > { %3862 = vmatpush.msra.mxu0 %v21903_v2  ;;  %3963 = vmatpush.msra.mxu2 %v13677_v40  ;;  %v14993_v40 = vpop.f32.mrf.mxu3  ;;  %21907 = vst [vmem:[#allocation79_spill] sm:$0xff] %v14995_v62  ;;  %v21925_v2 = vld [vmem:[#allocation112_spill] sm:$0xff] }
 0x29f   : > { %9806 = vmatpush.msk.msra.mxu1 %vm21841_vm0, %v21026_v14  ;;  %9823 = vmatpush.msk.msra.mxu3 %vm21844_vm14, %v21026_v14  ;;  %21906 = vst [vmem:[#allocation31_spill] sm:$0xff] %v14993_v40  ;;  %vm21908_vm0 = vnez %v21711_v0  ;;  %v15015_v4 = vpop.f32.mrf.mxu2  ;;  %v21965_v62 = vld [vmem:[#allocation200_spill] sm:$0xff]  ;;  %v21973_v40 = vld [vmem:[#allocation30_spill] sm:$0xff] }
 0x2a0   : > { %9827 = vmatpush.msk.msrb.mxu0 %vm21904_vm4, %v21026_v14  ;;  %3967 = vmatpush.msra.mxu2 %v21905_v56  ;;  %v15005_v33 = vpop.f32.mrf.mxu0  ;;  %21913 = vst [vmem:[#allocation32_spill] sm:$0xff] %v15015_v4  ;;  %v21926_v56 = vld [vmem:[#allocation113_spill] sm:$0xff] }
 0x2a1   : > { %9807 = vmatpush.msk.msra.mxu1 %vm21844_vm14, %v21026_v14  ;;  %9824 = vmatpush.msk.msra.mxu3 %vm21848_vm1, %v21026_v14  ;;  %21910 = vst [vmem:[#allocation125_spill] sm:$0xff] %v15005_v33  ;;  %vm21911_vm14 = vnez %v21586_v58 }
 0x2a2   : > { %9828 = vmatpush.msk.msrb.mxu0 %vm21908_vm0, %v21026_v14  ;;  %3710 = vmatmul.f32.vlgmr.msrb.gmra.mxu2 %v21909_v25 }
 0x2a3   : > { %9808 = vmatpush.msk.msra.mxu1 %vm21848_vm1, %v21026_v14  ;;  %3971 = vmatpush.msra.mxu2 %v13718_v10  ;;  %vm21914_vm1 = vnez %v21592_v17  ;;  %v22008_v17 = vld [vmem:[#allocation218_spill] sm:$0xff] }
 0x2a4   : > { %9825 = vmatpush.msk.msra.mxu3 %vm21852_vm6, %v21026_v14  ;;  %9829 = vmatpush.msk.msrb.mxu0 %vm21911_vm14, %v21026_v14 }
 0x2a5   : > { %3811 = vmatmul.f32.vlgmr.msrb.gmra.mxu3 %v21912_v7  ;;  %4158 = vmatpush.msrb.mxu2 %v13679_v46  ;;  %v21915_v46 = vld [vmem:[#allocation101_spill] sm:$0xff]  ;;  %v15039_v10 = vpop.f32.mrf.mxu1 }
 0x2a6   : > { %9809 = vmatpush.msk.msra.mxu1 %vm21852_vm6, %v21026_v14  ;;  %9826 = vmatpush.msk.msra.mxu3 %vm21857_vm12, %v21026_v14  ;;  %vm21916_vm2 = vnez %v21915_v46  ;;  %v15037_v50 = vpop.f32.mrf.mxu3  ;;  %21919 = vst [vmem:[#allocation33_spill] sm:$0xff] %v15039_v10 }
 0x2a7   : > { %9830 = vmatpush.msk.msrb.mxu0 %vm21914_vm1, %v21026_v14  ;;  %4161 = vmatpush.msrb.mxu2 %v13697_v48  ;;  %21918 = vst [vmem:[#allocation83_spill] sm:$0xff] %v15037_v50  ;;  %v21921_v48 = vld [vmem:[#allocation99_spill] sm:$0xff] }
 0x2a8   : > { %9843 = vmatpush.msk.msrb.mxu3 %vm21904_vm4, %v21026_v14  ;;  %9810 = vmatpush.msk.msra.mxu1 %vm21857_vm12, %v21026_v14  ;;  %vm21922_vm5 = vnez %v21921_v48  ;;  %v15049_v36 = vpop.f32.mrf.mxu0  ;;  %vm21927_vm12 = vnez %v21926_v56 }
 0x2a9   : > { %9831 = vmatpush.msk.msrb.mxu0 %vm21916_vm2, %v21026_v14  ;;  %4164 = vmatpush.msrb.mxu2 %v21920_v52  ;;  %21923 = vst [vmem:[#allocation86_spill] sm:$0xff] %v15049_v36  ;;  %v21929_v52 = vld [vmem:[#allocation27_spill] sm:$0xff]  ;;  %v21957_v36 = vld [vmem:[#allocation186_spill] sm:$0xff] }
 0x2aa   : > { %4060 = vmatpush.msrb.mxu1 %v21917_v21  ;;  %9844 = vmatpush.msk.msrb.mxu3 %vm21908_vm0, %v21026_v14  ;;  %v15059_v21 = vpop.f32.mrf.mxu2 }
 0x2ab   : > { %9832 = vmatpush.msk.msrb.mxu0 %vm21922_vm5, %v21026_v14  ;;  %3973 = vmatmul.f32.vlgmr.msra.gmra.mxu2 %v21912_v7  ;;  %21928 = vst [vmem:[#allocation38_spill] sm:$0xff] %v15059_v21 }
 0x2ac   : > { %4066 = vmatpush.msrb.mxu1 %v21924_v23  ;;  %4167 = vmatpush.msrb.mxu2 %v21925_v2  ;;  %v21932_v23 = vld [vmem:[#allocation115_spill] sm:$0xff]  ;;  %v21934_v2 = vld [vmem:[#allocation45_spill] sm:$0xff] }
 0x2ad   : > { %9845 = vmatpush.msk.msrb.mxu3 %vm21911_vm14, %v21026_v14  ;;  %9833 = vmatpush.msk.msrb.mxu0 %vm21927_vm12, %v21026_v14  ;;  %vm21933_vm6 = vnez %v21932_v23  ;;  %v15075_v59 = vpop.f32.mrf.mxu1 }
 0x2ae   : > { %3865 = vmatmul.f32.vlgmr.msra.gmra.mxu0 %v21929_v52  ;;  %4010 = vmatmul.f32.vlgmr.msra.gmra.mxu3 %v21912_v7  ;;  %v15073_v63 = vpop.f32.mrf.mxu3  ;;  %21937 = vst [vmem:[#allocation37_spill] sm:$0xff] %v15075_v59 }
 0x2af   : > { %4072 = vmatpush.msrb.mxu1 %v21930_v34  ;;  %4170 = vmatpush.msrb.mxu2 %v21931_v1  ;;  %21936 = vst [vmem:[#allocation89_spill] sm:$0xff] %v15073_v63  ;;  %v21939_v34 = vld [vmem:[#allocation129_spill] sm:$0xff]  ;;  %v21941_v1 = vld [vmem:[#allocation130_spill] sm:$0xff]  ;;  %v21948_v63 = vld [vmem:[#allocation95_spill] sm:$0xff] }
 0x2b0   : > { %9846 = vmatpush.msk.msrb.mxu3 %vm21914_vm1, %v21026_v14  ;;  %9834 = vmatpush.msk.msrb.mxu0 %vm21933_vm6, %v21026_v14  ;;  %vm21940_vm3 = vnez %v21939_v34  ;;  %v15085_v21 = vpop.f32.mrf.mxu0 }
 0x2b1   : > { %3904 = vmatmul.f32.vlgmr.msra.gmra.mxu1 %v21934_v2  ;;  %4173 = vmatpush.msrb.mxu2 %v21935_v37  ;;  %21942 = vst [vmem:[#allocation39_spill] sm:$0xff] %v15085_v21  ;;  %v21946_v37 = vld [vmem:[#allocation139_spill] sm:$0xff]  ;;  %v21952_v21 = vld [vmem:[#allocation165_spill] sm:$0xff]  ;;  %v22155_v2 = vmov 0 }
 0x2b2   : > { %4078 = vmatpush.msrb.mxu1 %v21938_v44  ;;  %9847 = vmatpush.msk.msrb.mxu3 %vm21916_vm2, %v21026_v14  ;;  %v21944_v44 = vld [vmem:[#allocation132_spill] sm:$0xff]  ;;  %v15095_v59 = vpop.f32.mrf.mxu2 }
 0x2b3   : > { %9835 = vmatpush.msk.msrb.mxu0 %vm21940_vm3, %v21026_v14  ;;  %4176 = vmatpush.msrb.mxu2 %v21941_v1  ;;  %vm21945_vm7 = vnez %v21944_v44  ;;  %21947 = vst [vmem:[#allocation44_spill] sm:$0xff] %v15095_v59  ;;  %v21951_v1 = vld [vmem:[#allocation149_spill] sm:$0xff] }
 0x2b4   : > { %4084 = vmatpush.msrb.mxu1 %v21943_v12  ;;  %9848 = vmatpush.msk.msrb.mxu3 %vm21922_vm5, %v21026_v14  ;;  %v21949_v12 = vld [vmem:[#allocation145_spill] sm:$0xff] }
 0x2b5   : > { %9836 = vmatpush.msk.msrb.mxu0 %vm21945_vm7, %v21026_v14  ;;  %4179 = vmatpush.msrb.mxu2 %v21946_v37  ;;  %vm21950_vm8 = vnez %v21949_v12  ;;  %v21953_v37 = vld [vmem:[#allocation150_spill] sm:$0xff]  ;;  %v2789_v10 = vpop.f32.mrf.mxu1  ;;  %v22023_v12 = vld [vmem:[#allocation173_spill] sm:$0xff] }
 0x2b6   : > { %4090 = vmatpush.msrb.mxu1 %v21948_v63  ;;  %9849 = vmatpush.msk.msrb.mxu3 %vm21927_vm12, %v21026_v14  ;;  %vm21954_vm10 = vnez %v21953_v37  ;;  %v21955_v63 = vld [vmem:[#allocation87_spill] sm:$0xff]  ;;  %v15113_v59 = vpop.f32.mrf.mxu3 }
 0x2b7   : > { %9837 = vmatpush.msk.msrb.mxu0 %vm21950_vm8, %v21026_v14  ;;  %4182 = vmatpush.msrb.mxu2 %v21951_v1  ;;  %21956 = vst [vmem:[#allocation41_spill] sm:$0xff] %v15113_v59  ;;  %v21960_v1 = vld [vmem:[#allocation159_spill] sm:$0xff]  ;;  %v21964_v59 = vld [vmem:[#allocation102_spill] sm:$0xff] }
 0x2b8   : > { %4096 = vmatpush.msrb.mxu1 %v21952_v21  ;;  %9850 = vmatpush.msk.msrb.mxu3 %vm21933_vm6, %v21026_v14  ;;  %v21958_v21 = vld [vmem:[#allocation156_spill] sm:$0xff]  ;;  %v2688_v50 = vpop.f32.mrf.mxu0 }
 0x2b9   : > { %9838 = vmatpush.msk.msrb.mxu0 %vm21954_vm10, %v21026_v14  ;;  %4185 = vmatpush.msrb.mxu2 %v21955_v63  ;;  %vm21959_vm11 = vnez %v21958_v21  ;;  %v2790_v63 = vadd.f32 %v2789_v10, %v2688_v50  ;;  %v21969_v50 = vld [vmem:[#allocation204_spill] sm:$0xff] }
 0x2ba   : > { %4102 = vmatpush.msrb.mxu1 %v21957_v36  ;;  %9851 = vmatpush.msk.msrb.mxu3 %vm21940_vm3, %v21026_v14  ;;  %v21962_v36 = vld [vmem:[#allocation157_spill] sm:$0xff]  ;;  %v2843_v4 = vpop.f32.mrf.mxu2  ;;  %v21970_v10 = vld [vmem:[#allocation116_spill] sm:$0xff] }
 0x2bb   : > { %9839 = vmatpush.msk.msrb.mxu0 %vm21959_vm11, %v21026_v14  ;;  %4188 = vmatpush.msrb.mxu2 %v21960_v1  ;;  %vm21963_vm13 = vnez %v21962_v36  ;;  %v21968_v1 = vld [vmem:[#allocation109_spill] sm:$0xff]  ;;  %vm21971_vm15 = vnez %v21970_v10 }
 0x2bc   : > { %4108 = vmatpush.msrb.mxu1 %v21961_v16  ;;  %9852 = vmatpush.msk.msrb.mxu3 %vm21945_vm7, %v21026_v14  ;;  %v21966_v16 = vld [vmem:[#allocation183_spill] sm:$0xff] }
 0x2bd   : > { %9840 = vmatpush.msk.msrb.mxu0 %vm21963_vm13, %v21026_v14  ;;  %4191 = vmatpush.msrb.mxu2 %v21964_v59  ;;  %vm21967_vm9 = vnez %v21966_v16  ;;  %v2844_v59 = vadd.f32 %v2843_v4, %v2790_v63  ;;  %v21977_v4 = vld [vmem:[#allocation127_spill] sm:$0xff] }
 0x2be   : > { %4114 = vmatpush.msrb.mxu1 %v21965_v62  ;;  %9853 = vmatpush.msk.msrb.mxu3 %vm21950_vm8, %v21026_v14  ;;  %v21972_v62 = vld [vmem:[#allocation195_spill] sm:$0xff]  ;;  %v2882_v33 = vpop.f32.mrf.mxu3 }
 0x2bf   : > { %9841 = vmatpush.msk.msrb.mxu0 %vm21967_vm9, %v21026_v14  ;;  %4194 = vmatpush.msrb.mxu2 %v21968_v1  ;;  %v21975_v1 = vld [vmem:[#allocation107_spill] sm:$0xff]  ;;  %v2883_v63 = vadd.f32 %v2882_v33, %v2844_v59  ;;  %v21983_v33 = vld [vmem:[#allocation160_spill] sm:$0xff] }
 0x2c0   : > { %4120 = vmatpush.msrb.mxu1 %v21969_v50  ;;  %9854 = vmatpush.msk.msrb.mxu3 %vm21954_vm10, %v21026_v14  ;;  %v21976_v50 = vld [vmem:[#allocation153_spill] sm:$0xff]  ;;  %v2951_v28 = vpop.f32.mrf.mxu0 }
 0x2c1   : > { %9842 = vmatpush.msk.msrb.mxu0 %vm21971_vm15, %v21026_v14  ;;  %4197 = vmatpush.msrb.mxu2 %v21972_v62  ;;  %v21978_v62 = vld [vmem:[#allocation110_spill] sm:$0xff]  ;;  %v2952_v59 = vadd.f32 %v2951_v28, %v2883_v63  ;;  %v21989_v28 = vld [vmem:[#allocation172_spill] sm:$0xff] }
 0x2c2   : > { %4051 = vmatmul.f32.vlgmr.msrb.gmra.mxu0 %v21973_v40  ;;  %4126 = vmatpush.msrb.mxu1 %v21974_v3  ;;  %v21980_v3 = vld [vmem:[#allocation137_spill] sm:$0xff]  ;;  %v21990_v63 = vld [vmem:[#allocation134_spill] sm:$0xff] }
 0x2c3   : > { %9855 = vmatpush.msk.msrb.mxu3 %vm21959_vm11, %v21026_v14  ;;  %4252 = vmatpush.msra.mxu0 %v21975_v1  ;;  %v21981_v1 = vld [vmem:[#allocation111_spill] sm:$0xff] }
 0x2c4   : > { %4132 = vmatpush.msrb.mxu1 %v21976_v50  ;;  %4200 = vmatpush.msrb.mxu2 %v21977_v4  ;;  %v21982_v50 = vld [vmem:[#allocation29_spill] sm:$0xff]  ;;  %v21985_v4 = vld [vmem:[#allocation124_spill] sm:$0xff] }
 0x2c5   : > { %9856 = vmatpush.msk.msrb.mxu3 %vm21963_vm13, %v21026_v14  ;;  %4256 = vmatpush.msra.mxu0 %v21978_v62  ;;  %vm21984_vm13 = vnez %v21723_v39  ;;  %v21986_v62 = vld [vmem:[#allocation47_spill] sm:$0xff]  ;;  %v22040_v39 = vld [vmem:[#allocation192_spill] sm:$0xff] }
 0x2c6   : > { %4138 = vmatpush.msrb.mxu1 %v21979_v31  ;;  %4203 = vmatpush.msrb.mxu2 %v21980_v3  ;;  %v2988_v31 = vpop.f32.mrf.mxu1  ;;  %v21988_v3 = vld [vmem:[#allocation191_spill] sm:$0xff]  ;;  %v3130_v53 = vpop.f32.mrf.mxu3 }
 0x2c7   : > { %9857 = vmatpush.msk.msrb.mxu3 %vm21967_vm9, %v21026_v14  ;;  %4260 = vmatpush.msra.mxu0 %v21981_v1  ;;  %vm21987_vm9 = vnez %v21726_v55  ;;  %v2989_v1 = vadd.f32 %v2988_v31, %v2952_v59  ;;  %v21996_v59 = vld [vmem:[#allocation205_spill] sm:$0xff] }
 0x2c8   : > { %4206 = vmatmul.f32.vlgmr.msrb.gmra.mxu2 %v21982_v50  ;;  %4144 = vmatpush.msrb.mxu1 %v21983_v33  ;;  %v21991_v33 = vld [vmem:[#allocation46_spill] sm:$0xff]  ;;  %v3184_v0 = vpop.f32.mrf.mxu0 }
 0x2c9   : > { %9875 = vmatpush.msk.msra.mxu2 %vm21984_vm13, %v21026_v14  ;;  %9858 = vmatpush.msk.msrb.mxu3 %vm21971_vm15, %v21026_v14  ;;  %vm21992_vm15 = vnez %v21729_v27  ;;  %v22042_v27 = vld [vmem:[#allocation210_spill] sm:$0xff] }
 0x2ca   : > { %4264 = vmatpush.msra.mxu0 %v21985_v4  ;;  %4245 = vmatmul.f32.vlgmr.msrb.gmra.mxu3 %v21986_v62  ;;  %v3029_v4 = vpop.f32.mrf.mxu2 }
 0x2cb   : > { %9876 = vmatpush.msk.msra.mxu2 %vm21987_vm9, %v21026_v14  ;;  %4401 = vmatpush.msra.mxu3 %v21988_v3  ;;  %vm21995_vm9 = vnez %v21733_v18  ;;  %v3030_v31 = vadd.f32 %v3029_v4, %v2989_v1  ;;  %v21997_v3 = vld [vmem:[#allocation138_spill] sm:$0xff]  ;;  %v22005_v4 = vld [vmem:[#allocation216_spill] sm:$0xff]  ;;  %v22044_v18 = vld [vmem:[#allocation211_spill] sm:$0xff] }
 0x2cc   : > { %4150 = vmatpush.msrb.mxu1 %v21989_v28  ;;  %4268 = vmatpush.msra.mxu0 %v21990_v63  ;;  %v22002_v28 = vld [vmem:[#allocation213_spill] sm:$0xff]  ;;  %v22003_v1 = vld [vmem:[#allocation90_spill] sm:$0xff] }
 0x2cd   : > { %4152 = vmatmul.f32.vlgmr.msrb.gmra.mxu1 %v21991_v33  ;;  %9877 = vmatpush.msk.msra.mxu2 %vm21992_vm15, %v21026_v14  ;;  %v3131_v63 = vadd.f32 %v3130_v53, %v3030_v31  ;;  %v22009_v53 = vld [vmem:[#allocation103_spill] sm:$0xff] }
 0x2ce   : > { %9859 = vmatpush.msk.msra.mxu1 %vm21904_vm4, %v21026_v14  ;;  %4407 = vmatpush.msra.mxu3 %v21993_v20  ;;  %vm21998_vm4 = vnez %v21737_v45  ;;  %v22000_v20 = vld [vmem:[#allocation148_spill] sm:$0xff]  ;;  %v3223_v58 = vpop.f32.mrf.mxu1  ;;  %v3329_v56 = vpop.f32.mrf.mxu3  ;;  %v22047_v45 = vld [vmem:[#allocation215_spill] sm:$0xff] }
 0x2cf   : > { %4272 = vmatpush.msra.mxu0 %v21994_v54  ;;  %9878 = vmatpush.msk.msra.mxu2 %vm21995_vm9, %v21026_v14  ;;  %v21999_v54 = vld [vmem:[#allocation212_spill] sm:$0xff] }
 0x2d0   : > { %9860 = vmatpush.msk.msra.mxu1 %vm21908_vm0, %v21026_v14  ;;  %4413 = vmatpush.msra.mxu3 %v21996_v59  ;;  %vm22001_vm0 = vnez %v21742_v43  ;;  %v3185_v59 = vadd.f32 %v3184_v0, %v3131_v63  ;;  %v22014_v0 = vld [vmem:[#allocation198_spill] sm:$0xff] }
 0x2d1   : > { %4276 = vmatpush.msra.mxu0 %v21997_v3  ;;  %9879 = vmatpush.msk.msra.mxu2 %vm21998_vm4, %v21026_v14  ;;  %v22006_v3 = vld [vmem:[#allocation163_spill] sm:$0xff] }
 0x2d2   : > { %9861 = vmatpush.msk.msra.mxu1 %vm21911_vm14, %v21026_v14  ;;  %4419 = vmatpush.msra.mxu3 %v21999_v54  ;;  %vm22004_vm14 = vnez %v21746_v29  ;;  %v3224_v31 = vadd.f32 %v3223_v58, %v3185_v59  ;;  %v3292_v46 = vpop.f32.mrf.mxu2  ;;  %v22011_v54 = vld [vmem:[#allocation220_spill] sm:$0xff]  ;;  %v22057_v29 = vmov 0.0  }
 0x2d3   : > { %4280 = vmatpush.msra.mxu0 %v22000_v20  ;;  %9880 = vmatpush.msk.msra.mxu2 %vm22001_vm0, %v21026_v14  ;;  %v22012_v20 = vld [vmem:[#allocation190_spill] sm:$0xff] }
 0x2d4   : > { %9862 = vmatpush.msk.msra.mxu1 %vm21914_vm1, %v21026_v14  ;;  %4425 = vmatpush.msra.mxu3 %v22002_v28  ;;  %vm22007_vm1 = vnez %v21750_v42  ;;  %v3293_v48 = vadd.f32 %v3292_v46, %v3224_v31  ;;  %v22016_v28 = vld [vmem:[#allocation131_spill] sm:$0xff]  ;;  %v22046_v31 = vld [vmem:[#allocation80_spill] sm:$0xff]  ;;  %v22049_v46 = vmov 0  ;;  %v22060_v42 = vmov 0 }
 0x2d5   : > { %4284 = vmatpush.msra.mxu0 %v22003_v1  ;;  %9881 = vmatpush.msk.msra.mxu2 %vm22004_vm14, %v21026_v14  ;;  %v22019_v1 = vld [vmem:[#allocation206_spill] sm:$0xff] }
 0x2d6   : > { %9863 = vmatpush.msk.msra.mxu1 %vm21916_vm2, %v21026_v14  ;;  %4431 = vmatpush.msra.mxu3 %v22005_v4  ;;  %vm22010_vm2 = vnez %v21756_v41  ;;  %v3330_v63 = vadd.f32 %v3329_v56, %v3293_v48  ;;  %v22025_v4 = vld [vmem:[#allocation175_spill] sm:$0xff] }
 0x2d7   : > { %4288 = vmatpush.msra.mxu0 %v22006_v3  ;;  %9882 = vmatpush.msk.msra.mxu2 %vm22007_vm1, %v21026_v14  ;;  %v22029_v3 = vld [vmem:[#allocation35_spill] sm:$0xff] }
 0x2d8   : > { %9864 = vmatpush.msk.msra.mxu1 %vm21922_vm5, %v21026_v14  ;;  %4437 = vmatpush.msra.mxu3 %v22008_v17  ;;  %vm22013_vm5 = vnez %v21762_v32  ;;  %v3370_v23 = vpop.f32.mrf.mxu0  ;;  %v22043_v17 = vld [vmem:[#allocation208_spill] sm:$0xff]  ;;  %v22053_v48 = vld [vmem:[#allocation15_spill] sm:$0xff]  ;;  %v22072_v32 = vld [vmem:[#allocation18_spill] sm:$0xff] }
 0x2d9   : > { %4292 = vmatpush.msra.mxu0 %v22009_v53  ;;  %9883 = vmatpush.msk.msra.mxu2 %vm22010_vm2, %v21026_v14  ;;  %v3371_v34 = vadd.f32 %v3370_v23, %v3330_v63  ;;  %v22048_v53 = vld [vmem:[#allocation14_spill] sm:$0xff]  ;;  %v22063_v23 = vld [vmem:[#allocation221_spill] sm:$0xff]  ;;  %v22066_v63 = vmov 0 }
 0x2da   : > { %9865 = vmatpush.msk.msra.mxu1 %vm21927_vm12, %v21026_v14  ;;  %4443 = vmatpush.msra.mxu3 %v22011_v54  ;;  %vm22015_vm12 = vnez %v21767_v6 }
 0x2db   : > { %4296 = vmatpush.msra.mxu0 %v22012_v20  ;;  %9884 = vmatpush.msk.msra.mxu2 %vm22013_vm5, %v21026_v14  ;;  %v22052_v20 = vld [vmem:[#allocation217_spill] sm:$0xff] }
 0x2dc   : > { %9866 = vmatpush.msk.msra.mxu1 %vm21933_vm6, %v21026_v14  ;;  %4449 = vmatpush.msra.mxu3 %v14596_v13  ;;  %vm22017_vm6 = vnez %v21774_v47  ;;  %v22018_v13 = vld [vmem:[#allocation225_spill] sm:$0xff] }
 0x2dd   : > { %4300 = vmatpush.msra.mxu0 %v22014_v0  ;;  %9885 = vmatpush.msk.msra.mxu2 %vm22015_vm12, %v21026_v14  ;;  %v22054_v0 = vmov 0 }
 0x2de   : > { %9867 = vmatpush.msk.msra.mxu1 %vm21940_vm3, %v21026_v14  ;;  %4455 = vmatpush.msra.mxu3 %v14616_v49  ;;  %vm22020_vm3 = vnez %v21780_v30  ;;  %v22021_v49 = vld [vmem:[#allocation144_spill] sm:$0xff] }
 0x2df   : > { %4304 = vmatpush.msra.mxu0 %v22016_v28  ;;  %9886 = vmatpush.msk.msra.mxu2 %vm22017_vm6, %v21026_v14  ;;  %v22058_v28 = vld [vmem:[#allocation219_spill] sm:$0xff] }
 0x2e0   : > { %9868 = vmatpush.msk.msra.mxu1 %vm21945_vm7, %v21026_v14  ;;  %4461 = vmatpush.msra.mxu3 %v22018_v13  ;;  %vm22022_vm7 = vnez %v21786_v61 }
 0x2e1   : > { %4308 = vmatpush.msra.mxu0 %v22019_v1  ;;  %9887 = vmatpush.msk.msra.mxu2 %vm22020_vm3, %v21026_v14  ;;  %v22069_v1 = vld [vmem:[#allocation223_spill] sm:$0xff] }
 0x2e2   : > { %9869 = vmatpush.msk.msra.mxu1 %vm21950_vm8, %v21026_v14  ;;  %4467 = vmatpush.msra.mxu3 %v14648_v38  ;;  %vm22024_vm8 = vnez %v21791_v11 }
 0x2e3   : > { %4312 = vmatpush.msra.mxu0 %v22021_v49  ;;  %9888 = vmatpush.msk.msra.mxu2 %vm22022_vm7, %v21026_v14  ;;  %vm22027_vm7 = vnez %v21797_v5  ;;  %v22070_v49 = vld [vmem:[#allocation222_spill] sm:$0xff] }
 0x2e4   : > { %4314 = vmatmul.f32.vlgmr.msra.gmra.mxu0 %v21991_v33  ;;  %9870 = vmatpush.msk.msra.mxu1 %vm21954_vm10, %v21026_v14  ;;  %v3471_v44 = vpop.f32.mrf.mxu1  ;;  %vm22026_vm10 = vnez %v21962_v36  ;;  %v22032_v36 = vld [vmem:[#allocation49_spill] sm:$0xff] }
 0x2e5   : > { %4473 = vmatpush.msra.mxu3 %v14660_v57  ;;  %4499 = vmatpush.msrb.mxu0 %v22023_v12  ;;  %v3472_v58 = vadd.f32 %v3471_v44, %v3371_v34  ;;  %v3525_v38 = vpop.f32.mrf.mxu2  ;;  %v22028_v57 = vld [vmem:[#allocation177_spill] sm:$0xff]  ;;  %v22073_v44 = vmov 0 }
 0x2e6   : > { %9871 = vmatpush.msk.msra.mxu1 %vm21959_vm11, %v21026_v14  ;;  %9889 = vmatpush.msk.msra.mxu2 %vm22024_vm8, %v21026_v14  ;;  %vm22030_vm11 = vnez %v21966_v16  ;;  %v22039_v16 = vld [vmem:[#allocation194_spill] sm:$0xff] }
 0x2e7   : > { %4479 = vmatpush.msra.mxu3 %v14673_v8  ;;  %4502 = vmatpush.msrb.mxu0 %v22025_v4  ;;  %v3526_v37 = vadd.f32 %v3525_v38, %v3472_v58  ;;  %v3564_v59 = vpop.f32.mrf.mxu3  ;;  %v22031_v8 = vld [vmem:[#allocation179_spill] sm:$0xff]  ;;  %v22076_v58 = vld [vmem:[#allocation226_spill] sm:$0xff]  ;;  %v22077_v38 = vld [vmem:[#allocation224_spill] sm:$0xff] }
 0x2e8   : > { %9872 = vmatpush.msk.msra.mxu1 %vm22026_vm10, %v21026_v14  ;;  %9890 = vmatpush.msk.msra.mxu2 %vm22027_vm7, %v21026_v14  ;;  %vm22033_vm10 = vnez %v21970_v10  ;;  %v22041_v10 = vld [vmem:[#allocation199_spill] sm:$0xff] }
 0x2e9   : > { %4485 = vmatpush.msra.mxu3 %v14681_v22  ;;  %4505 = vmatpush.msrb.mxu0 %v22028_v57  ;;  %v3565_v21 = vadd.f32 %v3564_v59, %v3526_v37  ;;  %v22034_v22 = vld [vmem:[#allocation181_spill] sm:$0xff]  ;;  %v22079_v37 = vld [vmem:[#allocation34_spill] sm:$0xff] }
 0x2ea   : > { %4392 = vmatmul.f32.vlgmr.msra.gmra.mxu2 %v22029_v3  ;;  %9873 = vmatpush.msk.msra.mxu1 %vm22030_vm11, %v21026_v14  ;;  %vm22036_vm11 = vnez %v21726_v55  ;;  %v15344_v55 = vld [vmem:[%s11026_s4 + $0x2] ss:$0 sm:$0xff]  ;;  %v22148_v3 = vld [vmem:[#allocation74_spill] sm:$0xff] }
 0x2eb   : > { %4593 = vmatpush.msrb.mxu2 %v14302_v9  ;;  %4491 = vmatpush.msra.mxu3 %v14697_v35  ;;  %v22035_v9 = vld [vmem:[#allocation184_spill] sm:$0xff] }
 0x2ec   : > { %4508 = vmatpush.msrb.mxu0 %v22031_v8  ;;  %4493 = vmatmul.f32.vlgmr.msra.gmra.mxu3 %v22032_v36  ;;  %v22038_v35 = vld [vmem:[#allocation188_spill] sm:$0xff]  ;;  %v22083_v8 = vmov 0 }
 0x2ed   : > { %4597 = vmatpush.msrb.mxu2 %v14322_v24  ;;  %9907 = vmatpush.msk.msrb.mxu3 %vm21984_vm13, %v21026_v14  ;;  %v22037_v24 = vld [vmem:[#allocation187_spill] sm:$0xff] }
 0x2ee   : > { %9874 = vmatpush.msk.msra.mxu1 %vm22033_vm10, %v21026_v14  ;;  %4511 = vmatpush.msrb.mxu0 %v22034_v22 }
 0x2ef   : > { %4351 = vmatmul.f32.vlgmr.msra.gmra.mxu1 %v21991_v33  ;;  %4601 = vmatpush.msrb.mxu2 %v22035_v9 }
 0x2f0   : > { %9891 = vmatpush.msk.msrb.mxu1 %vm21984_vm13, %v21026_v14  ;;  %9908 = vmatpush.msk.msrb.mxu3 %vm22036_vm11, %v21026_v14  ;;  %vm15366_vm13 = vcmp.eq.s32.totalorder %v22048_v53, %v15344_v55 }
 0x2f1   : > { %4514 = vmatpush.msrb.mxu0 %v22037_v24  ;;  %4605 = vmatpush.msrb.mxu2 %v22038_v35  ;;  %v22050_v46 = vsel %vm15366_vm13, 4294967295, %v22049_v46  ;;  %v9939_v56 = vsel %vm15366_vm13, 1.0, %v22057_v29  ;;  %v22088_v24 = vld [vmem:[#allocation227_spill] sm:$0xff]  ;;  %v22089_v35 = vld [vmem:[#allocation20_spill] sm:$0xff] }
 0x2f2   : > { %9892 = vmatpush.msk.msrb.mxu1 %vm22036_vm11, %v21026_v14  ;;  %9909 = vmatpush.msk.msrb.mxu3 %vm21992_vm15, %v21026_v14  ;;  %22051 = vst [vmem:[#allocation50_spill] sm:$0xff] %v22050_v46  ;;  %v15412_v41 = vsub.f32 %v9939_v56, %v9939_v56  ;;  %v22231_v46 = vld [vmem:[#allocation126_spill] sm:$0xff] }
 0x2f3   : > { %4517 = vmatpush.msrb.mxu0 %v22039_v16  ;;  %4609 = vmatpush.msrb.mxu2 %v22040_v39  ;;  %v22090_v16 = vmov 0 }
 0x2f4   : > { %9893 = vmatpush.msk.msrb.mxu1 %vm21992_vm15, %v21026_v14  ;;  %9910 = vmatpush.msk.msrb.mxu3 %vm21995_vm9, %v21026_v14  ;;  %22064 = vst [vmem:[#allocation57_spill] sm:$0xff] %v15412_v41  ;;  %v15451_v6 = vand.u32 4294901760, %v15412_v41 }
 0x2f5   : > { %4520 = vmatpush.msrb.mxu0 %v22041_v10  ;;  %4613 = vmatpush.msrb.mxu2 %v14434_v60  ;;  %v22045_v60 = vld [vmem:[#allocation209_spill] sm:$0xff]  ;;  %v22094_v10 = vld [vmem:[#allocation228_spill] sm:$0xff] }
 0x2f6   : > { %9894 = vmatpush.msk.msrb.mxu1 %vm21995_vm9, %v21026_v14  ;;  %9911 = vmatpush.msk.msrb.mxu3 %vm21998_vm4, %v21026_v14  ;;  %vm15380_vm9 = vcmp.eq.s32.totalorder %v22053_v48, %v15344_v55  ;;  %22078 = vst [vmem:[#allocation64_spill] sm:$0xff] %v15451_v6  ;;  %v4898_v30 = vsub.f32 %v15412_v41, %v15451_v6 }
 0x2f7   : > { %4523 = vmatpush.msrb.mxu0 %v22042_v27  ;;  %4617 = vmatpush.msrb.mxu2 %v22043_v17  ;;  %v22055_v0 = vsel %vm15380_vm9, 4294967295, %v22054_v0  ;;  %v9938_v13 = vsel %vm15380_vm9, 1.0, %v22057_v29 }
 0x2f8   : > { %9895 = vmatpush.msk.msrb.mxu1 %vm21998_vm4, %v21026_v14  ;;  %9912 = vmatpush.msk.msrb.mxu3 %vm22001_vm0, %v21026_v14  ;;  %22056 = vst [vmem:[#allocation43_spill] sm:$0xff] %v22055_v0  ;;  %v15547_v56 = vand.u32 4294901760, %v4898_v30  ;;  %v22118_v30 = vld [vmem:[#allocation52_spill] sm:$0xff] }
 0x2f9   : > { %4526 = vmatpush.msrb.mxu0 %v22044_v18  ;;  %4621 = vmatpush.msrb.mxu2 %v22045_v60  ;;  %v22097_v18 = vld [vmem:[#allocation21_spill] sm:$0xff]  ;;  %v22098_v60 = vmov 0 }
 0x2fa   : > { %9896 = vmatpush.msk.msrb.mxu1 %vm22001_vm0, %v21026_v14  ;;  %9913 = vmatpush.msk.msrb.mxu3 %vm22004_vm14, %v21026_v14  ;;  %vm15441_vm0 = vcmp.eq.s32.totalorder %v22072_v32, %v15344_v55  ;;  %22106 = vst [vmem:[#allocation141_spill] sm:$0xff] %v15547_v56  ;;  %v22136_v32 = vmov 0 }
 0x2fb   : > { %4529 = vmatpush.msrb.mxu0 %v22046_v31  ;;  %4625 = vmatpush.msrb.mxu2 %v22047_v45  ;;  %v3633_v54 = vpop.f32.mrf.mxu0  ;;  %v22074_v44 = vsel %vm15441_vm0, 4294967295, %v22073_v44  ;;  %v9935_v9 = vsel %vm15441_vm0, 1.0, %v22057_v29  ;;  %v22102_v45 = vld [vmem:[#allocation22_spill] sm:$0xff] }
 0x2fc   : > { %9897 = vmatpush.msk.msrb.mxu1 %vm22004_vm14, %v21026_v14  ;;  %9914 = vmatpush.msk.msrb.mxu3 %vm22007_vm1, %v21026_v14  ;;  %v3634_v43 = vadd.f32 %v3633_v54, %v3565_v21  ;;  %22075 = vst [vmem:[#allocation62_spill] sm:$0xff] %v22074_v44  ;;  %v22082_v21 = vld [vmem:[#allocation19_spill] sm:$0xff]  ;;  %v15509_v17 = vsub.f32 %v9935_v9, %v9935_v9  ;;  %v22103_v54 = vmov 0  ;;  %v22115_v9 = vld [vmem:[#allocation24_spill] sm:$0xff] }
 0x2fd   : > { %4532 = vmatpush.msrb.mxu0 %v22052_v20  ;;  %4629 = vmatpush.msrb.mxu2 %v14534_v51  ;;  %v22059_v51 = vld [vmem:[#allocation16_spill] sm:$0xff]  ;;  %vm15463_vm14 = vcmp.eq.s32.totalorder %v22082_v21, %v15344_v55 }
 0x2fe   : > { %9898 = vmatpush.msk.msrb.mxu1 %vm22007_vm1, %v21026_v14  ;;  %9915 = vmatpush.msk.msrb.mxu3 %vm22010_vm2, %v21026_v14  ;;  %vm15403_vm15 = vcmp.eq.s32.totalorder %v22059_v51, %v15344_v55  ;;  %v22084_v8 = vsel %vm15463_vm14, 4294967295, %v22083_v8  ;;  %vm15487_vm1 = vcmp.eq.s32.totalorder %v22089_v35, %v15344_v55  ;;  %v9934_v39 = vsel %vm15463_vm14, 1.0, %v22057_v29  ;;  %22096 = vst [vmem:[#allocation101_spill] sm:$0xff] %v15509_v17 }
 0x2ff   : > { %4535 = vmatpush.msrb.mxu0 %v22058_v28  ;;  %4633 = vmatpush.msrb.mxu2 %v14559_v15  ;;  %v22061_v42 = vsel %vm15403_vm15, 4294967295, %v22060_v42  ;;  %v22065_v15 = vld [vmem:[#allocation17_spill] sm:$0xff]  ;;  %v9937_v34 = vsel %vm15403_vm15, 1.0, %v22057_v29  ;;  %22085 = vst [vmem:[#allocation81_spill] sm:$0xff] %v22084_v8  ;;  %v22091_v16 = vsel %vm15487_vm1, 4294967295, %v22090_v16  ;;  %v15541_v20 = vsub.f32 %v9934_v39, %v9934_v39  ;;  %v22107_v28 = vld [vmem:[#allocation23_spill] sm:$0xff] }
 0x300   : > { %9899 = vmatpush.msk.msrb.mxu1 %vm22010_vm2, %v21026_v14  ;;  %9916 = vmatpush.msk.msrb.mxu3 %vm22013_vm5, %v21026_v14  ;;  %22062 = vst [vmem:[#allocation51_spill] sm:$0xff] %v22061_v42  ;;  %vm15416_vm4 = vcmp.eq.s32.totalorder %v22065_v15, %v15344_v55  ;;  %v15457_v59 = vsub.f32 %v9937_v34, %v9937_v34  ;;  %vm22093_vm2 = vnez %v21786_v61  ;;  %v22139_v15 = vld [vmem:[#allocation65_spill] sm:$0xff]  ;;  %v22245_v42 = vld [vmem:[#allocation142_spill] sm:$0xff] }
 0x301   : > { %4538 = vmatpush.msrb.mxu0 %v22063_v23  ;;  %4637 = vmatpush.msrb.mxu2 %v14584_v19  ;;  %v22067_v63 = vsel %vm15416_vm4, 4294967295, %v22066_v63  ;;  %v15428_v19 = vsub.f32 %v9938_v13, %v9938_v13  ;;  %v9936_v12 = vsel %vm15416_vm4, 1.0, %v22057_v29  ;;  %22092 = vst [vmem:[#allocation97_spill] sm:$0xff] %v22091_v16  ;;  %v22108_v13 = vmov 0 }
 0x302   : > { %22068 = vst [vmem:[#allocation58_spill] sm:$0xff] %v22067_v63  ;;  %9900 = vmatpush.msk.msrb.mxu1 %vm22013_vm5, %v21026_v14  ;;  %9917 = vmatpush.msk.msrb.mxu3 %vm22015_vm12, %v21026_v14  ;;  %v15476_v22 = vsub.f32 %v9936_v12, %v9936_v12  ;;  %v15507_v27 = vand.u32 4294901760, %v15457_v59  ;;  %vm15513_vm5 = vcmp.eq.s32.totalorder %v22097_v18, %v15344_v55 }
 0x303   : > { %4541 = vmatpush.msrb.mxu0 %v22069_v1  ;;  %4641 = vmatpush.msrb.mxu2 %v22070_v49  ;;  %22071 = vst [vmem:[#allocation54_spill] sm:$0xff] %v15428_v19  ;;  %v15474_v47 = vand.u32 4294901760, %v15428_v19  ;;  %v22099_v60 = vsel %vm15513_vm5, 4294967295, %v22098_v60  ;;  %v9932_v11 = vsel %vm15513_vm5, 1.0, %v22057_v29  ;;  %v15565_v1 = vand.u32 4294901760, %v15509_v17 }
 0x304   : > { %9901 = vmatpush.msk.msrb.mxu1 %vm22015_vm12, %v21026_v14  ;;  %9918 = vmatpush.msk.msrb.mxu3 %vm22017_vm6, %v21026_v14  ;;  %22080 = vst [vmem:[#allocation73_spill] sm:$0xff] %v15457_v59  ;;  %v15526_v31 = vand.u32 4294901760, %v15476_v22  ;;  %vm15530_vm12 = vcmp.eq.s32.totalorder %v22102_v45, %v15344_v55  ;;  %v4910_v23 = vsub.f32 %v15457_v59, %v15507_v27  ;;  %v22130_v45 = vmov 0 }
 0x305   : > { %4544 = vmatpush.msrb.mxu0 %v22076_v58  ;;  %4645 = vmatpush.msrb.mxu2 %v22077_v38  ;;  %v3670_v4 = vpop.f32.mrf.mxu1  ;;  %22086 = vst [vmem:[#allocation77_spill] sm:$0xff] %v15474_v47  ;;  %v4904_v61 = vsub.f32 %v15428_v19, %v15474_v47  ;;  %v22104_v54 = vsel %vm15530_vm12, 4294967295, %v22103_v54  ;;  %v9931_v34 = vsel %vm15530_vm12, 1.0, %v22057_v29  ;;  %v15587_v38 = vand.u32 4294901760, %v15541_v20 }
 0x306   : > { %4547 = vmatmul.f32.vlgmr.msrb.gmra.mxu0 %v22079_v37  ;;  %9902 = vmatpush.msk.msrb.mxu1 %vm22017_vm6, %v21026_v14  ;;  %v15459_v57 = vadd.f32 %v3670_v4, %v3634_v43  ;;  %22087 = vst [vmem:[#allocation91_spill] sm:$0xff] %v15476_v22  ;;  %v9933_v43 = vsel %vm15487_vm1, 1.0, %v22057_v29  ;;  %vm15551_vm6 = vcmp.eq.s32.totalorder %v22107_v28, %v15344_v55  ;;  %v22135_v37 = vld [vmem:[#allocation61_spill] sm:$0xff] }
 0x307   : > { %9919 = vmatpush.msk.msrb.mxu3 %vm22020_vm3, %v21026_v14  ;;  %9972 = vmatpush.msk.msra.mxu0 %vm15366_vm13, %v21026_v14  ;;  %22095 = vst [vmem:[#allocation92_spill] sm:$0xff] %v15507_v27  ;;  %v22109_v13 = vsel %vm15551_vm6, 4294967295, %v22108_v13  ;;  %v15567_v49 = vsub.f32 %v9933_v43, %v9933_v43  ;;  %v15576_v12 = vand.u32 4294901760, %v4904_v61  ;;  %v4916_v58 = vsub.f32 %v15476_v22, %v15526_v31 }
 0x308   : > { %22081 = vst [vmem:[#allocation72_spill] sm:$0xff] %v15459_v57  ;;  %9903 = vmatpush.msk.msrb.mxu1 %vm22020_vm3, %v21026_v14  ;;  %4649 = vmatpush.msrb.mxu2 %v22088_v24  ;;  %v15589_v4 = vsub.f32 %v9932_v11, %v9932_v11  ;;  %vm15593_vm3 = vcmp.eq.s32.totalorder %v22115_v9, %v15344_v55  ;;  %v22116_v24 = vmov 0  ;;  %v9930_v5 = vsel %vm15551_vm6, 1.0, %v22057_v29  ;;  %v22122_v11 = vld [vmem:[#allocation25_spill] sm:$0xff] }
 0x309   : > { %9920 = vmatpush.msk.msrb.mxu3 %vm22093_vm2, %v21026_v14  ;;  %9973 = vmatpush.msk.msra.mxu0 %vm15380_vm9, %v21026_v14  ;;  %22100 = vst [vmem:[#allocation128_spill] sm:$0xff] %v22099_v60  ;;  %v22117_v24 = vsel %vm15593_vm3, 4294967295, %v22116_v24  ;;  %v15602_v39 = vsub.f32 %v9931_v34, %v9931_v34  ;;  %v4922_v61 = vsub.f32 %v15509_v17, %v15565_v1  ;;  %v15613_v43 = vand.u32 4294901760, %v15567_v49 }
 0x30a   : > { %9904 = vmatpush.msk.msrb.mxu1 %vm22093_vm2, %v21026_v14  ;;  %4653 = vmatpush.msrb.mxu2 %v22094_v10  ;;  %22101 = vst [vmem:[#allocation96_spill] sm:$0xff] %v15526_v31  ;;  %v15608_v10 = vand.u32 4294901760, %v4910_v23  ;;  %v15625_v23 = vsub.f32 %v9930_v5, %v9930_v5  ;;  %v9929_v34 = vsel %vm15593_vm3, 1.0, %v22057_v29  ;;  %v4928_v9 = vsub.f32 %v15541_v20, %v15587_v38  ;;  %v22129_v5 = vld [vmem:[#allocation55_spill] sm:$0xff] }
 0x30b   : > { %9921 = vmatpush.msk.msrb.mxu3 %vm22024_vm8, %v21026_v14  ;;  %9974 = vmatpush.msk.msra.mxu0 %vm15403_vm15, %v21026_v14  ;;  %22105 = vst [vmem:[#allocation99_spill] sm:$0xff] %v15541_v20  ;;  %v15639_v28 = vand.u32 4294901760, %v15589_v4  ;;  %v4934_v35 = vsub.f32 %v15567_v49, %v15613_v43  ;;  %v15665_v21 = vsub.f32 %v9929_v34, %v9929_v34  ;;  %v22140_v34 = vmov 0 }
 0x30c   : > { %4655 = vmatmul.f32.vlgmr.msrb.gmra.mxu2 %v22032_v36  ;;  %9905 = vmatpush.msk.msrb.mxu1 %vm22024_vm8, %v21026_v14  ;;  %22110 = vst [vmem:[#allocation112_spill] sm:$0xff] %v15565_v1  ;;  %vm15643_vm8 = vcmp.eq.s32.totalorder %v22129_v5, %v15344_v55  ;;  %v15661_v5 = vand.u32 4294901760, %v4922_v61  ;;  %vm15669_vm10 = vcmp.eq.s32.totalorder %v22135_v37, %v15344_v55  ;;  %v15678_v61 = vand.u32 4294901760, %v15625_v23 }
 0x30d   : > { %4998 = vmatpush.msra.mxu2 %v15412_v41  ;;  %9922 = vmatpush.msk.msrb.mxu3 %vm22027_vm7, %v21026_v14  ;;  %22111 = vst [vmem:[#allocation113_spill] sm:$0xff] %v15567_v49  ;;  %v22131_v45 = vsel %vm15643_vm8, 4294967295, %v22130_v45  ;;  %v22137_v32 = vsel %vm15669_vm10, 4294967295, %v22136_v32  ;;  %vm15682_vm11 = vcmp.eq.s32.totalorder %v22139_v15, %v15344_v55  ;;  %v9927_v37 = vsel %vm15643_vm8, 1.0, %v22057_v29  ;;  %v22144_v15 = vld [vmem:[#allocation13_spill] sm:$0xff] }
 0x30e   : > { %9975 = vmatpush.msk.msra.mxu0 %vm15416_vm4, %v21026_v14  ;;  %4692 = vmatmul.f32.vlgmr.msrb.gmra.mxu3 %v22032_v36  ;;  %22112 = vst [vmem:[#allocation146_spill] sm:$0xff] %v15576_v12  ;;  %v22141_v34 = vsel %vm15682_vm11, 4294967295, %v22140_v34  ;;  %v15693_v51 = vand.u32 4294901760, %v4928_v9  ;;  %v4940_v48 = vsub.f32 %v15589_v4, %v15639_v28  ;;  %vm15701_vm2 = vcmp.eq.s32.totalorder %v22144_v15, %v15344_v55 }
 0x30f   : > { %5001 = vmatpush.msra.mxu2 %v15428_v19  ;;  %9988 = vmatpush.msk.msra.mxu3 %vm15366_vm13, %v21026_v14  ;;  %22113 = vst [vmem:[#allocation117_spill] sm:$0xff] %v15587_v38  ;;  %v22145_v36 = vmov 0  ;;  %v22149_v15 = vmov 0  ;;  %v15724_v33 = vand.u32 4294901760, %v4934_v35  ;;  %v15727_v62 = vand.u32 4294901760, %v15665_v21 }
 0x310   : > { %9906 = vmatpush.msk.msrb.mxu1 %vm22027_vm7, %v21026_v14  ;;  %9976 = vmatpush.msk.msra.mxu0 %vm15441_vm0, %v21026_v14  ;;  %22114 = vst [vmem:[#allocation115_spill] sm:$0xff] %v15589_v4  ;;  %vm15617_vm7 = vcmp.eq.s32.totalorder %v22122_v11, %v15344_v55  ;;  %v15634_v11 = vand.u32 4294901760, %v4916_v58  ;;  %v15652_v58 = vand.u32 4294901760, %v15602_v39  ;;  %v22146_v36 = vsel %vm15701_vm2, 4294967295, %v22145_v36 }
 0x311   : > { %4586 = vmatmul.f32.vlgmr.msrb.gmra.mxu1 %v22118_v30  ;;  %5004 = vmatpush.msra.mxu2 %v15457_v59  ;;  %22119 = vst [vmem:[#allocation123_spill] sm:$0xff] %v15602_v39  ;;  %v22123_v30 = vmov 0  ;;  %v9928_v18 = vsel %vm15617_vm7, 1.0, %v22057_v29  ;;  %v15729_v50 = vsub.f32 %v9927_v37, %v9927_v37  ;;  %v4952_v40 = vsub.f32 %v15625_v23, %v15678_v61  ;;  %v22154_v37 = vld [vmem:[#allocation75_spill] sm:$0xff]  ;;  %v22168_v59 = vld [vmem:[#allocation85_spill] sm:$0xff] }
 0x312   : > { %4900 = vmatpush.msra.mxu1 %v15547_v56  ;;  %9989 = vmatpush.msk.msra.mxu3 %vm15380_vm9, %v21026_v14  ;;  %22120 = vst [vmem:[#allocation154_spill] sm:$0xff] %v15608_v10  ;;  %v22124_v30 = vsel %vm15617_vm7, 4294967295, %v22123_v30  ;;  %v15697_v53 = vsub.f32 %v9928_v18, %v9928_v18  ;;  %v4946_v9 = vsub.f32 %v15602_v39, %v15652_v58  ;;  %v9926_v18 = vsel %vm15669_vm10, 1.0, %v22057_v29 }
 0x313   : > { %22121 = vst [vmem:[#allocation129_spill] sm:$0xff] %v15613_v43  ;;  %9977 = vmatpush.msk.msra.mxu0 %vm15463_vm14, %v21026_v14  ;;  %5007 = vmatpush.msra.mxu2 %v15476_v22  ;;  %v9924_v35 = vsel %vm15701_vm2, 1.0, %v22057_v29  ;;  %v15753_v52 = vand.u32 4294901760, %v4940_v48  ;;  %v15758_v25 = vsub.f32 %v9926_v18, %v9926_v18  ;;  %v22162_v48 = vld [vmem:[#allocation78_spill] sm:$0xff]  ;;  %v4958_v18 = vsub.f32 %v15665_v21, %v15727_v62 }
 0x314   : > { %22125 = vst [vmem:[#allocation130_spill] sm:$0xff] %v22124_v30  ;;  %4906 = vmatpush.msra.mxu1 %v15576_v12  ;;  %9990 = vmatpush.msk.msra.mxu3 %vm15403_vm15, %v21026_v14  ;;  %v15756_v7 = vand.u32 4294901760, %v15697_v53  ;;  %v22188_v12 = vld [vmem:[#allocation100_spill] sm:$0xff]  ;;  %v22194_v56 = vmov 0 }
 0x315   : > { %22126 = vst [vmem:[#allocation151_spill] sm:$0xff] %v15625_v23  ;;  %9978 = vmatpush.msk.msra.mxu0 %vm15487_vm1, %v21026_v14  ;;  %5010 = vmatpush.msra.mxu2 %v15509_v17  ;;  %v15806_v22 = vand.u32 4294901760, %v15758_v25 }
 0x316   : > { %22127 = vst [vmem:[#allocation132_spill] sm:$0xff] %v15634_v11  ;;  %4912 = vmatpush.msra.mxu1 %v15608_v10  ;;  %9991 = vmatpush.msk.msra.mxu3 %vm15416_vm4, %v21026_v14 }
 0x317   : > { %22128 = vst [vmem:[#allocation139_spill] sm:$0xff] %v15639_v28  ;;  %9979 = vmatpush.msk.msra.mxu0 %vm15513_vm5, %v21026_v14  ;;  %5013 = vmatpush.msra.mxu2 %v15541_v20  ;;  %v22163_v20 = vmov 0 }
 0x318   : > { %22132 = vst [vmem:[#allocation95_spill] sm:$0xff] %v15652_v58  ;;  %4918 = vmatpush.msra.mxu1 %v15634_v11  ;;  %9992 = vmatpush.msk.msra.mxu3 %vm15441_vm0, %v21026_v14  ;;  %vm15716_vm0 = vcmp.eq.s32.totalorder %v22148_v3, %v15344_v55  ;;  %v9925_v3 = vsel %vm15682_vm11, 1.0, %v22057_v29 }
 0x319   : > { %22133 = vst [vmem:[#allocation145_spill] sm:$0xff] %v15661_v5  ;;  %9980 = vmatpush.msk.msra.mxu0 %vm15530_vm12, %v21026_v14  ;;  %5016 = vmatpush.msra.mxu2 %v15567_v49  ;;  %v22150_v15 = vsel %vm15716_vm0, 4294967295, %v22149_v15  ;;  %v15769_v49 = vsub.f32 %v9925_v3, %v9925_v3  ;;  %v15786_v3 = vsub.f32 %v9924_v35, %v9924_v35 }
 0x31a   : > { %22134 = vst [vmem:[#allocation149_spill] sm:$0xff] %v15665_v21  ;;  %4924 = vmatpush.msra.mxu1 %v15661_v5  ;;  %9993 = vmatpush.msk.msra.mxu3 %vm15463_vm14, %v21026_v14  ;;  %vm15745_vm14 = vcmp.eq.s32.totalorder %v22154_v37, %v15344_v55  ;;  %v9955_v37 = vsel %vm15716_vm0, 1.0, %v22057_v29  ;;  %v4964_v35 = vsub.f32 %v15697_v53, %v15756_v7 }
 0x31b   : > { %22138 = vst [vmem:[#allocation165_spill] sm:$0xff] %v15678_v61  ;;  %9981 = vmatpush.msk.msra.mxu0 %vm15551_vm6, %v21026_v14  ;;  %5019 = vmatpush.msra.mxu2 %v15589_v4  ;;  %v22156_v2 = vsel %vm15745_vm14, 4294967295, %v22155_v2  ;;  %v15767_v4 = vand.u32 4294901760, %v4946_v9  ;;  %v15784_v9 = vand.u32 4294901760, %v15729_v50  ;;  %v15797_v17 = vsub.f32 %v9955_v37, %v9955_v37 }
 0x31c   : > { %22142 = vst [vmem:[#allocation150_spill] sm:$0xff] %v15693_v51  ;;  %4930 = vmatpush.msra.mxu1 %v15693_v51  ;;  %9994 = vmatpush.msk.msra.mxu3 %vm15487_vm1, %v21026_v14  ;;  %vm15773_vm1 = vcmp.eq.s32.totalorder %v22162_v48, %v15344_v55  ;;  %v9954_v48 = vsel %vm15745_vm14, 1.0, %v22057_v29  ;;  %v15822_v37 = vand.u32 4294901760, %v15769_v49  ;;  %v22181_v51 = vld [vmem:[#allocation94_spill] sm:$0xff] }
 0x31d   : > { %22143 = vst [vmem:[#allocation87_spill] sm:$0xff] %v15697_v53  ;;  %9982 = vmatpush.msk.msra.mxu0 %vm15593_vm3, %v21026_v14  ;;  %5022 = vmatpush.msra.mxu2 %v15602_v39  ;;  %v22164_v20 = vsel %vm15773_vm1, 4294967295, %v22163_v20  ;;  %v15795_v39 = vand.u32 4294901760, %v4952_v40  ;;  %v9953_v40 = vsel %vm15773_vm1, 1.0, %v22057_v29  ;;  %v15824_v19 = vsub.f32 %v9954_v48, %v9954_v48 }
 0x31e   : > { %22147 = vst [vmem:[#allocation186_spill] sm:$0xff] %v22146_v36  ;;  %4936 = vmatpush.msra.mxu1 %v15724_v33  ;;  %9995 = vmatpush.msk.msra.mxu3 %vm15513_vm5, %v21026_v14  ;;  %vm15810_vm5 = vcmp.eq.s32.totalorder %v22168_v59, %v15344_v55  ;;  %v15830_v59 = vand.u32 4294901760, %v4958_v18  ;;  %v4970_v41 = vsub.f32 %v15729_v50, %v15784_v9  ;;  %v15848_v48 = vand.u32 4294901760, %v15797_v17 }
 0x31f   : > { %22151 = vst [vmem:[#allocation156_spill] sm:$0xff] %v15724_v33  ;;  %9983 = vmatpush.msk.msra.mxu0 %vm15617_vm7, %v21026_v14  ;;  %5025 = vmatpush.msra.mxu2 %v15625_v23  ;;  %v22169_v23 = vmov 0  ;;  %v22175_v33 = vmov 0  ;;  %v15850_v18 = vsub.f32 %v9953_v40, %v9953_v40  ;;  %v22182_v40 = vmov 0 }
 0x320   : > { %22152 = vst [vmem:[#allocation159_spill] sm:$0xff] %v15727_v62  ;;  %4942 = vmatpush.msra.mxu1 %v15753_v52  ;;  %9996 = vmatpush.msk.msra.mxu3 %vm15530_vm12, %v21026_v14  ;;  %v22170_v23 = vsel %vm15810_vm5, 4294967295, %v22169_v23  ;;  %v15885_v11 = vand.u32 4294901760, %v4970_v41  ;;  %v5239_v41 = vsub.f32 %v15797_v17, %v15848_v48 }
 0x321   : > { %22153 = vst [vmem:[#allocation122_spill] sm:$0xff] %v15729_v50  ;;  %9984 = vmatpush.msk.msra.mxu0 %vm15643_vm8, %v21026_v14  ;;  %5028 = vmatpush.msra.mxu2 %v15665_v21  ;;  %v22174_v21 = vld [vmem:[#allocation88_spill] sm:$0xff] }
 0x322   : > { %22157 = vst [vmem:[#allocation157_spill] sm:$0xff] %v15753_v52  ;;  %4948 = vmatpush.msra.mxu1 %v15767_v4  ;;  %9997 = vmatpush.msk.msra.mxu3 %vm15551_vm6, %v21026_v14  ;;  %v15835_v52 = vand.u32 4294901760, %v15786_v3  ;;  %vm15839_vm12 = vcmp.eq.s32.totalorder %v22174_v21, %v15344_v55  ;;  %v15859_v21 = vand.u32 4294901760, %v4964_v35  ;;  %vm15865_vm6 = vcmp.eq.s32.totalorder %v22181_v51, %v15344_v55 }
 0x323   : > { %22158 = vst [vmem:[#allocation102_spill] sm:$0xff] %v15756_v7  ;;  %v22176_v33 = vsel %vm15839_vm12, 4294967295, %v22175_v33  ;;  %9985 = vmatpush.msk.msra.mxu0 %vm15669_vm10, %v21026_v14  ;;  %5031 = vmatpush.msra.mxu2 %v15697_v53  ;;  %v4976_v53 = vsub.f32 %v15758_v25, %v15806_v22  ;;  %v22183_v40 = vsel %vm15865_vm6, 4294967295, %v22182_v40  ;;  %v15876_v35 = vand.u32 4294901760, %v15824_v19 }
 0x324   : > { %22159 = vst [vmem:[#allocation200_spill] sm:$0xff] %v15758_v25  ;;  %4954 = vmatpush.msra.mxu1 %v15795_v39  ;;  %9998 = vmatpush.msk.msra.mxu3 %vm15593_vm3, %v21026_v14  ;;  %v9951_v51 = vsel %vm15839_vm12, 1.0, %v22057_v29  ;;  %vm15893_vm3 = vcmp.eq.s32.totalorder %v22188_v12, %v15344_v55  ;;  %v22193_v12 = vld [vmem:[#allocation106_spill] sm:$0xff] }
 0x325   : > { %22160 = vst [vmem:[#allocation183_spill] sm:$0xff] %v15767_v4  ;;  %v9952_v4 = vsel %vm15810_vm5, 1.0, %v22057_v29  ;;  %9986 = vmatpush.msk.msra.mxu0 %vm15682_vm11, %v21026_v14  ;;  %5034 = vmatpush.msra.mxu2 %v15729_v50  ;;  %v3711_v5 = vpop.f32.mrf.mxu2  ;;  %v4988_v50 = vsub.f32 %v15786_v3, %v15835_v52  ;;  %v22190_v26 = vsel %vm15893_vm3, 4294967295, %v22189_v26 }
 0x326   : > { %22161 = vst [vmem:[#allocation109_spill] sm:$0xff] %v15769_v49  ;;  %4960 = vmatpush.msra.mxu1 %v15830_v59  ;;  %9999 = vmatpush.msk.msra.mxu3 %vm15617_vm7, %v21026_v14  ;;  %v15889_v10 = vsub.f32 %v9952_v4, %v9952_v4  ;;  %v9950_v4 = vsel %vm15865_vm6, 1.0, %v22057_v29  ;;  %vm15911_vm7 = vcmp.eq.s32.totalorder %v22193_v12, %v15344_v55 }
 0x327   : > { %22165 = vst [vmem:[#allocation204_spill] sm:$0xff] %v15786_v3  ;;  %9987 = vmatpush.msk.msra.mxu0 %vm15701_vm2, %v21026_v14  ;;  %5037 = vmatpush.msra.mxu2 %v15758_v25  ;;  %v22195_v56 = vsel %vm15911_vm7, 4294967295, %v22194_v56  ;;  %v15919_v25 = vand.u32 4294901760, %v4976_v53  ;;  %v5245_v12 = vsub.f32 %v15824_v19, %v15876_v35 }
 0x328   : > { %22166 = vst [vmem:[#allocation116_spill] sm:$0xff] %v15795_v39  ;;  %v4982_v39 = vsub.f32 %v15769_v49, %v15822_v37  ;;  %4966 = vmatpush.msra.mxu1 %v15859_v21  ;;  %10000 = vmatpush.msk.msra.mxu3 %vm15643_vm8, %v21026_v14  ;;  %v3812_v57 = vpop.f32.mrf.mxu3  ;;  %v15937_v53 = vand.u32 4294901760, %v15889_v10 }
 0x329   : > { %22167 = vst [vmem:[#allocation195_spill] sm:$0xff] %v15797_v17  ;;  %5092 = vmatpush.msrb.mxu0 %v15451_v6  ;;  %5040 = vmatpush.msra.mxu2 %v15769_v49  ;;  %v3813_v30 = vadd.f32 %v3812_v57, %v3711_v5  ;;  %v22203_v49 = vmov 0  ;;  %v9948_v57 = vsel %vm15911_vm7, 1.0, %v22057_v29  ;;  %v15952_v5 = vand.u32 4294901760, %v5239_v41  ;;  %v22210_v41 = vld [vmem:[#allocation114_spill] sm:$0xff] }
 0x32a   : > { %22171 = vst [vmem:[#allocation140_spill] sm:$0xff] %v15822_v37  ;;  %v15925_v17 = vand.u32 4294901760, %v4982_v39  ;;  %4972 = vmatpush.msra.mxu1 %v15885_v11  ;;  %10001 = vmatpush.msk.msra.mxu3 %vm15669_vm10, %v21026_v14  ;;  %v22202_v39 = vld [vmem:[#allocation108_spill] sm:$0xff]  ;;  %v15954_v6 = vand.u32 4294901760, %v4988_v50  ;;  %vm15969_vm10 = vcmp.eq.s32.totalorder %v22210_v41, %v15344_v55  ;;  %v22211_v50 = vmov 0 }
 0x32b   : > { %22172 = vst [vmem:[#allocation107_spill] sm:$0xff] %v15830_v59  ;;  %v15904_v59 = vand.u32 4294901760, %v15850_v18  ;;  %vm15943_vm8 = vcmp.eq.s32.totalorder %v22202_v39, %v15344_v55  ;;  %5096 = vmatpush.msrb.mxu0 %v15474_v47  ;;  %5043 = vmatpush.msra.mxu2 %v15786_v3  ;;  %v22212_v50 = vsel %vm15969_vm10, 4294967295, %v22211_v50  ;;  %v15977_v3 = vsub.f32 %v9948_v57, %v9948_v57 }
 0x32c   : > { %22173 = vst [vmem:[#allocation153_spill] sm:$0xff] %v15835_v52  ;;  %v22204_v49 = vsel %vm15943_vm8, 4294967295, %v22203_v49  ;;  %4978 = vmatpush.msra.mxu1 %v15919_v25  ;;  %10002 = vmatpush.msk.msra.mxu3 %vm15682_vm11, %v21026_v14 }
 0x32d   : > { %22177 = vst [vmem:[#allocation127_spill] sm:$0xff] %v22176_v33  ;;  %5100 = vmatpush.msrb.mxu0 %v15507_v27  ;;  %10020 = vmatpush.msk.msrb.mxu2 %vm15716_vm0, %v21026_v14  ;;  %v10681_v33 = vld [vmem:[%s11037_s19 + $0x1] ss:$0 sm:$0xff] }
 0x32e   : > { %22178 = vst [vmem:[#allocation110_spill] sm:$0xff] %v15848_v48  ;;  %v15921_v48 = vsub.f32 %v9951_v51, %v9951_v51  ;;  %v15939_v51 = vsub.f32 %v9950_v4, %v9950_v4  ;;  %v5251_v4 = vsub.f32 %v15850_v18, %v15904_v59  ;;  %4984 = vmatpush.msra.mxu1 %v15925_v17  ;;  %v3905_v41 = vpop.f32.mrf.mxu1  ;;  %v3974_v57 = vpop.f32.mrf.mxu2 }
 0x32f   : > { %22179 = vst [vmem:[#allocation155_spill] sm:$0xff] %v15850_v18  ;;  %10003 = vmatpush.msk.msra.mxu3 %vm15701_vm2, %v21026_v14  ;;  %5104 = vmatpush.msrb.mxu0 %v15526_v31 }
 0x330   : > { %22180 = vst [vmem:[#allocation137_spill] sm:$0xff] %v15859_v21  ;;  %v9949_v21 = vsel %vm15893_vm3, 1.0, %v22057_v29  ;;  %v15991_v27 = vand.u32 4294901760, %v15939_v51  ;;  %10021 = vmatpush.msk.msrb.mxu2 %vm15745_vm14, %v21026_v14  ;;  %4990 = vmatpush.msra.mxu1 %v15954_v6 }
 0x331   : > { %22184 = vst [vmem:[#allocation111_spill] sm:$0xff] %v22183_v40  ;;  %v15965_v47 = vsub.f32 %v9949_v21, %v9949_v21  ;;  %v15986_v21 = vand.u32 4294901760, %v5245_v12  ;;  %v16003_v12 = vand.u32 4294901760, %v5251_v4  ;;  %5241 = vmatpush.msrb.mxu3 %v15952_v5  ;;  %v22224_v4 = vld [vmem:[#allocation120_spill] sm:$0xff]  ;;  %5108 = vmatpush.msrb.mxu0 %v15565_v1 }
 0x332   : > { %22185 = vst [vmem:[#allocation160_spill] sm:$0xff] %v15876_v35  ;;  %v15963_v35 = vand.u32 4294901760, %v15921_v48  ;;  %vm16019_vm14 = vcmp.eq.s32.totalorder %v22224_v4, %v15344_v55  ;;  %10004 = vmatpush.msk.msrb.mxu1 %vm15366_vm13, %v21026_v14  ;;  %10022 = vmatpush.msk.msrb.mxu2 %vm15773_vm1, %v21026_v14  ;;  %v5269_v1 = vsub.f32 %v15939_v51, %v15991_v27 }
 0x333   : > { %22186 = vst [vmem:[#allocation124_spill] sm:$0xff] %v15885_v11  ;;  %v3866_v11 = vpop.f32.mrf.mxu0  ;;  %v16013_v31 = vand.u32 4294901760, %v15965_v47  ;;  %5247 = vmatpush.msrb.mxu3 %v15986_v21  ;;  %5112 = vmatpush.msrb.mxu0 %v15587_v38  ;;  %vm16049_vm13 = vcmp.eq.s32.totalorder %v22231_v46, %v15344_v55 }
 0x334   : > { %22187 = vst [vmem:[#allocation191_spill] sm:$0xff] %v15889_v10  ;;  %v3867_v39 = vadd.f32 %v3866_v11, %v3813_v30  ;;  %v9947_v30 = vsel %vm15943_vm8, 1.0, %v22057_v29  ;;  %v5257_v11 = vsub.f32 %v15889_v10, %v15937_v53  ;;  %10005 = vmatpush.msk.msrb.mxu1 %vm15380_vm9, %v21026_v14  ;;  %10023 = vmatpush.msk.msrb.mxu2 %vm15810_vm5, %v21026_v14 }
 0x335   : > { %22191 = vst [vmem:[#allocation172_spill] sm:$0xff] %v22190_v26  ;;  %v16015_v36 = vsub.f32 %v9947_v30, %v9947_v30  ;;  %5253 = vmatpush.msrb.mxu3 %v16003_v12  ;;  %5116 = vmatpush.msrb.mxu0 %v15613_v43 }
 0x336   : > { %22192 = vst [vmem:[#allocation134_spill] sm:$0xff] %v15904_v59  ;;  %v22218_v59 = vmov 0  ;;  %v16037_v4 = vand.u32 4294901760, %v5257_v11  ;;  %v9944_v11 = vsel %vm16019_vm14, 1.0, %v22057_v29  ;;  %10006 = vmatpush.msk.msrb.mxu1 %vm15403_vm15, %v21026_v14  ;;  %10024 = vmatpush.msk.msrb.mxu2 %vm15839_vm12, %v21026_v14  ;;  %vm16101_vm15 = vcmp.eq.s32.totalorder %v22245_v42, %v15344_v55 }
 0x337   : > { %22196 = vst [vmem:[#allocation201_spill] sm:$0xff] %v22195_v56  ;;  %v16090_v38 = vsub.f32 %v9944_v11, %v9944_v11  ;;  %5120 = vmatpush.msrb.mxu0 %v15639_v28 }
 0x338   : > { %22197 = vst [vmem:[#allocation135_spill] sm:$0xff] %v15919_v25  ;;  %v22217_v25 = vld [vmem:[#allocation119_spill] sm:$0xff]  ;;  %5259 = vmatpush.msrb.mxu3 %v16037_v4  ;;  %10007 = vmatpush.msk.msrb.mxu1 %vm15416_vm4, %v21026_v14  ;;  %vm22251_vm4 = vnez %v22074_v44  ;;  %v22256_v44 = vmov 0 }
 0x339   : > { %22198 = vst [vmem:[#allocation205_spill] sm:$0xff] %v15921_v48  ;;  %vm15995_vm0 = vcmp.eq.s32.totalorder %v22217_v25, %v15344_v55  ;;  %v5263_v25 = vsub.f32 %v15921_v48, %v15963_v35  ;;  %10025 = vmatpush.msk.msrb.mxu2 %vm15865_vm6, %v21026_v14  ;;  %5124 = vmatpush.msrb.mxu0 %v15652_v58  ;;  %v16134_v0 = vand.u32 4294901760, %v16090_v38  ;;  %v22255_v58 = vld [vmem:[#allocation147_spill] sm:$0xff] }
 0x33a   : > { %22199 = vst [vmem:[#allocation138_spill] sm:$0xff] %v15925_v17  ;;  %v22219_v59 = vsel %vm15995_vm0, 4294967295, %v22218_v59  ;;  %v3906_v17 = vadd.f32 %v3905_v41, %v3867_v39  ;;  %v22225_v39 = vmov 0  ;;  %v9945_v30 = vsel %vm15995_vm0, 1.0, %v22057_v29  ;;  %10008 = vmatpush.msk.msrb.mxu1 %vm22251_vm4, %v21026_v14 }
 0x33b   : > { %22200 = vst [vmem:[#allocation212_spill] sm:$0xff] %v15937_v53  ;;  %v9946_v53 = vsel %vm15969_vm10, 1.0, %v22057_v29  ;;  %v22226_v39 = vsel %vm16019_vm14, 4294967295, %v22225_v39  ;;  %v16067_v46 = vsub.f32 %v9945_v30, %v9945_v30  ;;  %v16085_v30 = vand.u32 4294901760, %v5269_v1  ;;  %10026 = vmatpush.msk.msrb.mxu2 %vm15893_vm3, %v21026_v14  ;;  %5128 = vmatpush.msrb.mxu0 %v15678_v61 }
 0x33c   : > { %22201 = vst [vmem:[#allocation148_spill] sm:$0xff] %v15939_v51  ;;  %v3975_v41 = vadd.f32 %v3974_v57, %v3906_v17  ;;  %v16041_v17 = vsub.f32 %v9946_v53, %v9946_v53  ;;  %v16060_v53 = vand.u32 4294901760, %v5263_v25  ;;  %v22238_v25 = vld [vmem:[#allocation136_spill] sm:$0xff]  ;;  %v22246_v1 = vmov 0 }
 0x33d   : > { %22205 = vst [vmem:[#allocation213_spill] sm:$0xff] %v22204_v49  ;;  %vm16077_vm9 = vcmp.eq.s32.totalorder %v22238_v25, %v15344_v55  ;;  %v9943_v25 = vsel %vm16049_vm13, 1.0, %v22057_v29  ;;  %v22247_v1 = vsel %vm16101_vm15, 4294967295, %v22246_v1  ;;  %v16114_v28 = vand.u32 4294901760, %v16067_v46  ;;  %10027 = vmatpush.msk.msrb.mxu2 %vm15911_vm7, %v21026_v14  ;;  %5132 = vmatpush.msrb.mxu0 %v15727_v62 }
 0x33e   : > { %22206 = vst [vmem:[#allocation90_spill] sm:$0xff] %v15952_v5  ;;  %v4011_v5 = vpop.f32.mrf.mxu3  ;;  %v16088_v43 = vand.u32 4294901760, %v16041_v17  ;;  %5265 = vmatpush.msrb.mxu3 %v16060_v53  ;;  %v9942_v42 = vsel %vm16077_vm9, 1.0, %v22057_v29  ;;  %vm16138_vm6 = vcmp.eq.s32.totalorder %v22255_v58, %v15344_v55  ;;  %vm22259_vm4 = vnez %v22084_v8 }
 0x33f   : > { %22207 = vst [vmem:[#allocation216_spill] sm:$0xff] %v15954_v6  ;;  %v16028_v6 = vand.u32 4294901760, %v15977_v3  ;;  %v4012_v57 = vadd.f32 %v4011_v5, %v3975_v41  ;;  %v5275_v5 = vsub.f32 %v15965_v47, %v16013_v31  ;;  %v16065_v41 = vand.u32 4294901760, %v16015_v36  ;;  %10009 = vmatpush.msk.msrb.mxu1 %vm22259_vm4, %v21026_v14  ;;  %10028 = vmatpush.msk.msrb.mxu2 %vm15943_vm8, %v21026_v14 }
 0x340   : > { %22208 = vst [vmem:[#allocation163_spill] sm:$0xff] %v15963_v35  ;;  %v22232_v35 = vmov 0  ;;  %5271 = vmatpush.msrb.mxu3 %v16085_v30  ;;  %v22257_v44 = vsel %vm16138_vm6, 4294967295, %v22256_v44  ;;  %vm22262_vm3 = vnez %v22091_v16  ;;  %v5305_v62 = vsub.f32 %v16090_v38, %v16134_v0  ;;  %5136 = vmatpush.msrb.mxu0 %v15756_v7 }
 0x341   : > { %22209 = vst [vmem:[#allocation218_spill] sm:$0xff] %v15965_v47  ;;  %v22233_v35 = vsel %vm16049_vm13, 4294967295, %v22232_v35  ;;  %v16109_v11 = vand.u32 4294901760, %v5275_v5  ;;  %v16125_v5 = vsub.f32 %v9943_v25, %v9943_v25  ;;  %v16149_v25 = vsub.f32 %v9942_v42, %v9942_v42  ;;  %10010 = vmatpush.msk.msrb.mxu1 %vm22262_vm3, %v21026_v14  ;;  %10029 = vmatpush.msk.msrb.mxu2 %vm15969_vm10, %v21026_v14 }
 0x342   : > { %22213 = vst [vmem:[#allocation103_spill] sm:$0xff] %v22212_v50  ;;  %vm22266_vm3 = vnez %v22099_v60  ;;  %5140 = vmatpush.msrb.mxu0 %v15784_v9  ;;  %vm22273_vm4 = vnez %v22109_v13 }
 0x343   : > { %22214 = vst [vmem:[#allocation220_spill] sm:$0xff] %v15977_v3  ;;  %5277 = vmatpush.msrb.mxu3 %v16109_v11  ;;  %v16164_v42 = vand.u32 4294901760, %v16125_v5  ;;  %10011 = vmatpush.msk.msrb.mxu1 %vm22266_vm3, %v21026_v14  ;;  %v16184_v16 = vand.u32 4294901760, %v16149_v25  ;;  %vm22270_vm3 = vnez %v22104_v54 }
 0x344   : > { %22215 = vst [vmem:[#allocation190_spill] sm:$0xff] %v15986_v21  ;;  %v5281_v21 = vsub.f32 %v15977_v3, %v16028_v6  ;;  %10030 = vmatpush.msk.msrb.mxu2 %vm15995_vm0, %v21026_v14  ;;  %5144 = vmatpush.msrb.mxu0 %v15806_v22 }
 0x345   : > { %22216 = vst [vmem:[#allocation198_spill] sm:$0xff] %v15991_v27  ;;  %10012 = vmatpush.msk.msrb.mxu1 %vm22270_vm3, %v21026_v14  ;;  %v5311_v7 = vsub.f32 %v16125_v5, %v16164_v42  ;;  %vm22275_vm3 = vnez %v22117_v24 }
 0x346   : > { %22220 = vst [vmem:[#allocation131_spill] sm:$0xff] %v22219_v59  ;;  %v16123_v63 = vand.u32 4294901760, %v5281_v21  ;;  %v9941_v21 = vsel %vm16101_vm15, 1.0, %v22057_v29  ;;  %10031 = vmatpush.msk.msrb.mxu2 %vm16019_vm14, %v21026_v14  ;;  %5148 = vmatpush.msrb.mxu0 %v15822_v37 }
 0x347   : > { %22221 = vst [vmem:[#allocation225_spill] sm:$0xff] %v16003_v12  ;;  %v22239_v12 = vmov 0  ;;  %v16166_v61 = vsub.f32 %v9941_v21, %v9941_v21  ;;  %v4052_v21 = vpop.f32.mrf.mxu0  ;;  %10013 = vmatpush.msk.msrb.mxu1 %vm22273_vm4, %v21026_v14 }
 0x348   : > { %22222 = vst [vmem:[#allocation206_spill] sm:$0xff] %v16013_v31  ;;  %v22240_v12 = vsel %vm16077_vm9, 4294967295, %v22239_v12  ;;  %5283 = vmatpush.msrb.mxu3 %v16123_v63  ;;  %10032 = vmatpush.msk.msrb.mxu2 %vm16049_vm13, %v21026_v14 }
 0x349   : > { %22223 = vst [vmem:[#allocation144_spill] sm:$0xff] %v16015_v36  ;;  %v16201_v60 = vand.u32 4294901760, %v16166_v61  ;;  %10014 = vmatpush.msk.msrb.mxu1 %vm22275_vm3, %v21026_v14  ;;  %5152 = vmatpush.msrb.mxu0 %v15835_v52  ;;  %vm22285_vm3 = vnez %v22137_v32 }
 0x34a   : > { %22227 = vst [vmem:[#allocation173_spill] sm:$0xff] %v22226_v39  ;;  %10033 = vmatpush.msk.msrb.mxu2 %vm16077_vm9, %v21026_v14  ;;  %v22345_v39 = vmov 0 }
 0x34b   : > { %22228 = vst [vmem:[#allocation175_spill] sm:$0xff] %v16028_v6  ;;  %v4207_v37 = vpop.f32.mrf.mxu2 }
 0x34c   : > { %22229 = vst [vmem:[#allocation177_spill] sm:$0xff] %v16037_v4  ;;  %v5287_v4 = vsub.f32 %v16015_v36, %v16065_v41  ;;  %10034 = vmatpush.msk.msrb.mxu2 %vm16101_vm15, %v21026_v14 }
 0x34d   : > { %22230 = vst [vmem:[#allocation179_spill] sm:$0xff] %v16041_v17 }
 0x34e   : > { %22234 = vst [vmem:[#allocation181_spill] sm:$0xff] %v22233_v35  ;;  %v16155_v58 = vand.u32 4294901760, %v5287_v4  ;;  %10035 = vmatpush.msk.msrb.mxu2 %vm16138_vm6, %v21026_v14  ;;  %v22339_v35 = vld [vmem:[#allocation180_spill] sm:$0xff] }
 0x34f   : > { %22235 = vst [vmem:[#allocation184_spill] sm:$0xff] %v16060_v53  ;;  %v5293_v53 = vsub.f32 %v16041_v17, %v16088_v43 }
 0x350   : > { %22236 = vst [vmem:[#allocation187_spill] sm:$0xff] %v16065_v41  ;;  %5289 = vmatpush.msrb.mxu3 %v16155_v58 }
 0x351   : > { %22237 = vst [vmem:[#allocation188_spill] sm:$0xff] %v16067_v46  ;;  %v16175_v4 = vand.u32 4294901760, %v5293_v53 }
 0x352   : > { %22241 = vst [vmem:[#allocation194_spill] sm:$0xff] %v22240_v12 }
 0x353   : > { %22242 = vst [vmem:[#allocation192_spill] sm:$0xff] %v16085_v30  ;;  %v5299_v30 = vsub.f32 %v16067_v46, %v16114_v28  ;;  %5295 = vmatpush.msrb.mxu3 %v16175_v4 }
 0x354   : > { %22243 = vst [vmem:[#allocation199_spill] sm:$0xff] %v16088_v43 }
 0x355   : > { %22244 = vst [vmem:[#allocation210_spill] sm:$0xff] %v16090_v38  ;;  %v16190_v53 = vand.u32 4294901760, %v5299_v30  ;;  %v5317_v30 = vsub.f32 %v16149_v25, %v16184_v16 }
 0x356   : > { %22248 = vst [vmem:[#allocation208_spill] sm:$0xff] %v22247_v1 }
 0x357   : > { %22249 = vst [vmem:[#allocation211_spill] sm:$0xff] %v16109_v11  ;;  %v9940_v11 = vsel %vm16138_vm6, 1.0, %v22057_v29  ;;  %5301 = vmatpush.msrb.mxu3 %v16190_v53 }
 0x358   : > { %22250 = vst [vmem:[#allocation209_spill] sm:$0xff] %v16114_v28  ;;  %v16192_v8 = vsub.f32 %v9940_v11, %v9940_v11 }
 0x359   : > { %22252 = vst [vmem:[#allocation80_spill] sm:$0xff] %v16123_v63  ;;  %v4053_v63 = vadd.f32 %v4052_v21, %v4012_v57  ;;  %v16207_v57 = vand.u32 4294901760, %v5305_v62  ;;  %v16226_v62 = vand.u32 4294901760, %v5311_v7  ;;  %v5323_v21 = vsub.f32 %v16166_v61, %v16201_v60 }
 0x35a   : > { %22253 = vst [vmem:[#allocation215_spill] sm:$0xff] %v16125_v5  ;;  %v16220_v11 = vand.u32 4294901760, %v16192_v8 }
 0x35b   : > { %22254 = vst [vmem:[#allocation217_spill] sm:$0xff] %v16134_v0  ;;  %5307 = vmatpush.msrb.mxu3 %v16207_v57  ;;  %v16248_v52 = vand.u32 4294901760, %v5323_v21 }
 0x35c   : > { %22258 = vst [vmem:[#allocation219_spill] sm:$0xff] %v22257_v44  ;;  %v5329_v7 = vsub.f32 %v16192_v8, %v16220_v11  ;;  %v22347_v44 = vld [vmem:[#allocation164_spill] sm:$0xff] }
 0x35d   : > { %22260 = vst [vmem:[#allocation221_spill] sm:$0xff] %v16149_v25  ;;  %5313 = vmatpush.msrb.mxu3 %v16226_v62 }
 0x35e   : > { %22261 = vst [vmem:[#allocation223_spill] sm:$0xff] %v16155_v58  ;;  %v22280_v58 = vld [vmem:[#allocation161_spill] sm:$0xff]  ;;  %v16262_v21 = vand.u32 4294901760, %v5329_v7 }
 0x35f   : > { %22263 = vst [vmem:[#allocation222_spill] sm:$0xff] %v16164_v42  ;;  %4891 = vmatmul.f32.vlgmr.msra.gmra.mxu0 %v22280_v58 }
 0x360   : > { %22264 = vst [vmem:[#allocation226_spill] sm:$0xff] %v16166_v61 }
 0x361   : > { %22265 = vst [vmem:[#allocation224_spill] sm:$0xff] %v16175_v4  ;;  %v16238_v4 = vand.u32 4294901760, %v5317_v30  ;;  %v4153_v30 = vpop.f32.mrf.mxu1 }
 0x362   : > { %22267 = vst [vmem:[#allocation227_spill] sm:$0xff] %v16184_v16  ;;  %v4154_v58 = vadd.f32 %v4153_v30, %v4053_v63  ;;  %v22287_v63 = vld [vmem:[#allocation152_spill] sm:$0xff]  ;;  %v22288_v30 = vld [vmem:[#allocation110_spill] sm:$0xff] }
 0x363   : > { %22268 = vst [vmem:[#allocation228_spill] sm:$0xff] %v16190_v53  ;;  %v22277_v53 = vld [vmem:[#allocation130_spill] sm:$0xff]  ;;  %5319 = vmatpush.msrb.mxu3 %v16238_v4 }
 0x364   : > { %22269 = vst [vmem:[#allocation229_spill] sm:$0xff] %v16192_v8  ;;  %vm22278_vm4 = vnez %v22277_v53  ;;  %5085 = vmatmul.f32.vlgmr.msra.gmra.mxu3 %v22287_v63  ;;  %v22297_v63 = vld [vmem:[#allocation158_spill] sm:$0xff] }
 0x365   : > { %22271 = vst [vmem:[#allocation230_spill] sm:$0xff] %v16201_v60  ;;  %10015 = vmatpush.msk.msrb.mxu1 %vm22278_vm4, %v21026_v14  ;;  %vm22283_vm4 = vnez %v22131_v45  ;;  %5325 = vmatpush.msrb.mxu3 %v16248_v52 }
 0x366   : > { %22272 = vst [vmem:[#allocation231_spill] sm:$0xff] %v16207_v57  ;;  %v22281_v57 = vld [vmem:[#allocation195_spill] sm:$0xff] }
 0x367   : > { %22274 = vst [vmem:[#allocation232_spill] sm:$0xff] %v16220_v11  ;;  %5339 = vmatpush.msra.mxu0 %v22281_v57  ;;  %10016 = vmatpush.msk.msrb.mxu1 %vm22283_vm4, %v21026_v14  ;;  %v4208_v57 = vadd.f32 %v4207_v37, %v4154_v58  ;;  %v22292_v58 = vld [vmem:[#allocation186_spill] sm:$0xff] }
 0x368   : > { %22276 = vst [vmem:[#allocation233_spill] sm:$0xff] %v16226_v62  ;;  %v22284_v62 = vld [vmem:[#allocation143_spill] sm:$0xff]  ;;  %5331 = vmatpush.msrb.mxu3 %v16262_v21  ;;  %v22293_v37 = vld [vmem:[#allocation134_spill] sm:$0xff] }
 0x369   : > { %22279 = vst [vmem:[#allocation130_spill] sm:$0xff] %v16238_v4  ;;  %5342 = vmatpush.msra.mxu0 %v15824_v19  ;;  %5046 = vmatmul.f32.vlgmr.msra.gmra.mxu2 %v22284_v62  ;;  %v4246_v4 = vpop.f32.mrf.mxu3  ;;  %v22289_v62 = vld [vmem:[#allocation133_spill] sm:$0xff] }
 0x36a   : > { %22282 = vst [vmem:[#allocation234_spill] sm:$0xff] %v16248_v52  ;;  %10017 = vmatpush.msk.msrb.mxu1 %vm22285_vm3, %v21026_v14  ;;  %5433 = vmatpush.msra.mxu2 %v22288_v30  ;;  %v4247_v7 = vadd.f32 %v4246_v4, %v4208_v57  ;;  %v22290_v52 = vld [vmem:[#allocation160_spill] sm:$0xff]  ;;  %vm22291_vm3 = vnez %v22150_v15  ;;  %v22295_v4 = vld [vmem:[#allocation166_spill] sm:$0xff] }
 0x36b   : > { %22286 = vst [vmem:[#allocation235_spill] sm:$0xff] %v16262_v21  ;;  %5345 = vmatpush.msra.mxu0 %v15850_v18  ;;  %4992 = vmatmul.f32.vlgmr.msra.gmra.mxu1 %v22289_v62  ;;  %v22296_v57 = vld [vmem:[#allocation212_spill] sm:$0xff]  ;;  %v22315_v21 = vld [vmem:[#allocation170_spill] sm:$0xff] }
 0x36c   : > { %10018 = vmatpush.msk.msrb.mxu1 %vm15682_vm11, %v21026_v14  ;;  %5437 = vmatpush.msra.mxu2 %v22290_v52  ;;  %vm22294_vm11 = vnez %v22156_v2  ;;  %v22325_v30 = vld [vmem:[#allocation174_spill] sm:$0xff] }
 0x36d   : > { %5348 = vmatpush.msra.mxu0 %v15889_v10  ;;  %10052 = vmatpush.msk.msra.mxu3 %vm22291_vm3, %v21026_v14  ;;  %v22372_v10 = vmov 0 }
 0x36e   : > { %10019 = vmatpush.msk.msrb.mxu1 %vm15701_vm2, %v21026_v14  ;;  %5441 = vmatpush.msra.mxu2 %v22293_v37  ;;  %v4352_v37 = vpop.f32.mrf.mxu1 }
 0x36f   : > { %5351 = vmatpush.msra.mxu0 %v15921_v48  ;;  %10053 = vmatpush.msk.msra.mxu3 %vm22294_vm11, %v21026_v14  ;;  %v22366_v48 = vmov 0 }
 0x370   : > { %10036 = vmatpush.msk.msra.mxu1 %vm22291_vm3, %v21026_v14  ;;  %5445 = vmatpush.msra.mxu2 %v22296_v57  ;;  %v22316_v57 = vmov 0 }
 0x371   : > { %5354 = vmatpush.msra.mxu0 %v15939_v51  ;;  %5232 = vmatmul.f32.vlgmr.msrb.gmra.mxu2 %v22295_v4  ;;  %v22298_v4 = vld [vmem:[#allocation163_spill] sm:$0xff] }
 0x372   : > { %10037 = vmatpush.msk.msra.mxu1 %vm22294_vm11, %v21026_v14  ;;  %10054 = vmatpush.msk.msra.mxu3 %vm15773_vm1, %v21026_v14 }
 0x373   : > { %5357 = vmatpush.msra.mxu0 %v15965_v47  ;;  %5333 = vmatmul.f32.vlgmr.msrb.gmra.mxu3 %v22297_v63  ;;  %v22356_v47 = vmov 0 }
 0x374   : > { %5154 = vmatmul.f32.vlgmr.msrb.gmra.mxu0 %v22289_v62  ;;  %10038 = vmatpush.msk.msra.mxu1 %vm15773_vm1, %v21026_v14  ;;  %vm22299_vm1 = vnez %v22183_v40 }
 0x375   : > { %5449 = vmatpush.msra.mxu2 %v22298_v4  ;;  %10055 = vmatpush.msk.msra.mxu3 %vm15810_vm5, %v21026_v14  ;;  %v22305_v4 = vmov 0 }
 0x376   : > { %5360 = vmatpush.msra.mxu0 %v15977_v3  ;;  %5191 = vmatmul.f32.vlgmr.msrb.gmra.mxu1 %v22289_v62  ;;  %v4315_v62 = vpop.f32.mrf.mxu0  ;;  %v22351_v3 = vmov 0 }
 0x377   : > { %5453 = vmatpush.msra.mxu2 %v15991_v27  ;;  %10039 = vmatpush.msk.msra.mxu1 %vm15810_vm5, %v21026_v14  ;;  %vm22300_vm5 = vnez %v22190_v26  ;;  %v4316_v27 = vadd.f32 %v4315_v62, %v4247_v7  ;;  %v22307_v7 = vld [vmem:[#allocation168_spill] sm:$0xff] }
 0x378   : > { %10056 = vmatpush.msk.msra.mxu3 %vm15839_vm12, %v21026_v14  ;;  %5363 = vmatpush.msra.mxu0 %v16015_v36 }
 0x379   : > { %5457 = vmatpush.msra.mxu2 %v16013_v31  ;;  %10040 = vmatpush.msk.msra.mxu1 %vm15839_vm12, %v21026_v14  ;;  %v22302_v31 = vmov 0 }
 0x37a   : > { %10057 = vmatpush.msk.msra.mxu3 %vm22299_vm1, %v21026_v14  ;;  %5366 = vmatpush.msra.mxu0 %v16041_v17  ;;  %v22340_v17 = vmov 0 }
 0x37b   : > { %5461 = vmatpush.msra.mxu2 %v16028_v6  ;;  %10041 = vmatpush.msk.msra.mxu1 %vm22299_vm1, %v21026_v14  ;;  %v22301_v6 = vld [vmem:[#allocation70_spill] sm:$0xff] }
 0x37c   : > { %10058 = vmatpush.msk.msra.mxu3 %vm22300_vm5, %v21026_v14  ;;  %5369 = vmatpush.msra.mxu0 %v16067_v46  ;;  %vm16346_vm1 = vcmp.eq.s32.totalorder %v22301_v6, %v15344_v55  ;;  %v22334_v46 = vld [vmem:[#allocation178_spill] sm:$0xff] }
 0x37d   : > { %5465 = vmatpush.msra.mxu2 %v16065_v41  ;;  %10042 = vmatpush.msk.msra.mxu1 %vm22300_vm5, %v21026_v14  ;;  %v22303_v31 = vsel %vm16346_vm1, 4294967295, %v22302_v31  ;;  %v22304_v41 = vld [vmem:[#allocation167_spill] sm:$0xff]  ;;  %v9971_v62 = vsel %vm16346_vm1, 1.0, %v22057_v29 }
 0x37e   : > { %10059 = vmatpush.msk.msra.mxu3 %vm15911_vm7, %v21026_v14  ;;  %5372 = vmatpush.msra.mxu0 %v16090_v38  ;;  %vm16354_vm12 = vcmp.eq.s32.totalorder %v22304_v41, %v15344_v55  ;;  %v22308_v41 = vmov 0 }
 0x37f   : > { %5469 = vmatpush.msra.mxu2 %v16088_v43  ;;  %v22306_v4 = vsel %vm16354_vm12, 4294967295, %v22305_v4  ;;  %10043 = vmatpush.msk.msra.mxu1 %vm15911_vm7, %v21026_v14  ;;  %vm16377_vm7 = vcmp.eq.s32.totalorder %v22307_v7, %v15344_v55  ;;  %v9970_v6 = vsel %vm16354_vm12, 1.0, %v22057_v29  ;;  %v16392_v7 = vsub.f32 %v9971_v62, %v9971_v62 }
 0x380   : > { %10060 = vmatpush.msk.msra.mxu3 %vm15943_vm8, %v21026_v14  ;;  %5375 = vmatpush.msra.mxu0 %v16125_v5  ;;  %v22309_v41 = vsel %vm16377_vm7, 4294967295, %v22308_v41  ;;  %v22312_v43 = vmov 0  ;;  %v9969_v62 = vsel %vm16377_vm7, 1.0, %v22057_v29  ;;  %v22330_v5 = vmov 0 }
 0x381   : > { %5473 = vmatpush.msra.mxu2 %v16114_v28  ;;  %10044 = vmatpush.msk.msra.mxu1 %vm15943_vm8, %v21026_v14  ;;  %22310 = vst [vmem:[#allocation186_spill] sm:$0xff] %v16392_v7  ;;  %v22311_v28 = vld [vmem:[#allocation169_spill] sm:$0xff] }
 0x382   : > { %10061 = vmatpush.msk.msra.mxu3 %vm15969_vm10, %v21026_v14  ;;  %5378 = vmatpush.msra.mxu0 %v16149_v25  ;;  %vm16396_vm8 = vcmp.eq.s32.totalorder %v22311_v28, %v15344_v55  ;;  %v16429_v28 = vand.u32 4294901760, %v16392_v7  ;;  %v22326_v25 = vmov 0 }
 0x383   : > { %5477 = vmatpush.msra.mxu2 %v16134_v0  ;;  %10045 = vmatpush.msk.msra.mxu1 %vm15969_vm10, %v21026_v14  ;;  %v22313_v43 = vsel %vm16396_vm8, 4294967295, %v22312_v43  ;;  %v16402_v0 = vsub.f32 %v9970_v6, %v9970_v6  ;;  %vm16406_vm10 = vcmp.eq.s32.totalorder %v22315_v21, %v15344_v55  ;;  %v9968_v6 = vsel %vm16396_vm8, 1.0, %v22057_v29  ;;  %v22318_v21 = vld [vmem:[#allocation162_spill] sm:$0xff] }
 0x384   : > { %10062 = vmatpush.msk.msra.mxu3 %vm15995_vm0, %v21026_v14  ;;  %5381 = vmatpush.msra.mxu0 %v16166_v61  ;;  %v22317_v57 = vsel %vm16406_vm10, 4294967295, %v22316_v57  ;;  %v16455_v61 = vsub.f32 %v9968_v6, %v9968_v6  ;;  %v22329_v6 = vld [vmem:[#allocation176_spill] sm:$0xff] }
 0x385   : > { %5481 = vmatpush.msra.mxu2 %v16164_v42  ;;  %22314 = vst [vmem:[#allocation236_spill] sm:$0xff] %v16402_v0  ;;  %10046 = vmatpush.msk.msra.mxu1 %vm15995_vm0, %v21026_v14  ;;  %v16431_v42 = vsub.f32 %v9969_v62, %v9969_v62  ;;  %v4353_v62 = vadd.f32 %v4352_v37, %v4316_v27  ;;  %v16449_v52 = vand.u32 4294901760, %v16402_v0 }
 0x386   : > { %10063 = vmatpush.msk.msra.mxu3 %vm16019_vm14, %v21026_v14  ;;  %5384 = vmatpush.msra.mxu0 %v16192_v8  ;;  %v22320_v8 = vld [vmem:[#allocation171_spill] sm:$0xff]  ;;  %22324 = vst [vmem:[#allocation239_spill] sm:$0xff] %v16455_v61  ;;  %v16507_v38 = vand.u32 4294901760, %v16455_v61 }
 0x387   : > { %5485 = vmatpush.msra.mxu2 %v16184_v16  ;;  %5387 = vmatmul.f32.vlgmr.msra.gmra.mxu0 %v22318_v21  ;;  %22319 = vst [vmem:[#allocation237_spill] sm:$0xff] %v16431_v42  ;;  %vm16435_vm0 = vcmp.eq.s32.totalorder %v22320_v8, %v15344_v55  ;;  %v22321_v16 = vmov 0  ;;  %v9967_v21 = vsel %vm16406_vm10, 1.0, %v22057_v29  ;;  %v4393_v8 = vpop.f32.mrf.mxu2 }
 0x388   : > { %10047 = vmatpush.msk.msra.mxu1 %vm16019_vm14, %v21026_v14  ;;  %v22322_v16 = vsel %vm16435_vm0, 4294967295, %v22321_v16  ;;  %10064 = vmatpush.msk.msra.mxu3 %vm16049_vm13, %v21026_v14  ;;  %22323 = vst [vmem:[#allocation238_spill] sm:$0xff] %v16449_v52  ;;  %vm16459_vm14 = vcmp.eq.s32.totalorder %v22325_v30, %v15344_v55  ;;  %v4394_v27 = vadd.f32 %v4393_v8, %v4353_v62  ;;  %v9966_v30 = vsel %vm16435_vm0, 1.0, %v22057_v29 }
 0x389   : > { %10068 = vmatpush.msk.msrb.mxu0 %vm16346_vm1, %v21026_v14  ;;  %5489 = vmatpush.msra.mxu2 %v16201_v60  ;;  %v22327_v25 = vsel %vm16459_vm14, 4294967295, %v22326_v25  ;;  %v16469_v37 = vsub.f32 %v9967_v21, %v9967_v21  ;;  %v4494_v60 = vpop.f32.mrf.mxu3  ;;  %v5580_v8 = vsub.f32 %v16392_v7, %v16429_v28  ;;  %v16487_v21 = vand.u32 4294901760, %v16431_v42 }
 0x38a   : > { %10048 = vmatpush.msk.msra.mxu1 %vm16049_vm13, %v21026_v14  ;;  %10065 = vmatpush.msk.msra.mxu3 %vm16077_vm9, %v21026_v14  ;;  %vm16473_vm13 = vcmp.eq.s32.totalorder %v22329_v6, %v15344_v55  ;;  %v5586_v62 = vsub.f32 %v16402_v0, %v16449_v52  ;;  %v16497_v6 = vadd.f32 %v4494_v60, %v4394_v27  ;;  %v22335_v60 = vmov 0 }
 0x38b   : > { %10069 = vmatpush.msk.msrb.mxu0 %vm16354_vm12, %v21026_v14  ;;  %22328 = vst [vmem:[#allocation240_spill] sm:$0xff] %v16469_v37  ;;  %v22331_v5 = vsel %vm16473_vm13, 4294967295, %v22330_v5  ;;  %5493 = vmatpush.msra.mxu2 %v16220_v11  ;;  %v9965_v11 = vsel %vm16459_vm14, 1.0, %v22057_v29  ;;  %v16509_v12 = vsub.f32 %v9966_v30, %v9966_v30  ;;  %v9964_v27 = vsel %vm16473_vm13, 1.0, %v22057_v29 }
 0x38c   : > { %10049 = vmatpush.msk.msra.mxu1 %vm16077_vm9, %v21026_v14  ;;  %22332 = vst [vmem:[#allocation241_spill] sm:$0xff] %v16487_v21  ;;  %10066 = vmatpush.msk.msra.mxu3 %vm16101_vm15, %v21026_v14  ;;  %vm16513_vm9 = vcmp.eq.s32.totalorder %v22334_v46, %v15344_v55  ;;  %v16525_v1 = vand.u32 4294901760, %v16469_v37  ;;  %v16531_v30 = vand.u32 4294901760, %v5580_v8  ;;  %v5592_v46 = vsub.f32 %v16431_v42, %v16487_v21 }
 0x38d   : > { %10070 = vmatpush.msk.msrb.mxu0 %vm16377_vm7, %v21026_v14  ;;  %5495 = vmatmul.f32.vlgmr.msra.gmra.mxu2 %v22297_v63  ;;  %22333 = vst [vmem:[#allocation242_spill] sm:$0xff] %v16509_v12  ;;  %v22336_v60 = vsel %vm16513_vm9, 4294967295, %v22335_v60  ;;  %v9963_v8 = vsel %vm16513_vm9, 1.0, %v22057_v29 }
 0x38e   : > { %10050 = vmatpush.msk.msra.mxu1 %vm16101_vm15, %v21026_v14  ;;  %5680 = vmatpush.msrb.mxu2 %v16392_v7  ;;  %22337 = vst [vmem:[#allocation243_spill] sm:$0xff] %v16531_v30  ;;  %v16535_v7 = vsub.f32 %v9965_v11, %v9965_v11  ;;  %vm16539_vm15 = vcmp.eq.s32.totalorder %v22339_v35, %v15344_v55  ;;  %v16558_v55 = vand.u32 4294901760, %v5586_v62  ;;  %v10689_v35 = vld [vmem:[%s11026_s4 + $0x2] ss:$0 sm:$0xff] }
 0x38f   : > { %10067 = vmatpush.msk.msra.mxu3 %vm16138_vm6, %v21026_v14  ;;  %10071 = vmatpush.msk.msrb.mxu0 %vm16396_vm8, %v21026_v14  ;;  %v22341_v17 = vsel %vm16539_vm15, 4294967295, %v22340_v17  ;;  %v5598_v11 = vsub.f32 %v16455_v61, %v16507_v38  ;;  %v5604_v62 = vsub.f32 %v16469_v37, %v16525_v1  ;;  %v9962_v36 = vsel %vm16539_vm15, 1.0, %v22057_v29  ;;  %v4656_v18 = vpop.f32.mrf.mxu2 }
 0x390   : > { %5532 = vmatmul.f32.vlgmr.msra.gmra.mxu3 %v22297_v63  ;;  %22338 = vst [vmem:[#allocation244_spill] sm:$0xff] %v16535_v7  ;;  %5683 = vmatpush.msrb.mxu2 %v16402_v0  ;;  %v16547_v63 = vsub.f32 %v9964_v27, %v9964_v27  ;;  %v16563_v27 = vand.u32 4294901760, %v16509_v12  ;;  %v22344_v0 = vld [vmem:[#allocation182_spill] sm:$0xff]  ;;  %v16585_v59 = vand.u32 4294901760, %v16535_v7  ;;  %v16612_v50 = vsub.f32 %v9962_v36, %v9962_v36 }
 0x391   : > { %10084 = vmatpush.msk.msrb.mxu3 %vm16346_vm1, %v21026_v14  ;;  %10051 = vmatpush.msk.msra.mxu1 %vm16138_vm6, %v21026_v14  ;;  %22343 = vst [vmem:[#allocation246_spill] sm:$0xff] %v16558_v55  ;;  %vm16567_vm5 = vcmp.eq.s32.totalorder %v22344_v0, %v10689_v35  ;;  %v16582_v0 = vand.u32 4294901760, %v5592_v46 }
 0x392   : > { %22342 = vst [vmem:[#allocation245_spill] sm:$0xff] %v16547_v63  ;;  %10072 = vmatpush.msk.msrb.mxu0 %vm16406_vm10, %v21026_v14  ;;  %v22346_v39 = vsel %vm16567_vm5, 4294967295, %v22345_v39  ;;  %5426 = vmatmul.f32.vlgmr.msra.gmra.mxu1 %v22347_v44  ;;  %v16587_v44 = vsub.f32 %v9963_v8, %v9963_v8  ;;  %v9961_v46 = vsel %vm16567_vm5, 1.0, %v22057_v29  ;;  %v16608_v8 = vand.u32 4294901760, %v5598_v11 }
 0x393   : > { %5686 = vmatpush.msrb.mxu2 %v16431_v42  ;;  %5582 = vmatpush.msrb.mxu1 %v16531_v30  ;;  %22348 = vst [vmem:[#allocation247_spill] sm:$0xff] %v16582_v0  ;;  %v22350_v42 = vld [vmem:[#allocation185_spill] sm:$0xff]  ;;  %v16599_v30 = vand.u32 4294901760, %v16547_v63  ;;  %v5616_v36 = vsub.f32 %v16535_v7, %v16585_v59  ;;  %v16637_v49 = vsub.f32 %v9961_v46, %v9961_v46 }
 0x394   : > { %10085 = vmatpush.msk.msrb.mxu3 %vm16354_vm12, %v21026_v14  ;;  %22349 = vst [vmem:[#allocation248_spill] sm:$0xff] %v16587_v44  ;;  %vm16590_vm6 = vcmp.eq.s32.totalorder %v22350_v42, %v10689_v35  ;;  %10073 = vmatpush.msk.msrb.mxu0 %vm16435_vm0, %v21026_v14  ;;  %v5610_v42 = vsub.f32 %v16509_v12, %v16563_v27 }
 0x395   : > { %v22352_v3 = vsel %vm16590_vm6, 4294967295, %v22351_v3  ;;  %5689 = vmatpush.msrb.mxu2 %v16455_v61  ;;  %5588 = vmatpush.msrb.mxu1 %v16558_v55  ;;  %22353 = vst [vmem:[#allocation249_spill] sm:$0xff] %v16608_v8  ;;  %v22355_v61 = vld [vmem:[#allocation189_spill] sm:$0xff]  ;;  %v16623_v55 = vand.u32 4294901760, %v5604_v62  ;;  %v9960_v11 = vsel %vm16590_vm6, 1.0, %v22057_v29 }
 0x396   : > { %10086 = vmatpush.msk.msrb.mxu3 %vm16377_vm7, %v21026_v14  ;;  %22354 = vst [vmem:[#allocation250_spill] sm:$0xff] %v16612_v50  ;;  %vm16615_vm11 = vcmp.eq.s32.totalorder %v22355_v61, %v10689_v35  ;;  %10074 = vmatpush.msk.msrb.mxu0 %vm16459_vm14, %v21026_v14  ;;  %v16635_v61 = vand.u32 4294901760, %v16587_v44  ;;  %v22360_v62 = vld [vmem:[#allocation193_spill] sm:$0xff]  ;;  %v16657_v46 = vand.u32 4294901760, %v5610_v42  ;;  %v16662_v56 = vsub.f32 %v9960_v11, %v9960_v11 }
 0x397   : > { %v22357_v47 = vsel %vm16615_vm11, 4294967295, %v22356_v47  ;;  %5692 = vmatpush.msrb.mxu2 %v16469_v37  ;;  %22358 = vst [vmem:[#allocation251_spill] sm:$0xff] %v16623_v55  ;;  %5594 = vmatpush.msrb.mxu1 %v16582_v0  ;;  %vm16640_vm3 = vcmp.eq.s32.totalorder %v22360_v62, %v10689_v35  ;;  %v22361_v37 = vmov 0  ;;  %v5622_v0 = vsub.f32 %v16547_v63, %v16599_v30 }
 0x398   : > { %10087 = vmatpush.msk.msrb.mxu3 %vm16396_vm8, %v21026_v14  ;;  %22359 = vst [vmem:[#allocation252_spill] sm:$0xff] %v16637_v49  ;;  %v22362_v37 = vsel %vm16640_vm3, 4294967295, %v22361_v37  ;;  %10075 = vmatpush.msk.msrb.mxu0 %vm16473_vm13, %v21026_v14  ;;  %v9959_v51 = vsel %vm16615_vm11, 1.0, %v22057_v29  ;;  %v16660_v62 = vand.u32 4294901760, %v16612_v50  ;;  %v9958_v42 = vsel %vm16640_vm3, 1.0, %v22057_v29 }
 0x399   : > { %5695 = vmatpush.msrb.mxu2 %v16509_v12  ;;  %5600 = vmatpush.msrb.mxu1 %v16608_v8  ;;  %22363 = vst [vmem:[#allocation253_spill] sm:$0xff] %v16657_v46  ;;  %v22365_v12 = vld [vmem:[#allocation196_spill] sm:$0xff]  ;;  %v16680_v11 = vand.u32 4294901760, %v5616_v36  ;;  %v16685_v8 = vand.u32 4294901760, %v16637_v49  ;;  %v16687_v26 = vsub.f32 %v9959_v51, %v9959_v51 }
 0x39a   : > { %10088 = vmatpush.msk.msrb.mxu3 %vm16406_vm10, %v21026_v14  ;;  %22364 = vst [vmem:[#allocation254_spill] sm:$0xff] %v16662_v56  ;;  %vm16665_vm2 = vcmp.eq.s32.totalorder %v22365_v12, %v10689_v35  ;;  %10076 = vmatpush.msk.msrb.mxu0 %vm16513_vm9, %v21026_v14  ;;  %v5628_v12 = vsub.f32 %v16587_v44, %v16635_v61 }
 0x39b   : > { %v22367_v48 = vsel %vm16665_vm2, 4294967295, %v22366_v48  ;;  %5698 = vmatpush.msrb.mxu2 %v16535_v7  ;;  %5606 = vmatpush.msrb.mxu1 %v16623_v55  ;;  %22368 = vst [vmem:[#allocation255_spill] sm:$0xff] %v16680_v11  ;;  %v16693_v7 = vand.u32 4294901760, %v5622_v0  ;;  %v9957_v36 = vsel %vm16665_vm2, 1.0, %v22057_v29  ;;  %v5634_v51 = vsub.f32 %v16612_v50, %v16660_v62  ;;  %v22371_v55 = vld [vmem:[#allocation202_spill] sm:$0xff] }
 0x39c   : > { %10089 = vmatpush.msk.msrb.mxu3 %vm16435_vm0, %v21026_v14  ;;  %22369 = vst [vmem:[#allocation256_spill] sm:$0xff] %v16687_v26  ;;  %10077 = vmatpush.msk.msrb.mxu0 %vm16539_vm15, %v21026_v14  ;;  %vm16705_vm4 = vcmp.eq.s32.totalorder %v22371_v55, %v10689_v35  ;;  %v16710_v0 = vand.u32 4294901760, %v16662_v56  ;;  %v16722_v35 = vand.u32 4294901760, %v5628_v12  ;;  %v5640_v55 = vsub.f32 %v16637_v49, %v16685_v8 }
 0x39d   : > { %5701 = vmatpush.msrb.mxu2 %v16547_v63  ;;  %22370 = vst [vmem:[#allocation257_spill] sm:$0xff] %v16693_v7  ;;  %5612 = vmatpush.msrb.mxu1 %v16657_v46  ;;  %v22373_v10 = vsel %vm16705_vm4, 4294967295, %v22372_v10  ;;  %v16712_v63 = vsub.f32 %v9958_v42, %v9958_v42  ;;  %v16727_v42 = vand.u32 4294901760, %v16687_v26  ;;  %v16729_v46 = vsub.f32 %v9957_v36, %v9957_v36 }
 0x39e   : > { %10090 = vmatpush.msk.msrb.mxu3 %vm16459_vm14, %v21026_v14  ;;  %10078 = vmatpush.msk.msrb.mxu0 %vm16567_vm5, %v21026_v14  ;;  %22375 = vst [vmem:[#allocation259_spill] sm:$0xff] %v16722_v35  ;;  %v16742_v12 = vand.u32 4294901760, %v5634_v51  ;;  %v5646_v36 = vsub.f32 %v16662_v56, %v16710_v0  ;;  %v16757_v51 = vand.u32 4294901760, %v5640_v55 }
 0x39f   : > { %22374 = vst [vmem:[#allocation258_spill] sm:$0xff] %v16712_v63  ;;  %5704 = vmatpush.msrb.mxu2 %v16587_v44  ;;  %5618 = vmatpush.msrb.mxu1 %v16680_v11  ;;  %v9956_v44 = vsel %vm16705_vm4, 1.0, %v22057_v29  ;;  %v16747_v11 = vand.u32 4294901760, %v16712_v63  ;;  %v5652_v29 = vsub.f32 %v16687_v26, %v16727_v42 }
 0x3a0   : > { %10091 = vmatpush.msk.msrb.mxu3 %vm16473_vm13, %v21026_v14  ;;  %22376 = vst [vmem:[#allocation260_spill] sm:$0xff] %v16729_v46  ;;  %10079 = vmatpush.msk.msrb.mxu0 %vm16590_vm6, %v21026_v14  ;;  %v16774_v55 = vand.u32 4294901760, %v5646_v36 }
 0x3a1   : > { %5707 = vmatpush.msrb.mxu2 %v16612_v50  ;;  %5624 = vmatpush.msrb.mxu1 %v16693_v7  ;;  %22377 = vst [vmem:[#allocation261_spill] sm:$0xff] %v16742_v12  ;;  %v16761_v50 = vsub.f32 %v9956_v44, %v9956_v44  ;;  %v16764_v7 = vand.u32 4294901760, %v16729_v46  ;;  %v5658_v44 = vsub.f32 %v16712_v63, %v16747_v11 }
 0x3a2   : > { %10092 = vmatpush.msk.msrb.mxu3 %vm16513_vm9, %v21026_v14  ;;  %10080 = vmatpush.msk.msrb.mxu0 %vm16615_vm11, %v21026_v14  ;;  %22378 = vst [vmem:[#allocation262_spill] sm:$0xff] %v16757_v51 }
 0x3a3   : > { %5710 = vmatpush.msrb.mxu2 %v16637_v49  ;;  %5630 = vmatpush.msrb.mxu1 %v16722_v35  ;;  %22379 = vst [vmem:[#allocation263_spill] sm:$0xff] %v16761_v50  ;;  %v4548_v49 = vpop.f32.mrf.mxu0  ;;  %v5664_v36 = vsub.f32 %v16729_v46, %v16764_v7  ;;  %v4587_v35 = vpop.f32.mrf.mxu1 }
 0x3a4   : > { %10093 = vmatpush.msk.msrb.mxu3 %vm16539_vm15, %v21026_v14  ;;  %22380 = vst [vmem:[#allocation264_spill] sm:$0xff] %v16764_v7  ;;  %10081 = vmatpush.msk.msrb.mxu0 %vm16640_vm3, %v21026_v14 }
 0x3a5   : > { %5713 = vmatpush.msrb.mxu2 %v16662_v56  ;;  %5636 = vmatpush.msrb.mxu1 %v16742_v12  ;;  %v16786_v56 = vand.u32 4294901760, %v5652_v29  ;;  %v16791_v12 = vand.u32 4294901760, %v16761_v50  ;;  %v16800_v29 = vand.u32 4294901760, %v5658_v44  ;;  %v10682_v44 = vld [vmem:[%s11037_s19 + $0x5] ss:$0 sm:$0xff] }
 0x3a6   : > { %10094 = vmatpush.msk.msrb.mxu3 %vm16567_vm5, %v21026_v14  ;;  %10082 = vmatpush.msk.msrb.mxu0 %vm16665_vm2, %v21026_v14 }
 0x3a7   : > { %5716 = vmatpush.msrb.mxu2 %v16687_v26  ;;  %5642 = vmatpush.msrb.mxu1 %v16757_v51  ;;  %22381 = vst [vmem:[#allocation265_spill] sm:$0xff] %v16791_v12  ;;  %v4549_v26 = vadd.f32 %v4548_v49, %v16497_v6  ;;  %v22382_v51 = vld [vmem:[#allocation214_spill] sm:$0xff]  ;;  %v16809_v49 = vand.u32 4294901760, %v5664_v36  ;;  %v5670_v6 = vsub.f32 %v16761_v50, %v16791_v12  ;;  %v22383_v36 = vld [vmem:[#allocation72_spill] sm:$0xff] }
 0x3a8   : > { %10095 = vmatpush.msk.msrb.mxu3 %vm16590_vm6, %v21026_v14  ;;  %10083 = vmatpush.msk.msrb.mxu0 %vm16705_vm4, %v21026_v14 }
 0x3a9   : > { %5719 = vmatpush.msrb.mxu2 %v16712_v63  ;;  %5573 = vmatmul.f32.vlgmr.msrb.gmra.mxu0 %v22382_v51  ;;  %v4588_v40 = vadd.f32 %v4587_v35, %v4549_v26  ;;  %v4693_v26 = vpop.f32.mrf.mxu3  ;;  %v22385_v63 = vld [vmem:[#allocation203_spill] sm:$0xff] }
 0x3aa   : > { %5648 = vmatpush.msrb.mxu1 %v16774_v55  ;;  %10096 = vmatpush.msk.msrb.mxu3 %vm16615_vm11, %v21026_v14 }
 0x3ab   : > { %5774 = vmatpush.msra.mxu0 %v16429_v28  ;;  %5722 = vmatpush.msrb.mxu2 %v16729_v46  ;;  %v4657_v51 = vadd.f32 %v4656_v18, %v4588_v40  ;;  %v16825_v46 = vmul.f32 %v10681_v33, %v22383_v36  ;;  %v16829_v18 = vand.u32 4294901760, %v5670_v6  ;;  %v4705_v40 = vmul.f32 %v10682_v44, %v22383_v36  ;;  %v22390_v6 = vld [vmem:[#allocation43_spill] sm:$0xff]  ;;  %v22392_v36 = vld [vmem:[#allocation141_spill] sm:$0xff] }
 0x3ac   : > { %5654 = vmatpush.msrb.mxu1 %v16786_v56  ;;  %10097 = vmatpush.msk.msrb.mxu3 %vm16640_vm3, %v21026_v14 }
 0x3ad   : > { %5778 = vmatpush.msra.mxu0 %v16449_v52  ;;  %5725 = vmatpush.msrb.mxu2 %v16761_v50  ;;  %v4694_v35 = vadd.f32 %v4693_v26, %v4657_v51  ;;  %22384 = vst [vmem:[#allocation72_spill] sm:$0xff] %v16825_v46  ;;  %v22386_v50 = vld [vmem:[#allocation50_spill] sm:$0xff] }
 0x3ae   : > { %5660 = vmatpush.msrb.mxu1 %v16800_v29  ;;  %10098 = vmatpush.msk.msrb.mxu3 %vm16665_vm2, %v21026_v14  ;;  %vm22387_vm3 = vnez %v22386_v50  ;;  %vm22391_vm2 = vnez %v22390_v6  ;;  %v22428_v46 = vld [vmem:[#allocation54_spill] sm:$0xff]  ;;  %v22446_v50 = vld [vmem:[#allocation112_spill] sm:$0xff] }
 0x3af   : > { %5782 = vmatpush.msra.mxu0 %v16487_v21  ;;  %5728 = vmatmul.f32.vlgmr.msrb.gmra.mxu2 %v22385_v63  ;;  %v16838_v51 = vmul.f32 %v10682_v44, %v4694_v35  ;;  %v4704_v26 = vmul.f32 %v10681_v33, %v4694_v35  ;;  %v22389_v63 = vld [vmem:[#allocation207_spill] sm:$0xff]  ;;  %v22394_v33 = vld [vmem:[#allocation197_spill] sm:$0xff]  ;;  %v22397_v35 = vld [vmem:[#allocation146_spill] sm:$0xff] }
 0x3b0   : > { %5666 = vmatpush.msrb.mxu1 %v16809_v49  ;;  %10116 = vmatpush.msk.msra.mxu2 %vm22387_vm3, %v21026_v14  ;;  %v22395_v44 = vld [vmem:[#allocation51_spill] sm:$0xff]  ;;  %v22404_v21 = vld [vmem:[#allocation81_spill] sm:$0xff] }
 0x3b1   : > { %10099 = vmatpush.msk.msrb.mxu3 %vm16705_vm4, %v21026_v14  ;;  %22388 = vst [vmem:[#allocation50_spill] sm:$0xff] %v16838_v51  ;;  %5786 = vmatpush.msra.mxu0 %v16507_v38  ;;  %v16848_v52 = vadd.f32 %v4705_v40, %v4704_v26  ;;  %vm22396_vm4 = vnez %v22395_v44  ;;  %v22398_v40 = vld [vmem:[#allocation58_spill] sm:$0xff]  ;;  %v22425_v51 = vld [vmem:[#allocation57_spill] sm:$0xff] }
 0x3b2   : > { %5767 = vmatmul.f32.vlgmr.msrb.gmra.mxu3 %v22389_v63  ;;  %10117 = vmatpush.msk.msra.mxu2 %vm22391_vm2, %v21026_v14  ;;  %vm22399_vm2 = vnez %v22398_v40  ;;  %v22400_v26 = vld [vmem:[#allocation154_spill] sm:$0xff]  ;;  %v22410_v63 = vld [vmem:[#allocation128_spill] sm:$0xff]  ;;  %v22452_v40 = vld [vmem:[#allocation139_spill] sm:$0xff] }
 0x3b3   : > { %5923 = vmatpush.msra.mxu3 %v22392_v36  ;;  %22393 = vst [vmem:[#allocation43_spill] sm:$0xff] %v16848_v52  ;;  %5672 = vmatpush.msrb.mxu1 %v16829_v18  ;;  %v22401_v36 = vld [vmem:[#allocation62_spill] sm:$0xff]  ;;  %v22407_v52 = vld [vmem:[#allocation97_spill] sm:$0xff] }
 0x3b4   : > { %5790 = vmatpush.msra.mxu0 %v16525_v1  ;;  %5674 = vmatmul.f32.vlgmr.msrb.gmra.mxu1 %v22394_v33 }
 0x3b5   : > { %10118 = vmatpush.msk.msra.mxu2 %vm22396_vm4, %v21026_v14  ;;  %10100 = vmatpush.msk.msra.mxu1 %vm16346_vm1, %v21026_v14  ;;  %vm22402_vm4 = vnez %v22401_v36  ;;  %vm22405_vm1 = vnez %v22404_v21  ;;  %v22454_v36 = vld [vmem:[#allocation95_spill] sm:$0xff]  ;;  %v22456_v21 = vld [vmem:[#allocation165_spill] sm:$0xff] }
 0x3b6   : > { %5929 = vmatpush.msra.mxu3 %v22397_v35  ;;  %5794 = vmatpush.msra.mxu0 %v16563_v27  ;;  %v22403_v35 = vld [vmem:[#allocation132_spill] sm:$0xff] }
 0x3b7   : > { %10119 = vmatpush.msk.msra.mxu2 %vm22399_vm2, %v21026_v14  ;;  %10101 = vmatpush.msk.msra.mxu1 %vm16354_vm12, %v21026_v14  ;;  %vm22408_vm12 = vnez %v22407_v52  ;;  %v22458_v52 = vld [vmem:[#allocation159_spill] sm:$0xff] }
 0x3b8   : > { %5935 = vmatpush.msra.mxu3 %v22400_v26  ;;  %5798 = vmatpush.msra.mxu0 %v16585_v59  ;;  %v22406_v26 = vld [vmem:[#allocation145_spill] sm:$0xff] }
 0x3b9   : > { %10120 = vmatpush.msk.msra.mxu2 %vm22402_vm4, %v21026_v14  ;;  %10102 = vmatpush.msk.msra.mxu1 %vm16377_vm7, %v21026_v14  ;;  %vm22411_vm7 = vnez %v22410_v63  ;;  %v22460_v63 = vld [vmem:[#allocation102_spill] sm:$0xff] }
 0x3ba   : > { %5941 = vmatpush.msra.mxu3 %v22403_v35  ;;  %5802 = vmatpush.msra.mxu0 %v16599_v30  ;;  %v22409_v35 = vld [vmem:[#allocation150_spill] sm:$0xff] }
 0x3bb   : > { %10121 = vmatpush.msk.msra.mxu2 %vm22405_vm1, %v21026_v14  ;;  %10103 = vmatpush.msk.msra.mxu1 %vm16396_vm8, %v21026_v14  ;;  %vm22413_vm8 = vnez %v22104_v54 }
 0x3bc   : > { %5947 = vmatpush.msra.mxu3 %v22406_v26  ;;  %5806 = vmatpush.msra.mxu0 %v16635_v61  ;;  %v22412_v26 = vld [vmem:[#allocation156_spill] sm:$0xff] }
 0x3bd   : > { %10122 = vmatpush.msk.msra.mxu2 %vm22408_vm12, %v21026_v14  ;;  %10104 = vmatpush.msk.msra.mxu1 %vm16406_vm10, %v21026_v14  ;;  %vm22415_vm10 = vnez %v22109_v13 }
 0x3be   : > { %5953 = vmatpush.msra.mxu3 %v22409_v35  ;;  %5810 = vmatpush.msra.mxu0 %v16660_v62  ;;  %v22414_v35 = vld [vmem:[#allocation157_spill] sm:$0xff] }
 0x3bf   : > { %10123 = vmatpush.msk.msra.mxu2 %vm22411_vm7, %v21026_v14  ;;  %10105 = vmatpush.msk.msra.mxu1 %vm16435_vm0, %v21026_v14  ;;  %vm22417_vm0 = vnez %v22117_v24 }
 0x3c0   : > { %5959 = vmatpush.msra.mxu3 %v22412_v26  ;;  %5814 = vmatpush.msra.mxu0 %v16685_v8  ;;  %v22416_v26 = vld [vmem:[#allocation183_spill] sm:$0xff] }
 0x3c1   : > { %10124 = vmatpush.msk.msra.mxu2 %vm22413_vm8, %v21026_v14  ;;  %10106 = vmatpush.msk.msra.mxu1 %vm16459_vm14, %v21026_v14  ;;  %vm22419_vm14 = vnez %v22277_v53  ;;  %v22466_v53 = vld [vmem:[#allocation28_spill] sm:$0xff] }
 0x3c2   : > { %5965 = vmatpush.msra.mxu3 %v22414_v35  ;;  %5818 = vmatpush.msra.mxu0 %v16710_v0  ;;  %v22418_v35 = vld [vmem:[#allocation116_spill] sm:$0xff] }
 0x3c3   : > { %10125 = vmatpush.msk.msra.mxu2 %vm22415_vm10, %v21026_v14  ;;  %10107 = vmatpush.msk.msra.mxu1 %vm16473_vm13, %v21026_v14  ;;  %vm22421_vm13 = vnez %v22131_v45 }
 0x3c4   : > { %5971 = vmatpush.msra.mxu3 %v22416_v26  ;;  %5822 = vmatpush.msra.mxu0 %v16727_v42  ;;  %v22420_v26 = vld [vmem:[#allocation107_spill] sm:$0xff] }
 0x3c5   : > { %10126 = vmatpush.msk.msra.mxu2 %vm22417_vm0, %v21026_v14  ;;  %10108 = vmatpush.msk.msra.mxu1 %vm16513_vm9, %v21026_v14  ;;  %vm22423_vm9 = vnez %v22137_v32 }
 0x3c6   : > { %5977 = vmatpush.msra.mxu3 %v22418_v35  ;;  %5826 = vmatpush.msra.mxu0 %v16747_v11  ;;  %v22422_v35 = vld [vmem:[#allocation137_spill] sm:$0xff] }
 0x3c7   : > { %10127 = vmatpush.msk.msra.mxu2 %vm22419_vm14, %v21026_v14  ;;  %10109 = vmatpush.msk.msra.mxu1 %vm16539_vm15, %v21026_v14  ;;  %vm22429_vm15 = vnez %v22362_v37 }
 0x3c8   : > { %5983 = vmatpush.msra.mxu3 %v22420_v26  ;;  %5830 = vmatpush.msra.mxu0 %v16764_v7  ;;  %v22424_v26 = vld [vmem:[#allocation124_spill] sm:$0xff]  ;;  %v22437_v7 = vld [vmem:[#allocation77_spill] sm:$0xff] }
 0x3c9   : > { %10128 = vmatpush.msk.msra.mxu2 %vm22421_vm13, %v21026_v14  ;;  %10110 = vmatpush.msk.msra.mxu1 %vm16567_vm5, %v21026_v14  ;;  %vm22426_vm5 = vnez %v22141_v34  ;;  %v22472_v34 = vld [vmem:[#allocation127_spill] sm:$0xff] }
 0x3ca   : > { %5989 = vmatpush.msra.mxu3 %v22422_v35  ;;  %5834 = vmatpush.msra.mxu0 %v16791_v12  ;;  %v22427_v35 = vld [vmem:[#allocation135_spill] sm:$0xff]  ;;  %v22433_v12 = vld [vmem:[#allocation64_spill] sm:$0xff] }
 0x3cb   : > { %10129 = vmatpush.msk.msra.mxu2 %vm22423_vm9, %v21026_v14  ;;  %5836 = vmatmul.f32.vlgmr.msra.gmra.mxu0 %v22394_v33 }
 0x3cc   : > { %10111 = vmatpush.msk.msra.mxu1 %vm16590_vm6, %v21026_v14  ;;  %5995 = vmatpush.msra.mxu3 %v22424_v26  ;;  %vm22430_vm6 = vnez %v22292_v58  ;;  %v22432_v26 = vld [vmem:[#allocation73_spill] sm:$0xff] }
 0x3cd   : > { %6021 = vmatpush.msrb.mxu0 %v22425_v51  ;;  %10130 = vmatpush.msk.msra.mxu2 %vm22426_vm5, %v21026_v14  ;;  %v22431_v51 = vld [vmem:[#allocation138_spill] sm:$0xff] }
 0x3ce   : > { %10112 = vmatpush.msk.msra.mxu1 %vm16615_vm11, %v21026_v14  ;;  %6001 = vmatpush.msra.mxu3 %v22427_v35  ;;  %vm22434_vm11 = vnez %v22367_v48  ;;  %v22435_v35 = vld [vmem:[#allocation216_spill] sm:$0xff] }
 0x3cf   : > { %6024 = vmatpush.msrb.mxu0 %v22428_v46  ;;  %10131 = vmatpush.msk.msra.mxu2 %vm22430_vm6, %v21026_v14  ;;  %v22436_v46 = vld [vmem:[#allocation91_spill] sm:$0xff] }
 0x3d0   : > { %10113 = vmatpush.msk.msra.mxu1 %vm22429_vm15, %v21026_v14  ;;  %6007 = vmatpush.msra.mxu3 %v22431_v51  ;;  %vm22438_vm15 = vnez %v22373_v10  ;;  %v22439_v51 = vld [vmem:[#allocation101_spill] sm:$0xff] }
 0x3d1   : > { %6027 = vmatpush.msrb.mxu0 %v22432_v26  ;;  %6115 = vmatpush.msrb.mxu2 %v22433_v12  ;;  %v22440_v12 = vld [vmem:[#allocation92_spill] sm:$0xff] }
 0x3d2   : > { %10114 = vmatpush.msk.msra.mxu1 %vm22434_vm11, %v21026_v14  ;;  %6013 = vmatpush.msra.mxu3 %v22435_v35  ;;  %vm22441_vm11 = vnez %v22390_v6  ;;  %v22443_v26 = vld [vmem:[#allocation96_spill] sm:$0xff]  ;;  %v22445_v35 = vld [vmem:[#allocation113_spill] sm:$0xff] }
 0x3d3   : > { %6030 = vmatpush.msrb.mxu0 %v22436_v46  ;;  %6119 = vmatpush.msrb.mxu2 %v22437_v7  ;;  %v22442_v7 = vld [vmem:[#allocation99_spill] sm:$0xff]  ;;  %v22448_v6 = vld [vmem:[#allocation117_spill] sm:$0xff] }
 0x3d4   : > { %10148 = vmatpush.msk.msrb.mxu3 %vm22387_vm3, %v21026_v14  ;;  %10115 = vmatpush.msk.msra.mxu1 %vm22438_vm15, %v21026_v14  ;;  %vm22444_vm15 = vnez %v22395_v44  ;;  %v22447_v46 = vld [vmem:[#allocation115_spill] sm:$0xff]  ;;  %v22450_v44 = vld [vmem:[#allocation129_spill] sm:$0xff] }
 0x3d5   : > { %6033 = vmatpush.msrb.mxu0 %v22439_v51  ;;  %5873 = vmatmul.f32.vlgmr.msra.gmra.mxu1 %v22394_v33  ;;  %v22449_v51 = vld [vmem:[#allocation123_spill] sm:$0xff]  ;;  %v22738_v33 = vmov 0 }
 0x3d6   : > { %6123 = vmatpush.msrb.mxu2 %v22440_v12  ;;  %10132 = vmatpush.msk.msrb.mxu1 %vm22387_vm3, %v21026_v14  ;;  %v22451_v12 = vld [vmem:[#allocation151_spill] sm:$0xff] }
 0x3d7   : > { %10149 = vmatpush.msk.msrb.mxu3 %vm22441_vm11, %v21026_v14  ;;  %6036 = vmatpush.msrb.mxu0 %v22442_v7  ;;  %v22453_v7 = vld [vmem:[#allocation149_spill] sm:$0xff] }
 0x3d8   : > { %6127 = vmatpush.msrb.mxu2 %v22443_v26  ;;  %10133 = vmatpush.msk.msrb.mxu1 %vm22441_vm11, %v21026_v14  ;;  %v22455_v26 = vld [vmem:[#allocation87_spill] sm:$0xff] }
 0x3d9   : > { %10150 = vmatpush.msk.msrb.mxu3 %vm22444_vm15, %v21026_v14  ;;  %6039 = vmatpush.msrb.mxu0 %v22445_v35  ;;  %v22457_v35 = vld [vmem:[#allocation122_spill] sm:$0xff] }
 0x3da   : > { %6131 = vmatpush.msrb.mxu2 %v22446_v50  ;;  %10134 = vmatpush.msk.msrb.mxu1 %vm22444_vm15, %v21026_v14  ;;  %vm22463_vm15 = vnez %v22150_v15  ;;  %v22547_v15 = vld [vmem:[#allocation249_spill] sm:$0xff] }
 0x3db   : > { %10151 = vmatpush.msk.msrb.mxu3 %vm22399_vm2, %v21026_v14  ;;  %6042 = vmatpush.msrb.mxu0 %v22447_v46  ;;  %v22459_v46 = vld [vmem:[#allocation200_spill] sm:$0xff] }
 0x3dc   : > { %6135 = vmatpush.msrb.mxu2 %v22448_v6  ;;  %10135 = vmatpush.msk.msrb.mxu1 %vm22399_vm2, %v21026_v14  ;;  %v4892_v50 = vpop.f32.mrf.mxu0  ;;  %v22461_v6 = vld [vmem:[#allocation109_spill] sm:$0xff] }
 0x3dd   : > { %10152 = vmatpush.msk.msrb.mxu3 %vm22402_vm4, %v21026_v14  ;;  %6045 = vmatpush.msrb.mxu0 %v22449_v51 }
 0x3de   : > { %6139 = vmatpush.msrb.mxu2 %v22450_v44  ;;  %10136 = vmatpush.msk.msrb.mxu1 %vm22402_vm4, %v21026_v14  ;;  %v22462_v44 = vld [vmem:[#allocation204_spill] sm:$0xff]  ;;  %vm22465_vm4 = vnez %v22156_v2  ;;  %v22550_v2 = vld [vmem:[#allocation251_spill] sm:$0xff] }
 0x3df   : > { %10153 = vmatpush.msk.msrb.mxu3 %vm22405_vm1, %v21026_v14  ;;  %6048 = vmatpush.msrb.mxu0 %v22451_v12  ;;  %v22464_v12 = vld [vmem:[#allocation140_spill] sm:$0xff] }
 0x3e0   : > { %6143 = vmatpush.msrb.mxu2 %v22452_v40  ;;  %10137 = vmatpush.msk.msrb.mxu1 %vm22405_vm1, %v21026_v14  ;;  %v22467_v40 = vld [vmem:[#allocation153_spill] sm:$0xff] }
 0x3e1   : > { %10154 = vmatpush.msk.msrb.mxu3 %vm22408_vm12, %v21026_v14  ;;  %6051 = vmatpush.msrb.mxu0 %v22453_v7 }
 0x3e2   : > { %6147 = vmatpush.msrb.mxu2 %v22454_v36  ;;  %10138 = vmatpush.msk.msrb.mxu1 %vm22408_vm12, %v21026_v14  ;;  %v22469_v36 = vld [vmem:[#allocation26_spill] sm:$0xff] }
 0x3e3   : > { %10155 = vmatpush.msk.msrb.mxu3 %vm22411_vm7, %v21026_v14  ;;  %6054 = vmatpush.msrb.mxu0 %v22455_v26  ;;  %v22470_v26 = vld [vmem:[#allocation195_spill] sm:$0xff] }
 0x3e4   : > { %6151 = vmatpush.msrb.mxu2 %v22456_v21  ;;  %10139 = vmatpush.msk.msrb.mxu1 %vm22411_vm7, %v21026_v14 }
 0x3e5   : > { %10156 = vmatpush.msk.msrb.mxu3 %vm22413_vm8, %v21026_v14  ;;  %6057 = vmatpush.msrb.mxu0 %v22457_v35 }
 0x3e6   : > { %6155 = vmatpush.msrb.mxu2 %v22458_v52  ;;  %10140 = vmatpush.msk.msrb.mxu1 %vm22413_vm8, %v21026_v14  ;;  %v22474_v52 = vld [vmem:[#allocation90_spill] sm:$0xff] }
 0x3e7   : > { %10157 = vmatpush.msk.msrb.mxu3 %vm22415_vm10, %v21026_v14  ;;  %6060 = vmatpush.msrb.mxu0 %v22459_v46 }
 0x3e8   : > { %6159 = vmatpush.msrb.mxu2 %v22460_v63  ;;  %10141 = vmatpush.msk.msrb.mxu1 %vm22415_vm10, %v21026_v14  ;;  %v4993_v54 = vpop.f32.mrf.mxu1  ;;  %v22475_v63 = vld [vmem:[#allocation155_spill] sm:$0xff] }
 0x3e9   : > { %10158 = vmatpush.msk.msrb.mxu3 %vm22417_vm0, %v21026_v14  ;;  %6063 = vmatpush.msrb.mxu0 %v22461_v6  ;;  %v4994_v51 = vadd.f32 %v4993_v54, %v4892_v50  ;;  %v22478_v6 = vld [vmem:[#allocation190_spill] sm:$0xff]  ;;  %v22479_v54 = vld [vmem:[#allocation191_spill] sm:$0xff] }
 0x3ea   : > { %6163 = vmatpush.msrb.mxu2 %v15784_v9  ;;  %10142 = vmatpush.msk.msrb.mxu1 %vm22417_vm0, %v21026_v14  ;;  %v5086_v9 = vpop.f32.mrf.mxu3  ;;  %vm22473_vm0 = vnez %v22472_v34 }
 0x3eb   : > { %10159 = vmatpush.msk.msrb.mxu3 %vm22419_vm14, %v21026_v14  ;;  %6066 = vmatpush.msrb.mxu0 %v22462_v44  ;;  %v22483_v44 = vld [vmem:[#allocation225_spill] sm:$0xff] }
 0x3ec   : > { %v5047_v13 = vpop.f32.mrf.mxu2  ;;  %6167 = vmatpush.msrb.mxu2 %v15806_v22  ;;  %10143 = vmatpush.msk.msrb.mxu1 %vm22419_vm14, %v21026_v14 }
 0x3ed   : > { %10160 = vmatpush.msk.msrb.mxu3 %vm22421_vm13, %v21026_v14  ;;  %v5048_v24 = vadd.f32 %v5047_v13, %v4994_v51  ;;  %10164 = vmatpush.msk.msra.mxu0 %vm22463_vm15, %v21026_v14  ;;  %v22480_v51 = vld [vmem:[#allocation172_spill] sm:$0xff]  ;;  %v22482_v13 = vld [vmem:[#allocation27_spill] sm:$0xff] }
 0x3ee   : > { %6171 = vmatpush.msrb.mxu2 %v22464_v12  ;;  %10144 = vmatpush.msk.msrb.mxu1 %vm22421_vm13, %v21026_v14  ;;  %vm22468_vm13 = vnez %v22164_v20  ;;  %vm22481_vm1 = vnez %v22480_v51  ;;  %v22487_v12 = vld [vmem:[#allocation45_spill] sm:$0xff] }
 0x3ef   : > { %10161 = vmatpush.msk.msrb.mxu3 %vm22423_vm9, %v21026_v14  ;;  %v5087_v22 = vadd.f32 %v5086_v9, %v5048_v24  ;;  %10165 = vmatpush.msk.msra.mxu0 %vm22465_vm4, %v21026_v14  ;;  %v22484_v24 = vld [vmem:[#allocation205_spill] sm:$0xff] }
 0x3f0   : > { %5914 = vmatmul.f32.vlgmr.msra.gmra.mxu2 %v22466_v53  ;;  %10145 = vmatpush.msk.msrb.mxu1 %vm22423_vm9, %v21026_v14  ;;  %vm22471_vm9 = vnez %v22170_v23  ;;  %v22485_v9 = vld [vmem:[#allocation201_spill] sm:$0xff]  ;;  %v22556_v23 = vld [vmem:[#allocation255_spill] sm:$0xff] }
 0x3f1   : > { %6175 = vmatpush.msrb.mxu2 %v22467_v40  ;;  %v5155_v7 = vpop.f32.mrf.mxu0  ;;  %10162 = vmatpush.msk.msrb.mxu3 %vm22426_vm5, %v21026_v14  ;;  %v22489_v40 = vld [vmem:[#allocation177_spill] sm:$0xff] }
 0x3f2   : > { %10166 = vmatpush.msk.msra.mxu0 %vm22468_vm13, %v21026_v14  ;;  %v5156_v45 = vadd.f32 %v5155_v7, %v5087_v22  ;;  %6015 = vmatmul.f32.vlgmr.msra.gmra.mxu3 %v22469_v36  ;;  %v22488_v22 = vld [vmem:[#allocation148_spill] sm:$0xff]  ;;  %v22490_v7 = vld [vmem:[#allocation213_spill] sm:$0xff] }
 0x3f3   : > { %6362 = vmatpush.msra.mxu2 %v22470_v26  ;;  %10146 = vmatpush.msk.msrb.mxu1 %vm22426_vm5, %v21026_v14  ;;  %v5192_v32 = vpop.f32.mrf.mxu1  ;;  %vm22486_vm5 = vnez %v22485_v9  ;;  %vm22491_vm12 = vnez %v22490_v7  ;;  %v22493_v26 = vld [vmem:[#allocation184_spill] sm:$0xff]  ;;  %v22553_v20 = vld [vmem:[#allocation253_spill] sm:$0xff]  ;;  %v22568_v9 = vld [vmem:[#allocation262_spill] sm:$0xff] }
 0x3f4   : > { %10163 = vmatpush.msk.msrb.mxu3 %vm22430_vm6, %v21026_v14  ;;  %v5233_v21 = vpop.f32.mrf.mxu2  ;;  %10167 = vmatpush.msk.msra.mxu0 %vm22471_vm9, %v21026_v14  ;;  %v5193_v35 = vadd.f32 %v5192_v32, %v5156_v45  ;;  %v22492_v45 = vld [vmem:[#allocation218_spill] sm:$0xff]  ;;  %v22494_v32 = vld [vmem:[#allocation103_spill] sm:$0xff]  ;;  %v22565_v51 = vld [vmem:[#allocation261_spill] sm:$0xff] }
 0x3f5   : > { %6365 = vmatpush.msra.mxu2 %v15824_v19  ;;  %10147 = vmatpush.msk.msrb.mxu1 %vm22430_vm6, %v21026_v14  ;;  %v22476_v19 = vld [vmem:[#allocation111_spill] sm:$0xff]  ;;  %vm22495_vm6 = vnez %v22494_v32  ;;  %v22571_v7 = vld [vmem:[#allocation232_spill] sm:$0xff] }
 0x3f6   : > { %10180 = vmatpush.msk.msra.mxu3 %vm22463_vm15, %v21026_v14  ;;  %10168 = vmatpush.msk.msra.mxu0 %vm22473_vm0, %v21026_v14  ;;  %v5234_v50 = vadd.f32 %v5233_v21, %v5193_v35  ;;  %v5334_v46 = vpop.f32.mrf.mxu3  ;;  %vm22477_vm14 = vnez %v22476_v19  ;;  %v22496_v21 = vld [vmem:[#allocation220_spill] sm:$0xff]  ;;  %v22562_v19 = vld [vmem:[#allocation259_spill] sm:$0xff] }
 0x3f7   : > { %6264 = vmatpush.msra.mxu1 %v22474_v52  ;;  %6368 = vmatpush.msra.mxu2 %v22475_v63  ;;  %v22497_v35 = vld [vmem:[#allocation192_spill] sm:$0xff]  ;;  %v22498_v52 = vld [vmem:[#allocation131_spill] sm:$0xff] }
 0x3f8   : > { %10181 = vmatpush.msk.msra.mxu3 %vm22465_vm4, %v21026_v14  ;;  %10169 = vmatpush.msk.msra.mxu0 %vm22477_vm14, %v21026_v14  ;;  %v5335_v58 = vadd.f32 %v5334_v46, %v5234_v50  ;;  %vm22499_vm3 = vnez %v22498_v52  ;;  %v22500_v50 = vld [vmem:[#allocation144_spill] sm:$0xff]  ;;  %v22501_v63 = vld [vmem:[#allocation211_spill] sm:$0xff] }
 0x3f9   : > { %6177 = vmatmul.f32.vlgmr.msrb.gmra.mxu2 %v22469_v36  ;;  %6270 = vmatpush.msra.mxu1 %v22478_v6 }
 0x3fa   : > { %6371 = vmatpush.msra.mxu2 %v22479_v54  ;;  %10182 = vmatpush.msk.msra.mxu3 %vm22468_vm13, %v21026_v14  ;;  %v22502_v54 = vld [vmem:[#allocation173_spill] sm:$0xff] }
 0x3fb   : > { %10170 = vmatpush.msk.msra.mxu0 %vm22481_vm1, %v21026_v14  ;;  %6214 = vmatmul.f32.vlgmr.msrb.gmra.mxu3 %v22469_v36  ;;  %vm22503_vm7 = vnez %v22502_v54  ;;  %v22528_v36 = vld [vmem:[#allocation229_spill] sm:$0xff] }
 0x3fc   : > { %6069 = vmatmul.f32.vlgmr.msrb.gmra.mxu0 %v22482_v13  ;;  %6276 = vmatpush.msra.mxu1 %v22483_v44  ;;  %v22504_v44 = vld [vmem:[#allocation179_spill] sm:$0xff]  ;;  %v22527_v13 = vld [vmem:[#allocation130_spill] sm:$0xff] }
 0x3fd   : > { %6374 = vmatpush.msra.mxu2 %v22484_v24  ;;  %10183 = vmatpush.msk.msra.mxu3 %vm22471_vm9, %v21026_v14  ;;  %v22505_v24 = vld [vmem:[#allocation80_spill] sm:$0xff] }
 0x3fe   : > { %10171 = vmatpush.msk.msra.mxu0 %vm22486_vm5, %v21026_v14  ;;  %6108 = vmatmul.f32.vlgmr.msrb.gmra.mxu1 %v22487_v12  ;;  %v22525_v12 = vld [vmem:[#allocation226_spill] sm:$0xff] }
 0x3ff   : > { %6377 = vmatpush.msra.mxu2 %v22488_v22  ;;  %6282 = vmatpush.msra.mxu1 %v22489_v40  ;;  %v22506_v22 = vld [vmem:[#allocation181_spill] sm:$0xff]  ;;  %v22508_v40 = vld [vmem:[#allocation188_spill] sm:$0xff] }
 0x400   : > { %10184 = vmatpush.msk.msra.mxu3 %vm22473_vm0, %v21026_v14  ;;  %10172 = vmatpush.msk.msra.mxu0 %vm22491_vm12, %v21026_v14  ;;  %vm22507_vm8 = vnez %v22506_v22 }
 0x401   : > { %6380 = vmatpush.msra.mxu2 %v22492_v45  ;;  %6288 = vmatpush.msra.mxu1 %v22493_v26  ;;  %v22509_v45 = vld [vmem:[#allocation223_spill] sm:$0xff]  ;;  %v22512_v26 = vld [vmem:[#allocation210_spill] sm:$0xff] }
 0x402   : > { %10185 = vmatpush.msk.msra.mxu3 %vm22477_vm14, %v21026_v14  ;;  %10173 = vmatpush.msk.msra.mxu0 %vm22495_vm6, %v21026_v14 }
 0x403   : > { %6383 = vmatpush.msra.mxu2 %v22496_v21  ;;  %6294 = vmatpush.msra.mxu1 %v22497_v35  ;;  %v22513_v21 = vld [vmem:[#allocation224_spill] sm:$0xff] }
 0x404   : > { %10186 = vmatpush.msk.msra.mxu3 %vm22481_vm1, %v21026_v14  ;;  %10174 = vmatpush.msk.msra.mxu0 %vm22499_vm3, %v21026_v14  ;;  %v5388_v46 = vpop.f32.mrf.mxu0  ;;  %v22514_v35 = vld [vmem:[#allocation208_spill] sm:$0xff] }
 0x405   : > { %6386 = vmatpush.msra.mxu2 %v22500_v50  ;;  %6300 = vmatpush.msra.mxu1 %v22501_v63  ;;  %v5389_v6 = vadd.f32 %v5388_v46, %v5335_v58  ;;  %v22510_v58 = vld [vmem:[#allocation194_spill] sm:$0xff]  ;;  %vm22515_vm11 = vnez %v22514_v35  ;;  %v22516_v50 = vld [vmem:[#allocation215_spill] sm:$0xff]  ;;  %v22517_v46 = vld [vmem:[#allocation228_spill] sm:$0xff] }
 0x406   : > { %10187 = vmatpush.msk.msra.mxu3 %vm22486_vm5, %v21026_v14  ;;  %10175 = vmatpush.msk.msra.mxu0 %vm22503_vm7, %v21026_v14  ;;  %vm22511_vm10 = vnez %v22510_v58  ;;  %v22518_v63 = vld [vmem:[#allocation219_spill] sm:$0xff] }
 0x407   : > { %6389 = vmatpush.msra.mxu2 %v22504_v44  ;;  %6306 = vmatpush.msra.mxu1 %v22505_v24  ;;  %vm22519_vm2 = vnez %v22518_v63  ;;  %v22520_v44 = vld [vmem:[#allocation221_spill] sm:$0xff]  ;;  %v22521_v24 = vld [vmem:[#allocation30_spill] sm:$0xff] }
 0x408   : > { %10188 = vmatpush.msk.msra.mxu3 %vm22491_vm12, %v21026_v14  ;;  %10176 = vmatpush.msk.msra.mxu0 %vm22507_vm8, %v21026_v14 }
 0x409   : > { %6392 = vmatpush.msra.mxu2 %v22508_v40  ;;  %6312 = vmatpush.msra.mxu1 %v22509_v45  ;;  %v22522_v40 = vld [vmem:[#allocation231_spill] sm:$0xff] }
 0x40a   : > { %10189 = vmatpush.msk.msra.mxu3 %vm22495_vm6, %v21026_v14  ;;  %10177 = vmatpush.msk.msra.mxu0 %vm22511_vm10, %v21026_v14 }
 0x40b   : > { %6395 = vmatpush.msra.mxu2 %v22512_v26  ;;  %6318 = vmatpush.msra.mxu1 %v22513_v21  ;;  %v22523_v26 = vld [vmem:[#allocation110_spill] sm:$0xff] }
 0x40c   : > { %10190 = vmatpush.msk.msra.mxu3 %vm22499_vm3, %v21026_v14  ;;  %10178 = vmatpush.msk.msra.mxu0 %vm22515_vm11, %v21026_v14 }
 0x40d   : > { %6398 = vmatpush.msra.mxu2 %v22516_v50  ;;  %6324 = vmatpush.msra.mxu1 %v22517_v46  ;;  %v22524_v46 = vld [vmem:[#allocation233_spill] sm:$0xff] }
 0x40e   : > { %10191 = vmatpush.msk.msra.mxu3 %vm22503_vm7, %v21026_v14  ;;  %10179 = vmatpush.msk.msra.mxu0 %vm22519_vm2, %v21026_v14 }
 0x40f   : > { %6401 = vmatpush.msra.mxu2 %v22520_v44  ;;  %6255 = vmatmul.f32.vlgmr.msra.gmra.mxu0 %v22521_v24  ;;  %v5427_v45 = vpop.f32.mrf.mxu1  ;;  %v22526_v44 = vld [vmem:[#allocation160_spill] sm:$0xff] }
 0x410   : > { %6330 = vmatpush.msra.mxu1 %v22522_v40  ;;  %10192 = vmatpush.msk.msra.mxu3 %vm22507_vm8, %v21026_v14  ;;  %v5428_v21 = vadd.f32 %v5427_v45, %v5389_v6  ;;  %v5496_v50 = vpop.f32.mrf.mxu2  ;;  %v22529_v6 = vld [vmem:[#allocation134_spill] sm:$0xff] }
 0x411   : > { %6456 = vmatpush.msrb.mxu0 %v22523_v26  ;;  %6404 = vmatpush.msra.mxu2 %v22525_v12  ;;  %v22530_v12 = vld [vmem:[#allocation29_spill] sm:$0xff]  ;;  %v22531_v26 = vld [vmem:[#allocation234_spill] sm:$0xff] }
 0x412   : > { %6336 = vmatpush.msra.mxu1 %v22524_v46  ;;  %10193 = vmatpush.msk.msra.mxu3 %vm22511_vm10, %v21026_v14  ;;  %v5497_v40 = vadd.f32 %v5496_v50, %v5428_v21  ;;  %vm22532_vm10 = vnez %v22303_v31  ;;  %v22537_v21 = vld [vmem:[#allocation235_spill] sm:$0xff]  ;;  %v22539_v46 = vld [vmem:[#allocation46_spill] sm:$0xff] }
 0x413   : > { %6460 = vmatpush.msrb.mxu0 %v22526_v44  ;;  %v5533_v24 = vpop.f32.mrf.mxu3  ;;  %6407 = vmatpush.msra.mxu2 %v22528_v36  ;;  %v22533_v36 = vld [vmem:[#allocation212_spill] sm:$0xff]  ;;  %v22538_v50 = vld [vmem:[#allocation163_spill] sm:$0xff]  ;;  %v22541_v44 = vld [vmem:[#allocation246_spill] sm:$0xff] }
 0x414   : > { %6342 = vmatpush.msra.mxu1 %v22527_v13  ;;  %10194 = vmatpush.msk.msra.mxu3 %vm22515_vm11, %v21026_v14  ;;  %v5534_v45 = vadd.f32 %v5533_v24, %v5497_v40  ;;  %v22534_v13 = vld [vmem:[#allocation47_spill] sm:$0xff]  ;;  %vm22535_vm11 = vnez %v22306_v4  ;;  %v22542_v40 = vld [vmem:[#allocation198_spill] sm:$0xff] }
 0x415   : > { %6464 = vmatpush.msrb.mxu0 %v22529_v6  ;;  %6410 = vmatmul.f32.vlgmr.msra.gmra.mxu2 %v22530_v12  ;;  %v22536_v24 = vld [vmem:[#allocation243_spill] sm:$0xff] }
 0x416   : > { %6348 = vmatpush.msra.mxu1 %v22531_v26  ;;  %10212 = vmatpush.msk.msrb.mxu2 %vm22532_vm10, %v21026_v14  ;;  %vm22540_vm10 = vnez %v22309_v41  ;;  %v22544_v6 = vld [vmem:[#allocation247_spill] sm:$0xff]  ;;  %v22545_v26 = vld [vmem:[#allocation206_spill] sm:$0xff] }
 0x417   : > { %10195 = vmatpush.msk.msra.mxu3 %vm22519_vm2, %v21026_v14  ;;  %6468 = vmatpush.msrb.mxu0 %v22533_v36  ;;  %v22548_v36 = vld [vmem:[#allocation175_spill] sm:$0xff] }
 0x418   : > { %6449 = vmatmul.f32.vlgmr.msra.gmra.mxu3 %v22534_v13  ;;  %10213 = vmatpush.msk.msrb.mxu2 %vm22535_vm11, %v21026_v14  ;;  %vm22543_vm11 = vnez %v22313_v43  ;;  %v22593_v43 = vld [vmem:[#allocation250_spill] sm:$0xff] }
 0x419   : > { %6605 = vmatpush.msrb.mxu3 %v22536_v24  ;;  %6354 = vmatpush.msra.mxu1 %v22537_v21  ;;  %v22551_v24 = vld [vmem:[#allocation187_spill] sm:$0xff] }
 0x41a   : > { %6472 = vmatpush.msrb.mxu0 %v22538_v50  ;;  %6356 = vmatmul.f32.vlgmr.msra.gmra.mxu1 %v22539_v46  ;;  %v22554_v21 = vld [vmem:[#allocation199_spill] sm:$0xff]  ;;  %v22557_v50 = vld [vmem:[#allocation209_spill] sm:$0xff] }
 0x41b   : > { %10214 = vmatpush.msk.msrb.mxu2 %vm22540_vm10, %v21026_v14  ;;  %10196 = vmatpush.msk.msrb.mxu1 %vm22463_vm15, %v21026_v14  ;;  %vm22546_vm10 = vnez %v22317_v57  ;;  %vm22549_vm15 = vnez %v22322_v16 }
 0x41c   : > { %6611 = vmatpush.msrb.mxu3 %v22541_v44  ;;  %6476 = vmatpush.msrb.mxu0 %v22542_v40  ;;  %v22559_v44 = vld [vmem:[#allocation257_spill] sm:$0xff] }
 0x41d   : > { %10215 = vmatpush.msk.msrb.mxu2 %vm22543_vm11, %v21026_v14  ;;  %10197 = vmatpush.msk.msrb.mxu1 %vm22465_vm4, %v21026_v14  ;;  %vm22552_vm4 = vnez %v22327_v25  ;;  %v22604_v25 = vmov 0.0  }
 0x41e   : > { %6617 = vmatpush.msrb.mxu3 %v22544_v6  ;;  %6480 = vmatpush.msrb.mxu0 %v22545_v26  ;;  %v22560_v6 = vld [vmem:[#allocation217_spill] sm:$0xff]  ;;  %v22563_v26 = vld [vmem:[#allocation222_spill] sm:$0xff] }
 0x41f   : > { %10216 = vmatpush.msk.msrb.mxu2 %vm22546_vm10, %v21026_v14  ;;  %10198 = vmatpush.msk.msrb.mxu1 %vm22468_vm13, %v21026_v14  ;;  %vm22555_vm13 = vnez %v22331_v5  ;;  %v22606_v5 = vld [vmem:[#allocation16_spill] sm:$0xff] }
 0x420   : > { %6623 = vmatpush.msrb.mxu3 %v22547_v15  ;;  %6484 = vmatpush.msrb.mxu0 %v22548_v36  ;;  %v22569_v15 = vld [vmem:[#allocation230_spill] sm:$0xff] }
 0x421   : > { %10217 = vmatpush.msk.msrb.mxu2 %vm22549_vm15, %v21026_v14  ;;  %10199 = vmatpush.msk.msrb.mxu1 %vm22471_vm9, %v21026_v14  ;;  %vm22558_vm9 = vnez %v22336_v60  ;;  %v22573_v36 = vld [vmem:[#allocation186_spill] sm:$0xff] }
 0x422   : > { %6629 = vmatpush.msrb.mxu3 %v22550_v2  ;;  %6488 = vmatpush.msrb.mxu0 %v22551_v24 }
 0x423   : > { %10218 = vmatpush.msk.msrb.mxu2 %vm22552_vm4, %v21026_v14  ;;  %10200 = vmatpush.msk.msrb.mxu1 %vm22473_vm0, %v21026_v14  ;;  %vm22561_vm0 = vnez %v22341_v17  ;;  %v22618_v17 = vld [vmem:[#allocation18_spill] sm:$0xff] }
 0x424   : > { %6635 = vmatpush.msrb.mxu3 %v22553_v20  ;;  %6492 = vmatpush.msrb.mxu0 %v22554_v21  ;;  %v22579_v20 = vld [vmem:[#allocation35_spill] sm:$0xff]  ;;  %v22583_v21 = vld [vmem:[#allocation238_spill] sm:$0xff] }
 0x425   : > { %10219 = vmatpush.msk.msrb.mxu2 %vm22555_vm13, %v21026_v14  ;;  %10201 = vmatpush.msk.msrb.mxu1 %vm22477_vm14, %v21026_v14  ;;  %vm22564_vm14 = vnez %v22346_v39 }
 0x426   : > { %6641 = vmatpush.msrb.mxu3 %v22556_v23  ;;  %6496 = vmatpush.msrb.mxu0 %v22557_v50  ;;  %v5574_v34 = vpop.f32.mrf.mxu0  ;;  %v22605_v23 = vld [vmem:[#allocation256_spill] sm:$0xff] }
 0x427   : > { %10220 = vmatpush.msk.msrb.mxu2 %vm22558_vm9, %v21026_v14  ;;  %10202 = vmatpush.msk.msrb.mxu1 %vm22481_vm1, %v21026_v14  ;;  %v5575_v40 = vadd.f32 %v5574_v34, %v5534_v45  ;;  %v22566_v45 = vld [vmem:[#allocation227_spill] sm:$0xff]  ;;  %vm22567_vm1 = vnez %v22352_v3  ;;  %v22610_v34 = vld [vmem:[#allocation258_spill] sm:$0xff] }
 0x428   : > { %6647 = vmatpush.msrb.mxu3 %v22559_v44  ;;  %6500 = vmatpush.msrb.mxu0 %v22560_v6  ;;  %v22613_v44 = vmov 0 }
 0x429   : > { %10221 = vmatpush.msk.msrb.mxu2 %vm22561_vm0, %v21026_v14  ;;  %10203 = vmatpush.msk.msrb.mxu1 %vm22486_vm5, %v21026_v14  ;;  %vm22570_vm5 = vnez %v22357_v47 }
 0x42a   : > { %6653 = vmatpush.msrb.mxu3 %v22562_v19  ;;  %6504 = vmatpush.msrb.mxu0 %v22563_v26  ;;  %v22619_v19 = vmov 0  ;;  %v22622_v26 = vld [vmem:[#allocation263_spill] sm:$0xff] }
 0x42b   : > { %10222 = vmatpush.msk.msrb.mxu2 %vm22564_vm14, %v21026_v14  ;;  %10204 = vmatpush.msk.msrb.mxu1 %vm22491_vm12, %v21026_v14  ;;  %vm22572_vm12 = vnez %v22362_v37 }
 0x42c   : > { %6659 = vmatpush.msrb.mxu3 %v22565_v51  ;;  %6508 = vmatpush.msrb.mxu0 %v22566_v45  ;;  %v22624_v45 = vld [vmem:[#allocation34_spill] sm:$0xff] }
 0x42d   : > { %10223 = vmatpush.msk.msrb.mxu2 %vm22567_vm1, %v21026_v14  ;;  %10205 = vmatpush.msk.msrb.mxu1 %vm22495_vm6, %v21026_v14  ;;  %vm22574_vm6 = vnez %v22367_v48 }
 0x42e   : > { %6665 = vmatpush.msrb.mxu3 %v22568_v9  ;;  %6512 = vmatpush.msrb.mxu0 %v22569_v15 }
 0x42f   : > { %10224 = vmatpush.msk.msrb.mxu2 %vm22570_vm5, %v21026_v14  ;;  %10206 = vmatpush.msk.msrb.mxu1 %vm22499_vm3, %v21026_v14  ;;  %vm22576_vm3 = vnez %v22510_v58  ;;  %v22582_v58 = vld [vmem:[#allocation49_spill] sm:$0xff] }
 0x430   : > { %6671 = vmatpush.msrb.mxu3 %v16774_v55  ;;  %6516 = vmatpush.msrb.mxu0 %v22571_v7  ;;  %v22575_v55 = vld [vmem:[#allocation236_spill] sm:$0xff]  ;;  %v22627_v7 = vld [vmem:[#allocation19_spill] sm:$0xff] }
 0x431   : > { %10225 = vmatpush.msk.msrb.mxu2 %vm22572_vm12, %v21026_v14  ;;  %6518 = vmatmul.f32.vlgmr.msrb.gmra.mxu0 %v22539_v46  ;;  %v5675_v32 = vpop.f32.mrf.mxu1 }
 0x432   : > { %10207 = vmatpush.msk.msrb.mxu1 %vm22503_vm7, %v21026_v14  ;;  %6677 = vmatpush.msrb.mxu3 %v16786_v56  ;;  %v5676_v52 = vadd.f32 %v5675_v32, %v5575_v40  ;;  %v5729_v2 = vpop.f32.mrf.mxu2  ;;  %vm22577_vm7 = vnez %v22373_v10  ;;  %v22578_v56 = vld [vmem:[#allocation237_spill] sm:$0xff]  ;;  %v22616_v40 = vld [vmem:[#allocation260_spill] sm:$0xff]  ;;  %v22628_v32 = vmov 0 }
 0x433   : > { %6703 = vmatpush.msra.mxu0 %v22573_v36  ;;  %10226 = vmatpush.msk.msrb.mxu2 %vm22574_vm6, %v21026_v14 }
 0x434   : > { %10208 = vmatpush.msk.msrb.mxu1 %vm22507_vm8, %v21026_v14  ;;  %6683 = vmatpush.msrb.mxu3 %v16800_v29  ;;  %v5730_v54 = vadd.f32 %v5729_v2, %v5676_v52  ;;  %vm22580_vm8 = vnez %v22514_v35  ;;  %v22581_v29 = vld [vmem:[#allocation239_spill] sm:$0xff]  ;;  %v22590_v35 = vld [vmem:[#allocation244_spill] sm:$0xff] }
 0x435   : > { %6706 = vmatpush.msra.mxu0 %v22575_v55  ;;  %v5768_v24 = vpop.f32.mrf.mxu3  ;;  %10227 = vmatpush.msk.msrb.mxu2 %vm22577_vm7, %v21026_v14  ;;  %v22633_v52 = vld [vmem:[#allocation264_spill] sm:$0xff]  ;;  %v22635_v55 = vmov 0 }
 0x436   : > { %10209 = vmatpush.msk.msrb.mxu1 %vm22576_vm3, %v21026_v14  ;;  %6689 = vmatpush.msrb.mxu3 %v16809_v49  ;;  %v5769_v22 = vadd.f32 %v5768_v24, %v5730_v54  ;;  %vm22584_vm3 = vnez %v22303_v31  ;;  %v22585_v49 = vld [vmem:[#allocation240_spill] sm:$0xff]  ;;  %v22591_v31 = vld [vmem:[#allocation245_spill] sm:$0xff] }
 0x437   : > { %6709 = vmatpush.msra.mxu0 %v22578_v56  ;;  %6596 = vmatmul.f32.vlgmr.msrb.gmra.mxu2 %v22579_v20  ;;  %v22634_v2 = vld [vmem:[#allocation20_spill] sm:$0xff]  ;;  %v22638_v24 = vld [vmem:[#allocation265_spill] sm:$0xff] }
 0x438   : > { %10210 = vmatpush.msk.msrb.mxu1 %vm22580_vm8, %v21026_v14  ;;  %6797 = vmatpush.msra.mxu2 %v16429_v28  ;;  %v22586_v28 = vld [vmem:[#allocation241_spill] sm:$0xff]  ;;  %vm22587_vm8 = vnez %v22306_v4  ;;  %v22596_v4 = vmov 0 }
 0x439   : > { %6695 = vmatpush.msrb.mxu3 %v16829_v18  ;;  %6712 = vmatpush.msra.mxu0 %v22581_v29  ;;  %v22588_v18 = vld [vmem:[#allocation242_spill] sm:$0xff]  ;;  %v22641_v29 = vld [vmem:[#allocation21_spill] sm:$0xff] }
 0x43a   : > { %6697 = vmatmul.f32.vlgmr.msrb.gmra.mxu3 %v22582_v58  ;;  %6801 = vmatpush.msra.mxu2 %v22583_v21  ;;  %v22642_v21 = vmov 0 }
 0x43b   : > { %10244 = vmatpush.msk.msra.mxu3 %vm22584_vm3, %v21026_v14  ;;  %10211 = vmatpush.msk.msrb.mxu1 %vm22519_vm2, %v21026_v14  ;;  %vm22589_vm2 = vnez %v22309_v41  ;;  %v22592_v41 = vld [vmem:[#allocation248_spill] sm:$0xff] }
 0x43c   : > { %6715 = vmatpush.msra.mxu0 %v22585_v49  ;;  %6555 = vmatmul.f32.vlgmr.msrb.gmra.mxu1 %v22539_v46  ;;  %v22700_v46 = vmov 0 }
 0x43d   : > { %6805 = vmatpush.msra.mxu2 %v22586_v28  ;;  %10228 = vmatpush.msk.msra.mxu1 %vm22584_vm3, %v21026_v14  ;;  %v22646_v28 = vld [vmem:[#allocation22_spill] sm:$0xff] }
 0x43e   : > { %10245 = vmatpush.msk.msra.mxu3 %vm22587_vm8, %v21026_v14  ;;  %6718 = vmatpush.msra.mxu0 %v22588_v18  ;;  %v22647_v18 = vmov 0 }
 0x43f   : > { %6809 = vmatpush.msra.mxu2 %v16507_v38  ;;  %10229 = vmatpush.msk.msra.mxu1 %vm22587_vm8, %v21026_v14  ;;  %v17411_v38 = vld [vmem:[%s11026_s4 + $0x3] ss:$0 sm:$0xff] }
 0x440   : > { %10246 = vmatpush.msk.msra.mxu3 %vm22589_vm2, %v21026_v14  ;;  %6721 = vmatpush.msra.mxu0 %v22590_v35 }
 0x441   : > { %6813 = vmatpush.msra.mxu2 %v16525_v1  ;;  %10230 = vmatpush.msk.msra.mxu1 %vm22589_vm2, %v21026_v14  ;;  %v22595_v1 = vld [vmem:[#allocation14_spill] sm:$0xff] }
 0x442   : > { %10247 = vmatpush.msk.msra.mxu3 %vm22543_vm11, %v21026_v14  ;;  %6724 = vmatpush.msra.mxu0 %v22591_v31 }
 0x443   : > { %6817 = vmatpush.msra.mxu2 %v16563_v27  ;;  %10231 = vmatpush.msk.msra.mxu1 %vm22543_vm11, %v21026_v14  ;;  %v22601_v27 = vmov 0 }
 0x444   : > { %10248 = vmatpush.msk.msra.mxu3 %vm22546_vm10, %v21026_v14  ;;  %6727 = vmatpush.msra.mxu0 %v22592_v41 }
 0x445   : > { %6821 = vmatpush.msra.mxu2 %v16585_v59  ;;  %10232 = vmatpush.msk.msra.mxu1 %vm22546_vm10, %v21026_v14  ;;  %v22594_v59 = vld [vmem:[#allocation252_spill] sm:$0xff]  ;;  %vm17433_vm10 = vcmp.eq.s32.totalorder %v22595_v1, %v17411_v38 }
 0x446   : > { %10249 = vmatpush.msk.msra.mxu3 %vm22549_vm15, %v21026_v14  ;;  %6730 = vmatpush.msra.mxu0 %v22593_v43  ;;  %v22597_v4 = vsel %vm17433_vm10, 4294967295, %v22596_v4  ;;  %v10276_v63 = vsel %vm17433_vm10, 1.0, %v22604_v25  ;;  %v22651_v43 = vld [vmem:[#allocation23_spill] sm:$0xff] }
 0x447   : > { %6825 = vmatpush.msra.mxu2 %v16599_v30  ;;  %10233 = vmatpush.msk.msra.mxu1 %vm22549_vm15, %v21026_v14  ;;  %22598 = vst [vmem:[#allocation141_spill] sm:$0xff] %v22597_v4  ;;  %v22599_v30 = vld [vmem:[#allocation254_spill] sm:$0xff]  ;;  %vm17470_vm15 = vcmp.eq.s32.totalorder %v22606_v5, %v17411_v38  ;;  %v17479_v60 = vsub.f32 %v10276_v63, %v10276_v63 }
 0x448   : > { %10250 = vmatpush.msk.msra.mxu3 %vm22552_vm4, %v21026_v14  ;;  %6733 = vmatpush.msra.mxu0 %v22594_v59  ;;  %v5837_v57 = vpop.f32.mrf.mxu0  ;;  %v10274_v6 = vsel %vm17470_vm15, 1.0, %v22604_v25  ;;  %v22652_v59 = vmov 0  ;;  %v22780_v4 = vld [vmem:[#allocation126_spill] sm:$0xff] }
 0x449   : > { %6829 = vmatpush.msra.mxu2 %v16635_v61  ;;  %10234 = vmatpush.msk.msra.mxu1 %vm22552_vm4, %v21026_v14  ;;  %v5838_v16 = vadd.f32 %v5837_v57, %v5769_v22  ;;  %v22600_v61 = vld [vmem:[#allocation15_spill] sm:$0xff]  ;;  %22611 = vst [vmem:[#allocation58_spill] sm:$0xff] %v17479_v60  ;;  %v17518_v39 = vand.u32 4294901760, %v17479_v60  ;;  %v17524_v9 = vsub.f32 %v10274_v6, %v10274_v6 }
 0x44a   : > { %10251 = vmatpush.msk.msra.mxu3 %vm22555_vm13, %v21026_v14  ;;  %6736 = vmatpush.msra.mxu0 %v22599_v30  ;;  %vm17447_vm11 = vcmp.eq.s32.totalorder %v22600_v61, %v17411_v38 }
 0x44b   : > { %6833 = vmatpush.msra.mxu2 %v16660_v62  ;;  %v22602_v27 = vsel %vm17447_vm11, 4294967295, %v22601_v27  ;;  %10235 = vmatpush.msk.msra.mxu1 %vm22555_vm13, %v21026_v14  ;;  %v22607_v62 = vmov 0  ;;  %v10275_v50 = vsel %vm17447_vm11, 1.0, %v22604_v25  ;;  %vm17508_vm13 = vcmp.eq.s32.totalorder %v22618_v17, %v17411_v38  ;;  %22623 = vst [vmem:[#allocation81_spill] sm:$0xff] %v17518_v39 }
 0x44c   : > { %22603 = vst [vmem:[#allocation51_spill] sm:$0xff] %v22602_v27  ;;  %10252 = vmatpush.msk.msra.mxu3 %vm22558_vm9, %v21026_v14  ;;  %6739 = vmatpush.msra.mxu0 %v22605_v23  ;;  %v22608_v62 = vsel %vm17470_vm15, 4294967295, %v22607_v62  ;;  %v22620_v19 = vsel %vm17508_vm13, 4294967295, %v22619_v19  ;;  %v10272_v36 = vsel %vm17508_vm13, 1.0, %v22604_v25  ;;  %v7102_v47 = vsub.f32 %v17479_v60, %v17518_v39 }
 0x44d   : > { %6837 = vmatpush.msra.mxu2 %v16685_v8  ;;  %10236 = vmatpush.msk.msra.mxu1 %vm22558_vm9, %v21026_v14  ;;  %22609 = vst [vmem:[#allocation146_spill] sm:$0xff] %v22608_v62  ;;  %v22612_v8 = vld [vmem:[#allocation17_spill] sm:$0xff]  ;;  %vm17530_vm9 = vcmp.eq.s32.totalorder %v22627_v7, %v17411_v38  ;;  %v17574_v56 = vand.u32 4294901760, %v17524_v9  ;;  %v17576_v22 = vsub.f32 %v10272_v36, %v10272_v36  ;;  %v22794_v62 = vld [vmem:[#allocation142_spill] sm:$0xff] }
 0x44e   : > { %10253 = vmatpush.msk.msra.mxu3 %vm22561_vm0, %v21026_v14  ;;  %6742 = vmatpush.msra.mxu0 %v22610_v34  ;;  %vm17483_vm4 = vcmp.eq.s32.totalorder %v22612_v8, %v17411_v38  ;;  %22621 = vst [vmem:[#allocation132_spill] sm:$0xff] %v22620_v19  ;;  %v22629_v32 = vsel %vm17530_vm9, 4294967295, %v22628_v32  ;;  %v10271_v54 = vsel %vm17530_vm9, 1.0, %v22604_v25  ;;  %v17614_v41 = vand.u32 4294901760, %v7102_v47  ;;  %v22662_v8 = vld [vmem:[#allocation52_spill] sm:$0xff] }
 0x44f   : > { %6841 = vmatpush.msra.mxu2 %v16710_v0  ;;  %v22614_v44 = vsel %vm17483_vm4, 4294967295, %v22613_v44  ;;  %10237 = vmatpush.msk.msra.mxu1 %vm22561_vm0, %v21026_v14  ;;  %v17495_v0 = vsub.f32 %v10275_v50, %v10275_v50  ;;  %22625 = vst [vmem:[#allocation145_spill] sm:$0xff] %v17524_v9  ;;  %vm17554_vm0 = vcmp.eq.s32.totalorder %v22634_v2, %v17411_v38  ;;  %v17632_v57 = vand.u32 4294901760, %v17576_v22  ;;  %v22659_v50 = vld [vmem:[#allocation24_spill] sm:$0xff] }
 0x450   : > { %22615 = vst [vmem:[#allocation154_spill] sm:$0xff] %v22614_v44  ;;  %10254 = vmatpush.msk.msra.mxu3 %vm22564_vm14, %v21026_v14  ;;  %6745 = vmatpush.msra.mxu0 %v22616_v40  ;;  %v22636_v55 = vsel %vm17554_vm0, 4294967295, %v22635_v55  ;;  %v10270_v35 = vsel %vm17554_vm0, 1.0, %v22604_v25  ;;  %v17608_v31 = vsub.f32 %v10271_v54, %v10271_v54  ;;  %v7114_v1 = vsub.f32 %v17524_v9, %v17574_v56  ;;  %v22673_v54 = vld [vmem:[#allocation55_spill] sm:$0xff] }
 0x451   : > { %6845 = vmatpush.msra.mxu2 %v16727_v42  ;;  %22617 = vst [vmem:[#allocation62_spill] sm:$0xff] %v17495_v0  ;;  %10238 = vmatpush.msk.msra.mxu1 %vm22564_vm14, %v21026_v14  ;;  %v10273_v42 = vsel %vm17483_vm4, 1.0, %v22604_v25  ;;  %v17541_v3 = vand.u32 4294901760, %v17495_v0  ;;  %vm17580_vm14 = vcmp.eq.s32.totalorder %v22641_v29, %v17411_v38  ;;  %v22660_v34 = vmov 0 }
 0x452   : > { %10255 = vmatpush.msk.msra.mxu3 %vm22567_vm1, %v21026_v14  ;;  %6748 = vmatpush.msra.mxu0 %v22622_v26  ;;  %v5874_v51 = vpop.f32.mrf.mxu1  ;;  %22630 = vst [vmem:[#allocation150_spill] sm:$0xff] %v22629_v32  ;;  %v22643_v21 = vsel %vm17580_vm14, 4294967295, %v22642_v21  ;;  %v10269_v48 = vsel %vm17580_vm14, 1.0, %v22604_v25  ;;  %v17654_v23 = vand.u32 4294901760, %v17608_v31  ;;  %v17675_v6 = vand.u32 4294901760, %v7114_v1  ;;  %v22666_v26 = vld [vmem:[#allocation25_spill] sm:$0xff] }
 0x453   : > { %6849 = vmatpush.msra.mxu2 %v16747_v11  ;;  %6751 = vmatmul.f32.vlgmr.msra.gmra.mxu0 %v22624_v45  ;;  %v17526_v15 = vadd.f32 %v5874_v51, %v5838_v16  ;;  %22631 = vst [vmem:[#allocation128_spill] sm:$0xff] %v17541_v3  ;;  %v17543_v11 = vsub.f32 %v10273_v42, %v10273_v42  ;;  %v22667_v51 = vmov 0  ;;  %v22680_v1 = vmov 0 }
 0x454   : > { %10239 = vmatpush.msk.msra.mxu1 %vm22567_vm1, %v21026_v14  ;;  %10256 = vmatpush.msk.msra.mxu3 %vm22570_vm5, %v21026_v14  ;;  %22637 = vst [vmem:[#allocation157_spill] sm:$0xff] %v22636_v55  ;;  %v7108_v37 = vsub.f32 %v17495_v0, %v17541_v3  ;;  %vm17597_vm1 = vcmp.eq.s32.totalorder %v22646_v28, %v17411_v38 }
 0x455   : > { %22626 = vst [vmem:[#allocation97_spill] sm:$0xff] %v17526_v15  ;;  %10309 = vmatpush.msk.msrb.mxu0 %vm17433_vm10, %v21026_v14  ;;  %6853 = vmatpush.msra.mxu2 %v22633_v52  ;;  %v17593_v49 = vand.u32 4294901760, %v17543_v11  ;;  %v22648_v18 = vsel %vm17597_vm1, 4294967295, %v22647_v18  ;;  %v17634_v16 = vsub.f32 %v10270_v35, %v10270_v35  ;;  %v10268_v30 = vsel %vm17597_vm1, 1.0, %v22604_v25 }
 0x456   : > { %22632 = vst [vmem:[#allocation156_spill] sm:$0xff] %v17543_v11  ;;  %10240 = vmatpush.msk.msra.mxu1 %vm22570_vm5, %v21026_v14  ;;  %10257 = vmatpush.msk.msra.mxu3 %vm22572_vm12, %v21026_v14  ;;  %vm17618_vm5 = vcmp.eq.s32.totalorder %v22651_v43, %v17411_v38  ;;  %v17643_v61 = vand.u32 4294901760, %v7108_v37  ;;  %v17656_v5 = vsub.f32 %v10269_v48, %v10269_v48  ;;  %v22679_v48 = vld [vmem:[#allocation61_spill] sm:$0xff] }
 0x457   : > { %10310 = vmatpush.msk.msrb.mxu0 %vm17447_vm11, %v21026_v14  ;;  %6857 = vmatpush.msra.mxu2 %v22638_v24  ;;  %22639 = vst [vmem:[#allocation183_spill] sm:$0xff] %v17574_v56  ;;  %v22653_v59 = vsel %vm17618_vm5, 4294967295, %v22652_v59  ;;  %v7120_v63 = vsub.f32 %v17543_v11, %v17593_v49  ;;  %v10267_v10 = vsel %vm17618_vm5, 1.0, %v22604_v25  ;;  %v17669_v40 = vsub.f32 %v10268_v30, %v10268_v30 }
 0x458   : > { %10241 = vmatpush.msk.msra.mxu1 %vm22572_vm12, %v21026_v14  ;;  %22640 = vst [vmem:[#allocation116_spill] sm:$0xff] %v17576_v22  ;;  %10258 = vmatpush.msk.msra.mxu3 %vm22574_vm6, %v21026_v14  ;;  %vm17660_vm12 = vcmp.eq.s32.totalorder %v22659_v50, %v17411_v38  ;;  %v7126_v17 = vsub.f32 %v17576_v22, %v17632_v57  ;;  %v17680_v42 = vand.u32 4294901760, %v17634_v16  ;;  %v17706_v47 = vand.u32 4294901760, %v17656_v5 }
 0x459   : > { %22644 = vst [vmem:[#allocation107_spill] sm:$0xff] %v22643_v21  ;;  %10311 = vmatpush.msk.msrb.mxu0 %vm17470_vm15, %v21026_v14  ;;  %6859 = vmatmul.f32.vlgmr.msra.gmra.mxu2 %v22582_v58  ;;  %v22661_v34 = vsel %vm17660_vm12, 4294967295, %v22660_v34  ;;  %v17692_v7 = vsub.f32 %v10267_v10, %v10267_v10  ;;  %v10266_v36 = vsel %vm17660_vm12, 1.0, %v22604_v25  ;;  %v17701_v52 = vand.u32 4294901760, %v7120_v63  ;;  %v22683_v63 = vld [vmem:[#allocation65_spill] sm:$0xff] }
 0x45a   : > { %22645 = vst [vmem:[#allocation137_spill] sm:$0xff] %v17593_v49  ;;  %10242 = vmatpush.msk.msra.mxu1 %vm22574_vm6, %v21026_v14  ;;  %7202 = vmatpush.msrb.mxu2 %v17479_v60  ;;  %vm17684_vm6 = vcmp.eq.s32.totalorder %v22666_v26, %v17411_v38  ;;  %v7132_v2 = vsub.f32 %v17608_v31, %v17654_v23  ;;  %v22674_v24 = vmov 0  ;;  %v17719_v29 = vand.u32 4294901760, %v17669_v40 }
 0x45b   : > { %22649 = vst [vmem:[#allocation124_spill] sm:$0xff] %v17608_v31  ;;  %10259 = vmatpush.msk.msra.mxu3 %vm22577_vm7, %v21026_v14  ;;  %10312 = vmatpush.msk.msrb.mxu0 %vm17483_vm4, %v21026_v14  ;;  %v22668_v51 = vsel %vm17684_vm6, 4294967295, %v22667_v51  ;;  %v10265_v37 = vsel %vm17684_vm6, 1.0, %v22604_v25  ;;  %v17728_v28 = vand.u32 4294901760, %v7126_v17  ;;  %v7138_v35 = vsub.f32 %v17634_v16, %v17680_v42 }
 0x45c   : > { %22650 = vst [vmem:[#allocation57_spill] sm:$0xff] %v17614_v41  ;;  %6896 = vmatmul.f32.vlgmr.msra.gmra.mxu3 %v22582_v58  ;;  %7205 = vmatpush.msrb.mxu2 %v17495_v0  ;;  %v17732_v43 = vsub.f32 %v10266_v36, %v10266_v36  ;;  %vm17736_vm3 = vcmp.eq.s32.totalorder %v22679_v48, %v17411_v38  ;;  %v17745_v30 = vand.u32 4294901760, %v17692_v7  ;;  %v22684_v50 = vmov 0 }
 0x45d   : > { %22654 = vst [vmem:[#allocation135_spill] sm:$0xff] %v17632_v57  ;;  %10325 = vmatpush.msk.msrb.mxu3 %vm17433_vm10, %v21026_v14  ;;  %10243 = vmatpush.msk.msra.mxu1 %vm22577_vm7, %v21026_v14  ;;  %vm17710_vm7 = vcmp.eq.s32.totalorder %v22673_v54, %v17411_v38  ;;  %v22681_v1 = vsel %vm17736_vm3, 4294967295, %v22680_v1  ;;  %vm17749_vm8 = vcmp.eq.s32.totalorder %v22683_v63, %v17411_v38  ;;  %v17760_v17 = vand.u32 4294901760, %v7132_v2  ;;  %v22688_v54 = vld [vmem:[#allocation13_spill] sm:$0xff]  ;;  %v22692_v63 = vld [vmem:[#allocation74_spill] sm:$0xff] }
 0x45e   : > { %22655 = vst [vmem:[#allocation54_spill] sm:$0xff] %v17634_v16  ;;  %10313 = vmatpush.msk.msrb.mxu0 %vm17508_vm13, %v21026_v14  ;;  %6790 = vmatmul.f32.vlgmr.msra.gmra.mxu1 %v22662_v8  ;;  %v22675_v24 = vsel %vm17710_vm7, 4294967295, %v22674_v24  ;;  %v22685_v50 = vsel %vm17749_vm8, 4294967295, %v22684_v50  ;;  %v10264_v10 = vsel %vm17710_vm7, 1.0, %v22604_v25  ;;  %v7144_v26 = vsub.f32 %v17656_v5, %v17706_v47 }
 0x45f   : > { %22656 = vst [vmem:[#allocation138_spill] sm:$0xff] %v17643_v61  ;;  %7208 = vmatpush.msrb.mxu2 %v17524_v9  ;;  %7104 = vmatpush.msrb.mxu1 %v17614_v41  ;;  %v17764_v36 = vsub.f32 %v10265_v37, %v10265_v37  ;;  %vm17768_vm2 = vcmp.eq.s32.totalorder %v22688_v54, %v17411_v38  ;;  %v22689_v48 = vmov 0  ;;  %v10263_v37 = vsel %vm17736_vm3, 1.0, %v22604_v25  ;;  %v22715_v9 = vld [vmem:[#allocation85_spill] sm:$0xff] }
 0x460   : > { %22657 = vst [vmem:[#allocation73_spill] sm:$0xff] %v17654_v23  ;;  %10326 = vmatpush.msk.msrb.mxu3 %vm17447_vm11, %v21026_v14  ;;  %10314 = vmatpush.msk.msrb.mxu0 %vm17530_vm9, %v21026_v14  ;;  %v22690_v48 = vsel %vm17768_vm2, 4294967295, %v22689_v48  ;;  %v7150_v2 = vsub.f32 %v17669_v40, %v17719_v29  ;;  %v22693_v54 = vmov 0  ;;  %v17791_v8 = vand.u32 4294901760, %v7138_v35 }
 0x461   : > { %22658 = vst [vmem:[#allocation64_spill] sm:$0xff] %v17656_v5  ;;  %7211 = vmatpush.msrb.mxu2 %v17543_v11  ;;  %7110 = vmatpush.msrb.mxu1 %v17643_v61  ;;  %v17794_v45 = vand.u32 4294901760, %v17732_v43  ;;  %v17796_v58 = vsub.f32 %v10264_v10, %v10264_v10  ;;  %v7156_v20 = vsub.f32 %v17692_v7, %v17745_v30  ;;  %v10261_v35 = vsel %vm17768_vm2, 1.0, %v22604_v25  ;;  %v22699_v10 = vld [vmem:[#allocation75_spill] sm:$0xff]  ;;  %v22737_v61 = vld [vmem:[#allocation100_spill] sm:$0xff] }
 0x462   : > { %22663 = vst [vmem:[#allocation216_spill] sm:$0xff] %v17669_v40  ;;  %10327 = vmatpush.msk.msrb.mxu3 %vm17470_vm15, %v21026_v14  ;;  %10315 = vmatpush.msk.msrb.mxu0 %vm17554_vm0, %v21026_v14  ;;  %v17820_v13 = vand.u32 4294901760, %v7144_v26  ;;  %v17823_v12 = vand.u32 4294901760, %v17764_v36  ;;  %v17825_v53 = vsub.f32 %v10263_v37, %v10263_v37  ;;  %v22708_v26 = vld [vmem:[#allocation78_spill] sm:$0xff]  ;;  %v22743_v41 = vmov 0 }
 0x463   : > { %22664 = vst [vmem:[#allocation91_spill] sm:$0xff] %v17675_v6  ;;  %7214 = vmatpush.msrb.mxu2 %v17576_v22  ;;  %7116 = vmatpush.msrb.mxu1 %v17675_v6  ;;  %v7162_v37 = vsub.f32 %v17732_v43, %v17794_v45 }
 0x464   : > { %22665 = vst [vmem:[#allocation77_spill] sm:$0xff] %v17680_v42  ;;  %10328 = vmatpush.msk.msrb.mxu3 %vm17483_vm4, %v21026_v14  ;;  %10316 = vmatpush.msk.msrb.mxu0 %vm17580_vm14, %v21026_v14  ;;  %v17873_v11 = vand.u32 4294901760, %v17825_v53 }
 0x465   : > { %22669 = vst [vmem:[#allocation101_spill] sm:$0xff] %v22668_v51  ;;  %7217 = vmatpush.msrb.mxu2 %v17608_v31  ;;  %7122 = vmatpush.msrb.mxu1 %v17701_v52  ;;  %v22709_v31 = vmov 0 }
 0x466   : > { %22670 = vst [vmem:[#allocation92_spill] sm:$0xff] %v17692_v7  ;;  %10329 = vmatpush.msk.msrb.mxu3 %vm17508_vm13, %v21026_v14  ;;  %10317 = vmatpush.msk.msrb.mxu0 %vm17597_vm1, %v21026_v14  ;;  %vm17783_vm13 = vcmp.eq.s32.totalorder %v22692_v63, %v17411_v38  ;;  %v10262_v63 = vsel %vm17749_vm8, 1.0, %v22604_v25 }
 0x467   : > { %22671 = vst [vmem:[#allocation99_spill] sm:$0xff] %v17701_v52  ;;  %7220 = vmatpush.msrb.mxu2 %v17634_v16  ;;  %v22694_v54 = vsel %vm17783_vm13, 4294967295, %v22693_v54  ;;  %7128 = vmatpush.msrb.mxu1 %v17728_v28  ;;  %v17836_v16 = vsub.f32 %v10262_v63, %v10262_v63  ;;  %v17853_v63 = vsub.f32 %v10261_v35, %v10261_v35 }
 0x468   : > { %22672 = vst [vmem:[#allocation96_spill] sm:$0xff] %v17706_v47  ;;  %10330 = vmatpush.msk.msrb.mxu3 %vm17530_vm9, %v21026_v14  ;;  %10318 = vmatpush.msk.msrb.mxu0 %vm17618_vm5, %v21026_v14  ;;  %vm17812_vm9 = vcmp.eq.s32.totalorder %v22699_v10, %v17411_v38  ;;  %v10292_v10 = vsel %vm17783_vm13, 1.0, %v22604_v25  ;;  %v7168_v35 = vsub.f32 %v17764_v36, %v17823_v12 }
 0x469   : > { %22676 = vst [vmem:[#allocation113_spill] sm:$0xff] %v17719_v29  ;;  %7223 = vmatpush.msrb.mxu2 %v17656_v5  ;;  %v22701_v46 = vsel %vm17812_vm9, 4294967295, %v22700_v46  ;;  %7134 = vmatpush.msrb.mxu1 %v17760_v17  ;;  %v17834_v5 = vand.u32 4294901760, %v7150_v2  ;;  %v17851_v2 = vand.u32 4294901760, %v17796_v58  ;;  %v17864_v22 = vsub.f32 %v10292_v10, %v10292_v10 }
 0x46a   : > { %22677 = vst [vmem:[#allocation112_spill] sm:$0xff] %v17728_v28  ;;  %10331 = vmatpush.msk.msrb.mxu3 %vm17554_vm0, %v21026_v14  ;;  %10319 = vmatpush.msk.msrb.mxu0 %vm17660_vm12, %v21026_v14  ;;  %vm17840_vm0 = vcmp.eq.s32.totalorder %v22708_v26, %v17411_v38  ;;  %v10291_v26 = vsel %vm17812_vm9, 1.0, %v22604_v25  ;;  %v17889_v10 = vand.u32 4294901760, %v17836_v16 }
 0x46b   : > { %22678 = vst [vmem:[#allocation115_spill] sm:$0xff] %v17732_v43  ;;  %7226 = vmatpush.msrb.mxu2 %v17669_v40  ;;  %v22710_v31 = vsel %vm17840_vm0, 4294967295, %v22709_v31  ;;  %7140 = vmatpush.msrb.mxu1 %v17791_v8  ;;  %v17862_v40 = vand.u32 4294901760, %v7156_v20  ;;  %v10290_v20 = vsel %vm17840_vm0, 1.0, %v22604_v25  ;;  %v17891_v0 = vsub.f32 %v10291_v26, %v10291_v26 }
 0x46c   : > { %22682 = vst [vmem:[#allocation117_spill] sm:$0xff] %v17745_v30  ;;  %10332 = vmatpush.msk.msrb.mxu3 %vm17580_vm14, %v21026_v14  ;;  %10320 = vmatpush.msk.msrb.mxu0 %vm17684_vm6, %v21026_v14  ;;  %vm17877_vm14 = vcmp.eq.s32.totalorder %v22715_v9, %v17411_v38  ;;  %v17897_v9 = vand.u32 4294901760, %v7162_v37  ;;  %v7174_v60 = vsub.f32 %v17796_v58, %v17851_v2  ;;  %v17915_v37 = vand.u32 4294901760, %v17864_v22 }
 0x46d   : > { %22686 = vst [vmem:[#allocation123_spill] sm:$0xff] %v17760_v17  ;;  %7229 = vmatpush.msrb.mxu2 %v17692_v7  ;;  %7146 = vmatpush.msrb.mxu1 %v17820_v13  ;;  %v22716_v7 = vmov 0  ;;  %v17917_v26 = vsub.f32 %v10290_v20, %v10290_v20  ;;  %v22730_v17 = vld [vmem:[#allocation94_spill] sm:$0xff]  ;;  %v22731_v20 = vmov 0 }
 0x46e   : > { %22687 = vst [vmem:[#allocation129_spill] sm:$0xff] %v17764_v36  ;;  %10333 = vmatpush.msk.msrb.mxu3 %vm17597_vm1, %v21026_v14  ;;  %v22717_v7 = vsel %vm17877_vm14, 4294967295, %v22716_v7  ;;  %10321 = vmatpush.msk.msrb.mxu0 %vm17710_vm7, %v21026_v14  ;;  %v17952_v52 = vand.u32 4294901760, %v7174_v60  ;;  %v7443_v60 = vsub.f32 %v17864_v22, %v17915_v37 }
 0x46f   : > { %22691 = vst [vmem:[#allocation151_spill] sm:$0xff] %v22690_v48  ;;  %7232 = vmatpush.msrb.mxu2 %v17732_v43  ;;  %7152 = vmatpush.msrb.mxu1 %v17834_v5  ;;  %v22723_v43 = vld [vmem:[#allocation88_spill] sm:$0xff] }
 0x470   : > { %22695 = vst [vmem:[#allocation139_spill] sm:$0xff] %v22694_v54  ;;  %10334 = vmatpush.msk.msrb.mxu3 %vm17618_vm5, %v21026_v14  ;;  %vm17906_vm1 = vcmp.eq.s32.totalorder %v22723_v43, %v17411_v38  ;;  %10322 = vmatpush.msk.msrb.mxu0 %vm17736_vm3, %v21026_v14  ;;  %v17926_v43 = vand.u32 4294901760, %v7168_v35  ;;  %vm17932_vm5 = vcmp.eq.s32.totalorder %v22730_v17, %v17411_v38  ;;  %v17943_v35 = vand.u32 4294901760, %v17891_v0 }
 0x471   : > { %22696 = vst [vmem:[#allocation149_spill] sm:$0xff] %v17791_v8  ;;  %v22724_v8 = vmov 0  ;;  %7235 = vmatpush.msrb.mxu2 %v17764_v36  ;;  %7158 = vmatpush.msrb.mxu1 %v17862_v40  ;;  %v7180_v36 = vsub.f32 %v17825_v53, %v17873_v11  ;;  %v22732_v20 = vsel %vm17932_vm5, 4294967295, %v22731_v20  ;;  %v10288_v17 = vsel %vm17906_vm1, 1.0, %v22604_v25 }
 0x472   : > { %22697 = vst [vmem:[#allocation95_spill] sm:$0xff] %v17794_v45  ;;  %v22725_v8 = vsel %vm17906_vm1, 4294967295, %v22724_v8  ;;  %10335 = vmatpush.msk.msrb.mxu3 %vm17660_vm12, %v21026_v14  ;;  %10323 = vmatpush.msk.msrb.mxu0 %vm17749_vm8, %v21026_v14  ;;  %vm17960_vm12 = vcmp.eq.s32.totalorder %v22737_v61, %v17411_v38  ;;  %v22742_v61 = vld [vmem:[#allocation106_spill] sm:$0xff] }
 0x473   : > { %22698 = vst [vmem:[#allocation87_spill] sm:$0xff] %v17796_v58  ;;  %7238 = vmatpush.msrb.mxu2 %v17796_v58  ;;  %v5915_v28 = vpop.f32.mrf.mxu2  ;;  %7164 = vmatpush.msrb.mxu1 %v17897_v9  ;;  %v22739_v33 = vsel %vm17960_vm12, 4294967295, %v22738_v33 }
 0x474   : > { %22702 = vst [vmem:[#allocation165_spill] sm:$0xff] %v22701_v46  ;;  %10336 = vmatpush.msk.msrb.mxu3 %vm17684_vm6, %v21026_v14  ;;  %10324 = vmatpush.msk.msrb.mxu0 %vm17768_vm2, %v21026_v14  ;;  %vm17978_vm6 = vcmp.eq.s32.totalorder %v22742_v61, %v17411_v38  ;;  %v7449_v61 = vsub.f32 %v17891_v0, %v17943_v35 }
 0x475   : > { %22703 = vst [vmem:[#allocation122_spill] sm:$0xff] %v17820_v13  ;;  %v17902_v13 = vand.u32 4294901760, %v17853_v63  ;;  %7241 = vmatpush.msrb.mxu2 %v17825_v53  ;;  %v22744_v41 = vsel %vm17978_vm6, 4294967295, %v22743_v41  ;;  %7170 = vmatpush.msrb.mxu1 %v17926_v43  ;;  %v6016_v15 = vpop.f32.mrf.mxu3 }
 0x476   : > { %22704 = vst [vmem:[#allocation159_spill] sm:$0xff] %v17823_v12  ;;  %10337 = vmatpush.msk.msrb.mxu3 %vm17710_vm7, %v21026_v14  ;;  %7296 = vmatpush.msra.mxu0 %v17518_v39  ;;  %v6017_v51 = vadd.f32 %v6016_v15, %v5915_v28  ;;  %v10285_v15 = vsel %vm17978_vm6, 1.0, %v22604_v25  ;;  %v18019_v28 = vand.u32 4294901760, %v7443_v60  ;;  %v22759_v60 = vld [vmem:[#allocation114_spill] sm:$0xff] }
 0x477   : > { %22705 = vst [vmem:[#allocation200_spill] sm:$0xff] %v17825_v53  ;;  %v7192_v58 = vsub.f32 %v17853_v63, %v17902_v13  ;;  %v17986_v53 = vand.u32 4294901760, %v7180_v36  ;;  %7244 = vmatpush.msrb.mxu2 %v17836_v16  ;;  %7176 = vmatpush.msrb.mxu1 %v17952_v52 }
 0x478   : > { %22706 = vst [vmem:[#allocation102_spill] sm:$0xff] %v17834_v5  ;;  %v10289_v5 = vsel %vm17877_vm14, 1.0, %v22604_v25  ;;  %10338 = vmatpush.msk.msrb.mxu3 %vm17736_vm3, %v21026_v14  ;;  %7300 = vmatpush.msra.mxu0 %v17541_v3  ;;  %vm18036_vm3 = vcmp.eq.s32.totalorder %v22759_v60, %v17411_v38 }
 0x479   : > { %22707 = vst [vmem:[#allocation109_spill] sm:$0xff] %v17836_v16  ;;  %v17956_v6 = vsub.f32 %v10289_v5, %v10289_v5  ;;  %v10287_v5 = vsel %vm17932_vm5, 1.0, %v22604_v25  ;;  %7247 = vmatpush.msrb.mxu2 %v17853_v63  ;;  %v18021_v39 = vand.u32 4294901760, %v7192_v58  ;;  %7182 = vmatpush.msrb.mxu1 %v17986_v53  ;;  %v22760_v58 = vmov 0 }
 0x47a   : > { %22711 = vst [vmem:[#allocation204_spill] sm:$0xff] %v22710_v31  ;;  %10339 = vmatpush.msk.msrb.mxu3 %vm17749_vm8, %v21026_v14  ;;  %v22761_v58 = vsel %vm18036_vm3, 4294967295, %v22760_v58  ;;  %7304 = vmatpush.msra.mxu0 %v17574_v56 }
 0x47b   : > { %22712 = vst [vmem:[#allocation140_spill] sm:$0xff] %v17853_v63  ;;  %v18004_v36 = vand.u32 4294901760, %v17956_v6  ;;  %10357 = vmatpush.msk.msra.mxu2 %vm17783_vm13, %v21026_v14  ;;  %v18044_v63 = vsub.f32 %v10285_v15, %v10285_v15  ;;  %v6109_v60 = vpop.f32.mrf.mxu1 }
 0x47c   : > { %22713 = vst [vmem:[#allocation153_spill] sm:$0xff] %v17862_v40  ;;  %v7186_v40 = vsub.f32 %v17836_v16, %v17889_v10  ;;  %v22752_v16 = vmov 0  ;;  %10340 = vmatpush.msk.msrb.mxu3 %vm17768_vm2, %v21026_v14  ;;  %v6178_v15 = vpop.f32.mrf.mxu2  ;;  %7308 = vmatpush.msra.mxu0 %v17593_v49 }
 0x47d   : > { %22714 = vst [vmem:[#allocation195_spill] sm:$0xff] %v17864_v22  ;;  %10358 = vmatpush.msk.msra.mxu2 %vm17812_vm9, %v21026_v14 }
 0x47e   : > { %22718 = vst [vmem:[#allocation127_spill] sm:$0xff] %v22717_v7  ;;  %v17992_v22 = vand.u32 4294901760, %v7186_v40  ;;  %v22751_v40 = vld [vmem:[#allocation108_spill] sm:$0xff]  ;;  %7445 = vmatpush.msra.mxu3 %v18019_v28  ;;  %7312 = vmatpush.msra.mxu0 %v17632_v57 }
 0x47f   : > { %22719 = vst [vmem:[#allocation90_spill] sm:$0xff] %v17889_v10  ;;  %vm18010_vm7 = vcmp.eq.s32.totalorder %v22751_v40, %v17411_v38  ;;  %10359 = vmatpush.msk.msra.mxu2 %vm17840_vm0, %v21026_v14 }
 0x480   : > { %22720 = vst [vmem:[#allocation155_spill] sm:$0xff] %v17891_v0  ;;  %v22753_v16 = vsel %vm18010_vm7, 4294967295, %v22752_v16  ;;  %7188 = vmatpush.msrb.mxu1 %v17992_v22  ;;  %7316 = vmatpush.msra.mxu0 %v17654_v23 }
 0x481   : > { %22721 = vst [vmem:[#allocation111_spill] sm:$0xff] %v17897_v9  ;;  %v17971_v9 = vand.u32 4294901760, %v17917_v26  ;;  %10360 = vmatpush.msk.msra.mxu2 %vm17877_vm14, %v21026_v14 }
 0x482   : > { %22722 = vst [vmem:[#allocation190_spill] sm:$0xff] %v17902_v13  ;;  %7194 = vmatpush.msrb.mxu1 %v18021_v39  ;;  %7320 = vmatpush.msra.mxu0 %v17680_v42 }
 0x483   : > { %22726 = vst [vmem:[#allocation191_spill] sm:$0xff] %v22725_v8  ;;  %10361 = vmatpush.msk.msra.mxu2 %vm17906_vm1, %v21026_v14 }
 0x484   : > { %22727 = vst [vmem:[#allocation172_spill] sm:$0xff] %v17915_v37  ;;  %v17988_v37 = vsub.f32 %v10288_v17, %v10288_v17  ;;  %v18006_v17 = vsub.f32 %v10287_v5, %v10287_v5  ;;  %v7455_v5 = vsub.f32 %v17917_v26, %v17971_v9  ;;  %10341 = vmatpush.msk.msra.mxu1 %vm17433_vm10, %v21026_v14 }
 0x485   : > { %22728 = vst [vmem:[#allocation225_spill] sm:$0xff] %v17917_v26  ;;  %vm18116_vm10 = vcmp.eq.s32.totalorder %v22780_v4, %v17411_v38  ;;  %7324 = vmatpush.msra.mxu0 %v17706_v47  ;;  %10362 = vmatpush.msk.msra.mxu2 %vm17932_vm5, %v21026_v14 }
 0x486   : > { %22729 = vst [vmem:[#allocation205_spill] sm:$0xff] %v17926_v43  ;;  %v10286_v43 = vsel %vm17960_vm12, 1.0, %v22604_v25  ;;  %v18058_v56 = vand.u32 4294901760, %v18006_v17  ;;  %10342 = vmatpush.msk.msra.mxu1 %vm17447_vm11, %v21026_v14 }
 0x487   : > { %22733 = vst [vmem:[#allocation201_spill] sm:$0xff] %v22732_v20  ;;  %v18032_v3 = vsub.f32 %v10286_v43, %v10286_v43  ;;  %v7461_v43 = vsub.f32 %v17956_v6, %v18004_v36  ;;  %7328 = vmatpush.msra.mxu0 %v17719_v29  ;;  %10363 = vmatpush.msk.msra.mxu2 %vm17960_vm12, %v21026_v14  ;;  %v22804_v29 = vld [vmem:[#allocation147_spill] sm:$0xff]  ;;  %vm22811_vm12 = vnez %v22636_v55 }
 0x488   : > { %22734 = vst [vmem:[#allocation148_spill] sm:$0xff] %v17943_v35  ;;  %v18030_v35 = vand.u32 4294901760, %v17988_v37  ;;  %v7473_v57 = vsub.f32 %v18006_v17, %v18058_v56  ;;  %10343 = vmatpush.msk.msra.mxu1 %vm17470_vm15, %v21026_v14  ;;  %vm18168_vm15 = vcmp.eq.s32.totalorder %v22794_v62, %v17411_v38  ;;  %vm18205_vm5 = vcmp.eq.s32.totalorder %v22804_v29, %v17411_v38 }
 0x489   : > { %22735 = vst [vmem:[#allocation177_spill] sm:$0xff] %v17952_v52  ;;  %v6070_v52 = vpop.f32.mrf.mxu0  ;;  %v18080_v49 = vand.u32 4294901760, %v18032_v3  ;;  %7332 = vmatpush.msra.mxu0 %v17745_v30  ;;  %10364 = vmatpush.msk.msra.mxu2 %vm17978_vm6, %v21026_v14 }
 0x48a   : > { %22736 = vst [vmem:[#allocation213_spill] sm:$0xff] %v17956_v6  ;;  %v6071_v40 = vadd.f32 %v6070_v52, %v6017_v51  ;;  %v10284_v51 = vsel %vm18010_vm7, 1.0, %v22604_v25  ;;  %v18053_v52 = vand.u32 4294901760, %v7449_v61  ;;  %v18070_v61 = vand.u32 4294901760, %v7455_v5  ;;  %v22773_v5 = vld [vmem:[#allocation120_spill] sm:$0xff]  ;;  %10344 = vmatpush.msk.msra.mxu1 %vm17483_vm4, %v21026_v14 }
 0x48b   : > { %22740 = vst [vmem:[#allocation218_spill] sm:$0xff] %v22739_v33  ;;  %v18082_v48 = vsub.f32 %v10284_v51, %v10284_v51  ;;  %vm18086_vm9 = vcmp.eq.s32.totalorder %v22773_v5, %v17411_v38  ;;  %v18104_v5 = vand.u32 4294901760, %v7461_v43  ;;  %vm22800_vm4 = vnez %v22620_v19  ;;  %7336 = vmatpush.msra.mxu0 %v17794_v45  ;;  %10365 = vmatpush.msk.msra.mxu2 %vm18010_vm7, %v21026_v14 }
 0x48c   : > { %22741 = vst [vmem:[#allocation184_spill] sm:$0xff] %v17971_v9  ;;  %v22767_v9 = vmov 0  ;;  %7451 = vmatpush.msra.mxu3 %v18053_v52  ;;  %v10281_v43 = vsel %vm18086_vm9, 1.0, %v22604_v25  ;;  %10345 = vmatpush.msk.msra.mxu1 %vm22800_vm4, %v21026_v14  ;;  %v22805_v19 = vmov 0  ;;  %vm22808_vm4 = vnez %v22629_v32 }
 0x48d   : > { %22745 = vst [vmem:[#allocation103_spill] sm:$0xff] %v22744_v41  ;;  %v18132_v4 = vand.u32 4294901760, %v18082_v48  ;;  %v18157_v23 = vsub.f32 %v10281_v43, %v10281_v43  ;;  %v22806_v19 = vsel %vm18205_vm5, 4294967295, %v22805_v19  ;;  %7340 = vmatpush.msra.mxu0 %v17823_v12  ;;  %10366 = vmatpush.msk.msra.mxu2 %vm18036_vm3, %v21026_v14  ;;  %v22931_v41 = vld [vmem:[#allocation38_spill] sm:$0xff] }
 0x48e   : > { %22746 = vst [vmem:[#allocation220_spill] sm:$0xff] %v17986_v53  ;;  %v22766_v53 = vld [vmem:[#allocation119_spill] sm:$0xff]  ;;  %7457 = vmatpush.msra.mxu3 %v18070_v61  ;;  %10346 = vmatpush.msk.msra.mxu1 %vm22808_vm4, %v21026_v14  ;;  %vm22822_vm4 = vnez %v22653_v59 }
 0x48f   : > { %22747 = vst [vmem:[#allocation192_spill] sm:$0xff] %v17988_v37  ;;  %vm18062_vm13 = vcmp.eq.s32.totalorder %v22766_v53, %v17411_v38  ;;  %v7467_v53 = vsub.f32 %v17988_v37, %v18030_v35  ;;  %v18201_v27 = vand.u32 4294901760, %v18157_v23  ;;  %7344 = vmatpush.msra.mxu0 %v17851_v2 }
 0x490   : > { %22748 = vst [vmem:[#allocation131_spill] sm:$0xff] %v17992_v22  ;;  %v22768_v9 = vsel %vm18062_vm13, 4294967295, %v22767_v9  ;;  %v6110_v22 = vadd.f32 %v6109_v60, %v6071_v40  ;;  %v22774_v40 = vmov 0  ;;  %v10282_v51 = vsel %vm18062_vm13, 1.0, %v22604_v25  ;;  %7463 = vmatpush.msra.mxu3 %v18104_v5  ;;  %10347 = vmatpush.msk.msra.mxu1 %vm22811_vm12, %v21026_v14 }
 0x491   : > { %22749 = vst [vmem:[#allocation144_spill] sm:$0xff] %v18004_v36  ;;  %v10283_v36 = vsel %vm18036_vm3, 1.0, %v22604_v25  ;;  %v22775_v40 = vsel %vm18086_vm9, 4294967295, %v22774_v40  ;;  %v7509_v45 = vsub.f32 %v18157_v23, %v18201_v27  ;;  %vm22815_vm12 = vnez %v22643_v21  ;;  %10367 = vmatpush.msk.msra.mxu2 %vm18062_vm13, %v21026_v14  ;;  %7348 = vmatpush.msra.mxu0 %v17873_v11 }
 0x492   : > { %22750 = vst [vmem:[#allocation211_spill] sm:$0xff] %v18006_v17  ;;  %v6179_v60 = vadd.f32 %v6178_v15, %v6110_v22  ;;  %v18108_v22 = vsub.f32 %v10283_v36, %v10283_v36  ;;  %v18127_v36 = vand.u32 4294901760, %v7467_v53  ;;  %v22787_v53 = vld [vmem:[#allocation136_spill] sm:$0xff]  ;;  %10348 = vmatpush.msk.msra.mxu1 %vm22815_vm12, %v21026_v14  ;;  %vm22819_vm12 = vnez %v22648_v18 }
 0x493   : > { %22754 = vst [vmem:[#allocation173_spill] sm:$0xff] %v22753_v16  ;;  %vm18144_vm11 = vcmp.eq.s32.totalorder %v22787_v53, %v17411_v38  ;;  %v10280_v53 = vsel %vm18116_vm10, 1.0, %v22604_v25  ;;  %10368 = vmatpush.msk.msra.mxu2 %vm18086_vm9, %v21026_v14  ;;  %7352 = vmatpush.msra.mxu0 %v17889_v10  ;;  %v22929_v16 = vmov 0 }
 0x494   : > { %22755 = vst [vmem:[#allocation179_spill] sm:$0xff] %v18019_v28  ;;  %v6215_v28 = vpop.f32.mrf.mxu3  ;;  %v18155_v42 = vand.u32 4294901760, %v18108_v22  ;;  %7469 = vmatpush.msra.mxu3 %v18127_v36  ;;  %v10279_v62 = vsel %vm18144_vm11, 1.0, %v22604_v25  ;;  %10349 = vmatpush.msk.msra.mxu1 %vm22819_vm12, %v21026_v14  ;;  %vm22824_vm12 = vnez %v22661_v34 }
 0x495   : > { %22756 = vst [vmem:[#allocation80_spill] sm:$0xff] %v18021_v39  ;;  %v18095_v39 = vand.u32 4294901760, %v18044_v63  ;;  %v6216_v15 = vadd.f32 %v6215_v28, %v6179_v60  ;;  %v7479_v28 = vsub.f32 %v18032_v3, %v18080_v49  ;;  %v18134_v60 = vsub.f32 %v10282_v51, %v10282_v51  ;;  %10369 = vmatpush.msk.msra.mxu2 %vm18116_vm10, %v21026_v14 }
 0x496   : > { %22757 = vst [vmem:[#allocation181_spill] sm:$0xff] %v18030_v35  ;;  %v22781_v35 = vmov 0  ;;  %v18152_v51 = vand.u32 4294901760, %v7473_v57  ;;  %v22795_v57 = vmov 0  ;;  %10350 = vmatpush.msk.msra.mxu1 %vm22822_vm4, %v21026_v14  ;;  %7356 = vmatpush.msra.mxu0 %v17902_v13 }
 0x497   : > { %22758 = vst [vmem:[#allocation188_spill] sm:$0xff] %v18032_v3  ;;  %v22782_v35 = vsel %vm18116_vm10, 4294967295, %v22781_v35  ;;  %v22796_v57 = vsel %vm18168_vm15, 4294967295, %v22795_v57  ;;  %v18176_v43 = vand.u32 4294901760, %v7479_v28  ;;  %v18181_v47 = vand.u32 4294901760, %v18134_v60  ;;  %10370 = vmatpush.msk.msra.mxu2 %vm18144_vm11, %v21026_v14 }
 0x498   : > { %22762 = vst [vmem:[#allocation223_spill] sm:$0xff] %v22761_v58  ;;  %v18192_v28 = vsub.f32 %v10280_v53, %v10280_v53  ;;  %7475 = vmatpush.msra.mxu3 %v18152_v51  ;;  %v18216_v53 = vsub.f32 %v10279_v62, %v10279_v62  ;;  %10351 = vmatpush.msk.msra.mxu1 %vm22824_vm12, %v21026_v14  ;;  %v6411_v10 = vpop.f32.mrf.mxu2  ;;  %vm22834_vm12 = vnez %v22681_v1 }
 0x499   : > { %22763 = vst [vmem:[#allocation194_spill] sm:$0xff] %v18044_v63  ;;  %10371 = vmatpush.msk.msra.mxu2 %vm18168_vm15, %v21026_v14 }
 0x49a   : > { %22764 = vst [vmem:[#allocation210_spill] sm:$0xff] %v18053_v52  ;;  %v7485_v52 = vsub.f32 %v18044_v63, %v18095_v39  ;;  %7481 = vmatpush.msra.mxu3 %v18176_v43  ;;  %v18231_v62 = vand.u32 4294901760, %v18192_v28  ;;  %v18251_v55 = vand.u32 4294901760, %v18216_v53 }
 0x49b   : > { %22765 = vst [vmem:[#allocation224_spill] sm:$0xff] %v18058_v56  ;;  %10372 = vmatpush.msk.msra.mxu2 %vm18205_vm5, %v21026_v14 }
 0x49c   : > { %22769 = vst [vmem:[#allocation208_spill] sm:$0xff] %v22768_v9  ;;  %v18190_v44 = vand.u32 4294901760, %v7485_v52  ;;  %v10278_v52 = vsel %vm18168_vm15, 1.0, %v22604_v25  ;;  %v7515_v12 = vsub.f32 %v18192_v28, %v18231_v62 }
 0x49d   : > { %22770 = vst [vmem:[#allocation215_spill] sm:$0xff] %v18070_v61  ;;  %v22788_v61 = vmov 0  ;;  %v18233_v30 = vsub.f32 %v10278_v52, %v10278_v52  ;;  %v6256_v52 = vpop.f32.mrf.mxu0 }
 0x49e   : > { %22771 = vst [vmem:[#allocation228_spill] sm:$0xff] %v18080_v49  ;;  %v22789_v61 = vsel %vm18144_vm11, 4294967295, %v22788_v61  ;;  %7487 = vmatpush.msra.mxu3 %v18190_v44 }
 0x49f   : > { %22772 = vst [vmem:[#allocation219_spill] sm:$0xff] %v18082_v48  ;;  %v18268_v21 = vand.u32 4294901760, %v18233_v30 }
 0x4a0   : > { %22776 = vst [vmem:[#allocation221_spill] sm:$0xff] %v22775_v40 }
 0x4a1   : > { %22777 = vst [vmem:[#allocation231_spill] sm:$0xff] %v18095_v39 }
 0x4a2   : > { %22778 = vst [vmem:[#allocation110_spill] sm:$0xff] %v18104_v5  ;;  %v7491_v5 = vsub.f32 %v18082_v48, %v18132_v4 }
 0x4a3   : > { %22779 = vst [vmem:[#allocation233_spill] sm:$0xff] %v18108_v22 }
 0x4a4   : > { %22783 = vst [vmem:[#allocation226_spill] sm:$0xff] %v22782_v35  ;;  %v18222_v29 = vand.u32 4294901760, %v7491_v5 }
 0x4a5   : > { %22784 = vst [vmem:[#allocation160_spill] sm:$0xff] %v18127_v36  ;;  %v7497_v36 = vsub.f32 %v18108_v22, %v18155_v42 }
 0x4a6   : > { %22785 = vst [vmem:[#allocation130_spill] sm:$0xff] %v18132_v4  ;;  %7493 = vmatpush.msra.mxu3 %v18222_v29 }
 0x4a7   : > { %22786 = vst [vmem:[#allocation229_spill] sm:$0xff] %v18134_v60  ;;  %v18242_v5 = vand.u32 4294901760, %v7497_v36 }
 0x4a8   : > { %22790 = vst [vmem:[#allocation134_spill] sm:$0xff] %v22789_v61  ;;  %v22901_v61 = vmov 0 }
 0x4a9   : > { %22791 = vst [vmem:[#allocation234_spill] sm:$0xff] %v18152_v51  ;;  %v7503_v51 = vsub.f32 %v18134_v60, %v18181_v47  ;;  %7499 = vmatpush.msra.mxu3 %v18242_v5 }
 0x4aa   : > { %22792 = vst [vmem:[#allocation212_spill] sm:$0xff] %v18155_v42 }
 0x4ab   : > { %22793 = vst [vmem:[#allocation243_spill] sm:$0xff] %v18157_v23  ;;  %v18257_v36 = vand.u32 4294901760, %v7503_v51  ;;  %v7521_v51 = vsub.f32 %v18216_v53, %v18251_v55 }
 0x4ac   : > { %22797 = vst [vmem:[#allocation235_spill] sm:$0xff] %v22796_v57 }
 0x4ad   : > { %22798 = vst [vmem:[#allocation163_spill] sm:$0xff] %v18176_v43  ;;  %v10277_v43 = vsel %vm18205_vm5, 1.0, %v22604_v25  ;;  %7505 = vmatpush.msra.mxu3 %v18257_v36 }
 0x4ae   : > { %22799 = vst [vmem:[#allocation246_spill] sm:$0xff] %v18181_v47  ;;  %v18259_v32 = vsub.f32 %v10277_v43, %v10277_v43 }
 0x4af   : > { %22801 = vst [vmem:[#allocation198_spill] sm:$0xff] %v18190_v44  ;;  %v6257_v44 = vadd.f32 %v6256_v52, %v6216_v15  ;;  %v18274_v15 = vand.u32 4294901760, %v7509_v45  ;;  %v18293_v45 = vand.u32 4294901760, %v7515_v12  ;;  %v7527_v52 = vsub.f32 %v18233_v30, %v18268_v21 }
 0x4b0   : > { %22802 = vst [vmem:[#allocation247_spill] sm:$0xff] %v18192_v28  ;;  %v18287_v43 = vand.u32 4294901760, %v18259_v32 }
 0x4b1   : > { %22803 = vst [vmem:[#allocation206_spill] sm:$0xff] %v18201_v27  ;;  %7511 = vmatpush.msra.mxu3 %v18274_v15  ;;  %v18315_v13 = vand.u32 4294901760, %v7527_v52 }
 0x4b2   : > { %22807 = vst [vmem:[#allocation249_spill] sm:$0xff] %v22806_v19  ;;  %v7533_v12 = vsub.f32 %v18259_v32, %v18287_v43  ;;  %v22919_v19 = vld [vmem:[#allocation164_spill] sm:$0xff] }
 0x4b3   : > { %22809 = vst [vmem:[#allocation175_spill] sm:$0xff] %v18216_v53  ;;  %7517 = vmatpush.msra.mxu3 %v18293_v45 }
 0x4b4   : > { %22810 = vst [vmem:[#allocation251_spill] sm:$0xff] %v18222_v29  ;;  %v22829_v29 = vld [vmem:[#allocation161_spill] sm:$0xff]  ;;  %v18329_v52 = vand.u32 4294901760, %v7533_v12 }
 0x4b5   : > { %22812 = vst [vmem:[#allocation187_spill] sm:$0xff] %v18231_v62  ;;  %7095 = vmatmul.f32.vlgmr.msrb.gmra.mxu0 %v22829_v29  ;;  %v6357_v29 = vpop.f32.mrf.mxu1  ;;  %v22838_v12 = vld [vmem:[#allocation133_spill] sm:$0xff] }
 0x4b6   : > { %22813 = vst [vmem:[#allocation253_spill] sm:$0xff] %v18233_v30  ;;  %7196 = vmatmul.f32.vlgmr.msrb.gmra.mxu1 %v22838_v12 }
 0x4b7   : > { %22814 = vst [vmem:[#allocation199_spill] sm:$0xff] %v18242_v5  ;;  %v18305_v5 = vand.u32 4294901760, %v7521_v51  ;;  %v6358_v51 = vadd.f32 %v6357_v29, %v6257_v44  ;;  %v22836_v44 = vld [vmem:[#allocation152_spill] sm:$0xff] }
 0x4b8   : > { %22816 = vst [vmem:[#allocation255_spill] sm:$0xff] %v18251_v55  ;;  %7289 = vmatmul.f32.vlgmr.msrb.gmra.mxu3 %v22836_v44  ;;  %v22837_v29 = vld [vmem:[#allocation172_spill] sm:$0xff] }
 0x4b9   : > { %22817 = vst [vmem:[#allocation209_spill] sm:$0xff] %v18257_v36  ;;  %v22826_v36 = vld [vmem:[#allocation101_spill] sm:$0xff]  ;;  %7523 = vmatpush.msra.mxu3 %v18305_v5 }
 0x4ba   : > { %22818 = vst [vmem:[#allocation257_spill] sm:$0xff] %v18259_v32  ;;  %vm22827_vm4 = vnez %v22826_v36 }
 0x4bb   : > { %22820 = vst [vmem:[#allocation217_spill] sm:$0xff] %v18268_v21  ;;  %10352 = vmatpush.msk.msra.mxu1 %vm22827_vm4, %v21026_v14  ;;  %vm22832_vm4 = vnez %v22675_v24  ;;  %7529 = vmatpush.msra.mxu3 %v18315_v13 }
 0x4bc   : > { %22821 = vst [vmem:[#allocation259_spill] sm:$0xff] %v18274_v15  ;;  %v22830_v15 = vld [vmem:[#allocation195_spill] sm:$0xff] }
 0x4bd   : > { %22823 = vst [vmem:[#allocation222_spill] sm:$0xff] %v18287_v43  ;;  %7543 = vmatpush.msrb.mxu0 %v22830_v15  ;;  %10353 = vmatpush.msk.msra.mxu1 %vm22832_vm4, %v21026_v14  ;;  %v6412_v15 = vadd.f32 %v6411_v10, %v6358_v51  ;;  %v22841_v10 = vld [vmem:[#allocation151_spill] sm:$0xff] }
 0x4be   : > { %22825 = vst [vmem:[#allocation261_spill] sm:$0xff] %v18293_v45  ;;  %v22833_v45 = vld [vmem:[#allocation143_spill] sm:$0xff]  ;;  %7535 = vmatpush.msra.mxu3 %v18329_v52  ;;  %7358 = vmatmul.f32.vlgmr.msra.gmra.mxu0 %v22838_v12 }
 0x4bf   : > { %22828 = vst [vmem:[#allocation227_spill] sm:$0xff] %v18305_v5  ;;  %7546 = vmatpush.msrb.mxu0 %v17891_v0  ;;  %7250 = vmatmul.f32.vlgmr.msrb.gmra.mxu2 %v22833_v45  ;;  %v6450_v5 = vpop.f32.mrf.mxu3  ;;  %v22845_v51 = vld [vmem:[#allocation67_spill] sm:$0xff] }
 0x4c0   : > { %22831 = vst [vmem:[#allocation262_spill] sm:$0xff] %v18315_v13  ;;  %10354 = vmatpush.msk.msra.mxu1 %vm22834_vm12, %v21026_v14  ;;  %7637 = vmatpush.msrb.mxu2 %v22837_v29  ;;  %v6451_v45 = vadd.f32 %v6450_v5, %v6412_v15  ;;  %v22839_v13 = vld [vmem:[#allocation148_spill] sm:$0xff]  ;;  %vm22840_vm12 = vnez %v22694_v54  ;;  %v22844_v15 = vld [vmem:[#allocation105_spill] sm:$0xff] }
 0x4c1   : > { %22835 = vst [vmem:[#allocation230_spill] sm:$0xff] %v18329_v52  ;;  %7549 = vmatpush.msrb.mxu0 %v17917_v26  ;;  %10389 = vmatpush.msk.msrb.mxu3 %vm22840_vm12, %v21026_v14  ;;  %v22842_v5 = vld [vmem:[#allocation184_spill] sm:$0xff]  ;;  %v1608_v44 = vadd.f32 %v22845_v51, %v22844_v15  ;;  %v22846_v52 = vld [vmem:[#allocation166_spill] sm:$0xff]  ;;  %v22849_v15 = vld [vmem:[#allocation59_spill] sm:$0xff] }
 0x4c2   : > { %10355 = vmatpush.msk.msra.mxu1 %vm17749_vm8, %v21026_v14  ;;  %7641 = vmatpush.msrb.mxu2 %v22839_v13  ;;  %vm22843_vm8 = vnez %v22701_v46  ;;  %v22847_v13 = vld [vmem:[#allocation144_spill] sm:$0xff]  ;;  %v22969_v46 = vld [vmem:[#allocation97_spill] sm:$0xff] }
 0x4c3   : > { %7552 = vmatpush.msrb.mxu0 %v17956_v6  ;;  %10390 = vmatpush.msk.msrb.mxu3 %vm22843_vm8, %v21026_v14  ;;  %v22850_v51 = vld [vmem:[#allocation56_spill] sm:$0xff] }
 0x4c4   : > { %10356 = vmatpush.msk.msra.mxu1 %vm17768_vm2, %v21026_v14  ;;  %7645 = vmatpush.msrb.mxu2 %v22842_v5  ;;  %v22848_v5 = vld [vmem:[#allocation158_spill] sm:$0xff]  ;;  %v585_v29 = vadd.f32 %v22850_v51, %v22849_v15 }
 0x4c5   : > { %7555 = vmatpush.msrb.mxu0 %v17988_v37  ;;  %10391 = vmatpush.msk.msrb.mxu3 %vm17840_vm0, %v21026_v14  ;;  %v22854_v51 = vld [vmem:[#allocation118_spill] sm:$0xff] }
 0x4c6   : > { %10373 = vmatpush.msk.msrb.mxu1 %vm22840_vm12, %v21026_v14  ;;  %7649 = vmatpush.msrb.mxu2 %v22847_v13  ;;  %v22852_v13 = vld [vmem:[#allocation181_spill] sm:$0xff] }
 0x4c7   : > { %7558 = vmatpush.msrb.mxu0 %v18006_v17  ;;  %7436 = vmatmul.f32.vlgmr.msra.gmra.mxu2 %v22846_v52  ;;  %v22851_v52 = vld [vmem:[#allocation71_spill] sm:$0xff] }
 0x4c8   : > { %10374 = vmatpush.msk.msrb.mxu1 %vm22843_vm8, %v21026_v14  ;;  %7537 = vmatmul.f32.vlgmr.msra.gmra.mxu3 %v22848_v5  ;;  %v1662_v17 = vadd.f32 %v22851_v52, %v1608_v44  ;;  %v22853_v44 = vld [vmem:[#allocation40_spill] sm:$0xff] }
 0x4c9   : > { %7561 = vmatpush.msrb.mxu0 %v18032_v3  ;;  %7653 = vmatpush.msrb.mxu2 %v22852_v13  ;;  %v639_v15 = vadd.f32 %v22853_v44, %v585_v29  ;;  %v22858_v29 = vmov 0  ;;  %v22878_v13 = vld [vmem:[#allocation170_spill] sm:$0xff] }
 0x4ca   : > { %10375 = vmatpush.msk.msrb.mxu1 %vm17840_vm0, %v21026_v14  ;;  %10392 = vmatpush.msk.msrb.mxu3 %vm17877_vm14, %v21026_v14  ;;  %v1701_v52 = vadd.f32 %v22854_v51, %v1662_v17  ;;  %vm22855_vm0 = vnez %v22732_v20  ;;  %v22857_v17 = vld [vmem:[#allocation70_spill] sm:$0xff]  ;;  %v22861_v51 = vld [vmem:[#allocation121_spill] sm:$0xff] }
 0x4cb   : > { %7564 = vmatpush.msrb.mxu0 %v18044_v63  ;;  %7395 = vmatmul.f32.vlgmr.msra.gmra.mxu1 %v22838_v12  ;;  %vm18412_vm8 = vcmp.eq.s32.totalorder %v22857_v17, %v17411_v38  ;;  %v22860_v12 = vld [vmem:[#allocation63_spill] sm:$0xff]  ;;  %v22943_v20 = vld [vmem:[#allocation82_spill] sm:$0xff] }
 0x4cc   : > { %7657 = vmatpush.msrb.mxu2 %v18058_v56  ;;  %10376 = vmatpush.msk.msrb.mxu1 %vm17877_vm14, %v21026_v14  ;;  %vm22856_vm14 = vnez %v22739_v33  ;;  %v22859_v29 = vsel %vm18412_vm8, 4294967295, %v22858_v29  ;;  %v678_v44 = vadd.f32 %v22860_v12, %v639_v15  ;;  %v10308_v15 = vsel %vm18412_vm8, 1.0, %v22604_v25  ;;  %v22937_v33 = vld [vmem:[#allocation36_spill] sm:$0xff] }
 0x4cd   : > { %10393 = vmatpush.msk.msrb.mxu3 %vm17906_vm1, %v21026_v14  ;;  %7567 = vmatpush.msrb.mxu0 %v18082_v48  ;;  %v22868_v56 = vmov 0  ;;  %v22911_v48 = vld [vmem:[#allocation53_spill] sm:$0xff] }
 0x4ce   : > { %7661 = vmatpush.msrb.mxu2 %v18080_v49  ;;  %10377 = vmatpush.msk.msrb.mxu1 %vm17906_vm1, %v21026_v14  ;;  %v1770_v49 = vadd.f32 %v22861_v51, %v1701_v52  ;;  %v22862_v52 = vld [vmem:[#allocation167_spill] sm:$0xff] }
 0x4cf   : > { %10394 = vmatpush.msk.msrb.mxu3 %vm22855_vm0, %v21026_v14  ;;  %7570 = vmatpush.msrb.mxu0 %v18108_v22  ;;  %v22866_v51 = vld [vmem:[#allocation31_spill] sm:$0xff]  ;;  %v22900_v22 = vld [vmem:[#allocation178_spill] sm:$0xff] }
 0x4d0   : > { %7665 = vmatpush.msrb.mxu2 %v18095_v39  ;;  %10378 = vmatpush.msk.msrb.mxu1 %vm22855_vm0, %v21026_v14  ;;  %v6519_v39 = vpop.f32.mrf.mxu0  ;;  %vm18583_vm0 = vcmp.eq.s32.totalorder %v22900_v22, %v17411_v38 }
 0x4d1   : > { %10395 = vmatpush.msk.msrb.mxu3 %vm22856_vm14, %v21026_v14  ;;  %7573 = vmatpush.msrb.mxu0 %v18134_v60  ;;  %v6520_v17 = vadd.f32 %v6519_v39, %v6451_v45  ;;  %v22863_v39 = vmov 0  ;;  %v22865_v45 = vld [vmem:[#allocation69_spill] sm:$0xff]  ;;  %v22902_v61 = vsel %vm18583_vm0, 4294967295, %v22901_v61 }
 0x4d2   : > { %7669 = vmatpush.msrb.mxu2 %v18132_v4  ;;  %10379 = vmatpush.msk.msrb.mxu1 %vm22856_vm14, %v21026_v14  ;;  %vm18439_vm14 = vcmp.eq.s32.totalorder %v22862_v52, %v17411_v38  ;;  %v747_v12 = vadd.f32 %v22865_v45, %v678_v44  ;;  %v22867_v4 = vld [vmem:[#allocation168_spill] sm:$0xff]  ;;  %v18459_v44 = vsub.f32 %v10308_v15, %v10308_v15  ;;  %v22872_v15 = vld [vmem:[#allocation169_spill] sm:$0xff] }
 0x4d3   : > { %10396 = vmatpush.msk.msrb.mxu3 %vm17978_vm6, %v21026_v14  ;;  %7576 = vmatpush.msrb.mxu0 %v18157_v23  ;;  %v22864_v39 = vsel %vm18439_vm14, 4294967295, %v22863_v39  ;;  %v22895_v23 = vld [vmem:[#allocation176_spill] sm:$0xff] }
 0x4d4   : > { %7673 = vmatpush.msrb.mxu2 %v18155_v42  ;;  %10380 = vmatpush.msk.msrb.mxu1 %vm17978_vm6, %v21026_v14  ;;  %v1807_v42 = vadd.f32 %v22866_v51, %v1770_v49  ;;  %vm18449_vm6 = vcmp.eq.s32.totalorder %v22867_v4, %v17411_v38  ;;  %22870 = vst [vmem:[#allocation232_spill] sm:$0xff] %v18459_v44  ;;  %v22871_v49 = vld [vmem:[#allocation125_spill] sm:$0xff]  ;;  %v10307_v4 = vsel %vm18439_vm14, 1.0, %v22604_v25  ;;  %v22875_v51 = vld [vmem:[#allocation42_spill] sm:$0xff] }
 0x4d5   : > { %10397 = vmatpush.msk.msrb.mxu3 %vm18010_vm7, %v21026_v14  ;;  %7579 = vmatpush.msrb.mxu0 %v18192_v28  ;;  %v22869_v56 = vsel %vm18449_vm6, 4294967295, %v22868_v56  ;;  %v10306_v45 = vsel %vm18449_vm6, 1.0, %v22604_v25  ;;  %v6597_v28 = vpop.f32.mrf.mxu2 }
 0x4d6   : > { %7677 = vmatpush.msrb.mxu2 %v18181_v47  ;;  %10381 = vmatpush.msk.msrb.mxu1 %vm18010_vm7, %v21026_v14  ;;  %v1848_v52 = vadd.f32 %v22871_v49, %v1807_v42  ;;  %vm18475_vm7 = vcmp.eq.s32.totalorder %v22872_v15, %v17411_v38  ;;  %v22873_v42 = vmov 0  ;;  %v784_v49 = vadd.f32 %v22875_v51, %v747_v12  ;;  %v22883_v51 = vld [vmem:[#allocation162_spill] sm:$0xff] }
 0x4d7   : > { %10398 = vmatpush.msk.msrb.mxu3 %vm18036_vm3, %v21026_v14  ;;  %7582 = vmatpush.msrb.mxu0 %v18216_v53  ;;  %v22874_v42 = vsel %vm18475_vm7, 4294967295, %v22873_v42  ;;  %v18492_v15 = vsub.f32 %v10307_v4, %v10307_v4  ;;  %v22879_v12 = vmov 0  ;;  %v10305_v4 = vsel %vm18475_vm7, 1.0, %v22604_v25 }
 0x4d8   : > { %7681 = vmatpush.msrb.mxu2 %v18201_v27  ;;  %10382 = vmatpush.msk.msrb.mxu1 %vm18036_vm3, %v21026_v14  ;;  %v22876_v27 = vld [vmem:[#allocation79_spill] sm:$0xff]  ;;  %vm18496_vm3 = vcmp.eq.s32.totalorder %v22878_v13, %v17411_v38  ;;  %v6556_v13 = vpop.f32.mrf.mxu1  ;;  %v6752_v7 = vpop.f32.mrf.mxu0 }
 0x4d9   : > { %10399 = vmatpush.msk.msrb.mxu3 %vm18062_vm13, %v21026_v14  ;;  %v1949_v47 = vadd.f32 %v22876_v27, %v1848_v52  ;;  %7585 = vmatpush.msrb.mxu0 %v18233_v30  ;;  %22877 = vst [vmem:[#allocation186_spill] sm:$0xff] %v18492_v15  ;;  %v22880_v12 = vsel %vm18496_vm3, 4294967295, %v22879_v12  ;;  %v18501_v27 = vand.u32 4294901760, %v18459_v44  ;;  %v18505_v52 = vsub.f32 %v10306_v45, %v10306_v45 }
 0x4da   : > { %7685 = vmatpush.msrb.mxu2 %v18231_v62  ;;  %10383 = vmatpush.msk.msrb.mxu1 %vm18062_vm13, %v21026_v14  ;;  %v22884_v62 = vld [vmem:[#allocation171_spill] sm:$0xff]  ;;  %v22885_v30 = vmov 0 }
 0x4db   : > { %10400 = vmatpush.msk.msrb.mxu3 %vm18086_vm9, %v21026_v14  ;;  %22881 = vst [vmem:[#allocation236_spill] sm:$0xff] %v18501_v27  ;;  %7588 = vmatpush.msrb.mxu0 %v18259_v32  ;;  %vm18516_vm13 = vcmp.eq.s32.totalorder %v22884_v62, %v17411_v38  ;;  %v22888_v32 = vld [vmem:[#allocation32_spill] sm:$0xff]  ;;  %v10304_v62 = vsel %vm18496_vm3, 1.0, %v22604_v25 }
 0x4dc   : > { %7689 = vmatpush.msrb.mxu2 %v18251_v55  ;;  %22882 = vst [vmem:[#allocation237_spill] sm:$0xff] %v18505_v52  ;;  %7591 = vmatmul.f32.vlgmr.msrb.gmra.mxu0 %v22883_v51  ;;  %v22886_v30 = vsel %vm18516_vm13, 4294967295, %v22885_v30  ;;  %v22887_v55 = vld [vmem:[#allocation48_spill] sm:$0xff]  ;;  %v2003_v53 = vadd.f32 %v22888_v32, %v1949_v47  ;;  %v6557_v51 = vadd.f32 %v6556_v13, %v6520_v17  ;;  %v22891_v17 = vld [vmem:[#allocation174_spill] sm:$0xff]  ;;  %v10303_v60 = vsel %vm18516_vm13, 1.0, %v22604_v25 }
 0x4dd   : > { %10384 = vmatpush.msk.msrb.mxu1 %vm18086_vm9, %v21026_v14  ;;  %v825_v45 = vadd.f32 %v22887_v55, %v784_v49  ;;  %10401 = vmatpush.msk.msrb.mxu3 %vm18116_vm10, %v21026_v14  ;;  %v7784_v32 = vsub.f32 %v18459_v44, %v18501_v27  ;;  %v18538_v55 = vand.u32 4294901760, %v18492_v15  ;;  %v18540_v47 = vsub.f32 %v10305_v4, %v10305_v4  ;;  %v6698_v4 = vpop.f32.mrf.mxu3 }
 0x4de   : > { %10405 = vmatpush.msk.msra.mxu0 %vm18412_vm8, %v21026_v14  ;;  %7693 = vmatpush.msrb.mxu2 %v18268_v21  ;;  %vm18544_vm9 = vcmp.eq.s32.totalorder %v22891_v17, %v17411_v38  ;;  %v22892_v49 = vmov 0  ;;  %v6598_v13 = vadd.f32 %v6597_v28, %v6557_v51  ;;  %v18555_v21 = vand.u32 4294901760, %v18505_v52  ;;  %v22899_v51 = vld [vmem:[#allocation76_spill] sm:$0xff] }
 0x4df   : > { %10385 = vmatpush.msk.msrb.mxu1 %vm18116_vm10, %v21026_v14  ;;  %22889 = vst [vmem:[#allocation239_spill] sm:$0xff] %v18538_v55  ;;  %v22893_v49 = vsel %vm18544_vm9, 4294967295, %v22892_v49  ;;  %10402 = vmatpush.msk.msrb.mxu3 %vm18144_vm11, %v21026_v14  ;;  %vm18559_vm10 = vcmp.eq.s32.totalorder %v22895_v23, %v17411_v38  ;;  %v22896_v17 = vmov 0  ;;  %v18570_v28 = vsub.f32 %v10304_v62, %v10304_v62 }
 0x4e0   : > { %22890 = vst [vmem:[#allocation238_spill] sm:$0xff] %v18540_v47  ;;  %10406 = vmatpush.msk.msra.mxu0 %vm18439_vm14, %v21026_v14  ;;  %v22897_v17 = vsel %vm18559_vm10, 4294967295, %v22896_v17  ;;  %7697 = vmatpush.msrb.mxu2 %v18287_v43  ;;  %v926_v35 = vadd.f32 %v22899_v51, %v825_v45  ;;  %v18579_v23 = vadd.f32 %v6698_v4, %v6598_v13  ;;  %v10302_v45 = vsel %vm18544_vm9, 1.0, %v22604_v25  ;;  %v22904_v4 = vld [vmem:[#allocation60_spill] sm:$0xff]  ;;  %v22905_v43 = vld [vmem:[#allocation83_spill] sm:$0xff] }
 0x4e1   : > { %22894 = vst [vmem:[#allocation240_spill] sm:$0xff] %v18555_v21  ;;  %10386 = vmatpush.msk.msrb.mxu1 %vm18144_vm11, %v21026_v14  ;;  %10403 = vmatpush.msk.msrb.mxu3 %vm18168_vm15, %v21026_v14  ;;  %v7790_v62 = vsub.f32 %v18492_v15, %v18538_v55  ;;  %v18597_v13 = vand.u32 4294901760, %v18540_v47  ;;  %v18599_v38 = vsub.f32 %v10303_v60, %v10303_v60  ;;  %v10301_v22 = vsel %vm18559_vm10, 1.0, %v22604_v25 }
 0x4e2   : > { %22898 = vst [vmem:[#allocation241_spill] sm:$0xff] %v18570_v28  ;;  %10407 = vmatpush.msk.msra.mxu0 %vm18449_vm6, %v21026_v14  ;;  %7699 = vmatmul.f32.vlgmr.msrb.gmra.mxu2 %v22848_v5  ;;  %v980_v51 = vadd.f32 %v22904_v4, %v926_v35  ;;  %v2042_v40 = vadd.f32 %v22905_v43, %v2003_v53  ;;  %v18610_v57 = vand.u32 4294901760, %v7784_v32  ;;  %v18619_v35 = vand.u32 4294901760, %v18570_v28  ;;  %v18624_v43 = vld [vmem:[%s11026_s4 + $0x3] ss:$0 sm:$0xff] }
 0x4e3   : > { %10387 = vmatpush.msk.msrb.mxu1 %vm18168_vm15, %v21026_v14  ;;  %22903 = vst [vmem:[#allocation242_spill] sm:$0xff] %v18599_v38  ;;  %7884 = vmatpush.msra.mxu2 %v18459_v44  ;;  %v7796_v60 = vsub.f32 %v18505_v52, %v18555_v21  ;;  %v18621_v53 = vsub.f32 %v10302_v45, %v10302_v45  ;;  %v22908_v4 = vld [vmem:[#allocation180_spill] sm:$0xff]  ;;  %v22909_v32 = vmov 0  ;;  %v10300_v44 = vsel %vm18583_vm0, 1.0, %v22604_v25 }
 0x4e4   : > { %10404 = vmatpush.msk.msrb.mxu3 %vm18205_vm5, %v21026_v14  ;;  %22906 = vst [vmem:[#allocation244_spill] sm:$0xff] %v18610_v57  ;;  %10408 = vmatpush.msk.msra.mxu0 %vm18475_vm7, %v21026_v14  ;;  %vm18628_vm15 = vcmp.eq.s32.totalorder %v22908_v4, %v18624_v43  ;;  %v1019_v9 = vadd.f32 %v22911_v48, %v980_v51  ;;  %v18649_v4 = vand.u32 4294901760, %v7790_v62  ;;  %v22915_v51 = vld [vmem:[#allocation182_spill] sm:$0xff] }
 0x4e5   : > { %7736 = vmatmul.f32.vlgmr.msrb.gmra.mxu3 %v22848_v5  ;;  %22907 = vst [vmem:[#allocation245_spill] sm:$0xff] %v18621_v53  ;;  %v22910_v32 = vsel %vm18628_vm15, 4294967295, %v22909_v32  ;;  %v22912_v5 = vld [vmem:[#allocation86_spill] sm:$0xff]  ;;  %7887 = vmatpush.msra.mxu2 %v18492_v15  ;;  %v18641_v45 = vsub.f32 %v10301_v22, %v10301_v22  ;;  %v7802_v48 = vsub.f32 %v18540_v47, %v18597_v13  ;;  %v22916_v22 = vmov 0 }
 0x4e6   : > { %v2111_v63 = vadd.f32 %v22912_v5, %v2042_v40  ;;  %10421 = vmatpush.msk.msra.mxu3 %vm18412_vm8, %v21026_v14  ;;  %10388 = vmatpush.msk.msrb.mxu1 %vm18205_vm5, %v21026_v14  ;;  %22914 = vst [vmem:[#allocation250_spill] sm:$0xff] %v18649_v4  ;;  %v18654_v40 = vand.u32 4294901760, %v18599_v38  ;;  %vm18658_vm11 = vcmp.eq.s32.totalorder %v22915_v51, %v18624_v43  ;;  %v22918_v5 = vld [vmem:[#allocation33_spill] sm:$0xff]  ;;  %v10299_v58 = vsel %vm18628_vm15, 1.0, %v22604_v25 }
 0x4e7   : > { %22913 = vst [vmem:[#allocation248_spill] sm:$0xff] %v18641_v45  ;;  %10409 = vmatpush.msk.msra.mxu0 %vm18496_vm3, %v21026_v14  ;;  %v22917_v22 = vsel %vm18658_vm11, 4294967295, %v22916_v22  ;;  %7630 = vmatmul.f32.vlgmr.msrb.gmra.mxu1 %v22919_v19  ;;  %v18665_v62 = vsub.f32 %v10300_v44, %v10300_v44  ;;  %v18674_v51 = vand.u32 4294901760, %v7796_v60  ;;  %v18679_v19 = vand.u32 4294901760, %v18621_v53  ;;  %v22922_v44 = vld [vmem:[#allocation185_spill] sm:$0xff] }
 0x4e8   : > { %v2148_v15 = vadd.f32 %v22918_v5, %v2111_v63  ;;  %7890 = vmatpush.msra.mxu2 %v18505_v52  ;;  %7786 = vmatpush.msra.mxu1 %v18610_v57  ;;  %v7808_v63 = vsub.f32 %v18570_v28, %v18619_v35  ;;  %vm18683_vm5 = vcmp.eq.s32.totalorder %v22922_v44, %v18624_v43  ;;  %v22923_v5 = vmov 0  ;;  %v22925_v52 = vld [vmem:[#allocation68_spill] sm:$0xff] }
 0x4e9   : > { %22920 = vst [vmem:[#allocation252_spill] sm:$0xff] %v18665_v62  ;;  %10422 = vmatpush.msk.msra.mxu3 %vm18439_vm14, %v21026_v14  ;;  %v22924_v5 = vsel %vm18683_vm5, 4294967295, %v22923_v5  ;;  %v1088_v57 = vadd.f32 %v22925_v52, %v1019_v9  ;;  %10410 = vmatpush.msk.msra.mxu0 %vm18516_vm13, %v21026_v14  ;;  %v18693_v60 = vand.u32 4294901760, %v18641_v45  ;;  %v10298_v3 = vsel %vm18658_vm11, 1.0, %v22604_v25 }
 0x4ea   : > { %22921 = vst [vmem:[#allocation14_spill] sm:$0xff] %v18674_v51  ;;  %7893 = vmatpush.msra.mxu2 %v18540_v47  ;;  %7792 = vmatpush.msra.mxu1 %v18649_v4  ;;  %v18702_v9 = vand.u32 4294901760, %v7802_v48  ;;  %v7814_v52 = vsub.f32 %v18599_v38, %v18654_v40  ;;  %v18706_v44 = vsub.f32 %v10299_v58, %v10299_v58  ;;  %v22928_v47 = vld [vmem:[#allocation189_spill] sm:$0xff]  ;;  %v18720_v48 = vand.u32 4294901760, %v18665_v62 }
 0x4eb   : > { %10423 = vmatpush.msk.msra.mxu3 %vm18449_vm6, %v21026_v14  ;;  %vm18710_vm1 = vcmp.eq.s32.totalorder %v22928_v47, %v18624_v43  ;;  %v2189_v37 = vadd.f32 %v22931_v41, %v2148_v15  ;;  %10411 = vmatpush.msk.msra.mxu0 %vm18544_vm9, %v21026_v14  ;;  %v10297_v58 = vsel %vm18683_vm5, 1.0, %v22604_v25  ;;  %v18729_v41 = vand.u32 4294901760, %v7808_v63 }
 0x4ec   : > { %22926 = vst [vmem:[#allocation254_spill] sm:$0xff] %v18702_v9  ;;  %v22930_v16 = vsel %vm18710_vm1, 4294967295, %v22929_v16  ;;  %7896 = vmatpush.msra.mxu2 %v18570_v28  ;;  %7798 = vmatpush.msra.mxu1 %v18674_v51  ;;  %v7820_v15 = vsub.f32 %v18621_v53, %v18679_v19  ;;  %v18733_v47 = vsub.f32 %v10298_v3, %v10298_v3  ;;  %v22934_v28 = vld [vmem:[#allocation193_spill] sm:$0xff]  ;;  %v22935_v4 = vmov 0 }
 0x4ed   : > { %22927 = vst [vmem:[#allocation15_spill] sm:$0xff] %v18706_v44  ;;  %10424 = vmatpush.msk.msra.mxu3 %vm18475_vm7, %v21026_v14  ;;  %vm18737_vm12 = vcmp.eq.s32.totalorder %v22934_v28, %v18624_v43  ;;  %v1125_v6 = vadd.f32 %v22937_v33, %v1088_v57  ;;  %10412 = vmatpush.msk.msra.mxu0 %vm18559_vm10, %v21026_v14  ;;  %v10296_v3 = vsel %vm18710_vm1, 1.0, %v22604_v25  ;;  %v18755_v33 = vand.u32 4294901760, %v7814_v52 }
 0x4ee   : > { %22932 = vst [vmem:[#allocation256_spill] sm:$0xff] %v18729_v41  ;;  %v22936_v4 = vsel %vm18737_vm12, 4294967295, %v22935_v4  ;;  %7899 = vmatpush.msra.mxu2 %v18599_v38  ;;  %v7826_v63 = vsub.f32 %v18641_v45, %v18693_v60  ;;  %7804 = vmatpush.msra.mxu1 %v18702_v9  ;;  %v18758_v57 = vand.u32 4294901760, %v18706_v44  ;;  %v18760_v28 = vsub.f32 %v10297_v58, %v10297_v58  ;;  %v22940_v38 = vld [vmem:[#allocation196_spill] sm:$0xff]  ;;  %v22944_v9 = vld [vmem:[#allocation89_spill] sm:$0xff] }
 0x4ef   : > { %22933 = vst [vmem:[#allocation16_spill] sm:$0xff] %v18733_v47  ;;  %10425 = vmatpush.msk.msra.mxu3 %vm18496_vm3, %v21026_v14  ;;  %vm18764_vm2 = vcmp.eq.s32.totalorder %v22940_v38, %v18624_v43  ;;  %v22941_v51 = vmov 0  ;;  %v1166_v26 = vadd.f32 %v22943_v20, %v1125_v6  ;;  %v2290_v8 = vadd.f32 %v22944_v9, %v2189_v37  ;;  %v22947_v9 = vld [vmem:[#allocation66_spill] sm:$0xff] }
 0x4f0   : > { %22938 = vst [vmem:[#allocation258_spill] sm:$0xff] %v18755_v33  ;;  %v22942_v51 = vsel %vm18764_vm2, 4294967295, %v22941_v51  ;;  %10413 = vmatpush.msk.msra.mxu0 %vm18583_vm0, %v21026_v14  ;;  %7902 = vmatpush.msra.mxu2 %v18621_v53  ;;  %v7832_v52 = vsub.f32 %v18665_v62, %v18720_v48  ;;  %v10295_v38 = vsel %vm18737_vm12, 1.0, %v22604_v25  ;;  %v18783_v6 = vand.u32 4294901760, %v7820_v15  ;;  %v22948_v53 = vld [vmem:[#allocation39_spill] sm:$0xff] }
 0x4f1   : > { %22939 = vst [vmem:[#allocation17_spill] sm:$0xff] %v18760_v28  ;;  %7810 = vmatpush.msra.mxu1 %v18729_v41  ;;  %10426 = vmatpush.msk.msra.mxu3 %vm18516_vm13, %v21026_v14  ;;  %v18786_v37 = vand.u32 4294901760, %v18733_v47  ;;  %v18788_v20 = vsub.f32 %v10296_v3, %v10296_v3  ;;  %v1267_v58 = vadd.f32 %v22947_v9, %v1166_v26  ;;  %v18796_v41 = vand.u32 4294901760, %v7826_v63  ;;  %v22950_v26 = vld [vmem:[#allocation202_spill] sm:$0xff]  ;;  %v22954_v9 = vld [vmem:[#allocation37_spill] sm:$0xff] }
 0x4f2   : > { %22945 = vst [vmem:[#allocation260_spill] sm:$0xff] %v18783_v6  ;;  %v2344_v0 = vadd.f32 %v22948_v53, %v2290_v8  ;;  %10414 = vmatpush.msk.msra.mxu0 %vm18628_vm15, %v21026_v14  ;;  %7905 = vmatpush.msra.mxu2 %v18641_v45  ;;  %v10294_v15 = vsel %vm18764_vm2, 1.0, %v22604_v25  ;;  %v7838_v8 = vsub.f32 %v18706_v44, %v18758_v57  ;;  %v22951_v53 = vmov 0 }
 0x4f3   : > { %22946 = vst [vmem:[#allocation18_spill] sm:$0xff] %v18788_v20  ;;  %7816 = vmatpush.msra.mxu1 %v18755_v33  ;;  %10427 = vmatpush.msk.msra.mxu3 %vm18544_vm9, %v21026_v14  ;;  %vm18809_vm4 = vcmp.eq.s32.totalorder %v22950_v26, %v18624_v43  ;;  %v18814_v63 = vand.u32 4294901760, %v18760_v28  ;;  %v18816_v3 = vsub.f32 %v10295_v38, %v10295_v38  ;;  %v18823_v33 = vand.u32 4294901760, %v7832_v52 }
 0x4f4   : > { %22949 = vst [vmem:[#allocation263_spill] sm:$0xff] %v18796_v41  ;;  %v22952_v53 = vsel %vm18809_vm4, 4294967295, %v22951_v53  ;;  %v2383_v45 = vadd.f32 %v22954_v9, %v2344_v0  ;;  %10415 = vmatpush.msk.msra.mxu0 %vm18658_vm11, %v21026_v14  ;;  %7908 = vmatpush.msra.mxu2 %v18665_v62  ;;  %v7844_v43 = vsub.f32 %v18733_v47, %v18786_v37  ;;  %v18833_v38 = vand.u32 4294901760, %v18788_v20  ;;  %v22957_v9 = vld [vmem:[#allocation84_spill] sm:$0xff] }
 0x4f5   : > { %22953 = vst [vmem:[#allocation19_spill] sm:$0xff] %v18816_v3  ;;  %7822 = vmatpush.msra.mxu1 %v18783_v6  ;;  %10428 = vmatpush.msk.msra.mxu3 %vm18559_vm10, %v21026_v14  ;;  %v6753_v0 = vadd.f32 %v6752_v7, %v18579_v23  ;;  %v18835_v26 = vsub.f32 %v10294_v15, %v10294_v15  ;;  %v10293_v62 = vsel %vm18809_vm4, 1.0, %v22604_v25  ;;  %v18849_v7 = vand.u32 4294901760, %v7838_v8  ;;  %v22959_v15 = vld [vmem:[#allocation44_spill] sm:$0xff] }
 0x4f6   : > { %22955 = vst [vmem:[#allocation264_spill] sm:$0xff] %v18823_v33  ;;  %v1321_v52 = vadd.f32 %v22957_v9, %v1267_v58  ;;  %10416 = vmatpush.msk.msra.mxu0 %vm18683_vm5, %v21026_v14  ;;  %7911 = vmatpush.msra.mxu2 %v18706_v44  ;;  %v7850_v23 = vsub.f32 %v18760_v28, %v18814_v63  ;;  %v18854_v58 = vand.u32 4294901760, %v18816_v3  ;;  %v18865_v25 = vand.u32 4294901760, %v7844_v43 }
 0x4f7   : > { %22956 = vst [vmem:[#allocation20_spill] sm:$0xff] %v18835_v26  ;;  %7828 = vmatpush.msra.mxu1 %v18796_v41  ;;  %10429 = vmatpush.msk.msra.mxu3 %vm18583_vm0, %v21026_v14  ;;  %v2452_v9 = vadd.f32 %v22959_v15, %v2383_v45  ;;  %v7856_v8 = vsub.f32 %v18788_v20, %v18833_v38  ;;  %v18872_v45 = vand.u32 4294901760, %v18835_v26  ;;  %v22962_v15 = vld [vmem:[#allocation93_spill] sm:$0xff] }
 0x4f8   : > { %22958 = vst [vmem:[#allocation265_spill] sm:$0xff] %v18849_v7  ;;  %10417 = vmatpush.msk.msra.mxu0 %vm18710_vm1, %v21026_v14  ;;  %7914 = vmatpush.msra.mxu2 %v18733_v47  ;;  %v18869_v44 = vsub.f32 %v10293_v62, %v10293_v62  ;;  %v1360_v41 = vadd.f32 %v22962_v15, %v1321_v52  ;;  %v18883_v62 = vand.u32 4294901760, %v7850_v23  ;;  %v22964_v52 = vld [vmem:[#allocation104_spill] sm:$0xff] }
 0x4f9   : > { %7834 = vmatpush.msra.mxu1 %v18823_v33  ;;  %10430 = vmatpush.msk.msra.mxu3 %vm18628_vm15, %v21026_v14  ;;  %22960 = vst [vmem:[#allocation21_spill] sm:$0xff] %v18865_v25  ;;  %v7862_v43 = vsub.f32 %v18816_v3, %v18854_v58  ;;  %v18897_v23 = vand.u32 4294901760, %v7856_v8  ;;  %v6791_v33 = vpop.f32.mrf.mxu1 }
 0x4fa   : > { %22961 = vst [vmem:[#allocation22_spill] sm:$0xff] %v18869_v44  ;;  %10418 = vmatpush.msk.msra.mxu0 %vm18737_vm12, %v21026_v14  ;;  %7917 = vmatpush.msra.mxu2 %v18760_v28  ;;  %v1429_v15 = vadd.f32 %v22964_v52, %v1360_v41  ;;  %v22965_v28 = vld [vmem:[#allocation41_spill] sm:$0xff]  ;;  %v18902_v41 = vand.u32 4294901760, %v18869_v44  ;;  %v10679_v52 = vld [vmem:[%s11037_s19] ss:$0 sm:$0xff]  ;;  %v6792_v6 = vadd.f32 %v6791_v33, %v6753_v0  ;;  %v6897_v0 = vpop.f32.mrf.mxu3 }
 0x4fb   : > { %7840 = vmatpush.msra.mxu1 %v18849_v7  ;;  %10431 = vmatpush.msk.msra.mxu3 %vm18658_vm11, %v21026_v14  ;;  %22963 = vst [vmem:[#allocation23_spill] sm:$0xff] %v18883_v62  ;;  %v2489_v47 = vadd.f32 %v22965_v28, %v2452_v9  ;;  %v7868_v7 = vsub.f32 %v18835_v26, %v18872_v45  ;;  %v22967_v28 = vld [vmem:[#allocation98_spill] sm:$0xff]  ;;  %v18913_v8 = vand.u32 4294901760, %v7862_v43 }
 0x4fc   : > { %10419 = vmatpush.msk.msra.mxu0 %vm18764_vm2, %v21026_v14  ;;  %7920 = vmatpush.msra.mxu2 %v18788_v20  ;;  %22966 = vst [vmem:[#allocation24_spill] sm:$0xff] %v18897_v23  ;;  %v1466_v9 = vadd.f32 %v22967_v28, %v1429_v15  ;;  %v10680_v20 = vld [vmem:[%s11037_s19 + $0x4] ss:$0 sm:$0xff]  ;;  %v10683_v28 = vld [vmem:[%s11037_s19 + $0x2] ss:$0 sm:$0xff]  ;;  %v7874_v43 = vsub.f32 %v18869_v44, %v18902_v41 }
 0x4fd   : > { %7846 = vmatpush.msra.mxu1 %v18865_v25  ;;  %10432 = vmatpush.msk.msra.mxu3 %vm18683_vm5, %v21026_v14  ;;  %v22968_v25 = vld [vmem:[#allocation214_spill] sm:$0xff]  ;;  %v2497_v31 = vmul.f32 %v10680_v20, %v2489_v47  ;;  %v2500_v15 = vmul.f32 %v10679_v52, %v2489_v47  ;;  %v6903_v54 = vmul.f32 %v10683_v28, %v22969_v46 }
 0x4fe   : > { %10420 = vmatpush.msk.msra.mxu0 %vm18809_vm4, %v21026_v14  ;;  %7923 = vmatpush.msra.mxu2 %v18816_v3  ;;  %v6860_v3 = vpop.f32.mrf.mxu2  ;;  %v2495_v47 = vmul.f32 %v10679_v52, %v1466_v9  ;;  %v22974_v52 = vld [vmem:[#allocation50_spill] sm:$0xff] }
 0x4ff   : > { %7777 = vmatmul.f32.vlgmr.msra.gmra.mxu0 %v22968_v25  ;;  %7852 = vmatpush.msra.mxu1 %v18883_v62  ;;  %v18922_v25 = vand.u32 4294901760, %v7868_v7  ;;  %v10684_v62 = vld [vmem:[%s11037_s19 + $0x6] ss:$0 sm:$0xff]  ;;  %v6861_v33 = vadd.f32 %v6860_v3, %v6792_v6  ;;  %v18940_v6 = vand.u32 4294901760, %v7874_v43  ;;  %v22971_v3 = vld [vmem:[#allocation141_spill] sm:$0xff] }
 0x500   : > { %10433 = vmatpush.msk.msra.mxu3 %vm18710_vm1, %v21026_v14  ;;  %7978 = vmatpush.msrb.mxu0 %v18501_v27  ;;  %v2501_v27 = vmul.f32 %v10680_v20, %v1466_v9  ;;  %v6909_v20 = vmul.f32 %v10684_v62, %v22969_v46  ;;  %v22973_v9 = vld [vmem:[#allocation72_spill] sm:$0xff]  ;;  %v22976_v43 = vld [vmem:[#allocation207_spill] sm:$0xff] }
 0x501   : > { %7858 = vmatpush.msra.mxu1 %v18897_v23  ;;  %7926 = vmatpush.msra.mxu2 %v18835_v26  ;;  %v6898_v7 = vadd.f32 %v6897_v0, %v6861_v33  ;;  %v2498_v26 = vsub.f32 %v2495_v47, %v2497_v31  ;;  %v22977_v33 = vld [vmem:[#allocation43_spill] sm:$0xff]  ;;  %v22980_v47 = vld [vmem:[#allocation57_spill] sm:$0xff] }
 0x502   : > { %10434 = vmatpush.msk.msra.mxu3 %vm18737_vm12, %v21026_v14  ;;  %7982 = vmatpush.msrb.mxu0 %v18538_v55  ;;  %v2502_v23 = vadd.f32 %v2501_v27, %v2500_v15  ;;  %v22970_v55 = vld [vmem:[#allocation203_spill] sm:$0xff]  ;;  %vm22972_vm12 = vnez %v22971_v3  ;;  %v22975_v15 = vsub.f32 %v22973_v9, %v22974_v52  ;;  %v22994_v9 = vld [vmem:[#allocation157_spill] sm:$0xff] }
 0x503   : > { %7864 = vmatpush.msra.mxu1 %v18913_v8  ;;  %7929 = vmatpush.msra.mxu2 %v18869_v44  ;;  %v6905_v31 = vmul.f32 %v10684_v62, %v6898_v7  ;;  %v6908_v27 = vmul.f32 %v10683_v28, %v6898_v7  ;;  %v22978_v0 = vld [vmem:[#allocation51_spill] sm:$0xff]  ;;  %v22981_v62 = vld [vmem:[#allocation197_spill] sm:$0xff]  ;;  %v22985_v7 = vld [vmem:[#allocation154_spill] sm:$0xff] }
 0x504   : > { %10435 = vmatpush.msk.msra.mxu3 %vm18764_vm2, %v21026_v14  ;;  %7986 = vmatpush.msrb.mxu0 %v18555_v21  ;;  %v4707_v46 = vadd.f32 %v22977_v33, %v2502_v23  ;;  %vm22979_vm2 = vnez %v22978_v0  ;;  %v22996_v52 = vld [vmem:[#allocation123_spill] sm:$0xff]  ;;  %v23003_v33 = vld [vmem:[#allocation102_spill] sm:$0xff] }
 0x505   : > { %7932 = vmatmul.f32.vlgmr.msra.gmra.mxu2 %v22970_v55  ;;  %7870 = vmatpush.msra.mxu1 %v18922_v25  ;;  %v4703_v55 = vadd.f32 %v22975_v15, %v2498_v26  ;;  %v6906_v44 = vsub.f32 %v6903_v54, %v6905_v31  ;;  %v6910_v21 = vadd.f32 %v6909_v20, %v6908_v27  ;;  %v22982_v26 = vld [vmem:[#allocation146_spill] sm:$0xff]  ;;  %v22990_v20 = vld [vmem:[#allocation99_spill] sm:$0xff]  ;;  %v22993_v27 = vld [vmem:[#allocation112_spill] sm:$0xff] }
 0x506   : > { %10453 = vmatpush.msk.msrb.mxu2 %vm22972_vm12, %v21026_v14  ;;  %10436 = vmatpush.msk.msra.mxu3 %vm18809_vm4, %v21026_v14  ;;  %vm22983_vm4 = vnez %v22982_v26  ;;  %v22984_v54 = vld [vmem:[#allocation138_spill] sm:$0xff]  ;;  %v22997_v15 = vld [vmem:[#allocation107_spill] sm:$0xff] }
 0x507   : > { %7990 = vmatpush.msrb.mxu0 %v18597_v13  ;;  %7971 = vmatmul.f32.vlgmr.msra.gmra.mxu3 %v22976_v43  ;;  %v18965_v28 = vadd.f32 %v6906_v44, %v4703_v55  ;;  %v18967_v23 = vadd.f32 %v6910_v21, %v4707_v46  ;;  %v22987_v44 = vld [vmem:[#allocation91_spill] sm:$0xff]  ;;  %v22988_v21 = vld [vmem:[#allocation132_spill] sm:$0xff]  ;;  %v22991_v31 = vld [vmem:[#allocation150_spill] sm:$0xff] }
 0x508   : > { %10454 = vmatpush.msk.msrb.mxu2 %vm22979_vm2, %v21026_v14  ;;  %8127 = vmatpush.msrb.mxu3 %v22980_v47  ;;  %vm22986_vm2 = vnez %v22985_v7  ;;  %v22999_v55 = vld [vmem:[#allocation149_spill] sm:$0xff]  ;;  %v23001_v43 = vld [vmem:[#allocation122_spill] sm:$0xff]  ;;  %v23007_v47 = vld [vmem:[#allocation111_spill] sm:$0xff] }
 0x509   : > { %7876 = vmatpush.msra.mxu1 %v18940_v6  ;;  %7994 = vmatpush.msrb.mxu0 %v18619_v35  ;;  %v23005_v46 = vld [vmem:[#allocation153_spill] sm:$0xff]  ;;  %v23033_v3 = vld [vmem:[#allocation135_spill] sm:$0xff]  ;;  %v23039_v7 = vld [vmem:[#allocation96_spill] sm:$0xff] }
 0x50a   : > { %7878 = vmatmul.f32.vlgmr.msra.gmra.mxu1 %v22981_v62  ;;  %10455 = vmatpush.msk.msrb.mxu2 %vm22983_vm4, %v21026_v14  ;;  %vm22989_vm4 = vnez %v22988_v21  ;;  %v23041_v21 = vld [vmem:[#allocation113_spill] sm:$0xff] }
 0x50b   : > { %10437 = vmatpush.msk.msrb.mxu1 %vm18412_vm8, %v21026_v14  ;;  %8133 = vmatpush.msrb.mxu3 %v22984_v54  ;;  %vm22992_vm8 = vnez %v22991_v31  ;;  %v23009_v54 = vld [vmem:[#allocation205_spill] sm:$0xff] }
 0x50c   : > { %7998 = vmatpush.msrb.mxu0 %v18654_v40  ;;  %10456 = vmatpush.msk.msrb.mxu2 %vm22986_vm2, %v21026_v14  ;;  %v23043_v31 = vld [vmem:[#allocation117_spill] sm:$0xff] }
 0x50d   : > { %10438 = vmatpush.msk.msrb.mxu1 %vm18439_vm14, %v21026_v14  ;;  %8139 = vmatpush.msrb.mxu3 %v22987_v44  ;;  %vm22995_vm14 = vnez %v22994_v9  ;;  %v23011_v44 = vld [vmem:[#allocation177_spill] sm:$0xff]  ;;  %v23045_v9 = vld [vmem:[#allocation95_spill] sm:$0xff] }
 0x50e   : > { %8002 = vmatpush.msrb.mxu0 %v18679_v19  ;;  %10457 = vmatpush.msk.msrb.mxu2 %vm22989_vm4, %v21026_v14 }
 0x50f   : > { %10439 = vmatpush.msk.msrb.mxu1 %vm18449_vm6, %v21026_v14  ;;  %8145 = vmatpush.msrb.mxu3 %v22990_v20  ;;  %vm22998_vm6 = vnez %v22997_v15  ;;  %v23012_v20 = vld [vmem:[#allocation58_spill] sm:$0xff]  ;;  %v23047_v15 = vld [vmem:[#allocation159_spill] sm:$0xff] }
 0x510   : > { %8006 = vmatpush.msrb.mxu0 %v18693_v60  ;;  %10458 = vmatpush.msk.msrb.mxu2 %vm22992_vm8, %v21026_v14 }
 0x511   : > { %10440 = vmatpush.msk.msrb.mxu1 %vm18475_vm7, %v21026_v14  ;;  %8151 = vmatpush.msrb.mxu3 %v22993_v27  ;;  %vm23000_vm7 = vnez %v22648_v18  ;;  %v23014_v27 = vld [vmem:[#allocation220_spill] sm:$0xff] }
 0x512   : > { %8010 = vmatpush.msrb.mxu0 %v18720_v48  ;;  %10459 = vmatpush.msk.msrb.mxu2 %vm22995_vm14, %v21026_v14  ;;  %v23049_v18 = vld [vmem:[#allocation140_spill] sm:$0xff] }
 0x513   : > { %10441 = vmatpush.msk.msrb.mxu1 %vm18496_vm3, %v21026_v14  ;;  %8157 = vmatpush.msrb.mxu3 %v22996_v52  ;;  %vm23002_vm3 = vnez %v22653_v59  ;;  %v23015_v52 = vld [vmem:[#allocation62_spill] sm:$0xff]  ;;  %v23050_v59 = vld [vmem:[#allocation139_spill] sm:$0xff] }
 0x514   : > { %8014 = vmatpush.msrb.mxu0 %v18758_v57  ;;  %10460 = vmatpush.msk.msrb.mxu2 %vm22998_vm6, %v21026_v14 }
 0x515   : > { %10442 = vmatpush.msk.msrb.mxu1 %vm18516_vm13, %v21026_v14  ;;  %8163 = vmatpush.msrb.mxu3 %v22999_v55  ;;  %vm23004_vm13 = vnez %v22661_v34  ;;  %v23018_v55 = vld [vmem:[#allocation131_spill] sm:$0xff]  ;;  %v23052_v34 = vld [vmem:[#allocation90_spill] sm:$0xff] }
 0x516   : > { %8018 = vmatpush.msrb.mxu0 %v18786_v37  ;;  %10461 = vmatpush.msk.msrb.mxu2 %vm23000_vm7, %v21026_v14 }
 0x517   : > { %10443 = vmatpush.msk.msrb.mxu1 %vm18544_vm9, %v21026_v14  ;;  %8169 = vmatpush.msrb.mxu3 %v23001_v43  ;;  %vm23006_vm9 = vnez %v22826_v36  ;;  %v23019_v43 = vld [vmem:[#allocation145_spill] sm:$0xff]  ;;  %v23056_v36 = vld [vmem:[#allocation190_spill] sm:$0xff] }
 0x518   : > { %8022 = vmatpush.msrb.mxu0 %v18814_v63  ;;  %10462 = vmatpush.msk.msrb.mxu2 %vm23002_vm3, %v21026_v14 }
 0x519   : > { %10444 = vmatpush.msk.msrb.mxu1 %vm18559_vm10, %v21026_v14  ;;  %8175 = vmatpush.msrb.mxu3 %v23003_v33  ;;  %vm23008_vm10 = vnez %v22675_v24  ;;  %v23020_v33 = vld [vmem:[#allocation81_spill] sm:$0xff]  ;;  %v23057_v24 = vld [vmem:[#allocation204_spill] sm:$0xff] }
 0x51a   : > { %8026 = vmatpush.msrb.mxu0 %v18833_v38  ;;  %10463 = vmatpush.msk.msrb.mxu2 %vm23004_vm13, %v21026_v14 }
 0x51b   : > { %10445 = vmatpush.msk.msrb.mxu1 %vm18583_vm0, %v21026_v14  ;;  %8181 = vmatpush.msrb.mxu3 %v23005_v46  ;;  %vm23010_vm0 = vnez %v22681_v1  ;;  %v23022_v46 = vld [vmem:[#allocation80_spill] sm:$0xff]  ;;  %v23061_v1 = vld [vmem:[#allocation127_spill] sm:$0xff] }
 0x51c   : > { %8030 = vmatpush.msrb.mxu0 %v18854_v58  ;;  %10464 = vmatpush.msk.msrb.mxu2 %vm23006_vm9, %v21026_v14 }
 0x51d   : > { %10446 = vmatpush.msk.msrb.mxu1 %vm18628_vm15, %v21026_v14  ;;  %8187 = vmatpush.msrb.mxu3 %v23007_v47  ;;  %vm23016_vm15 = vnez %v22936_v4  ;;  %v23023_v47 = vld [vmem:[#allocation156_spill] sm:$0xff] }
 0x51e   : > { %8034 = vmatpush.msrb.mxu0 %v18872_v45  ;;  %10465 = vmatpush.msk.msrb.mxu2 %vm23008_vm10, %v21026_v14 }
 0x51f   : > { %10447 = vmatpush.msk.msrb.mxu1 %vm18658_vm11, %v21026_v14  ;;  %8193 = vmatpush.msrb.mxu3 %v23009_v54  ;;  %vm23013_vm11 = vnez %v22685_v50  ;;  %v23024_v54 = vld [vmem:[#allocation128_spill] sm:$0xff]  ;;  %v23064_v50 = vld [vmem:[#allocation191_spill] sm:$0xff] }
 0x520   : > { %8038 = vmatpush.msrb.mxu0 %v18902_v41  ;;  %10466 = vmatpush.msk.msrb.mxu2 %vm23010_vm0, %v21026_v14 }
 0x521   : > { %8040 = vmatmul.f32.vlgmr.msrb.gmra.mxu0 %v22981_v62  ;;  %10448 = vmatpush.msk.msrb.mxu1 %vm18683_vm5, %v21026_v14  ;;  %vm23017_vm5 = vnez %v22841_v10  ;;  %v23070_v10 = vld [vmem:[#allocation210_spill] sm:$0xff] }
 0x522   : > { %8199 = vmatpush.msrb.mxu3 %v23011_v44  ;;  %8225 = vmatpush.msra.mxu0 %v23012_v20  ;;  %v23026_v44 = vld [vmem:[#allocation116_spill] sm:$0xff]  ;;  %v23027_v20 = vld [vmem:[#allocation183_spill] sm:$0xff] }
 0x523   : > { %10449 = vmatpush.msk.msrb.mxu1 %vm18710_vm1, %v21026_v14  ;;  %10467 = vmatpush.msk.msrb.mxu2 %vm23013_vm11, %v21026_v14  ;;  %vm23021_vm1 = vnez %v22942_v51 }
 0x524   : > { %8205 = vmatpush.msrb.mxu3 %v23014_v27  ;;  %8228 = vmatpush.msra.mxu0 %v23015_v52  ;;  %v23029_v27 = vld [vmem:[#allocation124_spill] sm:$0xff]  ;;  %v23030_v52 = vld [vmem:[#allocation137_spill] sm:$0xff] }
 0x525   : > { %10450 = vmatpush.msk.msrb.mxu1 %vm23016_vm15, %v21026_v14  ;;  %10468 = vmatpush.msk.msrb.mxu2 %vm23017_vm5, %v21026_v14  ;;  %vm23025_vm15 = vnez %v22952_v53 }
 0x526   : > { %8211 = vmatpush.msrb.mxu3 %v23018_v55  ;;  %8231 = vmatpush.msra.mxu0 %v23019_v43  ;;  %v23034_v55 = vld [vmem:[#allocation64_spill] sm:$0xff] }
 0x527   : > { %8319 = vmatpush.msra.mxu2 %v23020_v33  ;;  %10451 = vmatpush.msk.msrb.mxu1 %vm23021_vm1, %v21026_v14  ;;  %vm23028_vm1 = vnez %v22978_v0  ;;  %v23035_v0 = vld [vmem:[#allocation73_spill] sm:$0xff]  ;;  %v23036_v43 = vld [vmem:[#allocation216_spill] sm:$0xff] }
 0x528   : > { %8217 = vmatpush.msrb.mxu3 %v23022_v46  ;;  %8234 = vmatpush.msra.mxu0 %v23023_v47  ;;  %v23038_v33 = vld [vmem:[#allocation92_spill] sm:$0xff]  ;;  %v23040_v46 = vld [vmem:[#allocation115_spill] sm:$0xff]  ;;  %v23042_v47 = vld [vmem:[#allocation129_spill] sm:$0xff] }
 0x529   : > { %8323 = vmatpush.msra.mxu2 %v23024_v54  ;;  %10452 = vmatpush.msk.msrb.mxu1 %vm23025_vm15, %v21026_v14  ;;  %vm23031_vm15 = vnez %v22982_v26  ;;  %v23037_v26 = vld [vmem:[#allocation77_spill] sm:$0xff]  ;;  %v23044_v54 = vld [vmem:[#allocation87_spill] sm:$0xff] }
 0x52a   : > { %10485 = vmatpush.msk.msra.mxu3 %vm22972_vm12, %v21026_v14  ;;  %8237 = vmatpush.msra.mxu0 %v23026_v44  ;;  %v23046_v44 = vld [vmem:[#allocation200_spill] sm:$0xff] }
 0x52b   : > { %8077 = vmatmul.f32.vlgmr.msrb.gmra.mxu1 %v22981_v62  ;;  %8327 = vmatpush.msra.mxu2 %v23027_v20  ;;  %v23032_v62 = vld [vmem:[#allocation54_spill] sm:$0xff]  ;;  %v23048_v20 = vld [vmem:[#allocation109_spill] sm:$0xff] }
 0x52c   : > { %10469 = vmatpush.msk.msra.mxu1 %vm22972_vm12, %v21026_v14  ;;  %10486 = vmatpush.msk.msra.mxu3 %vm23028_vm1, %v21026_v14 }
 0x52d   : > { %8240 = vmatpush.msra.mxu0 %v23029_v27  ;;  %8331 = vmatpush.msra.mxu2 %v23030_v52  ;;  %v23059_v27 = vld [vmem:[#allocation26_spill] sm:$0xff]  ;;  %v23060_v52 = vld [vmem:[#allocation195_spill] sm:$0xff] }
 0x52e   : > { %10470 = vmatpush.msk.msra.mxu1 %vm23028_vm1, %v21026_v14  ;;  %10487 = vmatpush.msk.msra.mxu3 %vm23031_vm15, %v21026_v14 }
 0x52f   : > { %8243 = vmatpush.msra.mxu0 %v23032_v62  ;;  %8335 = vmatpush.msra.mxu2 %v23033_v3  ;;  %v23063_v62 = vld [vmem:[#allocation155_spill] sm:$0xff] }
 0x530   : > { %10471 = vmatpush.msk.msra.mxu1 %vm23031_vm15, %v21026_v14  ;;  %10488 = vmatpush.msk.msra.mxu3 %vm22986_vm2, %v21026_v14  ;;  %vm23051_vm15 = vnez %v23050_v59  ;;  %v23066_v3 = vld [vmem:[#allocation179_spill] sm:$0xff]  ;;  %v23139_v59 = vld [vmem:[#allocation254_spill] sm:$0xff] }
 0x531   : > { %8246 = vmatpush.msra.mxu0 %v23034_v55  ;;  %8339 = vmatpush.msra.mxu2 %v23035_v0  ;;  %v23067_v55 = vld [vmem:[#allocation225_spill] sm:$0xff] }
 0x532   : > { %10472 = vmatpush.msk.msra.mxu1 %vm22986_vm2, %v21026_v14  ;;  %10489 = vmatpush.msk.msra.mxu3 %vm22989_vm4, %v21026_v14  ;;  %v23068_v0 = vld [vmem:[#allocation201_spill] sm:$0xff] }
 0x533   : > { %8249 = vmatpush.msra.mxu0 %v23036_v43  ;;  %8343 = vmatpush.msra.mxu2 %v23037_v26  ;;  %v23071_v43 = vld [vmem:[#allocation213_spill] sm:$0xff]  ;;  %v23072_v26 = vld [vmem:[#allocation218_spill] sm:$0xff] }
 0x534   : > { %10473 = vmatpush.msk.msra.mxu1 %vm22989_vm4, %v21026_v14  ;;  %10490 = vmatpush.msk.msra.mxu3 %vm22992_vm8, %v21026_v14 }
 0x535   : > { %8252 = vmatpush.msra.mxu0 %v23038_v33  ;;  %8347 = vmatpush.msra.mxu2 %v23039_v7  ;;  %v23074_v33 = vld [vmem:[#allocation27_spill] sm:$0xff] }
 0x536   : > { %10474 = vmatpush.msk.msra.mxu1 %vm22992_vm8, %v21026_v14  ;;  %10491 = vmatpush.msk.msra.mxu3 %vm22995_vm14, %v21026_v14  ;;  %v23075_v7 = vld [vmem:[#allocation215_spill] sm:$0xff] }
 0x537   : > { %8255 = vmatpush.msra.mxu0 %v23040_v46  ;;  %8351 = vmatpush.msra.mxu2 %v23041_v21  ;;  %v23076_v46 = vld [vmem:[#allocation192_spill] sm:$0xff]  ;;  %v23077_v21 = vld [vmem:[#allocation103_spill] sm:$0xff] }
 0x538   : > { %10475 = vmatpush.msk.msra.mxu1 %vm22995_vm14, %v21026_v14  ;;  %10492 = vmatpush.msk.msra.mxu3 %vm22998_vm6, %v21026_v14  ;;  %vm23078_vm14 = vnez %v23077_v21  ;;  %v23160_v21 = vld [vmem:[#allocation21_spill] sm:$0xff] }
 0x539   : > { %8258 = vmatpush.msra.mxu0 %v23042_v47  ;;  %8355 = vmatpush.msra.mxu2 %v23043_v31  ;;  %v23079_v47 = vld [vmem:[#allocation45_spill] sm:$0xff]  ;;  %v23080_v31 = vld [vmem:[#allocation211_spill] sm:$0xff] }
 0x53a   : > { %10476 = vmatpush.msk.msra.mxu1 %vm22998_vm6, %v21026_v14  ;;  %10493 = vmatpush.msk.msra.mxu3 %vm23000_vm7, %v21026_v14 }
 0x53b   : > { %8261 = vmatpush.msra.mxu0 %v23044_v54  ;;  %8359 = vmatpush.msra.mxu2 %v23045_v9  ;;  %v23081_v54 = vld [vmem:[#allocation110_spill] sm:$0xff]  ;;  %v23082_v9 = vld [vmem:[#allocation173_spill] sm:$0xff] }
 0x53c   : > { %10477 = vmatpush.msk.msra.mxu1 %vm23000_vm7, %v21026_v14  ;;  %10494 = vmatpush.msk.msra.mxu3 %vm23002_vm3, %v21026_v14  ;;  %vm23083_vm1 = vnez %v23082_v9  ;;  %v23163_v9 = vld [vmem:[#allocation23_spill] sm:$0xff] }
 0x53d   : > { %8264 = vmatpush.msra.mxu0 %v23046_v44  ;;  %8363 = vmatpush.msra.mxu2 %v23047_v15  ;;  %v23084_v44 = vld [vmem:[#allocation188_spill] sm:$0xff] }
 0x53e   : > { %10478 = vmatpush.msk.msra.mxu1 %vm23002_vm3, %v21026_v14  ;;  %10495 = vmatpush.msk.msra.mxu3 %vm23004_vm13, %v21026_v14  ;;  %v23085_v15 = vld [vmem:[#allocation160_spill] sm:$0xff] }
 0x53f   : > { %8267 = vmatpush.msra.mxu0 %v23048_v20  ;;  %8367 = vmatpush.msra.mxu2 %v17851_v2  ;;  %v23055_v2 = vld [vmem:[#allocation28_spill] sm:$0xff]  ;;  %v23086_v20 = vld [vmem:[#allocation223_spill] sm:$0xff] }
 0x540   : > { %10479 = vmatpush.msk.msra.mxu1 %vm23004_vm13, %v21026_v14  ;;  %10496 = vmatpush.msk.msra.mxu3 %vm23006_vm9, %v21026_v14  ;;  %vm23062_vm13 = vnez %v23061_v1  ;;  %v23148_v1 = vld [vmem:[#allocation260_spill] sm:$0xff] }
 0x541   : > { %8270 = vmatpush.msra.mxu0 %v23049_v18  ;;  %8371 = vmatpush.msra.mxu2 %v17873_v11  ;;  %v23053_v11 = vld [vmem:[#allocation165_spill] sm:$0xff]  ;;  %v23088_v18 = vld [vmem:[#allocation194_spill] sm:$0xff] }
 0x542   : > { %10480 = vmatpush.msk.msra.mxu1 %vm23006_vm9, %v21026_v14  ;;  %10497 = vmatpush.msk.msra.mxu3 %vm23008_vm10, %v21026_v14  ;;  %vm23054_vm4 = vnez %v23053_v11  ;;  %vm23069_vm9 = vnez %v23068_v0  ;;  %v23142_v11 = vld [vmem:[#allocation256_spill] sm:$0xff] }
 0x543   : > { %10501 = vmatpush.msk.msrb.mxu0 %vm23051_vm15, %v21026_v14  ;;  %8375 = vmatpush.msra.mxu2 %v23052_v34  ;;  %v23089_v34 = vld [vmem:[#allocation234_spill] sm:$0xff]  ;;  %v23154_v0 = vld [vmem:[#allocation264_spill] sm:$0xff] }
 0x544   : > { %10481 = vmatpush.msk.msra.mxu1 %vm23008_vm10, %v21026_v14  ;;  %10498 = vmatpush.msk.msra.mxu3 %vm23010_vm0, %v21026_v14  ;;  %vm23058_vm10 = vnez %v23057_v24  ;;  %v23145_v24 = vld [vmem:[#allocation258_spill] sm:$0xff] }
 0x545   : > { %10502 = vmatpush.msk.msrb.mxu0 %vm23054_vm4, %v21026_v14  ;;  %8118 = vmatmul.f32.vlgmr.msrb.gmra.mxu2 %v23055_v2  ;;  %v23090_v2 = vld [vmem:[#allocation208_spill] sm:$0xff] }
 0x546   : > { %10482 = vmatpush.msk.msra.mxu1 %vm23010_vm0, %v21026_v14  ;;  %8379 = vmatpush.msra.mxu2 %v23056_v36  ;;  %vm23073_vm0 = vnez %v23072_v26  ;;  %vm23091_vm12 = vnez %v23090_v2  ;;  %v23092_v36 = vld [vmem:[#allocation219_spill] sm:$0xff]  ;;  %v23157_v26 = vld [vmem:[#allocation265_spill] sm:$0xff]  ;;  %v23170_v2 = vld [vmem:[#allocation186_spill] sm:$0xff] }
 0x547   : > { %10499 = vmatpush.msk.msra.mxu3 %vm23013_vm11, %v21026_v14  ;;  %10503 = vmatpush.msk.msrb.mxu0 %vm23058_vm10, %v21026_v14 }
 0x548   : > { %8219 = vmatmul.f32.vlgmr.msrb.gmra.mxu3 %v23059_v27  ;;  %8566 = vmatpush.msrb.mxu2 %v23060_v52  ;;  %v23094_v52 = vld [vmem:[#allocation221_spill] sm:$0xff] }
 0x549   : > { %10483 = vmatpush.msk.msra.mxu1 %vm23013_vm11, %v21026_v14  ;;  %10500 = vmatpush.msk.msra.mxu3 %vm23017_vm5, %v21026_v14  ;;  %vm23065_vm11 = vnez %v23064_v50  ;;  %vm23095_vm6 = vnez %v23094_v52  ;;  %v23151_v50 = vld [vmem:[#allocation263_spill] sm:$0xff]  ;;  %v23172_v52 = vld [vmem:[#allocation237_spill] sm:$0xff] }
 0x54a   : > { %10504 = vmatpush.msk.msrb.mxu0 %vm23062_vm13, %v21026_v14  ;;  %8569 = vmatpush.msrb.mxu2 %v23063_v62  ;;  %v23096_v62 = vld [vmem:[#allocation233_spill] sm:$0xff] }
 0x54b   : > { %10517 = vmatpush.msk.msrb.mxu3 %vm23051_vm15, %v21026_v14  ;;  %10484 = vmatpush.msk.msra.mxu1 %vm23017_vm5, %v21026_v14  ;;  %vm23087_vm5 = vnez %v23086_v20  ;;  %v23166_v20 = vld [vmem:[#allocation24_spill] sm:$0xff] }
 0x54c   : > { %10505 = vmatpush.msk.msrb.mxu0 %vm23065_vm11, %v21026_v14  ;;  %8572 = vmatpush.msrb.mxu2 %v23067_v55  ;;  %v23098_v55 = vld [vmem:[#allocation226_spill] sm:$0xff] }
 0x54d   : > { %8468 = vmatpush.msrb.mxu1 %v23066_v3  ;;  %10518 = vmatpush.msk.msrb.mxu3 %vm23054_vm4, %v21026_v14  ;;  %v23097_v3 = vld [vmem:[#allocation198_spill] sm:$0xff]  ;;  %vm23099_vm7 = vnez %v23098_v55 }
 0x54e   : > { %10506 = vmatpush.msk.msrb.mxu0 %vm23069_vm9, %v21026_v14  ;;  %8381 = vmatmul.f32.vlgmr.msra.gmra.mxu2 %v23059_v27 }
 0x54f   : > { %8474 = vmatpush.msrb.mxu1 %v23070_v10  ;;  %8575 = vmatpush.msrb.mxu2 %v23071_v43  ;;  %v23100_v10 = vld [vmem:[#allocation229_spill] sm:$0xff]  ;;  %v23101_v43 = vld [vmem:[#allocation251_spill] sm:$0xff] }
 0x550   : > { %10519 = vmatpush.msk.msrb.mxu3 %vm23058_vm10, %v21026_v14  ;;  %10507 = vmatpush.msk.msrb.mxu0 %vm23073_vm0, %v21026_v14 }
 0x551   : > { %8273 = vmatmul.f32.vlgmr.msra.gmra.mxu0 %v23074_v33  ;;  %8418 = vmatmul.f32.vlgmr.msra.gmra.mxu3 %v23059_v27  ;;  %v23093_v27 = vld [vmem:[#allocation163_spill] sm:$0xff]  ;;  %v23102_v33 = vld [vmem:[#allocation134_spill] sm:$0xff] }
 0x552   : > { %8480 = vmatpush.msrb.mxu1 %v23075_v7  ;;  %8578 = vmatpush.msrb.mxu2 %v23076_v46  ;;  %vm23103_vm3 = vnez %v23102_v33  ;;  %v23104_v7 = vld [vmem:[#allocation243_spill] sm:$0xff]  ;;  %v23176_v33 = vld [vmem:[#allocation238_spill] sm:$0xff] }
 0x553   : > { %10520 = vmatpush.msk.msrb.mxu3 %vm23062_vm13, %v21026_v14  ;;  %10508 = vmatpush.msk.msrb.mxu0 %vm23078_vm14, %v21026_v14  ;;  %v23105_v46 = vld [vmem:[#allocation199_spill] sm:$0xff] }
 0x554   : > { %8312 = vmatmul.f32.vlgmr.msra.gmra.mxu1 %v23079_v47  ;;  %8581 = vmatpush.msrb.mxu2 %v23080_v31  ;;  %v23106_v47 = vld [vmem:[#allocation235_spill] sm:$0xff] }
 0x555   : > { %8486 = vmatpush.msrb.mxu1 %v23081_v54  ;;  %10521 = vmatpush.msk.msrb.mxu3 %vm23065_vm11, %v21026_v14  ;;  %vm23107_vm8 = vnez %v23106_v47  ;;  %v23108_v31 = vld [vmem:[#allocation247_spill] sm:$0xff]  ;;  %v23109_v54 = vld [vmem:[#allocation209_spill] sm:$0xff] }
 0x556   : > { %10509 = vmatpush.msk.msrb.mxu0 %vm23083_vm1, %v21026_v14  ;;  %8584 = vmatpush.msrb.mxu2 %v23084_v44  ;;  %v23110_v44 = vld [vmem:[#allocation249_spill] sm:$0xff] }
 0x557   : > { %8492 = vmatpush.msrb.mxu1 %v23085_v15  ;;  %10522 = vmatpush.msk.msrb.mxu3 %vm23069_vm9, %v21026_v14  ;;  %vm23111_vm2 = vnez %v23110_v44  ;;  %v23112_v15 = vld [vmem:[#allocation175_spill] sm:$0xff]  ;;  %v23185_v44 = vld [vmem:[#allocation245_spill] sm:$0xff] }
 0x558   : > { %10510 = vmatpush.msk.msrb.mxu0 %vm23087_vm5, %v21026_v14  ;;  %8587 = vmatpush.msrb.mxu2 %v23088_v18  ;;  %v23113_v18 = vld [vmem:[#allocation30_spill] sm:$0xff] }
 0x559   : > { %8498 = vmatpush.msrb.mxu1 %v23089_v34  ;;  %10523 = vmatpush.msk.msrb.mxu3 %vm23073_vm0, %v21026_v14  ;;  %v23114_v34 = vld [vmem:[#allocation259_spill] sm:$0xff] }
 0x55a   : > { %10511 = vmatpush.msk.msrb.mxu0 %vm23091_vm12, %v21026_v14  ;;  %8590 = vmatpush.msrb.mxu2 %v23092_v36  ;;  %v23115_v36 = vld [vmem:[#allocation172_spill] sm:$0xff] }
 0x55b   : > { %8504 = vmatpush.msrb.mxu1 %v23093_v27  ;;  %10524 = vmatpush.msk.msrb.mxu3 %vm23078_vm14, %v21026_v14  ;;  %v23116_v27 = vld [vmem:[#allocation261_spill] sm:$0xff] }
 0x55c   : > { %10512 = vmatpush.msk.msrb.mxu0 %vm23095_vm6, %v21026_v14  ;;  %8593 = vmatpush.msrb.mxu2 %v23096_v62  ;;  %v23117_v62 = vld [vmem:[#allocation253_spill] sm:$0xff] }
 0x55d   : > { %8510 = vmatpush.msrb.mxu1 %v23097_v3  ;;  %10525 = vmatpush.msk.msrb.mxu3 %vm23083_vm1, %v21026_v14  ;;  %v23118_v3 = vld [vmem:[#allocation148_spill] sm:$0xff] }
 0x55e   : > { %10513 = vmatpush.msk.msrb.mxu0 %vm23099_vm7, %v21026_v14  ;;  %8596 = vmatpush.msrb.mxu2 %v23100_v10  ;;  %v23119_v10 = vld [vmem:[#allocation227_spill] sm:$0xff] }
 0x55f   : > { %8516 = vmatpush.msrb.mxu1 %v23101_v43  ;;  %10526 = vmatpush.msk.msrb.mxu3 %vm23087_vm5, %v21026_v14  ;;  %v23120_v43 = vld [vmem:[#allocation257_spill] sm:$0xff] }
 0x560   : > { %10514 = vmatpush.msk.msrb.mxu0 %vm23103_vm3, %v21026_v14  ;;  %8599 = vmatpush.msrb.mxu2 %v23104_v7  ;;  %v23121_v7 = vld [vmem:[#allocation184_spill] sm:$0xff] }
 0x561   : > { %8522 = vmatpush.msrb.mxu1 %v23105_v46  ;;  %10527 = vmatpush.msk.msrb.mxu3 %vm23091_vm12, %v21026_v14  ;;  %v23122_v46 = vld [vmem:[#allocation29_spill] sm:$0xff] }
 0x562   : > { %10515 = vmatpush.msk.msrb.mxu0 %vm23107_vm8, %v21026_v14  ;;  %8602 = vmatpush.msrb.mxu2 %v23108_v31  ;;  %v23123_v31 = vld [vmem:[#allocation262_spill] sm:$0xff] }
 0x563   : > { %8528 = vmatpush.msrb.mxu1 %v23109_v54  ;;  %10528 = vmatpush.msk.msrb.mxu3 %vm23095_vm6, %v21026_v14  ;;  %v23125_v54 = vld [vmem:[#allocation144_spill] sm:$0xff] }
 0x564   : > { %10516 = vmatpush.msk.msrb.mxu0 %vm23111_vm2, %v21026_v14  ;;  %8605 = vmatpush.msrb.mxu2 %v23112_v15  ;;  %v23126_v15 = vld [vmem:[#allocation47_spill] sm:$0xff] }
 0x565   : > { %8459 = vmatmul.f32.vlgmr.msrb.gmra.mxu0 %v23113_v18  ;;  %8534 = vmatpush.msrb.mxu1 %v23114_v34  ;;  %v23128_v18 = vld [vmem:[#allocation244_spill] sm:$0xff]  ;;  %v23129_v34 = vld [vmem:[#allocation230_spill] sm:$0xff] }
 0x566   : > { %10529 = vmatpush.msk.msrb.mxu3 %vm23099_vm7, %v21026_v14  ;;  %8660 = vmatpush.msra.mxu0 %v23115_v36  ;;  %vm23124_vm7 = vnez %v22859_v29  ;;  %v23130_v36 = vld [vmem:[#allocation181_spill] sm:$0xff] }
 0x567   : > { %8540 = vmatpush.msrb.mxu1 %v23116_v27  ;;  %8608 = vmatpush.msrb.mxu2 %v23117_v62  ;;  %v23131_v27 = vld [vmem:[#allocation46_spill] sm:$0xff] }
 0x568   : > { %10530 = vmatpush.msk.msrb.mxu3 %vm23103_vm3, %v21026_v14  ;;  %8664 = vmatpush.msra.mxu0 %v23118_v3  ;;  %v23133_v62 = vld [vmem:[#allocation250_spill] sm:$0xff]  ;;  %v23134_v3 = vld [vmem:[#allocation224_spill] sm:$0xff] }
 0x569   : > { %8546 = vmatpush.msrb.mxu1 %v23119_v10  ;;  %8611 = vmatpush.msrb.mxu2 %v23120_v43  ;;  %v23136_v10 = vld [vmem:[#allocation14_spill] sm:$0xff]  ;;  %v23137_v43 = vld [vmem:[#allocation228_spill] sm:$0xff] }
 0x56a   : > { %10531 = vmatpush.msk.msrb.mxu3 %vm23107_vm8, %v21026_v14  ;;  %8668 = vmatpush.msra.mxu0 %v23121_v7  ;;  %vm23127_vm8 = vnez %v22864_v39  ;;  %v23140_v7 = vld [vmem:[#allocation231_spill] sm:$0xff] }
 0x56b   : > { %8614 = vmatmul.f32.vlgmr.msrb.gmra.mxu2 %v23122_v46  ;;  %8552 = vmatpush.msrb.mxu1 %v23123_v31  ;;  %v23143_v46 = vld [vmem:[#allocation130_spill] sm:$0xff]  ;;  %v23146_v31 = vld [vmem:[#allocation212_spill] sm:$0xff] }
 0x56c   : > { %10549 = vmatpush.msk.msra.mxu2 %vm23124_vm7, %v21026_v14  ;;  %10532 = vmatpush.msk.msrb.mxu3 %vm23111_vm2, %v21026_v14  ;;  %vm23132_vm7 = vnez %v22869_v56 }
 0x56d   : > { %8672 = vmatpush.msra.mxu0 %v23125_v54  ;;  %8653 = vmatmul.f32.vlgmr.msrb.gmra.mxu3 %v23126_v15  ;;  %v23149_v54 = vld [vmem:[#allocation246_spill] sm:$0xff] }
 0x56e   : > { %10550 = vmatpush.msk.msra.mxu2 %vm23127_vm8, %v21026_v14  ;;  %8809 = vmatpush.msra.mxu3 %v23128_v18  ;;  %vm23135_vm8 = vnez %v22874_v42  ;;  %v23152_v15 = vld [vmem:[#allocation206_spill] sm:$0xff]  ;;  %v23155_v18 = vld [vmem:[#allocation187_spill] sm:$0xff]  ;;  %v23189_v42 = vld [vmem:[#allocation16_spill] sm:$0xff] }
 0x56f   : > { %8558 = vmatpush.msrb.mxu1 %v23129_v34  ;;  %8676 = vmatpush.msra.mxu0 %v23130_v36  ;;  %v23158_v34 = vld [vmem:[#allocation255_spill] sm:$0xff]  ;;  %v23161_v36 = vld [vmem:[#allocation217_spill] sm:$0xff] }
 0x570   : > { %8560 = vmatmul.f32.vlgmr.msrb.gmra.mxu1 %v23131_v27  ;;  %10551 = vmatpush.msk.msra.mxu2 %vm23132_vm7, %v21026_v14  ;;  %vm23138_vm7 = vnez %v22880_v12  ;;  %v23190_v12 = vld [vmem:[#allocation17_spill] sm:$0xff] }
 0x571   : > { %10533 = vmatpush.msk.msra.mxu1 %vm23051_vm15, %v21026_v14  ;;  %8815 = vmatpush.msra.mxu3 %v23133_v62  ;;  %vm23141_vm15 = vnez %v22886_v30  ;;  %v23164_v62 = vld [vmem:[#allocation222_spill] sm:$0xff] }
 0x572   : > { %8680 = vmatpush.msra.mxu0 %v23134_v3  ;;  %10552 = vmatpush.msk.msra.mxu2 %vm23135_vm8, %v21026_v14  ;;  %v23167_v3 = vld [vmem:[#allocation232_spill] sm:$0xff]  ;;  %v23191_v30 = vld [vmem:[#allocation18_spill] sm:$0xff] }
 0x573   : > { %10534 = vmatpush.msk.msra.mxu1 %vm23054_vm4, %v21026_v14  ;;  %8821 = vmatpush.msra.mxu3 %v23136_v10  ;;  %vm23144_vm4 = vnez %v22893_v49  ;;  %v23177_v10 = vld [vmem:[#allocation49_spill] sm:$0xff]  ;;  %v23192_v49 = vld [vmem:[#allocation19_spill] sm:$0xff] }
 0x574   : > { %8684 = vmatpush.msra.mxu0 %v23137_v43  ;;  %10553 = vmatpush.msk.msra.mxu2 %vm23138_vm7, %v21026_v14  ;;  %v23178_v43 = vld [vmem:[#allocation239_spill] sm:$0xff] }
 0x575   : > { %10535 = vmatpush.msk.msra.mxu1 %vm23058_vm10, %v21026_v14  ;;  %8827 = vmatpush.msra.mxu3 %v23139_v59  ;;  %vm23147_vm10 = vnez %v22897_v17  ;;  %v23193_v17 = vld [vmem:[#allocation20_spill] sm:$0xff] }
 0x576   : > { %8688 = vmatpush.msra.mxu0 %v23140_v7  ;;  %10554 = vmatpush.msk.msra.mxu2 %vm23141_vm15, %v21026_v14 }
 0x577   : > { %10536 = vmatpush.msk.msra.mxu1 %vm23062_vm13, %v21026_v14  ;;  %8833 = vmatpush.msra.mxu3 %v23142_v11  ;;  %vm23150_vm13 = vnez %v22902_v61  ;;  %v23194_v61 = vld [vmem:[#allocation22_spill] sm:$0xff] }
 0x578   : > { %8692 = vmatpush.msra.mxu0 %v23143_v46  ;;  %10555 = vmatpush.msk.msra.mxu2 %vm23144_vm4, %v21026_v14 }
 0x579   : > { %10537 = vmatpush.msk.msra.mxu1 %vm23065_vm11, %v21026_v14  ;;  %8839 = vmatpush.msra.mxu3 %v23145_v24  ;;  %vm23153_vm11 = vnez %v22910_v32  ;;  %v7197_v32 = vpop.f32.mrf.mxu1 }
 0x57a   : > { %8696 = vmatpush.msra.mxu0 %v23146_v31  ;;  %10556 = vmatpush.msk.msra.mxu2 %vm23147_vm10, %v21026_v14 }
 0x57b   : > { %10538 = vmatpush.msk.msra.mxu1 %vm23069_vm9, %v21026_v14  ;;  %8845 = vmatpush.msra.mxu3 %v23148_v1  ;;  %vm23156_vm9 = vnez %v22917_v22 }
 0x57c   : > { %8700 = vmatpush.msra.mxu0 %v23149_v54  ;;  %10557 = vmatpush.msk.msra.mxu2 %vm23150_vm13, %v21026_v14 }
 0x57d   : > { %10539 = vmatpush.msk.msra.mxu1 %vm23073_vm0, %v21026_v14  ;;  %8851 = vmatpush.msra.mxu3 %v23151_v50  ;;  %vm23159_vm0 = vnez %v22924_v5 }
 0x57e   : > { %8704 = vmatpush.msra.mxu0 %v23152_v15  ;;  %10558 = vmatpush.msk.msra.mxu2 %vm23153_vm11, %v21026_v14 }
 0x57f   : > { %10540 = vmatpush.msk.msra.mxu1 %vm23078_vm14, %v21026_v14  ;;  %8857 = vmatpush.msra.mxu3 %v23154_v0  ;;  %vm23162_vm14 = vnez %v22930_v16  ;;  %v23196_v16 = vld [vmem:[#allocation52_spill] sm:$0xff] }
 0x580   : > { %8708 = vmatpush.msra.mxu0 %v23155_v18  ;;  %10559 = vmatpush.msk.msra.mxu2 %vm23156_vm9, %v21026_v14 }
 0x581   : > { %10541 = vmatpush.msk.msra.mxu1 %vm23083_vm1, %v21026_v14  ;;  %8863 = vmatpush.msra.mxu3 %v23157_v26  ;;  %vm23165_vm1 = vnez %v22936_v4  ;;  %v7290_v4 = vpop.f32.mrf.mxu3 }
 0x582   : > { %8712 = vmatpush.msra.mxu0 %v23158_v34  ;;  %10560 = vmatpush.msk.msra.mxu2 %vm23159_vm0, %v21026_v14 }
 0x583   : > { %10542 = vmatpush.msk.msra.mxu1 %vm23087_vm5, %v21026_v14  ;;  %8869 = vmatpush.msra.mxu3 %v23160_v21  ;;  %vm23168_vm5 = vnez %v23098_v55  ;;  %v23173_v55 = vld [vmem:[#allocation35_spill] sm:$0xff] }
 0x584   : > { %8716 = vmatpush.msra.mxu0 %v23161_v36  ;;  %10561 = vmatpush.msk.msra.mxu2 %vm23162_vm14, %v21026_v14 }
 0x585   : > { %10543 = vmatpush.msk.msra.mxu1 %vm23091_vm12, %v21026_v14  ;;  %8875 = vmatpush.msra.mxu3 %v23163_v9  ;;  %vm23169_vm12 = vnez %v22942_v51 }
 0x586   : > { %8720 = vmatpush.msra.mxu0 %v23164_v62  ;;  %10562 = vmatpush.msk.msra.mxu2 %vm23165_vm1, %v21026_v14 }
 0x587   : > { %8722 = vmatmul.f32.vlgmr.msra.gmra.mxu0 %v23131_v27  ;;  %10544 = vmatpush.msk.msra.mxu1 %vm23095_vm6, %v21026_v14  ;;  %vm23171_vm6 = vnez %v22952_v53 }
 0x588   : > { %8881 = vmatpush.msra.mxu3 %v23166_v20  ;;  %8907 = vmatpush.msrb.mxu0 %v23167_v3 }
 0x589   : > { %10545 = vmatpush.msk.msra.mxu1 %vm23168_vm5, %v21026_v14  ;;  %10563 = vmatpush.msk.msra.mxu2 %vm23169_vm12, %v21026_v14  ;;  %vm23174_vm5 = vnez %v23106_v47  ;;  %v23181_v47 = vld [vmem:[#allocation240_spill] sm:$0xff]  ;;  %v7538_v51 = vpop.f32.mrf.mxu3 }
 0x58a   : > { %8887 = vmatpush.msra.mxu3 %v18913_v8  ;;  %8910 = vmatpush.msrb.mxu0 %v23170_v2  ;;  %v23175_v8 = vld [vmem:[#allocation236_spill] sm:$0xff] }
 0x58b   : > { %10546 = vmatpush.msk.msra.mxu1 %vm23103_vm3, %v21026_v14  ;;  %10564 = vmatpush.msk.msra.mxu2 %vm23171_vm6, %v21026_v14  ;;  %vm23179_vm3 = vnez %v22859_v29  ;;  %v23186_v29 = vld [vmem:[#allocation248_spill] sm:$0xff] }
 0x58c   : > { %8893 = vmatpush.msra.mxu3 %v18922_v25  ;;  %8913 = vmatpush.msrb.mxu0 %v23172_v52  ;;  %v23180_v25 = vld [vmem:[#allocation241_spill] sm:$0xff] }
 0x58d   : > { %8800 = vmatmul.f32.vlgmr.msra.gmra.mxu2 %v23173_v55  ;;  %10547 = vmatpush.msk.msra.mxu1 %vm23174_vm5, %v21026_v14  ;;  %vm23182_vm5 = vnez %v22864_v39  ;;  %v23187_v39 = vld [vmem:[#allocation252_spill] sm:$0xff] }
 0x58e   : > { %9001 = vmatpush.msrb.mxu2 %v23175_v8  ;;  %8899 = vmatpush.msra.mxu3 %v18940_v6  ;;  %v23183_v6 = vld [vmem:[#allocation242_spill] sm:$0xff] }
 0x58f   : > { %8916 = vmatpush.msrb.mxu0 %v23176_v33  ;;  %8901 = vmatmul.f32.vlgmr.msra.gmra.mxu3 %v23177_v10 }
 0x590   : > { %9005 = vmatpush.msrb.mxu2 %v23178_v43  ;;  %10581 = vmatpush.msk.msrb.mxu3 %vm23179_vm3, %v21026_v14 }
 0x591   : > { %10548 = vmatpush.msk.msra.mxu1 %vm23111_vm2, %v21026_v14  ;;  %8919 = vmatpush.msrb.mxu0 %v23180_v25  ;;  %vm23184_vm2 = vnez %v22869_v56  ;;  %v23188_v56 = vld [vmem:[#allocation15_spill] sm:$0xff] }
 0x592   : > { %8759 = vmatmul.f32.vlgmr.msra.gmra.mxu1 %v23131_v27  ;;  %9009 = vmatpush.msrb.mxu2 %v23181_v47 }
 0x593   : > { %10565 = vmatpush.msk.msrb.mxu1 %vm23179_vm3, %v21026_v14  ;;  %10582 = vmatpush.msk.msrb.mxu3 %vm23182_vm5, %v21026_v14 }
 0x594   : > { %8922 = vmatpush.msrb.mxu0 %v23183_v6  ;;  %9013 = vmatpush.msrb.mxu2 %v18597_v13  ;;  %v23195_v13 = vld [vmem:[#allocation34_spill] sm:$0xff] }
 0x595   : > { %10566 = vmatpush.msk.msrb.mxu1 %vm23182_vm5, %v21026_v14  ;;  %10583 = vmatpush.msk.msrb.mxu3 %vm23184_vm2, %v21026_v14 }
 0x596   : > { %8925 = vmatpush.msrb.mxu0 %v23185_v44  ;;  %9017 = vmatpush.msrb.mxu2 %v18619_v35  ;;  %v7096_v35 = vpop.f32.mrf.mxu0 }
 0x597   : > { %10567 = vmatpush.msk.msrb.mxu1 %vm23184_vm2, %v21026_v14  ;;  %10584 = vmatpush.msk.msrb.mxu3 %vm23135_vm8, %v21026_v14 }
 0x598   : > { %8928 = vmatpush.msrb.mxu0 %v23186_v29  ;;  %9021 = vmatpush.msrb.mxu2 %v18654_v40  ;;  %v7251_v40 = vpop.f32.mrf.mxu2 }
 0x599   : > { %10568 = vmatpush.msk.msrb.mxu1 %vm23135_vm8, %v21026_v14  ;;  %10585 = vmatpush.msk.msrb.mxu3 %vm23138_vm7, %v21026_v14 }
 0x59a   : > { %8931 = vmatpush.msrb.mxu0 %v23187_v39  ;;  %9025 = vmatpush.msrb.mxu2 %v18679_v19  ;;  %v7396_v19 = vpop.f32.mrf.mxu1 }
 0x59b   : > { %10569 = vmatpush.msk.msrb.mxu1 %vm23138_vm7, %v21026_v14  ;;  %10586 = vmatpush.msk.msrb.mxu3 %vm23141_vm15, %v21026_v14 }
 0x59c   : > { %8934 = vmatpush.msrb.mxu0 %v23188_v56  ;;  %9029 = vmatpush.msrb.mxu2 %v18693_v60 }
 0x59d   : > { %10570 = vmatpush.msk.msrb.mxu1 %vm23141_vm15, %v21026_v14  ;;  %10587 = vmatpush.msk.msrb.mxu3 %vm23144_vm4, %v21026_v14 }
 0x59e   : > { %8937 = vmatpush.msrb.mxu0 %v23189_v42  ;;  %9033 = vmatpush.msrb.mxu2 %v18720_v48  ;;  %v7359_v22 = vpop.f32.mrf.mxu0 }
 0x59f   : > { %10571 = vmatpush.msk.msrb.mxu1 %vm23144_vm4, %v21026_v14  ;;  %10588 = vmatpush.msk.msrb.mxu3 %vm23147_vm10, %v21026_v14 }
 0x5a0   : > { %8940 = vmatpush.msrb.mxu0 %v23190_v12  ;;  %9037 = vmatpush.msrb.mxu2 %v18758_v57  ;;  %v7437_v5 = vpop.f32.mrf.mxu2  ;;  %v7737_v57 = vpop.f32.mrf.mxu3 }
 0x5a1   : > { %10572 = vmatpush.msk.msrb.mxu1 %vm23147_vm10, %v21026_v14  ;;  %10589 = vmatpush.msk.msrb.mxu3 %vm23150_vm13, %v21026_v14 }
 0x5a2   : > { %8943 = vmatpush.msrb.mxu0 %v23191_v30  ;;  %9041 = vmatpush.msrb.mxu2 %v18786_v37  ;;  %v7631_v48 = vpop.f32.mrf.mxu1 }
 0x5a3   : > { %10573 = vmatpush.msk.msrb.mxu1 %vm23150_vm13, %v21026_v14  ;;  %10590 = vmatpush.msk.msrb.mxu3 %vm23153_vm11, %v21026_v14 }
 0x5a4   : > { %8946 = vmatpush.msrb.mxu0 %v23192_v49  ;;  %9045 = vmatpush.msrb.mxu2 %v18814_v63 }
 0x5a5   : > { %10574 = vmatpush.msk.msrb.mxu1 %vm23153_vm11, %v21026_v14  ;;  %10591 = vmatpush.msk.msrb.mxu3 %vm23156_vm9, %v21026_v14 }
 0x5a6   : > { %8949 = vmatpush.msrb.mxu0 %v23193_v17  ;;  %9049 = vmatpush.msrb.mxu2 %v18833_v38  ;;  %v7592_v60 = vpop.f32.mrf.mxu0 }
 0x5a7   : > { %10575 = vmatpush.msk.msrb.mxu1 %vm23156_vm9, %v21026_v14  ;;  %10592 = vmatpush.msk.msrb.mxu3 %vm23159_vm0, %v21026_v14 }
 0x5a8   : > { %8952 = vmatpush.msrb.mxu0 %v23194_v61  ;;  %9053 = vmatpush.msrb.mxu2 %v18854_v58  ;;  %v7700_v37 = vpop.f32.mrf.mxu2  ;;  %v7972_v58 = vpop.f32.mrf.mxu3 }
 0x5a9   : > { %8955 = vmatmul.f32.vlgmr.msrb.gmra.mxu0 %v23195_v13  ;;  %10576 = vmatpush.msk.msrb.mxu1 %vm23159_vm0, %v21026_v14 }
 0x5aa   : > { %10593 = vmatpush.msk.msrb.mxu3 %vm23162_vm14, %v21026_v14  ;;  %9057 = vmatpush.msrb.mxu2 %v18872_v45  ;;  %v7879_v38 = vpop.f32.mrf.mxu1 }
 0x5ab   : > { %10577 = vmatpush.msk.msrb.mxu1 %vm23162_vm14, %v21026_v14 }
 0x5ac   : > { %10594 = vmatpush.msk.msrb.mxu3 %vm23165_vm1, %v21026_v14  ;;  %9061 = vmatpush.msrb.mxu2 %v18902_v41 }
 0x5ad   : > { %10578 = vmatpush.msk.msrb.mxu1 %vm23165_vm1, %v21026_v14  ;;  %9063 = vmatmul.f32.vlgmr.msrb.gmra.mxu2 %v23177_v10 }
 0x5ae   : > { %10595 = vmatpush.msk.msrb.mxu3 %vm23169_vm12, %v21026_v14  ;;  %v7778_v63 = vpop.f32.mrf.mxu0 }
 0x5af   : > { %10579 = vmatpush.msk.msrb.mxu1 %vm23169_vm12, %v21026_v14 }
 0x5b0   : > { %10596 = vmatpush.msk.msrb.mxu3 %vm23171_vm6, %v21026_v14  ;;  %v7933_v45 = vpop.f32.mrf.mxu2 }
 0x5b1   : > { %9100 = vmatmul.f32.vlgmr.msrb.gmra.mxu3 %v23177_v10  ;;  %10580 = vmatpush.msk.msrb.mxu1 %vm23171_vm6, %v21026_v14  ;;  %v7198_v14 = vadd.f32 %v7197_v32, %v7096_v35 }
 0x5b2   : > { %8994 = vmatmul.f32.vlgmr.msrb.gmra.mxu1 %v23196_v16  ;;  %v8078_v41 = vpop.f32.mrf.mxu1 }
 0x5b3   : > { %v7252_v59 = vadd.f32 %v7251_v40, %v7198_v14 }
 0x5b5   : > { %v7291_v24 = vadd.f32 %v7290_v4, %v7252_v59 }
 0x5b6   : > { %v8041_v53 = vpop.f32.mrf.mxu0 }
 0x5b7   : > { %v7360_v54 = vadd.f32 %v7359_v22, %v7291_v24 }
 0x5b9   : > { %v7397_v0 = vadd.f32 %v7396_v19, %v7360_v54 }
 0x5bb   : > { %v7438_v34 = vadd.f32 %v7437_v5, %v7397_v0  ;;  %v10686_v5 = vld [vmem:[%s11037_s19 + $0x7] ss:$0 sm:$0xff] }
 0x5bd   : > { %v7539_v20 = vadd.f32 %v7538_v51, %v7438_v34  ;;  %v10685_v51 = vld [vmem:[%s11037_s19 + $0x3] ss:$0 sm:$0xff] }
 0x5bf   : > { %v7593_v2 = vadd.f32 %v7592_v60, %v7539_v20 }
 0x5c1   : > { %v7632_v55 = vadd.f32 %v7631_v48, %v7593_v2 }
 0x5c3   : > { %v7701_v10 = vadd.f32 %v7700_v37, %v7632_v55 }
 0x5c5   : > { %v7738_v44 = vadd.f32 %v7737_v57, %v7701_v10 }
 0x5c7   : > { %v7779_v39 = vadd.f32 %v7778_v63, %v7738_v44 }
 0x5c8   : > { %v8119_v7 = vpop.f32.mrf.mxu2 }
 0x5c9   : > { %v7880_v42 = vadd.f32 %v7879_v38, %v7779_v39 }
 0x5cb   : > { %v8220_v27 = vpop.f32.mrf.mxu3  ;;  %v7934_v49 = vadd.f32 %v7933_v45, %v7880_v42 }
 0x5cc   : > { %v8221_v11 = vadd.f32 %v8220_v27, %v8119_v7 }
 0x5cd   : > { %v7973_v16 = vadd.f32 %v7972_v58, %v7934_v49 }
 0x5ce   : > { %v8274_v46 = vpop.f32.mrf.mxu0 }
 0x5cf   : > { %v8275_v31 = vadd.f32 %v8274_v46, %v8221_v11  ;;  %v8042_v40 = vadd.f32 %v8041_v53, %v7973_v16 }
 0x5d1   : > { %v8313_v1 = vpop.f32.mrf.mxu1  ;;  %v8382_v15 = vpop.f32.mrf.mxu2  ;;  %v8079_v19 = vadd.f32 %v8078_v41, %v8042_v40 }
 0x5d2   : > { %v8314_v50 = vadd.f32 %v8313_v1, %v8275_v31 }
 0x5d3   : > { %v9107_v57 = vmul.f32 %v10685_v51, %v8079_v19  ;;  %v9113_v37 = vmul.f32 %v10686_v5, %v8079_v19 }
 0x5d4   : > { %v8383_v18 = vadd.f32 %v8382_v15, %v8314_v50  ;;  %v8419_v26 = vpop.f32.mrf.mxu3 }
 0x5d6   : > { %v8420_v36 = vadd.f32 %v8419_v26, %v8383_v18 }
 0x5e2   : > { %v8460_v21 = vpop.f32.mrf.mxu0 }
 0x5e3   : > { %v8461_v62 = vadd.f32 %v8460_v21, %v8420_v36 }
 0x5ed   : > { %v8561_v9 = vpop.f32.mrf.mxu1 }
 0x5ee   : > { %v8562_v3 = vadd.f32 %v8561_v9, %v8461_v62  ;;  %v8615_v52 = vpop.f32.mrf.mxu2 }
 0x5f0   : > { %v8616_v8 = vadd.f32 %v8615_v52, %v8562_v3  ;;  %v8654_v33 = vpop.f32.mrf.mxu3 }
 0x5f2   : > { %v8655_v25 = vadd.f32 %v8654_v33, %v8616_v8 }
 0x604   : > { %v8723_v43 = vpop.f32.mrf.mxu0 }
 0x605   : > { %v8724_v6 = vadd.f32 %v8723_v43, %v8655_v25 }
 0x60f   : > { %v8760_v47 = vpop.f32.mrf.mxu1 }
 0x610   : > { %v8761_v29 = vadd.f32 %v8760_v47, %v8724_v6  ;;  %v8801_v56 = vpop.f32.mrf.mxu2 }
 0x612   : > { %v8802_v12 = vadd.f32 %v8801_v56, %v8761_v29  ;;  %v8902_v30 = vpop.f32.mrf.mxu3 }
 0x614   : > { %v8903_v61 = vadd.f32 %v8902_v30, %v8802_v12 }
 0x626   : > { %v8956_v17 = vpop.f32.mrf.mxu0 }
 0x627   : > { %v8957_v13 = vadd.f32 %v8956_v17, %v8903_v61 }
 0x62f   : > { %v8995_v35 = vpop.f32.mrf.mxu1 }
 0x630   : > { %v8996_v32 = vadd.f32 %v8995_v35, %v8957_v13  ;;  %v9064_v4 = vpop.f32.mrf.mxu2 }
 0x632   : > { %v9065_v22 = vadd.f32 %v9064_v4, %v8996_v32 }
 0x634   : > { %v9101_v60 = vpop.f32.mrf.mxu3 }
 0x635   : > { %v9102_v48 = vadd.f32 %v9101_v60, %v9065_v22 }
 0x637   : > { %v9109_v63 = vmul.f32 %v10686_v5, %v9102_v48  ;;  %v9112_v38 = vmul.f32 %v10685_v51, %v9102_v48 }
 0x639   : > { %v9110_v58 = vsub.f32 %v9107_v57, %v9109_v63  ;;  %v9114_v45 = vadd.f32 %v9113_v37, %v9112_v38 }
 0x63b   : > { %v9111_v53 = vadd.f32 %v9110_v58, %v18965_v28  ;;  %v9115_v14 = vadd.f32 %v9114_v45, %v18967_v23 }
 0x63d   : > { %9116 = vst [vmem:[%s242_s25] sm:$0xff] %v9111_v53 }
 0x63e   : > { %10598 = vst [vmem:[%s242_s25 + $0x8] sm:$0xff] %v9115_v14 }
 0x63f   : > { %10808 = shalt.err (!%p10805_p7)
}
 0x640   : > { %s10865_s22 = smov 128   ;;  %s10866_s8 = smov 256  }
 0x641   : > { %s10867_s19 = smov 8  }
 0x642   : > { %10611 = dma.vmem_to_hbm [thread:$0]  (%p10931_p6), %s9132_s11, 256, %s9134_s5, %s9120_s16, %s10865_s22, %s10866_s8, %s10867_s19  }
 0x643 PF: > { %s9148_s20 = sand.u32 1, %s10843_s12   ;;  %p23197_p12 = scmp.ge.s32.totalorder %s10855_s15, 2 }
 0x644   : > { %s9149_s28 = scalar_lea.sflag [#allocation4], %s9148_s20 }
 0x645   : > { %p10625_p0 = pnand %p23197_p12, %p10940_p10 }
 0x647   : > { %p10626_p4 = pneg %p10625_p0 }
 0x649   : > { %10838 = dma.done.wait (%p10626_p4), %s9149_s28, 256  }
 0x64a   : > { %10840 = vsyncadd (%p10626_p4), %s9149_s28, 4294967040  ;;  %p17_p8 = scmp.ge.s32.totalorder %s10913_s18, 4   ;;  %s23198_s12 = smov %s10847_s13 }
 0x64b   : > { %s23199_s13 = smov %s10851_s14  ;;  %s23200_s14 = smov %s10925_s21 }
 0x64c   : > { %s23201_s15 = smov %s10913_s18  ;;  %19 = sbr.rel (!%p17_p8) target bundleno = 6 (0x6), region = 95 }
 0x651   :  { %9155 = vsyncpa [#allocation3], 1 }
 0x652   :  { %9157 = vsyncpa [#allocation3 + $0x1], 1 }
 0x653   :  { %9158 = vsyncpa [#allocation6], 1 }
 0x654   :  { %9159 = vsyncpa [#allocation4], 1 }
 0x655   :  { %9161 = vsyncpa [#allocation4 + $0x1], 1 }

</bundles_post_ra>
